<compile_context>
chip_gen: v6e
topology: v6e:2x2x1
jax: 0.10.0
libtpu: 0.0.40
codegen_flags: <defaults>
</compile_context>

<pallas_src>
import functools

import numpy as np
import jax
import jax.numpy as jnp
from jax.experimental import pallas as pl
from jax.experimental.pallas import tpu as pltpu

EPS = 1e-5
HALO = 8  # halo rows above/below the activation inside the padded scratch
_VMEM = pl.BlockSpec(memory_space=pltpu.MemorySpace.VMEM)


# ---------------------------------------------------------------------------
# Fused Pallas kernel: conv blocks + heads, everything VMEM-resident
# ---------------------------------------------------------------------------
def fused_encoder_kernel(x_ref, tapmask_ref,
                         w1_ref, b1_ref, g1_ref, e1_ref,
                         w2_ref, b2_ref, g2_ref, e2_ref,
                         w3_ref, b3_ref, g3_ref, e3_ref,
                         wh_ref, bh_ref,
                         out_ref,
                         apad_ref, patch_ref, feat_ref,
                         *, batch, cin, hidden, fout):
    hw = 36                     # 6x6 spatial positions per image
    n_rows = batch * hw         # one row per (b, h, w)

    # Zero halo rows / unused channels once, then drop the layer-1 input in.
    apad_ref[...] = jnp.zeros_like(apad_ref)
    apad_ref[pl.ds(HALO, n_rows), pl.ds(0, cin)] = x_ref[...]

    def conv_elu_bn(w_ref, b_ref, g_ref, beta_ref):
        # In-VMEM 3x3 im2col (stride 1, padding 1): 9 shifted row loads of the
        # halo-padded activation, masked at the 6x6 image borders.
        k = 0
        for dy in (-1, 0, 1):
            for dx in (-1, 0, 1):
                shift = dy * 6 + dx
                taps = apad_ref[pl.ds(HALO + shift, n_rows), :]       # (R, C)
                m = tapmask_ref[:, k:k + 1]                           # (R, 1)
                patch_ref[:, k * hidden:(k + 1) * hidden] = taps * m
                k += 1
        # Conv as one MXU matmul: bf16 operands, f32 accumulation.
        y = jnp.dot(patch_ref[...].astype(jnp.bfloat16), w_ref[...],
                    preferred_element_type=jnp.float32) + b_ref[...]
        # ELU (alpha = 1), f32.
        y = jnp.where(y > 0, y, jnp.exp(jnp.minimum(y, 0.0)) - 1.0)
        # BatchNorm2d, train-mode batch stats (biased variance), affine folded
        # into one scale + shift.
        mean = jnp.sum(y, axis=0, keepdims=True) * (1.0 / n_rows)
        var = jnp.sum(y * y, axis=0, keepdims=True) * (1.0 / n_rows) - mean * mean
        scale = g_ref[...] * jax.lax.rsqrt(var + EPS)
        y = y * scale + (beta_ref[...] - mean * scale)
        apad_ref[pl.ds(HALO, n_rows), :] = y      # input of the next stage

    conv_elu_bn(w1_ref, b1_ref, g1_ref, e1_ref)
    conv_elu_bn(w2_ref, b2_ref, g2_ref, e2_ref)
    conv_elu_bn(w3_ref, b3_ref, g3_ref, e3_ref)

    # Flatten (h, w, c)-major per image.  The head weights were row-permuted
    # from torch's (c, h, w) flatten order at prepare time, so no transpose.
    for b in range(batch):
        for p in range(hw):
            feat_ref[pl.ds(b, 1), pl.ds(p * hidden, hidden)] = \
                apad_ref[pl.ds(HALO + b * hw + p, 1), :]

    # Both heads in a single matmul: columns [0:fout) = mean, [fout:) = cov.
    z = jnp.dot(feat_ref[...].astype(jnp.bfloat16), wh_ref[...],
                preferred_element_type=jnp.float32) + bh_ref[...]
    col = jax.lax.broadcasted_iota(jnp.int32, z.shape, 1)
    clamp = 0.1 + 0.9 * pl.reciprocal(1.0 + jnp.exp(-z), approx=True)
    out_ref[...] = jnp.where(col < fout, z, clamp)


# ---------------------------------------------------------------------------
# Wrapper / glue
# ---------------------------------------------------------------------------
def _make_tap_mask(batch):
    """(batch*36, 9) border-validity mask for the 9 conv taps (static)."""
    hh, ww = np.meshgrid(np.arange(6), np.arange(6), indexing="ij")
    hh = np.tile(hh.reshape(-1), batch)
    ww = np.tile(ww.reshape(-1), batch)
    cols = []
    for dy in (-1, 0, 1):
        for dx in (-1, 0, 1):
            ok = ((hh + dy >= 0) & (hh + dy < 6) & (ww + dx >= 0) & (ww + dx < 6))
            cols.append(ok.astype(np.float32))
    return jnp.asarray(np.stack(cols, axis=1))


def l2_mlp_encoder_forward(x_nchw, prepped):
    B, cin, H, W = x_nchw.shape
    assert (H, W) == (6, 6), "module reshapes its output to (B, -1, 6, 6)"
    hidden = prepped["conv"][0][0].shape[1]
    fout = prepped["bh"].shape[1] // 2
    out_dim = fout // 36
    n_rows = B * 36

    # Tiny one-time glue: NCHW -> row-per-pixel NHWC layout for the kernel.
    x_rows = jnp.transpose(x_nchw, (0, 2, 3, 1)).reshape(n_rows, cin)
    tapmask = _make_tap_mask(B)

    (w1, b1, g1, e1), (w2, b2, g2, e2), (w3, b3, g3, e3) = prepped["conv"]
    kernel = functools.partial(fused_encoder_kernel,
                               batch=B, cin=cin, hidden=hidden, fout=fout)
    z = pl.pallas_call(
        kernel,
        out_shape=jax.ShapeDtypeStruct((B, 2 * fout), jnp.float32),
        in_specs=[_VMEM] * 16,
        out_specs=_VMEM,
        scratch_shapes=[
            pltpu.VMEM((n_rows + 2 * HALO, hidden), jnp.float32),  # halo-padded act
            pltpu.VMEM((n_rows, 9 * hidden), jnp.float32),         # im2col patches
            pltpu.VMEM((B, 36 * hidden), jnp.float32),             # flattened feats
        ],
    )(x_rows, tapmask,
      w1, b1, g1, e1, w2, b2, g2, e2, w3, b3, g3, e3,
      prepped["wh"], prepped["bh"])

    mean = z[:, :fout].reshape(B, out_dim, 6, 6)
    cov = z[:, fout:].reshape(B, out_dim, 6, 6)
    return mean, cov


# ---------------------------------------------------------------------------
# Parameters: torch-layout init + one-time prepare for the fused kernel
# ---------------------------------------------------------------------------
def init_params(key, in_dim, out_dim, hidden_dim, zw_dim):
    ks = jax.random.split(key, 16)
    conv, cin, i = [], in_dim, 0
    for _ in range(3):
        w = 0.08 * jax.random.normal(ks[i], (3, 3, cin, hidden_dim), jnp.float32)
        b = 0.05 * jax.random.normal(ks[i + 1], (1, hidden_dim), jnp.float32)
        g = 1.0 + 0.1 * jax.random.normal(ks[i + 2], (1, hidden_dim), jnp.float32)
        be = 0.1 * jax.random.normal(ks[i + 3], (1, hidden_dim), jnp.float32)
        conv.append((w.reshape(9 * cin, hidden_dim), b, g, be))
        cin, i = hidden_dim, i + 4
    fin = hidden_dim * zw_dim * zw_dim
    fout = out_dim * zw_dim * zw_dim
    wm = 0.03 * jax.random.normal(ks[i], (fin, fout), jnp.float32)
    bm = 0.05 * jax.random.normal(ks[i + 1], (1, fout), jnp.float32)
    wc = 0.03 * jax.random.normal(ks[i + 2], (fin, fout), jnp.float32)
    bc = 0.05 * jax.random.normal(ks[i + 3], (1, fout), jnp.float32)
    return {"conv": conv, "wm": wm, "bm": bm, "wc": wc, "bc": bc}


def prepare_params(params, in_dim, hidden_dim):
    """One-time preprocessing: bf16 matmul weights, layer-1 input channels
    zero-padded to hidden_dim, head weights row-permuted from torch's NCHW
    flatten order to the kernel's (h, w, c) order and mean|cov concatenated."""
    assert in_dim <= hidden_dim
    conv = []
    for li, (w, b, g, be) in enumerate(params["conv"]):
        cin = in_dim if li == 0 else hidden_dim
        if cin != hidden_dim:
            w3 = w.reshape(9, cin, hidden_dim)
            w = jnp.zeros((9, hidden_dim, hidden_dim), w.dtype
                          ).at[:, :cin, :].set(w3).reshape(9 * hidden_dim, hidden_dim)
        conv.append((w.astype(jnp.bfloat16), b, g, be))

    fout = params["wm"].shape[1]

    def permute_rows(w):  # rows c*36+p  ->  rows p*hidden+c
        return w.reshape(hidden_dim, 36, fout).transpose(1, 0, 2) \
                .reshape(36 * hidden_dim, fout)

    wh = jnp.concatenate([permute_rows(params["wm"]), permute_rows(params["wc"])],
                         axis=1).astype(jnp.bfloat16)
    bh = jnp.concatenate([params["bm"], params["bc"]], axis=1)
    return {"conv": tuple(conv), "wh": wh, "bh": bh}


# ---------------------------------------------------------------------------
# Pure-JAX reference (torch-layout params).  matmul_dtype=bfloat16 mimics the
# kernel's MXU-input rounding (f32 accumulation) for a tight cross-check.
# ---------------------------------------------------------------------------
def im2col_3x3(x_nhwc):
    B, H, W, C = x_nhwc.shape
    xp = jnp.pad(x_nhwc, ((0, 0), (1, 1), (1, 1), (0, 0)))
    cols = [xp[:, dy:dy + H, dx:dx + W, :] for dy in range(3) for dx in range(3)]
    return jnp.concatenate(cols, axis=-1).reshape(B * H * W, 9 * C)


def reference_forward(x_nchw, params, matmul_dtype=jnp.float32):
    def mm(a, w):
        return jnp.dot(a.astype(matmul_dtype), w.astype(matmul_dtype),
                       preferred_element_type=jnp.float32)

    B, _, H, W = x_nchw.shape
    a = jnp.transpose(x_nchw, (0, 2, 3, 1))
    for (w, b, g, beta) in params["conv"]:
        y = mm(im2col_3x3(a), w) + b
        y = jnp.where(y > 0, y, jnp.exp(jnp.minimum(y, 0.0)) - 1.0)
        mean = y.mean(axis=0, keepdims=True)
        var = jnp.mean(y * y, axis=0, keepdims=True) - mean * mean
        y = (y - mean) / jnp.sqrt(var + EPS) * g + beta
        a = y.reshape(B, H, W, -1)
    hidden = a.shape[-1]
    f = jnp.transpose(a, (0, 3, 1, 2)).reshape(B, hidden * H * W)  # torch flatten
    m = mm(f, params["wm"]) + params["bm"]
    c = 0.1 + 0.9 / (1.0 + jnp.exp(-(mm(f, params["wc"]) + params["bc"])))
    return m.reshape(B, -1, 6, 6), c.reshape(B, -1, 6, 6)


if __name__ == "__main__":
    B, in_dim, out_dim, hidden_dim, zw_dim = 2, 4, 4, 32, 6
    key = jax.random.PRNGKey(0)
    kx, kp = jax.random.split(key)
    x = jax.random.normal(kx, (B, in_dim, zw_dim, zw_dim), jnp.float32)  # NCHW
    params = init_params(kp, in_dim, out_dim, hidden_dim, zw_dim)
    prepped = prepare_params(params, in_dim, hidden_dim)

    fwd = jax.jit(l2_mlp_encoder_forward)
    mean, cov = fwd(x, prepped)
    mean = jax.block_until_ready(mean)
    cov = jax.block_until_ready(cov)

    assert mean.shape == (B, out_dim, 6, 6)
    assert cov.shape == (B, out_dim, 6, 6)

    # Tight check vs a reference applying the same bf16 MXU-input rounding.
    ref_m_bf, ref_c_bf = reference_forward(x, params, matmul_dtype=jnp.bfloat16)
    assert np.allclose(np.asarray(mean), np.asarray(ref_m_bf), rtol=5e-3, atol=5e-3)
    assert np.allclose(np.asarray(cov), np.asarray(ref_c_bf), rtol=5e-3, atol=5e-3)

    # Sanity check vs the full-f32 reference (bf16 MXU inputs cost ~1e-2 abs).
    ref_m, ref_c = reference_forward(x, params)
    assert np.allclose(np.asarray(mean), np.asarray(ref_m), rtol=5e-2, atol=5e-2)
    assert np.allclose(np.asarray(cov), np.asarray(ref_c), rtol=5e-2, atol=5e-2)

    print("KERNEL_OK")
</pallas_src>

<mosaic_0001>
module attributes {stable_mosaic.version = 11 : i64} {
  func.func @fused_encoder_kernel(%arg0: memref<72x4xf32, #tpu.memory_space<vmem>>, %arg1: memref<72x9xf32, #tpu.memory_space<vmem>>, %arg2: memref<288x32xbf16, #tpu.memory_space<vmem>>, %arg3: memref<1x32xf32, #tpu.memory_space<vmem>>, %arg4: memref<1x32xf32, #tpu.memory_space<vmem>>, %arg5: memref<1x32xf32, #tpu.memory_space<vmem>>, %arg6: memref<288x32xbf16, #tpu.memory_space<vmem>>, %arg7: memref<1x32xf32, #tpu.memory_space<vmem>>, %arg8: memref<1x32xf32, #tpu.memory_space<vmem>>, %arg9: memref<1x32xf32, #tpu.memory_space<vmem>>, %arg10: memref<288x32xbf16, #tpu.memory_space<vmem>>, %arg11: memref<1x32xf32, #tpu.memory_space<vmem>>, %arg12: memref<1x32xf32, #tpu.memory_space<vmem>>, %arg13: memref<1x32xf32, #tpu.memory_space<vmem>>, %arg14: memref<1152x288xbf16, #tpu.memory_space<vmem>>, %arg15: memref<1x288xf32, #tpu.memory_space<vmem>>, %arg16: memref<2x288xf32, #tpu.memory_space<vmem>>, %arg17: memref<88x32xf32, #tpu.memory_space<vmem>>, %arg18: memref<72x288xf32, #tpu.memory_space<vmem>>, %arg19: memref<2x1152xf32, #tpu.memory_space<vmem>>) attributes {dimension_semantics = [], scalar_prefetch = 0 : i64, scratch_operands = 3 : i64, tpu.core_type = #tpu.core_type<tc>} {
    %cst = arith.constant 0.000000e+00 : f32
    %0 = vector.broadcast %cst : f32 to vector<88x32xf32>
    %c0 = arith.constant 0 : index
    %c0_0 = arith.constant 0 : index
    %1 = vector.load %arg17[%c0, %c0_0] : memref<88x32xf32, #tpu.memory_space<vmem>>, vector<88x32xf32>
    tpu.vector_store %arg17[%c0, %c0_0], %0 {strides = array<i32>} : memref<88x32xf32, #tpu.memory_space<vmem>>, vector<88x32xf32>,
    %c0_1 = arith.constant 0 : index
    %c0_2 = arith.constant 0 : index
    %2 = vector.load %arg0[%c0_1, %c0_2] : memref<72x4xf32, #tpu.memory_space<vmem>>, vector<72x4xf32>
    %c8 = arith.constant 8 : index
    %c0_3 = arith.constant 0 : index
    %3 = vector.load %arg17[%c8, %c0_3] : memref<88x32xf32, #tpu.memory_space<vmem>>, vector<72x4xf32>
    tpu.vector_store %arg17[%c8, %c0_3], %2 {strides = array<i32>} : memref<88x32xf32, #tpu.memory_space<vmem>>, vector<72x4xf32>,
    %c1 = arith.constant 1 : index
    %c0_4 = arith.constant 0 : index
    %4 = vector.load %arg17[%c1, %c0_4] : memref<88x32xf32, #tpu.memory_space<vmem>>, vector<72x32xf32>
    %c0_5 = arith.constant 0 : index
    %c0_6 = arith.constant 0 : index
    %5 = vector.load %arg1[%c0_5, %c0_6] : memref<72x9xf32, #tpu.memory_space<vmem>>, vector<72x1xf32>
    %6 = vector.broadcast %5 : vector<72x1xf32> to vector<72x32xf32>
    %7 = arith.mulf %4, %6 : vector<72x32xf32>
    %c0_7 = arith.constant 0 : index
    %c0_8 = arith.constant 0 : index
    %8 = vector.load %arg18[%c0_7, %c0_8] : memref<72x288xf32, #tpu.memory_space<vmem>>, vector<72x32xf32>
    tpu.vector_store %arg18[%c0_7, %c0_8], %7 {strides = array<i32>} : memref<72x288xf32, #tpu.memory_space<vmem>>, vector<72x32xf32>,
    %c2 = arith.constant 2 : index
    %c0_9 = arith.constant 0 : index
    %9 = vector.load %arg17[%c2, %c0_9] : memref<88x32xf32, #tpu.memory_space<vmem>>, vector<72x32xf32>
    %c0_10 = arith.constant 0 : index
    %c1_11 = arith.constant 1 : index
    %10 = vector.load %arg1[%c0_10, %c1_11] : memref<72x9xf32, #tpu.memory_space<vmem>>, vector<72x1xf32>
    %11 = vector.broadcast %10 : vector<72x1xf32> to vector<72x32xf32>
    %12 = arith.mulf %9, %11 : vector<72x32xf32>
    %c0_12 = arith.constant 0 : index
    %c32 = arith.constant 32 : index
    %13 = vector.load %arg18[%c0_12, %c32] : memref<72x288xf32, #tpu.memory_space<vmem>>, vector<72x32xf32>
    tpu.vector_store %arg18[%c0_12, %c32], %12 {strides = array<i32>} : memref<72x288xf32, #tpu.memory_space<vmem>>, vector<72x32xf32>,
    %c3 = arith.constant 3 : index
    %c0_13 = arith.constant 0 : index
    %14 = vector.load %arg17[%c3, %c0_13] : memref<88x32xf32, #tpu.memory_space<vmem>>, vector<72x32xf32>
    %c0_14 = arith.constant 0 : index
    %c2_15 = arith.constant 2 : index
    %15 = vector.load %arg1[%c0_14, %c2_15] : memref<72x9xf32, #tpu.memory_space<vmem>>, vector<72x1xf32>
    %16 = vector.broadcast %15 : vector<72x1xf32> to vector<72x32xf32>
    %17 = arith.mulf %14, %16 : vector<72x32xf32>
    %c0_16 = arith.constant 0 : index
    %c64 = arith.constant 64 : index
    %18 = vector.load %arg18[%c0_16, %c64] : memref<72x288xf32, #tpu.memory_space<vmem>>, vector<72x32xf32>
    tpu.vector_store %arg18[%c0_16, %c64], %17 {strides = array<i32>} : memref<72x288xf32, #tpu.memory_space<vmem>>, vector<72x32xf32>,
    %c7 = arith.constant 7 : index
    %c0_17 = arith.constant 0 : index
    %19 = vector.load %arg17[%c7, %c0_17] : memref<88x32xf32, #tpu.memory_space<vmem>>, vector<72x32xf32>
    %c0_18 = arith.constant 0 : index
    %c3_19 = arith.constant 3 : index
    %20 = vector.load %arg1[%c0_18, %c3_19] : memref<72x9xf32, #tpu.memory_space<vmem>>, vector<72x1xf32>
    %21 = vector.broadcast %20 : vector<72x1xf32> to vector<72x32xf32>
    %22 = arith.mulf %19, %21 : vector<72x32xf32>
    %c0_20 = arith.constant 0 : index
    %c96 = arith.constant 96 : index
    %23 = vector.load %arg18[%c0_20, %c96] : memref<72x288xf32, #tpu.memory_space<vmem>>, vector<72x32xf32>
    tpu.vector_store %arg18[%c0_20, %c96], %22 {strides = array<i32>} : memref<72x288xf32, #tpu.memory_space<vmem>>, vector<72x32xf32>,
    %c8_21 = arith.constant 8 : index
    %c0_22 = arith.constant 0 : index
    %24 = vector.load %arg17[%c8_21, %c0_22] : memref<88x32xf32, #tpu.memory_space<vmem>>, vector<72x32xf32>
    %c0_23 = arith.constant 0 : index
    %c4 = arith.constant 4 : index
    %25 = vector.load %arg1[%c0_23, %c4] : memref<72x9xf32, #tpu.memory_space<vmem>>, vector<72x1xf32>
    %26 = vector.broadcast %25 : vector<72x1xf32> to vector<72x32xf32>
    %27 = arith.mulf %24, %26 : vector<72x32xf32>
    %c0_24 = arith.constant 0 : index
    %c128 = arith.constant 128 : index
    %28 = vector.load %arg18[%c0_24, %c128] : memref<72x288xf32, #tpu.memory_space<vmem>>, vector<72x32xf32>
    tpu.vector_store %arg18[%c0_24, %c128], %27 {strides = array<i32>} : memref<72x288xf32, #tpu.memory_space<vmem>>, vector<72x32xf32>,
    %c9 = arith.constant 9 : index
    %c0_25 = arith.constant 0 : index
    %29 = vector.load %arg17[%c9, %c0_25] : memref<88x32xf32, #tpu.memory_space<vmem>>, vector<72x32xf32>
    %c0_26 = arith.constant 0 : index
    %c5 = arith.constant 5 : index
    %30 = vector.load %arg1[%c0_26, %c5] : memref<72x9xf32, #tpu.memory_space<vmem>>, vector<72x1xf32>
    %31 = vector.broadcast %30 : vector<72x1xf32> to vector<72x32xf32>
    %32 = arith.mulf %29, %31 : vector<72x32xf32>
    %c0_27 = arith.constant 0 : index
    %c160 = arith.constant 160 : index
    %33 = vector.load %arg18[%c0_27, %c160] : memref<72x288xf32, #tpu.memory_space<vmem>>, vector<72x32xf32>
    tpu.vector_store %arg18[%c0_27, %c160], %32 {strides = array<i32>} : memref<72x288xf32, #tpu.memory_space<vmem>>, vector<72x32xf32>,
    %c13 = arith.constant 13 : index
    %c0_28 = arith.constant 0 : index
    %34 = vector.load %arg17[%c13, %c0_28] : memref<88x32xf32, #tpu.memory_space<vmem>>, vector<72x32xf32>
    %c0_29 = arith.constant 0 : index
    %c6 = arith.constant 6 : index
    %35 = vector.load %arg1[%c0_29, %c6] : memref<72x9xf32, #tpu.memory_space<vmem>>, vector<72x1xf32>
    %36 = vector.broadcast %35 : vector<72x1xf32> to vector<72x32xf32>
    %37 = arith.mulf %34, %36 : vector<72x32xf32>
    %c0_30 = arith.constant 0 : index
    %c192 = arith.constant 192 : index
    %38 = vector.load %arg18[%c0_30, %c192] : memref<72x288xf32, #tpu.memory_space<vmem>>, vector<72x32xf32>
    tpu.vector_store %arg18[%c0_30, %c192], %37 {strides = array<i32>} : memref<72x288xf32, #tpu.memory_space<vmem>>, vector<72x32xf32>,
    %c14 = arith.constant 14 : index
    %c0_31 = arith.constant 0 : index
    %39 = vector.load %arg17[%c14, %c0_31] : memref<88x32xf32, #tpu.memory_space<vmem>>, vector<72x32xf32>
    %c0_32 = arith.constant 0 : index
    %c7_33 = arith.constant 7 : index
    %40 = vector.load %arg1[%c0_32, %c7_33] : memref<72x9xf32, #tpu.memory_space<vmem>>, vector<72x1xf32>
    %41 = vector.broadcast %40 : vector<72x1xf32> to vector<72x32xf32>
    %42 = arith.mulf %39, %41 : vector<72x32xf32>
    %c0_34 = arith.constant 0 : index
    %c224 = arith.constant 224 : index
    %43 = vector.load %arg18[%c0_34, %c224] : memref<72x288xf32, #tpu.memory_space<vmem>>, vector<72x32xf32>
    tpu.vector_store %arg18[%c0_34, %c224], %42 {strides = array<i32>} : memref<72x288xf32, #tpu.memory_space<vmem>>, vector<72x32xf32>,
    %c15 = arith.constant 15 : index
    %c0_35 = arith.constant 0 : index
    %44 = vector.load %arg17[%c15, %c0_35] : memref<88x32xf32, #tpu.memory_space<vmem>>, vector<72x32xf32>
    %c0_36 = arith.constant 0 : index
    %c8_37 = arith.constant 8 : index
    %45 = vector.load %arg1[%c0_36, %c8_37] : memref<72x9xf32, #tpu.memory_space<vmem>>, vector<72x1xf32>
    %46 = vector.broadcast %45 : vector<72x1xf32> to vector<72x32xf32>
    %47 = arith.mulf %44, %46 : vector<72x32xf32>
    %c0_38 = arith.constant 0 : index
    %c256 = arith.constant 256 : index
    %48 = vector.load %arg18[%c0_38, %c256] : memref<72x288xf32, #tpu.memory_space<vmem>>, vector<72x32xf32>
    tpu.vector_store %arg18[%c0_38, %c256], %47 {strides = array<i32>} : memref<72x288xf32, #tpu.memory_space<vmem>>, vector<72x32xf32>,
    %c0_39 = arith.constant 0 : index
    %c0_40 = arith.constant 0 : index
    %49 = vector.load %arg18[%c0_39, %c0_40] : memref<72x288xf32, #tpu.memory_space<vmem>>, vector<72x288xf32>
    %50 = arith.truncf %49 : vector<72x288xf32> to vector<72x288xbf16>
    %c0_41 = arith.constant 0 : index
    %c0_42 = arith.constant 0 : index
    %51 = vector.load %arg2[%c0_41, %c0_42] : memref<288x32xbf16, #tpu.memory_space<vmem>>, vector<288x32xbf16>
    %cst_43 = arith.constant dense<0.000000e+00> : vector<72x32xf32>
    %52 = tpu.matmul %50, %51, %cst_43 {dimension_numbers = #tpu.dot_dimension_numbers<[1], [0], [0], [1], [0, 0, 1, 1], [], []>} : vector<72x288xbf16>, vector<288x32xbf16>, vector<72x32xf32> -> vector<72x32xf32>
    %c0_44 = arith.constant 0 : index
    %c0_45 = arith.constant 0 : index
    %53 = vector.load %arg3[%c0_44, %c0_45] : memref<1x32xf32, #tpu.memory_space<vmem>>, vector<1x32xf32>
    %54 = vector.broadcast %53 : vector<1x32xf32> to vector<72x32xf32>
    %55 = arith.addf %52, %54 : vector<72x32xf32>
    %cst_46 = arith.constant 0.000000e+00 : f32
    %56 = vector.broadcast %cst_46 : f32 to vector<72x32xf32>
    %57 = arith.cmpf ogt, %55, %56 : vector<72x32xf32>
    %cst_47 = arith.constant 0.000000e+00 : f32
    %58 = vector.broadcast %cst_47 : f32 to vector<72x32xf32>
    %59 = arith.minimumf %55, %58 : vector<72x32xf32>
    %60 = math.exp %59 : vector<72x32xf32>
    %cst_48 = arith.constant 1.000000e+00 : f32
    %61 = vector.broadcast %cst_48 : f32 to vector<72x32xf32>
    %62 = arith.subf %60, %61 : vector<72x32xf32>
    %63 = arith.select %57, %55, %62 : vector<72x32xi1>, vector<72x32xf32>
    %cst_49 = arith.constant dense<0.000000e+00> : vector<32xf32>
    %64 = vector.multi_reduction <add>, %63, %cst_49 [0] : vector<72x32xf32> to vector<32xf32>
    %65 = vector.shape_cast %64 : vector<32xf32> to vector<1x32xf32>
    %cst_50 = arith.constant 0.013888889 : f32
    %66 = vector.broadcast %cst_50 : f32 to vector<1x32xf32>
    %67 = arith.mulf %65, %66 : vector<1x32xf32>
    %68 = arith.mulf %63, %63 : vector<72x32xf32>
    %cst_51 = arith.constant dense<0.000000e+00> : vector<32xf32>
    %69 = vector.multi_reduction <add>, %68, %cst_51 [0] : vector<72x32xf32> to vector<32xf32>
    %70 = vector.shape_cast %69 : vector<32xf32> to vector<1x32xf32>
    %cst_52 = arith.constant 0.013888889 : f32
    %71 = vector.broadcast %cst_52 : f32 to vector<1x32xf32>
    %72 = arith.mulf %70, %71 : vector<1x32xf32>
    %73 = arith.mulf %67, %67 : vector<1x32xf32>
    %74 = arith.subf %72, %73 : vector<1x32xf32>
    %c0_53 = arith.constant 0 : index
    %c0_54 = arith.constant 0 : index
    %75 = vector.load %arg4[%c0_53, %c0_54] : memref<1x32xf32, #tpu.memory_space<vmem>>, vector<1x32xf32>
    %cst_55 = arith.constant 9.99999974E-6 : f32
    %76 = vector.broadcast %cst_55 : f32 to vector<1x32xf32>
    %77 = arith.addf %74, %76 : vector<1x32xf32>
    %78 = math.rsqrt %77 : vector<1x32xf32>
    %79 = arith.mulf %75, %78 : vector<1x32xf32>
    %80 = vector.broadcast %79 : vector<1x32xf32> to vector<72x32xf32>
    %81 = arith.mulf %63, %80 : vector<72x32xf32>
    %c0_56 = arith.constant 0 : index
    %c0_57 = arith.constant 0 : index
    %82 = vector.load %arg5[%c0_56, %c0_57] : memref<1x32xf32, #tpu.memory_space<vmem>>, vector<1x32xf32>
    %83 = arith.mulf %67, %79 : vector<1x32xf32>
    %84 = arith.subf %82, %83 : vector<1x32xf32>
    %85 = vector.broadcast %84 : vector<1x32xf32> to vector<72x32xf32>
    %86 = arith.addf %81, %85 : vector<72x32xf32>
    %c8_58 = arith.constant 8 : index
    %c0_59 = arith.constant 0 : index
    %87 = vector.load %arg17[%c8_58, %c0_59] : memref<88x32xf32, #tpu.memory_space<vmem>>, vector<72x32xf32>
    tpu.vector_store %arg17[%c8_58, %c0_59], %86 {strides = array<i32>} : memref<88x32xf32, #tpu.memory_space<vmem>>, vector<72x32xf32>,
    %c1_60 = arith.constant 1 : index
    %c0_61 = arith.constant 0 : index
    %88 = vector.load %arg17[%c1_60, %c0_61] : memref<88x32xf32, #tpu.memory_space<vmem>>, vector<72x32xf32>
    %c0_62 = arith.constant 0 : index
    %c0_63 = arith.constant 0 : index
    %89 = vector.load %arg1[%c0_62, %c0_63] : memref<72x9xf32, #tpu.memory_space<vmem>>, vector<72x1xf32>
    %90 = vector.broadcast %89 : vector<72x1xf32> to vector<72x32xf32>
    %91 = arith.mulf %88, %90 : vector<72x32xf32>
    %c0_64 = arith.constant 0 : index
    %c0_65 = arith.constant 0 : index
    %92 = vector.load %arg18[%c0_64, %c0_65] : memref<72x288xf32, #tpu.memory_space<vmem>>, vector<72x32xf32>
    tpu.vector_store %arg18[%c0_64, %c0_65], %91 {strides = array<i32>} : memref<72x288xf32, #tpu.memory_space<vmem>>, vector<72x32xf32>,
    %c2_66 = arith.constant 2 : index
    %c0_67 = arith.constant 0 : index
    %93 = vector.load %arg17[%c2_66, %c0_67] : memref<88x32xf32, #tpu.memory_space<vmem>>, vector<72x32xf32>
    %c0_68 = arith.constant 0 : index
    %c1_69 = arith.constant 1 : index
    %94 = vector.load %arg1[%c0_68, %c1_69] : memref<72x9xf32, #tpu.memory_space<vmem>>, vector<72x1xf32>
    %95 = vector.broadcast %94 : vector<72x1xf32> to vector<72x32xf32>
    %96 = arith.mulf %93, %95 : vector<72x32xf32>
    %c0_70 = arith.constant 0 : index
    %c32_71 = arith.constant 32 : index
    %97 = vector.load %arg18[%c0_70, %c32_71] : memref<72x288xf32, #tpu.memory_space<vmem>>, vector<72x32xf32>
    tpu.vector_store %arg18[%c0_70, %c32_71], %96 {strides = array<i32>} : memref<72x288xf32, #tpu.memory_space<vmem>>, vector<72x32xf32>,
    %c3_72 = arith.constant 3 : index
    %c0_73 = arith.constant 0 : index
    %98 = vector.load %arg17[%c3_72, %c0_73] : memref<88x32xf32, #tpu.memory_space<vmem>>, vector<72x32xf32>
    %c0_74 = arith.constant 0 : index
    %c2_75 = arith.constant 2 : index
    %99 = vector.load %arg1[%c0_74, %c2_75] : memref<72x9xf32, #tpu.memory_space<vmem>>, vector<72x1xf32>
    %100 = vector.broadcast %99 : vector<72x1xf32> to vector<72x32xf32>
    %101 = arith.mulf %98, %100 : vector<72x32xf32>
    %c0_76 = arith.constant 0 : index
    %c64_77 = arith.constant 64 : index
    %102 = vector.load %arg18[%c0_76, %c64_77] : memref<72x288xf32, #tpu.memory_space<vmem>>, vector<72x32xf32>
    tpu.vector_store %arg18[%c0_76, %c64_77], %101 {strides = array<i32>} : memref<72x288xf32, #tpu.memory_space<vmem>>, vector<72x32xf32>,
    %c7_78 = arith.constant 7 : index
    %c0_79 = arith.constant 0 : index
    %103 = vector.load %arg17[%c7_78, %c0_79] : memref<88x32xf32, #tpu.memory_space<vmem>>, vector<72x32xf32>
    %c0_80 = arith.constant 0 : index
    %c3_81 = arith.constant 3 : index
    %104 = vector.load %arg1[%c0_80, %c3_81] : memref<72x9xf32, #tpu.memory_space<vmem>>, vector<72x1xf32>
    %105 = vector.broadcast %104 : vector<72x1xf32> to vector<72x32xf32>
    %106 = arith.mulf %103, %105 : vector<72x32xf32>
    %c0_82 = arith.constant 0 : index
    %c96_83 = arith.constant 96 : index
    %107 = vector.load %arg18[%c0_82, %c96_83] : memref<72x288xf32, #tpu.memory_space<vmem>>, vector<72x32xf32>
    tpu.vector_store %arg18[%c0_82, %c96_83], %106 {strides = array<i32>} : memref<72x288xf32, #tpu.memory_space<vmem>>, vector<72x32xf32>,
    %c8_84 = arith.constant 8 : index
    %c0_85 = arith.constant 0 : index
    %108 = vector.load %arg17[%c8_84, %c0_85] : memref<88x32xf32, #tpu.memory_space<vmem>>, vector<72x32xf32>
    %c0_86 = arith.constant 0 : index
    %c4_87 = arith.constant 4 : index
    %109 = vector.load %arg1[%c0_86, %c4_87] : memref<72x9xf32, #tpu.memory_space<vmem>>, vector<72x1xf32>
    %110 = vector.broadcast %109 : vector<72x1xf32> to vector<72x32xf32>
    %111 = arith.mulf %108, %110 : vector<72x32xf32>
    %c0_88 = arith.constant 0 : index
    %c128_89 = arith.constant 128 : index
    %112 = vector.load %arg18[%c0_88, %c128_89] : memref<72x288xf32, #tpu.memory_space<vmem>>, vector<72x32xf32>
    tpu.vector_store %arg18[%c0_88, %c128_89], %111 {strides = array<i32>} : memref<72x288xf32, #tpu.memory_space<vmem>>, vector<72x32xf32>,
    %c9_90 = arith.constant 9 : index
    %c0_91 = arith.constant 0 : index
    %113 = vector.load %arg17[%c9_90, %c0_91] : memref<88x32xf32, #tpu.memory_space<vmem>>, vector<72x32xf32>
    %c0_92 = arith.constant 0 : index
    %c5_93 = arith.constant 5 : index
    %114 = vector.load %arg1[%c0_92, %c5_93] : memref<72x9xf32, #tpu.memory_space<vmem>>, vector<72x1xf32>
    %115 = vector.broadcast %114 : vector<72x1xf32> to vector<72x32xf32>
    %116 = arith.mulf %113, %115 : vector<72x32xf32>
    %c0_94 = arith.constant 0 : index
    %c160_95 = arith.constant 160 : index
    %117 = vector.load %arg18[%c0_94, %c160_95] : memref<72x288xf32, #tpu.memory_space<vmem>>, vector<72x32xf32>
    tpu.vector_store %arg18[%c0_94, %c160_95], %116 {strides = array<i32>} : memref<72x288xf32, #tpu.memory_space<vmem>>, vector<72x32xf32>,
    %c13_96 = arith.constant 13 : index
    %c0_97 = arith.constant 0 : index
    %118 = vector.load %arg17[%c13_96, %c0_97] : memref<88x32xf32, #tpu.memory_space<vmem>>, vector<72x32xf32>
    %c0_98 = arith.constant 0 : index
    %c6_99 = arith.constant 6 : index
    %119 = vector.load %arg1[%c0_98, %c6_99] : memref<72x9xf32, #tpu.memory_space<vmem>>, vector<72x1xf32>
    %120 = vector.broadcast %119 : vector<72x1xf32> to vector<72x32xf32>
    %121 = arith.mulf %118, %120 : vector<72x32xf32>
    %c0_100 = arith.constant 0 : index
    %c192_101 = arith.constant 192 : index
    %122 = vector.load %arg18[%c0_100, %c192_101] : memref<72x288xf32, #tpu.memory_space<vmem>>, vector<72x32xf32>
    tpu.vector_store %arg18[%c0_100, %c192_101], %121 {strides = array<i32>} : memref<72x288xf32, #tpu.memory_space<vmem>>, vector<72x32xf32>,
    %c14_102 = arith.constant 14 : index
    %c0_103 = arith.constant 0 : index
    %123 = vector.load %arg17[%c14_102, %c0_103] : memref<88x32xf32, #tpu.memory_space<vmem>>, vector<72x32xf32>
    %c0_104 = arith.constant 0 : index
    %c7_105 = arith.constant 7 : index
    %124 = vector.load %arg1[%c0_104, %c7_105] : memref<72x9xf32, #tpu.memory_space<vmem>>, vector<72x1xf32>
    %125 = vector.broadcast %124 : vector<72x1xf32> to vector<72x32xf32>
    %126 = arith.mulf %123, %125 : vector<72x32xf32>
    %c0_106 = arith.constant 0 : index
    %c224_107 = arith.constant 224 : index
    %127 = vector.load %arg18[%c0_106, %c224_107] : memref<72x288xf32, #tpu.memory_space<vmem>>, vector<72x32xf32>
    tpu.vector_store %arg18[%c0_106, %c224_107], %126 {strides = array<i32>} : memref<72x288xf32, #tpu.memory_space<vmem>>, vector<72x32xf32>,
    %c15_108 = arith.constant 15 : index
    %c0_109 = arith.constant 0 : index
    %128 = vector.load %arg17[%c15_108, %c0_109] : memref<88x32xf32, #tpu.memory_space<vmem>>, vector<72x32xf32>
    %c0_110 = arith.constant 0 : index
    %c8_111 = arith.constant 8 : index
    %129 = vector.load %arg1[%c0_110, %c8_111] : memref<72x9xf32, #tpu.memory_space<vmem>>, vector<72x1xf32>
    %130 = vector.broadcast %129 : vector<72x1xf32> to vector<72x32xf32>
    %131 = arith.mulf %128, %130 : vector<72x32xf32>
    %c0_112 = arith.constant 0 : index
    %c256_113 = arith.constant 256 : index
    %132 = vector.load %arg18[%c0_112, %c256_113] : memref<72x288xf32, #tpu.memory_space<vmem>>, vector<72x32xf32>
    tpu.vector_store %arg18[%c0_112, %c256_113], %131 {strides = array<i32>} : memref<72x288xf32, #tpu.memory_space<vmem>>, vector<72x32xf32>,
    %c0_114 = arith.constant 0 : index
    %c0_115 = arith.constant 0 : index
    %133 = vector.load %arg18[%c0_114, %c0_115] : memref<72x288xf32, #tpu.memory_space<vmem>>, vector<72x288xf32>
    %134 = arith.truncf %133 : vector<72x288xf32> to vector<72x288xbf16>
    %c0_116 = arith.constant 0 : index
    %c0_117 = arith.constant 0 : index
    %135 = vector.load %arg6[%c0_116, %c0_117] : memref<288x32xbf16, #tpu.memory_space<vmem>>, vector<288x32xbf16>
    %cst_118 = arith.constant dense<0.000000e+00> : vector<72x32xf32>
    %136 = tpu.matmul %134, %135, %cst_118 {dimension_numbers = #tpu.dot_dimension_numbers<[1], [0], [0], [1], [0, 0, 1, 1], [], []>} : vector<72x288xbf16>, vector<288x32xbf16>, vector<72x32xf32> -> vector<72x32xf32>
    %c0_119 = arith.constant 0 : index
    %c0_120 = arith.constant 0 : index
    %137 = vector.load %arg7[%c0_119, %c0_120] : memref<1x32xf32, #tpu.memory_space<vmem>>, vector<1x32xf32>
    %138 = vector.broadcast %137 : vector<1x32xf32> to vector<72x32xf32>
    %139 = arith.addf %136, %138 : vector<72x32xf32>
    %cst_121 = arith.constant 0.000000e+00 : f32
    %140 = vector.broadcast %cst_121 : f32 to vector<72x32xf32>
    %141 = arith.cmpf ogt, %139, %140 : vector<72x32xf32>
    %cst_122 = arith.constant 0.000000e+00 : f32
    %142 = vector.broadcast %cst_122 : f32 to vector<72x32xf32>
    %143 = arith.minimumf %139, %142 : vector<72x32xf32>
    %144 = math.exp %143 : vector<72x32xf32>
    %cst_123 = arith.constant 1.000000e+00 : f32
    %145 = vector.broadcast %cst_123 : f32 to vector<72x32xf32>
    %146 = arith.subf %144, %145 : vector<72x32xf32>
    %147 = arith.select %141, %139, %146 : vector<72x32xi1>, vector<72x32xf32>
    %cst_124 = arith.constant dense<0.000000e+00> : vector<32xf32>
    %148 = vector.multi_reduction <add>, %147, %cst_124 [0] : vector<72x32xf32> to vector<32xf32>
    %149 = vector.shape_cast %148 : vector<32xf32> to vector<1x32xf32>
    %cst_125 = arith.constant 0.013888889 : f32
    %150 = vector.broadcast %cst_125 : f32 to vector<1x32xf32>
    %151 = arith.mulf %149, %150 : vector<1x32xf32>
    %152 = arith.mulf %147, %147 : vector<72x32xf32>
    %cst_126 = arith.constant dense<0.000000e+00> : vector<32xf32>
    %153 = vector.multi_reduction <add>, %152, %cst_126 [0] : vector<72x32xf32> to vector<32xf32>
    %154 = vector.shape_cast %153 : vector<32xf32> to vector<1x32xf32>
    %cst_127 = arith.constant 0.013888889 : f32
    %155 = vector.broadcast %cst_127 : f32 to vector<1x32xf32>
    %156 = arith.mulf %154, %155 : vector<1x32xf32>
    %157 = arith.mulf %151, %151 : vector<1x32xf32>
    %158 = arith.subf %156, %157 : vector<1x32xf32>
    %c0_128 = arith.constant 0 : index
    %c0_129 = arith.constant 0 : index
    %159 = vector.load %arg8[%c0_128, %c0_129] : memref<1x32xf32, #tpu.memory_space<vmem>>, vector<1x32xf32>
    %cst_130 = arith.constant 9.99999974E-6 : f32
    %160 = vector.broadcast %cst_130 : f32 to vector<1x32xf32>
    %161 = arith.addf %158, %160 : vector<1x32xf32>
    %162 = math.rsqrt %161 : vector<1x32xf32>
    %163 = arith.mulf %159, %162 : vector<1x32xf32>
    %164 = vector.broadcast %163 : vector<1x32xf32> to vector<72x32xf32>
    %165 = arith.mulf %147, %164 : vector<72x32xf32>
    %c0_131 = arith.constant 0 : index
    %c0_132 = arith.constant 0 : index
    %166 = vector.load %arg9[%c0_131, %c0_132] : memref<1x32xf32, #tpu.memory_space<vmem>>, vector<1x32xf32>
    %167 = arith.mulf %151, %163 : vector<1x32xf32>
    %168 = arith.subf %166, %167 : vector<1x32xf32>
    %169 = vector.broadcast %168 : vector<1x32xf32> to vector<72x32xf32>
    %170 = arith.addf %165, %169 : vector<72x32xf32>
    %c8_133 = arith.constant 8 : index
    %c0_134 = arith.constant 0 : index
    %171 = vector.load %arg17[%c8_133, %c0_134] : memref<88x32xf32, #tpu.memory_space<vmem>>, vector<72x32xf32>
    tpu.vector_store %arg17[%c8_133, %c0_134], %170 {strides = array<i32>} : memref<88x32xf32, #tpu.memory_space<vmem>>, vector<72x32xf32>,
    %c1_135 = arith.constant 1 : index
    %c0_136 = arith.constant 0 : index
    %172 = vector.load %arg17[%c1_135, %c0_136] : memref<88x32xf32, #tpu.memory_space<vmem>>, vector<72x32xf32>
    %c0_137 = arith.constant 0 : index
    %c0_138 = arith.constant 0 : index
    %173 = vector.load %arg1[%c0_137, %c0_138] : memref<72x9xf32, #tpu.memory_space<vmem>>, vector<72x1xf32>
    %174 = vector.broadcast %173 : vector<72x1xf32> to vector<72x32xf32>
    %175 = arith.mulf %172, %174 : vector<72x32xf32>
    %c0_139 = arith.constant 0 : index
    %c0_140 = arith.constant 0 : index
    %176 = vector.load %arg18[%c0_139, %c0_140] : memref<72x288xf32, #tpu.memory_space<vmem>>, vector<72x32xf32>
    tpu.vector_store %arg18[%c0_139, %c0_140], %175 {strides = array<i32>} : memref<72x288xf32, #tpu.memory_space<vmem>>, vector<72x32xf32>,
    %c2_141 = arith.constant 2 : index
    %c0_142 = arith.constant 0 : index
    %177 = vector.load %arg17[%c2_141, %c0_142] : memref<88x32xf32, #tpu.memory_space<vmem>>, vector<72x32xf32>
    %c0_143 = arith.constant 0 : index
    %c1_144 = arith.constant 1 : index
    %178 = vector.load %arg1[%c0_143, %c1_144] : memref<72x9xf32, #tpu.memory_space<vmem>>, vector<72x1xf32>
    %179 = vector.broadcast %178 : vector<72x1xf32> to vector<72x32xf32>
    %180 = arith.mulf %177, %179 : vector<72x32xf32>
    %c0_145 = arith.constant 0 : index
    %c32_146 = arith.constant 32 : index
    %181 = vector.load %arg18[%c0_145, %c32_146] : memref<72x288xf32, #tpu.memory_space<vmem>>, vector<72x32xf32>
    tpu.vector_store %arg18[%c0_145, %c32_146], %180 {strides = array<i32>} : memref<72x288xf32, #tpu.memory_space<vmem>>, vector<72x32xf32>,
    %c3_147 = arith.constant 3 : index
    %c0_148 = arith.constant 0 : index
    %182 = vector.load %arg17[%c3_147, %c0_148] : memref<88x32xf32, #tpu.memory_space<vmem>>, vector<72x32xf32>
    %c0_149 = arith.constant 0 : index
    %c2_150 = arith.constant 2 : index
    %183 = vector.load %arg1[%c0_149, %c2_150] : memref<72x9xf32, #tpu.memory_space<vmem>>, vector<72x1xf32>
    %184 = vector.broadcast %183 : vector<72x1xf32> to vector<72x32xf32>
    %185 = arith.mulf %182, %184 : vector<72x32xf32>
    %c0_151 = arith.constant 0 : index
    %c64_152 = arith.constant 64 : index
    %186 = vector.load %arg18[%c0_151, %c64_152] : memref<72x288xf32, #tpu.memory_space<vmem>>, vector<72x32xf32>
    tpu.vector_store %arg18[%c0_151, %c64_152], %185 {strides = array<i32>} : memref<72x288xf32, #tpu.memory_space<vmem>>, vector<72x32xf32>,
    %c7_153 = arith.constant 7 : index
    %c0_154 = arith.constant 0 : index
    %187 = vector.load %arg17[%c7_153, %c0_154] : memref<88x32xf32, #tpu.memory_space<vmem>>, vector<72x32xf32>
    %c0_155 = arith.constant 0 : index
    %c3_156 = arith.constant 3 : index
    %188 = vector.load %arg1[%c0_155, %c3_156] : memref<72x9xf32, #tpu.memory_space<vmem>>, vector<72x1xf32>
    %189 = vector.broadcast %188 : vector<72x1xf32> to vector<72x32xf32>
    %190 = arith.mulf %187, %189 : vector<72x32xf32>
    %c0_157 = arith.constant 0 : index
    %c96_158 = arith.constant 96 : index
    %191 = vector.load %arg18[%c0_157, %c96_158] : memref<72x288xf32, #tpu.memory_space<vmem>>, vector<72x32xf32>
    tpu.vector_store %arg18[%c0_157, %c96_158], %190 {strides = array<i32>} : memref<72x288xf32, #tpu.memory_space<vmem>>, vector<72x32xf32>,
    %c8_159 = arith.constant 8 : index
    %c0_160 = arith.constant 0 : index
    %192 = vector.load %arg17[%c8_159, %c0_160] : memref<88x32xf32, #tpu.memory_space<vmem>>, vector<72x32xf32>
    %c0_161 = arith.constant 0 : index
    %c4_162 = arith.constant 4 : index
    %193 = vector.load %arg1[%c0_161, %c4_162] : memref<72x9xf32, #tpu.memory_space<vmem>>, vector<72x1xf32>
    %194 = vector.broadcast %193 : vector<72x1xf32> to vector<72x32xf32>
    %195 = arith.mulf %192, %194 : vector<72x32xf32>
    %c0_163 = arith.constant 0 : index
    %c128_164 = arith.constant 128 : index
    %196 = vector.load %arg18[%c0_163, %c128_164] : memref<72x288xf32, #tpu.memory_space<vmem>>, vector<72x32xf32>
    tpu.vector_store %arg18[%c0_163, %c128_164], %195 {strides = array<i32>} : memref<72x288xf32, #tpu.memory_space<vmem>>, vector<72x32xf32>,
    %c9_165 = arith.constant 9 : index
    %c0_166 = arith.constant 0 : index
    %197 = vector.load %arg17[%c9_165, %c0_166] : memref<88x32xf32, #tpu.memory_space<vmem>>, vector<72x32xf32>
    %c0_167 = arith.constant 0 : index
    %c5_168 = arith.constant 5 : index
    %198 = vector.load %arg1[%c0_167, %c5_168] : memref<72x9xf32, #tpu.memory_space<vmem>>, vector<72x1xf32>
    %199 = vector.broadcast %198 : vector<72x1xf32> to vector<72x32xf32>
    %200 = arith.mulf %197, %199 : vector<72x32xf32>
    %c0_169 = arith.constant 0 : index
    %c160_170 = arith.constant 160 : index
    %201 = vector.load %arg18[%c0_169, %c160_170] : memref<72x288xf32, #tpu.memory_space<vmem>>, vector<72x32xf32>
    tpu.vector_store %arg18[%c0_169, %c160_170], %200 {strides = array<i32>} : memref<72x288xf32, #tpu.memory_space<vmem>>, vector<72x32xf32>,
    %c13_171 = arith.constant 13 : index
    %c0_172 = arith.constant 0 : index
    %202 = vector.load %arg17[%c13_171, %c0_172] : memref<88x32xf32, #tpu.memory_space<vmem>>, vector<72x32xf32>
    %c0_173 = arith.constant 0 : index
    %c6_174 = arith.constant 6 : index
    %203 = vector.load %arg1[%c0_173, %c6_174] : memref<72x9xf32, #tpu.memory_space<vmem>>, vector<72x1xf32>
    %204 = vector.broadcast %203 : vector<72x1xf32> to vector<72x32xf32>
    %205 = arith.mulf %202, %204 : vector<72x32xf32>
    %c0_175 = arith.constant 0 : index
    %c192_176 = arith.constant 192 : index
    %206 = vector.load %arg18[%c0_175, %c192_176] : memref<72x288xf32, #tpu.memory_space<vmem>>, vector<72x32xf32>
    tpu.vector_store %arg18[%c0_175, %c192_176], %205 {strides = array<i32>} : memref<72x288xf32, #tpu.memory_space<vmem>>, vector<72x32xf32>,
    %c14_177 = arith.constant 14 : index
    %c0_178 = arith.constant 0 : index
    %207 = vector.load %arg17[%c14_177, %c0_178] : memref<88x32xf32, #tpu.memory_space<vmem>>, vector<72x32xf32>
    %c0_179 = arith.constant 0 : index
    %c7_180 = arith.constant 7 : index
    %208 = vector.load %arg1[%c0_179, %c7_180] : memref<72x9xf32, #tpu.memory_space<vmem>>, vector<72x1xf32>
    %209 = vector.broadcast %208 : vector<72x1xf32> to vector<72x32xf32>
    %210 = arith.mulf %207, %209 : vector<72x32xf32>
    %c0_181 = arith.constant 0 : index
    %c224_182 = arith.constant 224 : index
    %211 = vector.load %arg18[%c0_181, %c224_182] : memref<72x288xf32, #tpu.memory_space<vmem>>, vector<72x32xf32>
    tpu.vector_store %arg18[%c0_181, %c224_182], %210 {strides = array<i32>} : memref<72x288xf32, #tpu.memory_space<vmem>>, vector<72x32xf32>,
    %c15_183 = arith.constant 15 : index
    %c0_184 = arith.constant 0 : index
    %212 = vector.load %arg17[%c15_183, %c0_184] : memref<88x32xf32, #tpu.memory_space<vmem>>, vector<72x32xf32>
    %c0_185 = arith.constant 0 : index
    %c8_186 = arith.constant 8 : index
    %213 = vector.load %arg1[%c0_185, %c8_186] : memref<72x9xf32, #tpu.memory_space<vmem>>, vector<72x1xf32>
    %214 = vector.broadcast %213 : vector<72x1xf32> to vector<72x32xf32>
    %215 = arith.mulf %212, %214 : vector<72x32xf32>
    %c0_187 = arith.constant 0 : index
    %c256_188 = arith.constant 256 : index
    %216 = vector.load %arg18[%c0_187, %c256_188] : memref<72x288xf32, #tpu.memory_space<vmem>>, vector<72x32xf32>
    tpu.vector_store %arg18[%c0_187, %c256_188], %215 {strides = array<i32>} : memref<72x288xf32, #tpu.memory_space<vmem>>, vector<72x32xf32>,
    %c0_189 = arith.constant 0 : index
    %c0_190 = arith.constant 0 : index
    %217 = vector.load %arg18[%c0_189, %c0_190] : memref<72x288xf32, #tpu.memory_space<vmem>>, vector<72x288xf32>
    %218 = arith.truncf %217 : vector<72x288xf32> to vector<72x288xbf16>
    %c0_191 = arith.constant 0 : index
    %c0_192 = arith.constant 0 : index
    %219 = vector.load %arg10[%c0_191, %c0_192] : memref<288x32xbf16, #tpu.memory_space<vmem>>, vector<288x32xbf16>
    %cst_193 = arith.constant dense<0.000000e+00> : vector<72x32xf32>
    %220 = tpu.matmul %218, %219, %cst_193 {dimension_numbers = #tpu.dot_dimension_numbers<[1], [0], [0], [1], [0, 0, 1, 1], [], []>} : vector<72x288xbf16>, vector<288x32xbf16>, vector<72x32xf32> -> vector<72x32xf32>
    %c0_194 = arith.constant 0 : index
    %c0_195 = arith.constant 0 : index
    %221 = vector.load %arg11[%c0_194, %c0_195] : memref<1x32xf32, #tpu.memory_space<vmem>>, vector<1x32xf32>
    %222 = vector.broadcast %221 : vector<1x32xf32> to vector<72x32xf32>
    %223 = arith.addf %220, %222 : vector<72x32xf32>
    %cst_196 = arith.constant 0.000000e+00 : f32
    %224 = vector.broadcast %cst_196 : f32 to vector<72x32xf32>
    %225 = arith.cmpf ogt, %223, %224 : vector<72x32xf32>
    %cst_197 = arith.constant 0.000000e+00 : f32
    %226 = vector.broadcast %cst_197 : f32 to vector<72x32xf32>
    %227 = arith.minimumf %223, %226 : vector<72x32xf32>
    %228 = math.exp %227 : vector<72x32xf32>
    %cst_198 = arith.constant 1.000000e+00 : f32
    %229 = vector.broadcast %cst_198 : f32 to vector<72x32xf32>
    %230 = arith.subf %228, %229 : vector<72x32xf32>
    %231 = arith.select %225, %223, %230 : vector<72x32xi1>, vector<72x32xf32>
    %cst_199 = arith.constant dense<0.000000e+00> : vector<32xf32>
    %232 = vector.multi_reduction <add>, %231, %cst_199 [0] : vector<72x32xf32> to vector<32xf32>
    %233 = vector.shape_cast %232 : vector<32xf32> to vector<1x32xf32>
    %cst_200 = arith.constant 0.013888889 : f32
    %234 = vector.broadcast %cst_200 : f32 to vector<1x32xf32>
    %235 = arith.mulf %233, %234 : vector<1x32xf32>
    %236 = arith.mulf %231, %231 : vector<72x32xf32>
    %cst_201 = arith.constant dense<0.000000e+00> : vector<32xf32>
    %237 = vector.multi_reduction <add>, %236, %cst_201 [0] : vector<72x32xf32> to vector<32xf32>
    %238 = vector.shape_cast %237 : vector<32xf32> to vector<1x32xf32>
    %cst_202 = arith.constant 0.013888889 : f32
    %239 = vector.broadcast %cst_202 : f32 to vector<1x32xf32>
    %240 = arith.mulf %238, %239 : vector<1x32xf32>
    %241 = arith.mulf %235, %235 : vector<1x32xf32>
    %242 = arith.subf %240, %241 : vector<1x32xf32>
    %c0_203 = arith.constant 0 : index
    %c0_204 = arith.constant 0 : index
    %243 = vector.load %arg12[%c0_203, %c0_204] : memref<1x32xf32, #tpu.memory_space<vmem>>, vector<1x32xf32>
    %cst_205 = arith.constant 9.99999974E-6 : f32
    %244 = vector.broadcast %cst_205 : f32 to vector<1x32xf32>
    %245 = arith.addf %242, %244 : vector<1x32xf32>
    %246 = math.rsqrt %245 : vector<1x32xf32>
    %247 = arith.mulf %243, %246 : vector<1x32xf32>
    %248 = vector.broadcast %247 : vector<1x32xf32> to vector<72x32xf32>
    %249 = arith.mulf %231, %248 : vector<72x32xf32>
    %c0_206 = arith.constant 0 : index
    %c0_207 = arith.constant 0 : index
    %250 = vector.load %arg13[%c0_206, %c0_207] : memref<1x32xf32, #tpu.memory_space<vmem>>, vector<1x32xf32>
    %251 = arith.mulf %235, %247 : vector<1x32xf32>
    %252 = arith.subf %250, %251 : vector<1x32xf32>
    %253 = vector.broadcast %252 : vector<1x32xf32> to vector<72x32xf32>
    %254 = arith.addf %249, %253 : vector<72x32xf32>
    %c8_208 = arith.constant 8 : index
    %c0_209 = arith.constant 0 : index
    %255 = vector.load %arg17[%c8_208, %c0_209] : memref<88x32xf32, #tpu.memory_space<vmem>>, vector<72x32xf32>
    tpu.vector_store %arg17[%c8_208, %c0_209], %254 {strides = array<i32>} : memref<88x32xf32, #tpu.memory_space<vmem>>, vector<72x32xf32>,
    %c8_210 = arith.constant 8 : index
    %c0_211 = arith.constant 0 : index
    %256 = vector.load %arg17[%c8_210, %c0_211] : memref<88x32xf32, #tpu.memory_space<vmem>>, vector<1x32xf32>
    %c0_212 = arith.constant 0 : index
    %c0_213 = arith.constant 0 : index
    %257 = vector.load %arg19[%c0_212, %c0_213] : memref<2x1152xf32, #tpu.memory_space<vmem>>, vector<1x32xf32>
    tpu.vector_store %arg19[%c0_212, %c0_213], %256 {strides = array<i32>} : memref<2x1152xf32, #tpu.memory_space<vmem>>, vector<1x32xf32>,
    %c9_214 = arith.constant 9 : index
    %c0_215 = arith.constant 0 : index
    %258 = vector.load %arg17[%c9_214, %c0_215] : memref<88x32xf32, #tpu.memory_space<vmem>>, vector<1x32xf32>
    %c0_216 = arith.constant 0 : index
    %c32_217 = arith.constant 32 : index
    %259 = vector.load %arg19[%c0_216, %c32_217] : memref<2x1152xf32, #tpu.memory_space<vmem>>, vector<1x32xf32>
    tpu.vector_store %arg19[%c0_216, %c32_217], %258 {strides = array<i32>} : memref<2x1152xf32, #tpu.memory_space<vmem>>, vector<1x32xf32>,
    %c10 = arith.constant 10 : index
    %c0_218 = arith.constant 0 : index
    %260 = vector.load %arg17[%c10, %c0_218] : memref<88x32xf32, #tpu.memory_space<vmem>>, vector<1x32xf32>
    %c0_219 = arith.constant 0 : index
    %c64_220 = arith.constant 64 : index
    %261 = vector.load %arg19[%c0_219, %c64_220] : memref<2x1152xf32, #tpu.memory_space<vmem>>, vector<1x32xf32>
    tpu.vector_store %arg19[%c0_219, %c64_220], %260 {strides = array<i32>} : memref<2x1152xf32, #tpu.memory_space<vmem>>, vector<1x32xf32>,
    %c11 = arith.constant 11 : index
    %c0_221 = arith.constant 0 : index
    %262 = vector.load %arg17[%c11, %c0_221] : memref<88x32xf32, #tpu.memory_space<vmem>>, vector<1x32xf32>
    %c0_222 = arith.constant 0 : index
    %c96_223 = arith.constant 96 : index
    %263 = vector.load %arg19[%c0_222, %c96_223] : memref<2x1152xf32, #tpu.memory_space<vmem>>, vector<1x32xf32>
    tpu.vector_store %arg19[%c0_222, %c96_223], %262 {strides = array<i32>} : memref<2x1152xf32, #tpu.memory_space<vmem>>, vector<1x32xf32>,
    %c12 = arith.constant 12 : index
    %c0_224 = arith.constant 0 : index
    %264 = vector.load %arg17[%c12, %c0_224] : memref<88x32xf32, #tpu.memory_space<vmem>>, vector<1x32xf32>
    %c0_225 = arith.constant 0 : index
    %c128_226 = arith.constant 128 : index
    %265 = vector.load %arg19[%c0_225, %c128_226] : memref<2x1152xf32, #tpu.memory_space<vmem>>, vector<1x32xf32>
    tpu.vector_store %arg19[%c0_225, %c128_226], %264 {strides = array<i32>} : memref<2x1152xf32, #tpu.memory_space<vmem>>, vector<1x32xf32>,
    %c13_227 = arith.constant 13 : index
    %c0_228 = arith.constant 0 : index
    %266 = vector.load %arg17[%c13_227, %c0_228] : memref<88x32xf32, #tpu.memory_space<vmem>>, vector<1x32xf32>
    %c0_229 = arith.constant 0 : index
    %c160_230 = arith.constant 160 : index
    %267 = vector.load %arg19[%c0_229, %c160_230] : memref<2x1152xf32, #tpu.memory_space<vmem>>, vector<1x32xf32>
    tpu.vector_store %arg19[%c0_229, %c160_230], %266 {strides = array<i32>} : memref<2x1152xf32, #tpu.memory_space<vmem>>, vector<1x32xf32>,
    %c14_231 = arith.constant 14 : index
    %c0_232 = arith.constant 0 : index
    %268 = vector.load %arg17[%c14_231, %c0_232] : memref<88x32xf32, #tpu.memory_space<vmem>>, vector<1x32xf32>
    %c0_233 = arith.constant 0 : index
    %c192_234 = arith.constant 192 : index
    %269 = vector.load %arg19[%c0_233, %c192_234] : memref<2x1152xf32, #tpu.memory_space<vmem>>, vector<1x32xf32>
    tpu.vector_store %arg19[%c0_233, %c192_234], %268 {strides = array<i32>} : memref<2x1152xf32, #tpu.memory_space<vmem>>, vector<1x32xf32>,
    %c15_235 = arith.constant 15 : index
    %c0_236 = arith.constant 0 : index
    %270 = vector.load %arg17[%c15_235, %c0_236] : memref<88x32xf32, #tpu.memory_space<vmem>>, vector<1x32xf32>
    %c0_237 = arith.constant 0 : index
    %c224_238 = arith.constant 224 : index
    %271 = vector.load %arg19[%c0_237, %c224_238] : memref<2x1152xf32, #tpu.memory_space<vmem>>, vector<1x32xf32>
    tpu.vector_store %arg19[%c0_237, %c224_238], %270 {strides = array<i32>} : memref<2x1152xf32, #tpu.memory_space<vmem>>, vector<1x32xf32>,
    %c16 = arith.constant 16 : index
    %c0_239 = arith.constant 0 : index
    %272 = vector.load %arg17[%c16, %c0_239] : memref<88x32xf32, #tpu.memory_space<vmem>>, vector<1x32xf32>
    %c0_240 = arith.constant 0 : index
    %c256_241 = arith.constant 256 : index
    %273 = vector.load %arg19[%c0_240, %c256_241] : memref<2x1152xf32, #tpu.memory_space<vmem>>, vector<1x32xf32>
    tpu.vector_store %arg19[%c0_240, %c256_241], %272 {strides = array<i32>} : memref<2x1152xf32, #tpu.memory_space<vmem>>, vector<1x32xf32>,
    %c17 = arith.constant 17 : index
    %c0_242 = arith.constant 0 : index
    %274 = vector.load %arg17[%c17, %c0_242] : memref<88x32xf32, #tpu.memory_space<vmem>>, vector<1x32xf32>
    %c0_243 = arith.constant 0 : index
    %c288 = arith.constant 288 : index
    %275 = vector.load %arg19[%c0_243, %c288] : memref<2x1152xf32, #tpu.memory_space<vmem>>, vector<1x32xf32>
    tpu.vector_store %arg19[%c0_243, %c288], %274 {strides = array<i32>} : memref<2x1152xf32, #tpu.memory_space<vmem>>, vector<1x32xf32>,
    %c18 = arith.constant 18 : index
    %c0_244 = arith.constant 0 : index
    %276 = vector.load %arg17[%c18, %c0_244] : memref<88x32xf32, #tpu.memory_space<vmem>>, vector<1x32xf32>
    %c0_245 = arith.constant 0 : index
    %c320 = arith.constant 320 : index
    %277 = vector.load %arg19[%c0_245, %c320] : memref<2x1152xf32, #tpu.memory_space<vmem>>, vector<1x32xf32>
    tpu.vector_store %arg19[%c0_245, %c320], %276 {strides = array<i32>} : memref<2x1152xf32, #tpu.memory_space<vmem>>, vector<1x32xf32>,
    %c19 = arith.constant 19 : index
    %c0_246 = arith.constant 0 : index
    %278 = vector.load %arg17[%c19, %c0_246] : memref<88x32xf32, #tpu.memory_space<vmem>>, vector<1x32xf32>
    %c0_247 = arith.constant 0 : index
    %c352 = arith.constant 352 : index
    %279 = vector.load %arg19[%c0_247, %c352] : memref<2x1152xf32, #tpu.memory_space<vmem>>, vector<1x32xf32>
    tpu.vector_store %arg19[%c0_247, %c352], %278 {strides = array<i32>} : memref<2x1152xf32, #tpu.memory_space<vmem>>, vector<1x32xf32>,
    %c20 = arith.constant 20 : index
    %c0_248 = arith.constant 0 : index
    %280 = vector.load %arg17[%c20, %c0_248] : memref<88x32xf32, #tpu.memory_space<vmem>>, vector<1x32xf32>
    %c0_249 = arith.constant 0 : index
    %c384 = arith.constant 384 : index
    %281 = vector.load %arg19[%c0_249, %c384] : memref<2x1152xf32, #tpu.memory_space<vmem>>, vector<1x32xf32>
    tpu.vector_store %arg19[%c0_249, %c384], %280 {strides = array<i32>} : memref<2x1152xf32, #tpu.memory_space<vmem>>, vector<1x32xf32>,
    %c21 = arith.constant 21 : index
    %c0_250 = arith.constant 0 : index
    %282 = vector.load %arg17[%c21, %c0_250] : memref<88x32xf32, #tpu.memory_space<vmem>>, vector<1x32xf32>
    %c0_251 = arith.constant 0 : index
    %c416 = arith.constant 416 : index
    %283 = vector.load %arg19[%c0_251, %c416] : memref<2x1152xf32, #tpu.memory_space<vmem>>, vector<1x32xf32>
    tpu.vector_store %arg19[%c0_251, %c416], %282 {strides = array<i32>} : memref<2x1152xf32, #tpu.memory_space<vmem>>, vector<1x32xf32>,
    %c22 = arith.constant 22 : index
    %c0_252 = arith.constant 0 : index
    %284 = vector.load %arg17[%c22, %c0_252] : memref<88x32xf32, #tpu.memory_space<vmem>>, vector<1x32xf32>
    %c0_253 = arith.constant 0 : index
    %c448 = arith.constant 448 : index
    %285 = vector.load %arg19[%c0_253, %c448] : memref<2x1152xf32, #tpu.memory_space<vmem>>, vector<1x32xf32>
    tpu.vector_store %arg19[%c0_253, %c448], %284 {strides = array<i32>} : memref<2x1152xf32, #tpu.memory_space<vmem>>, vector<1x32xf32>,
    %c23 = arith.constant 23 : index
    %c0_254 = arith.constant 0 : index
    %286 = vector.load %arg17[%c23, %c0_254] : memref<88x32xf32, #tpu.memory_space<vmem>>, vector<1x32xf32>
    %c0_255 = arith.constant 0 : index
    %c480 = arith.constant 480 : index
    %287 = vector.load %arg19[%c0_255, %c480] : memref<2x1152xf32, #tpu.memory_space<vmem>>, vector<1x32xf32>
    tpu.vector_store %arg19[%c0_255, %c480], %286 {strides = array<i32>} : memref<2x1152xf32, #tpu.memory_space<vmem>>, vector<1x32xf32>,
    %c24 = arith.constant 24 : index
    %c0_256 = arith.constant 0 : index
    %288 = vector.load %arg17[%c24, %c0_256] : memref<88x32xf32, #tpu.memory_space<vmem>>, vector<1x32xf32>
    %c0_257 = arith.constant 0 : index
    %c512 = arith.constant 512 : index
    %289 = vector.load %arg19[%c0_257, %c512] : memref<2x1152xf32, #tpu.memory_space<vmem>>, vector<1x32xf32>
    tpu.vector_store %arg19[%c0_257, %c512], %288 {strides = array<i32>} : memref<2x1152xf32, #tpu.memory_space<vmem>>, vector<1x32xf32>,
    %c25 = arith.constant 25 : index
    %c0_258 = arith.constant 0 : index
    %290 = vector.load %arg17[%c25, %c0_258] : memref<88x32xf32, #tpu.memory_space<vmem>>, vector<1x32xf32>
    %c0_259 = arith.constant 0 : index
    %c544 = arith.constant 544 : index
    %291 = vector.load %arg19[%c0_259, %c544] : memref<2x1152xf32, #tpu.memory_space<vmem>>, vector<1x32xf32>
    tpu.vector_store %arg19[%c0_259, %c544], %290 {strides = array<i32>} : memref<2x1152xf32, #tpu.memory_space<vmem>>, vector<1x32xf32>,
    %c26 = arith.constant 26 : index
    %c0_260 = arith.constant 0 : index
    %292 = vector.load %arg17[%c26, %c0_260] : memref<88x32xf32, #tpu.memory_space<vmem>>, vector<1x32xf32>
    %c0_261 = arith.constant 0 : index
    %c576 = arith.constant 576 : index
    %293 = vector.load %arg19[%c0_261, %c576] : memref<2x1152xf32, #tpu.memory_space<vmem>>, vector<1x32xf32>
    tpu.vector_store %arg19[%c0_261, %c576], %292 {strides = array<i32>} : memref<2x1152xf32, #tpu.memory_space<vmem>>, vector<1x32xf32>,
    %c27 = arith.constant 27 : index
    %c0_262 = arith.constant 0 : index
    %294 = vector.load %arg17[%c27, %c0_262] : memref<88x32xf32, #tpu.memory_space<vmem>>, vector<1x32xf32>
    %c0_263 = arith.constant 0 : index
    %c608 = arith.constant 608 : index
    %295 = vector.load %arg19[%c0_263, %c608] : memref<2x1152xf32, #tpu.memory_space<vmem>>, vector<1x32xf32>
    tpu.vector_store %arg19[%c0_263, %c608], %294 {strides = array<i32>} : memref<2x1152xf32, #tpu.memory_space<vmem>>, vector<1x32xf32>,
    %c28 = arith.constant 28 : index
    %c0_264 = arith.constant 0 : index
    %296 = vector.load %arg17[%c28, %c0_264] : memref<88x32xf32, #tpu.memory_space<vmem>>, vector<1x32xf32>
    %c0_265 = arith.constant 0 : index
    %c640 = arith.constant 640 : index
    %297 = vector.load %arg19[%c0_265, %c640] : memref<2x1152xf32, #tpu.memory_space<vmem>>, vector<1x32xf32>
    tpu.vector_store %arg19[%c0_265, %c640], %296 {strides = array<i32>} : memref<2x1152xf32, #tpu.memory_space<vmem>>, vector<1x32xf32>,
    %c29 = arith.constant 29 : index
    %c0_266 = arith.constant 0 : index
    %298 = vector.load %arg17[%c29, %c0_266] : memref<88x32xf32, #tpu.memory_space<vmem>>, vector<1x32xf32>
    %c0_267 = arith.constant 0 : index
    %c672 = arith.constant 672 : index
    %299 = vector.load %arg19[%c0_267, %c672] : memref<2x1152xf32, #tpu.memory_space<vmem>>, vector<1x32xf32>
    tpu.vector_store %arg19[%c0_267, %c672], %298 {strides = array<i32>} : memref<2x1152xf32, #tpu.memory_space<vmem>>, vector<1x32xf32>,
    %c30 = arith.constant 30 : index
    %c0_268 = arith.constant 0 : index
    %300 = vector.load %arg17[%c30, %c0_268] : memref<88x32xf32, #tpu.memory_space<vmem>>, vector<1x32xf32>
    %c0_269 = arith.constant 0 : index
    %c704 = arith.constant 704 : index
    %301 = vector.load %arg19[%c0_269, %c704] : memref<2x1152xf32, #tpu.memory_space<vmem>>, vector<1x32xf32>
    tpu.vector_store %arg19[%c0_269, %c704], %300 {strides = array<i32>} : memref<2x1152xf32, #tpu.memory_space<vmem>>, vector<1x32xf32>,
    %c31 = arith.constant 31 : index
    %c0_270 = arith.constant 0 : index
    %302 = vector.load %arg17[%c31, %c0_270] : memref<88x32xf32, #tpu.memory_space<vmem>>, vector<1x32xf32>
    %c0_271 = arith.constant 0 : index
    %c736 = arith.constant 736 : index
    %303 = vector.load %arg19[%c0_271, %c736] : memref<2x1152xf32, #tpu.memory_space<vmem>>, vector<1x32xf32>
    tpu.vector_store %arg19[%c0_271, %c736], %302 {strides = array<i32>} : memref<2x1152xf32, #tpu.memory_space<vmem>>, vector<1x32xf32>,
    %c32_272 = arith.constant 32 : index
    %c0_273 = arith.constant 0 : index
    %304 = vector.load %arg17[%c32_272, %c0_273] : memref<88x32xf32, #tpu.memory_space<vmem>>, vector<1x32xf32>
    %c0_274 = arith.constant 0 : index
    %c768 = arith.constant 768 : index
    %305 = vector.load %arg19[%c0_274, %c768] : memref<2x1152xf32, #tpu.memory_space<vmem>>, vector<1x32xf32>
    tpu.vector_store %arg19[%c0_274, %c768], %304 {strides = array<i32>} : memref<2x1152xf32, #tpu.memory_space<vmem>>, vector<1x32xf32>,
    %c33 = arith.constant 33 : index
    %c0_275 = arith.constant 0 : index
    %306 = vector.load %arg17[%c33, %c0_275] : memref<88x32xf32, #tpu.memory_space<vmem>>, vector<1x32xf32>
    %c0_276 = arith.constant 0 : index
    %c800 = arith.constant 800 : index
    %307 = vector.load %arg19[%c0_276, %c800] : memref<2x1152xf32, #tpu.memory_space<vmem>>, vector<1x32xf32>
    tpu.vector_store %arg19[%c0_276, %c800], %306 {strides = array<i32>} : memref<2x1152xf32, #tpu.memory_space<vmem>>, vector<1x32xf32>,
    %c34 = arith.constant 34 : index
    %c0_277 = arith.constant 0 : index
    %308 = vector.load %arg17[%c34, %c0_277] : memref<88x32xf32, #tpu.memory_space<vmem>>, vector<1x32xf32>
    %c0_278 = arith.constant 0 : index
    %c832 = arith.constant 832 : index
    %309 = vector.load %arg19[%c0_278, %c832] : memref<2x1152xf32, #tpu.memory_space<vmem>>, vector<1x32xf32>
    tpu.vector_store %arg19[%c0_278, %c832], %308 {strides = array<i32>} : memref<2x1152xf32, #tpu.memory_space<vmem>>, vector<1x32xf32>,
    %c35 = arith.constant 35 : index
    %c0_279 = arith.constant 0 : index
    %310 = vector.load %arg17[%c35, %c0_279] : memref<88x32xf32, #tpu.memory_space<vmem>>, vector<1x32xf32>
    %c0_280 = arith.constant 0 : index
    %c864 = arith.constant 864 : index
    %311 = vector.load %arg19[%c0_280, %c864] : memref<2x1152xf32, #tpu.memory_space<vmem>>, vector<1x32xf32>
    tpu.vector_store %arg19[%c0_280, %c864], %310 {strides = array<i32>} : memref<2x1152xf32, #tpu.memory_space<vmem>>, vector<1x32xf32>,
    %c36 = arith.constant 36 : index
    %c0_281 = arith.constant 0 : index
    %312 = vector.load %arg17[%c36, %c0_281] : memref<88x32xf32, #tpu.memory_space<vmem>>, vector<1x32xf32>
    %c0_282 = arith.constant 0 : index
    %c896 = arith.constant 896 : index
    %313 = vector.load %arg19[%c0_282, %c896] : memref<2x1152xf32, #tpu.memory_space<vmem>>, vector<1x32xf32>
    tpu.vector_store %arg19[%c0_282, %c896], %312 {strides = array<i32>} : memref<2x1152xf32, #tpu.memory_space<vmem>>, vector<1x32xf32>,
    %c37 = arith.constant 37 : index
    %c0_283 = arith.constant 0 : index
    %314 = vector.load %arg17[%c37, %c0_283] : memref<88x32xf32, #tpu.memory_space<vmem>>, vector<1x32xf32>
    %c0_284 = arith.constant 0 : index
    %c928 = arith.constant 928 : index
    %315 = vector.load %arg19[%c0_284, %c928] : memref<2x1152xf32, #tpu.memory_space<vmem>>, vector<1x32xf32>
    tpu.vector_store %arg19[%c0_284, %c928], %314 {strides = array<i32>} : memref<2x1152xf32, #tpu.memory_space<vmem>>, vector<1x32xf32>,
    %c38 = arith.constant 38 : index
    %c0_285 = arith.constant 0 : index
    %316 = vector.load %arg17[%c38, %c0_285] : memref<88x32xf32, #tpu.memory_space<vmem>>, vector<1x32xf32>
    %c0_286 = arith.constant 0 : index
    %c960 = arith.constant 960 : index
    %317 = vector.load %arg19[%c0_286, %c960] : memref<2x1152xf32, #tpu.memory_space<vmem>>, vector<1x32xf32>
    tpu.vector_store %arg19[%c0_286, %c960], %316 {strides = array<i32>} : memref<2x1152xf32, #tpu.memory_space<vmem>>, vector<1x32xf32>,
    %c39 = arith.constant 39 : index
    %c0_287 = arith.constant 0 : index
    %318 = vector.load %arg17[%c39, %c0_287] : memref<88x32xf32, #tpu.memory_space<vmem>>, vector<1x32xf32>
    %c0_288 = arith.constant 0 : index
    %c992 = arith.constant 992 : index
    %319 = vector.load %arg19[%c0_288, %c992] : memref<2x1152xf32, #tpu.memory_space<vmem>>, vector<1x32xf32>
    tpu.vector_store %arg19[%c0_288, %c992], %318 {strides = array<i32>} : memref<2x1152xf32, #tpu.memory_space<vmem>>, vector<1x32xf32>,
    %c40 = arith.constant 40 : index
    %c0_289 = arith.constant 0 : index
    %320 = vector.load %arg17[%c40, %c0_289] : memref<88x32xf32, #tpu.memory_space<vmem>>, vector<1x32xf32>
    %c0_290 = arith.constant 0 : index
    %c1024 = arith.constant 1024 : index
    %321 = vector.load %arg19[%c0_290, %c1024] : memref<2x1152xf32, #tpu.memory_space<vmem>>, vector<1x32xf32>
    tpu.vector_store %arg19[%c0_290, %c1024], %320 {strides = array<i32>} : memref<2x1152xf32, #tpu.memory_space<vmem>>, vector<1x32xf32>,
    %c41 = arith.constant 41 : index
    %c0_291 = arith.constant 0 : index
    %322 = vector.load %arg17[%c41, %c0_291] : memref<88x32xf32, #tpu.memory_space<vmem>>, vector<1x32xf32>
    %c0_292 = arith.constant 0 : index
    %c1056 = arith.constant 1056 : index
    %323 = vector.load %arg19[%c0_292, %c1056] : memref<2x1152xf32, #tpu.memory_space<vmem>>, vector<1x32xf32>
    tpu.vector_store %arg19[%c0_292, %c1056], %322 {strides = array<i32>} : memref<2x1152xf32, #tpu.memory_space<vmem>>, vector<1x32xf32>,
    %c42 = arith.constant 42 : index
    %c0_293 = arith.constant 0 : index
    %324 = vector.load %arg17[%c42, %c0_293] : memref<88x32xf32, #tpu.memory_space<vmem>>, vector<1x32xf32>
    %c0_294 = arith.constant 0 : index
    %c1088 = arith.constant 1088 : index
    %325 = vector.load %arg19[%c0_294, %c1088] : memref<2x1152xf32, #tpu.memory_space<vmem>>, vector<1x32xf32>
    tpu.vector_store %arg19[%c0_294, %c1088], %324 {strides = array<i32>} : memref<2x1152xf32, #tpu.memory_space<vmem>>, vector<1x32xf32>,
    %c43 = arith.constant 43 : index
    %c0_295 = arith.constant 0 : index
    %326 = vector.load %arg17[%c43, %c0_295] : memref<88x32xf32, #tpu.memory_space<vmem>>, vector<1x32xf32>
    %c0_296 = arith.constant 0 : index
    %c1120 = arith.constant 1120 : index
    %327 = vector.load %arg19[%c0_296, %c1120] : memref<2x1152xf32, #tpu.memory_space<vmem>>, vector<1x32xf32>
    tpu.vector_store %arg19[%c0_296, %c1120], %326 {strides = array<i32>} : memref<2x1152xf32, #tpu.memory_space<vmem>>, vector<1x32xf32>,
    %c44 = arith.constant 44 : index
    %c0_297 = arith.constant 0 : index
    %328 = vector.load %arg17[%c44, %c0_297] : memref<88x32xf32, #tpu.memory_space<vmem>>, vector<1x32xf32>
    %c1_298 = arith.constant 1 : index
    %c0_299 = arith.constant 0 : index
    %329 = vector.load %arg19[%c1_298, %c0_299] : memref<2x1152xf32, #tpu.memory_space<vmem>>, vector<1x32xf32>
    tpu.vector_store %arg19[%c1_298, %c0_299], %328 {strides = array<i32>} : memref<2x1152xf32, #tpu.memory_space<vmem>>, vector<1x32xf32>,
    %c45 = arith.constant 45 : index
    %c0_300 = arith.constant 0 : index
    %330 = vector.load %arg17[%c45, %c0_300] : memref<88x32xf32, #tpu.memory_space<vmem>>, vector<1x32xf32>
    %c1_301 = arith.constant 1 : index
    %c32_302 = arith.constant 32 : index
    %331 = vector.load %arg19[%c1_301, %c32_302] : memref<2x1152xf32, #tpu.memory_space<vmem>>, vector<1x32xf32>
    tpu.vector_store %arg19[%c1_301, %c32_302], %330 {strides = array<i32>} : memref<2x1152xf32, #tpu.memory_space<vmem>>, vector<1x32xf32>,
    %c46 = arith.constant 46 : index
    %c0_303 = arith.constant 0 : index
    %332 = vector.load %arg17[%c46, %c0_303] : memref<88x32xf32, #tpu.memory_space<vmem>>, vector<1x32xf32>
    %c1_304 = arith.constant 1 : index
    %c64_305 = arith.constant 64 : index
    %333 = vector.load %arg19[%c1_304, %c64_305] : memref<2x1152xf32, #tpu.memory_space<vmem>>, vector<1x32xf32>
    tpu.vector_store %arg19[%c1_304, %c64_305], %332 {strides = array<i32>} : memref<2x1152xf32, #tpu.memory_space<vmem>>, vector<1x32xf32>,
    %c47 = arith.constant 47 : index
    %c0_306 = arith.constant 0 : index
    %334 = vector.load %arg17[%c47, %c0_306] : memref<88x32xf32, #tpu.memory_space<vmem>>, vector<1x32xf32>
    %c1_307 = arith.constant 1 : index
    %c96_308 = arith.constant 96 : index
    %335 = vector.load %arg19[%c1_307, %c96_308] : memref<2x1152xf32, #tpu.memory_space<vmem>>, vector<1x32xf32>
    tpu.vector_store %arg19[%c1_307, %c96_308], %334 {strides = array<i32>} : memref<2x1152xf32, #tpu.memory_space<vmem>>, vector<1x32xf32>,
    %c48 = arith.constant 48 : index
    %c0_309 = arith.constant 0 : index
    %336 = vector.load %arg17[%c48, %c0_309] : memref<88x32xf32, #tpu.memory_space<vmem>>, vector<1x32xf32>
    %c1_310 = arith.constant 1 : index
    %c128_311 = arith.constant 128 : index
    %337 = vector.load %arg19[%c1_310, %c128_311] : memref<2x1152xf32, #tpu.memory_space<vmem>>, vector<1x32xf32>
    tpu.vector_store %arg19[%c1_310, %c128_311], %336 {strides = array<i32>} : memref<2x1152xf32, #tpu.memory_space<vmem>>, vector<1x32xf32>,
    %c49 = arith.constant 49 : index
    %c0_312 = arith.constant 0 : index
    %338 = vector.load %arg17[%c49, %c0_312] : memref<88x32xf32, #tpu.memory_space<vmem>>, vector<1x32xf32>
    %c1_313 = arith.constant 1 : index
    %c160_314 = arith.constant 160 : index
    %339 = vector.load %arg19[%c1_313, %c160_314] : memref<2x1152xf32, #tpu.memory_space<vmem>>, vector<1x32xf32>
    tpu.vector_store %arg19[%c1_313, %c160_314], %338 {strides = array<i32>} : memref<2x1152xf32, #tpu.memory_space<vmem>>, vector<1x32xf32>,
    %c50 = arith.constant 50 : index
    %c0_315 = arith.constant 0 : index
    %340 = vector.load %arg17[%c50, %c0_315] : memref<88x32xf32, #tpu.memory_space<vmem>>, vector<1x32xf32>
    %c1_316 = arith.constant 1 : index
    %c192_317 = arith.constant 192 : index
    %341 = vector.load %arg19[%c1_316, %c192_317] : memref<2x1152xf32, #tpu.memory_space<vmem>>, vector<1x32xf32>
    tpu.vector_store %arg19[%c1_316, %c192_317], %340 {strides = array<i32>} : memref<2x1152xf32, #tpu.memory_space<vmem>>, vector<1x32xf32>,
    %c51 = arith.constant 51 : index
    %c0_318 = arith.constant 0 : index
    %342 = vector.load %arg17[%c51, %c0_318] : memref<88x32xf32, #tpu.memory_space<vmem>>, vector<1x32xf32>
    %c1_319 = arith.constant 1 : index
    %c224_320 = arith.constant 224 : index
    %343 = vector.load %arg19[%c1_319, %c224_320] : memref<2x1152xf32, #tpu.memory_space<vmem>>, vector<1x32xf32>
    tpu.vector_store %arg19[%c1_319, %c224_320], %342 {strides = array<i32>} : memref<2x1152xf32, #tpu.memory_space<vmem>>, vector<1x32xf32>,
    %c52 = arith.constant 52 : index
    %c0_321 = arith.constant 0 : index
    %344 = vector.load %arg17[%c52, %c0_321] : memref<88x32xf32, #tpu.memory_space<vmem>>, vector<1x32xf32>
    %c1_322 = arith.constant 1 : index
    %c256_323 = arith.constant 256 : index
    %345 = vector.load %arg19[%c1_322, %c256_323] : memref<2x1152xf32, #tpu.memory_space<vmem>>, vector<1x32xf32>
    tpu.vector_store %arg19[%c1_322, %c256_323], %344 {strides = array<i32>} : memref<2x1152xf32, #tpu.memory_space<vmem>>, vector<1x32xf32>,
    %c53 = arith.constant 53 : index
    %c0_324 = arith.constant 0 : index
    %346 = vector.load %arg17[%c53, %c0_324] : memref<88x32xf32, #tpu.memory_space<vmem>>, vector<1x32xf32>
    %c1_325 = arith.constant 1 : index
    %c288_326 = arith.constant 288 : index
    %347 = vector.load %arg19[%c1_325, %c288_326] : memref<2x1152xf32, #tpu.memory_space<vmem>>, vector<1x32xf32>
    tpu.vector_store %arg19[%c1_325, %c288_326], %346 {strides = array<i32>} : memref<2x1152xf32, #tpu.memory_space<vmem>>, vector<1x32xf32>,
    %c54 = arith.constant 54 : index
    %c0_327 = arith.constant 0 : index
    %348 = vector.load %arg17[%c54, %c0_327] : memref<88x32xf32, #tpu.memory_space<vmem>>, vector<1x32xf32>
    %c1_328 = arith.constant 1 : index
    %c320_329 = arith.constant 320 : index
    %349 = vector.load %arg19[%c1_328, %c320_329] : memref<2x1152xf32, #tpu.memory_space<vmem>>, vector<1x32xf32>
    tpu.vector_store %arg19[%c1_328, %c320_329], %348 {strides = array<i32>} : memref<2x1152xf32, #tpu.memory_space<vmem>>, vector<1x32xf32>,
    %c55 = arith.constant 55 : index
    %c0_330 = arith.constant 0 : index
    %350 = vector.load %arg17[%c55, %c0_330] : memref<88x32xf32, #tpu.memory_space<vmem>>, vector<1x32xf32>
    %c1_331 = arith.constant 1 : index
    %c352_332 = arith.constant 352 : index
    %351 = vector.load %arg19[%c1_331, %c352_332] : memref<2x1152xf32, #tpu.memory_space<vmem>>, vector<1x32xf32>
    tpu.vector_store %arg19[%c1_331, %c352_332], %350 {strides = array<i32>} : memref<2x1152xf32, #tpu.memory_space<vmem>>, vector<1x32xf32>,
    %c56 = arith.constant 56 : index
    %c0_333 = arith.constant 0 : index
    %352 = vector.load %arg17[%c56, %c0_333] : memref<88x32xf32, #tpu.memory_space<vmem>>, vector<1x32xf32>
    %c1_334 = arith.constant 1 : index
    %c384_335 = arith.constant 384 : index
    %353 = vector.load %arg19[%c1_334, %c384_335] : memref<2x1152xf32, #tpu.memory_space<vmem>>, vector<1x32xf32>
    tpu.vector_store %arg19[%c1_334, %c384_335], %352 {strides = array<i32>} : memref<2x1152xf32, #tpu.memory_space<vmem>>, vector<1x32xf32>,
    %c57 = arith.constant 57 : index
    %c0_336 = arith.constant 0 : index
    %354 = vector.load %arg17[%c57, %c0_336] : memref<88x32xf32, #tpu.memory_space<vmem>>, vector<1x32xf32>
    %c1_337 = arith.constant 1 : index
    %c416_338 = arith.constant 416 : index
    %355 = vector.load %arg19[%c1_337, %c416_338] : memref<2x1152xf32, #tpu.memory_space<vmem>>, vector<1x32xf32>
    tpu.vector_store %arg19[%c1_337, %c416_338], %354 {strides = array<i32>} : memref<2x1152xf32, #tpu.memory_space<vmem>>, vector<1x32xf32>,
    %c58 = arith.constant 58 : index
    %c0_339 = arith.constant 0 : index
    %356 = vector.load %arg17[%c58, %c0_339] : memref<88x32xf32, #tpu.memory_space<vmem>>, vector<1x32xf32>
    %c1_340 = arith.constant 1 : index
    %c448_341 = arith.constant 448 : index
    %357 = vector.load %arg19[%c1_340, %c448_341] : memref<2x1152xf32, #tpu.memory_space<vmem>>, vector<1x32xf32>
    tpu.vector_store %arg19[%c1_340, %c448_341], %356 {strides = array<i32>} : memref<2x1152xf32, #tpu.memory_space<vmem>>, vector<1x32xf32>,
    %c59 = arith.constant 59 : index
    %c0_342 = arith.constant 0 : index
    %358 = vector.load %arg17[%c59, %c0_342] : memref<88x32xf32, #tpu.memory_space<vmem>>, vector<1x32xf32>
    %c1_343 = arith.constant 1 : index
    %c480_344 = arith.constant 480 : index
    %359 = vector.load %arg19[%c1_343, %c480_344] : memref<2x1152xf32, #tpu.memory_space<vmem>>, vector<1x32xf32>
    tpu.vector_store %arg19[%c1_343, %c480_344], %358 {strides = array<i32>} : memref<2x1152xf32, #tpu.memory_space<vmem>>, vector<1x32xf32>,
    %c60 = arith.constant 60 : index
    %c0_345 = arith.constant 0 : index
    %360 = vector.load %arg17[%c60, %c0_345] : memref<88x32xf32, #tpu.memory_space<vmem>>, vector<1x32xf32>
    %c1_346 = arith.constant 1 : index
    %c512_347 = arith.constant 512 : index
    %361 = vector.load %arg19[%c1_346, %c512_347] : memref<2x1152xf32, #tpu.memory_space<vmem>>, vector<1x32xf32>
    tpu.vector_store %arg19[%c1_346, %c512_347], %360 {strides = array<i32>} : memref<2x1152xf32, #tpu.memory_space<vmem>>, vector<1x32xf32>,
    %c61 = arith.constant 61 : index
    %c0_348 = arith.constant 0 : index
    %362 = vector.load %arg17[%c61, %c0_348] : memref<88x32xf32, #tpu.memory_space<vmem>>, vector<1x32xf32>
    %c1_349 = arith.constant 1 : index
    %c544_350 = arith.constant 544 : index
    %363 = vector.load %arg19[%c1_349, %c544_350] : memref<2x1152xf32, #tpu.memory_space<vmem>>, vector<1x32xf32>
    tpu.vector_store %arg19[%c1_349, %c544_350], %362 {strides = array<i32>} : memref<2x1152xf32, #tpu.memory_space<vmem>>, vector<1x32xf32>,
    %c62 = arith.constant 62 : index
    %c0_351 = arith.constant 0 : index
    %364 = vector.load %arg17[%c62, %c0_351] : memref<88x32xf32, #tpu.memory_space<vmem>>, vector<1x32xf32>
    %c1_352 = arith.constant 1 : index
    %c576_353 = arith.constant 576 : index
    %365 = vector.load %arg19[%c1_352, %c576_353] : memref<2x1152xf32, #tpu.memory_space<vmem>>, vector<1x32xf32>
    tpu.vector_store %arg19[%c1_352, %c576_353], %364 {strides = array<i32>} : memref<2x1152xf32, #tpu.memory_space<vmem>>, vector<1x32xf32>,
    %c63 = arith.constant 63 : index
    %c0_354 = arith.constant 0 : index
    %366 = vector.load %arg17[%c63, %c0_354] : memref<88x32xf32, #tpu.memory_space<vmem>>, vector<1x32xf32>
    %c1_355 = arith.constant 1 : index
    %c608_356 = arith.constant 608 : index
    %367 = vector.load %arg19[%c1_355, %c608_356] : memref<2x1152xf32, #tpu.memory_space<vmem>>, vector<1x32xf32>
    tpu.vector_store %arg19[%c1_355, %c608_356], %366 {strides = array<i32>} : memref<2x1152xf32, #tpu.memory_space<vmem>>, vector<1x32xf32>,
    %c64_357 = arith.constant 64 : index
    %c0_358 = arith.constant 0 : index
    %368 = vector.load %arg17[%c64_357, %c0_358] : memref<88x32xf32, #tpu.memory_space<vmem>>, vector<1x32xf32>
    %c1_359 = arith.constant 1 : index
    %c640_360 = arith.constant 640 : index
    %369 = vector.load %arg19[%c1_359, %c640_360] : memref<2x1152xf32, #tpu.memory_space<vmem>>, vector<1x32xf32>
    tpu.vector_store %arg19[%c1_359, %c640_360], %368 {strides = array<i32>} : memref<2x1152xf32, #tpu.memory_space<vmem>>, vector<1x32xf32>,
    %c65 = arith.constant 65 : index
    %c0_361 = arith.constant 0 : index
    %370 = vector.load %arg17[%c65, %c0_361] : memref<88x32xf32, #tpu.memory_space<vmem>>, vector<1x32xf32>
    %c1_362 = arith.constant 1 : index
    %c672_363 = arith.constant 672 : index
    %371 = vector.load %arg19[%c1_362, %c672_363] : memref<2x1152xf32, #tpu.memory_space<vmem>>, vector<1x32xf32>
    tpu.vector_store %arg19[%c1_362, %c672_363], %370 {strides = array<i32>} : memref<2x1152xf32, #tpu.memory_space<vmem>>, vector<1x32xf32>,
    %c66 = arith.constant 66 : index
    %c0_364 = arith.constant 0 : index
    %372 = vector.load %arg17[%c66, %c0_364] : memref<88x32xf32, #tpu.memory_space<vmem>>, vector<1x32xf32>
    %c1_365 = arith.constant 1 : index
    %c704_366 = arith.constant 704 : index
    %373 = vector.load %arg19[%c1_365, %c704_366] : memref<2x1152xf32, #tpu.memory_space<vmem>>, vector<1x32xf32>
    tpu.vector_store %arg19[%c1_365, %c704_366], %372 {strides = array<i32>} : memref<2x1152xf32, #tpu.memory_space<vmem>>, vector<1x32xf32>,
    %c67 = arith.constant 67 : index
    %c0_367 = arith.constant 0 : index
    %374 = vector.load %arg17[%c67, %c0_367] : memref<88x32xf32, #tpu.memory_space<vmem>>, vector<1x32xf32>
    %c1_368 = arith.constant 1 : index
    %c736_369 = arith.constant 736 : index
    %375 = vector.load %arg19[%c1_368, %c736_369] : memref<2x1152xf32, #tpu.memory_space<vmem>>, vector<1x32xf32>
    tpu.vector_store %arg19[%c1_368, %c736_369], %374 {strides = array<i32>} : memref<2x1152xf32, #tpu.memory_space<vmem>>, vector<1x32xf32>,
    %c68 = arith.constant 68 : index
    %c0_370 = arith.constant 0 : index
    %376 = vector.load %arg17[%c68, %c0_370] : memref<88x32xf32, #tpu.memory_space<vmem>>, vector<1x32xf32>
    %c1_371 = arith.constant 1 : index
    %c768_372 = arith.constant 768 : index
    %377 = vector.load %arg19[%c1_371, %c768_372] : memref<2x1152xf32, #tpu.memory_space<vmem>>, vector<1x32xf32>
    tpu.vector_store %arg19[%c1_371, %c768_372], %376 {strides = array<i32>} : memref<2x1152xf32, #tpu.memory_space<vmem>>, vector<1x32xf32>,
    %c69 = arith.constant 69 : index
    %c0_373 = arith.constant 0 : index
    %378 = vector.load %arg17[%c69, %c0_373] : memref<88x32xf32, #tpu.memory_space<vmem>>, vector<1x32xf32>
    %c1_374 = arith.constant 1 : index
    %c800_375 = arith.constant 800 : index
    %379 = vector.load %arg19[%c1_374, %c800_375] : memref<2x1152xf32, #tpu.memory_space<vmem>>, vector<1x32xf32>
    tpu.vector_store %arg19[%c1_374, %c800_375], %378 {strides = array<i32>} : memref<2x1152xf32, #tpu.memory_space<vmem>>, vector<1x32xf32>,
    %c70 = arith.constant 70 : index
    %c0_376 = arith.constant 0 : index
    %380 = vector.load %arg17[%c70, %c0_376] : memref<88x32xf32, #tpu.memory_space<vmem>>, vector<1x32xf32>
    %c1_377 = arith.constant 1 : index
    %c832_378 = arith.constant 832 : index
    %381 = vector.load %arg19[%c1_377, %c832_378] : memref<2x1152xf32, #tpu.memory_space<vmem>>, vector<1x32xf32>
    tpu.vector_store %arg19[%c1_377, %c832_378], %380 {strides = array<i32>} : memref<2x1152xf32, #tpu.memory_space<vmem>>, vector<1x32xf32>,
    %c71 = arith.constant 71 : index
    %c0_379 = arith.constant 0 : index
    %382 = vector.load %arg17[%c71, %c0_379] : memref<88x32xf32, #tpu.memory_space<vmem>>, vector<1x32xf32>
    %c1_380 = arith.constant 1 : index
    %c864_381 = arith.constant 864 : index
    %383 = vector.load %arg19[%c1_380, %c864_381] : memref<2x1152xf32, #tpu.memory_space<vmem>>, vector<1x32xf32>
    tpu.vector_store %arg19[%c1_380, %c864_381], %382 {strides = array<i32>} : memref<2x1152xf32, #tpu.memory_space<vmem>>, vector<1x32xf32>,
    %c72 = arith.constant 72 : index
    %c0_382 = arith.constant 0 : index
    %384 = vector.load %arg17[%c72, %c0_382] : memref<88x32xf32, #tpu.memory_space<vmem>>, vector<1x32xf32>
    %c1_383 = arith.constant 1 : index
    %c896_384 = arith.constant 896 : index
    %385 = vector.load %arg19[%c1_383, %c896_384] : memref<2x1152xf32, #tpu.memory_space<vmem>>, vector<1x32xf32>
    tpu.vector_store %arg19[%c1_383, %c896_384], %384 {strides = array<i32>} : memref<2x1152xf32, #tpu.memory_space<vmem>>, vector<1x32xf32>,
    %c73 = arith.constant 73 : index
    %c0_385 = arith.constant 0 : index
    %386 = vector.load %arg17[%c73, %c0_385] : memref<88x32xf32, #tpu.memory_space<vmem>>, vector<1x32xf32>
    %c1_386 = arith.constant 1 : index
    %c928_387 = arith.constant 928 : index
    %387 = vector.load %arg19[%c1_386, %c928_387] : memref<2x1152xf32, #tpu.memory_space<vmem>>, vector<1x32xf32>
    tpu.vector_store %arg19[%c1_386, %c928_387], %386 {strides = array<i32>} : memref<2x1152xf32, #tpu.memory_space<vmem>>, vector<1x32xf32>,
    %c74 = arith.constant 74 : index
    %c0_388 = arith.constant 0 : index
    %388 = vector.load %arg17[%c74, %c0_388] : memref<88x32xf32, #tpu.memory_space<vmem>>, vector<1x32xf32>
    %c1_389 = arith.constant 1 : index
    %c960_390 = arith.constant 960 : index
    %389 = vector.load %arg19[%c1_389, %c960_390] : memref<2x1152xf32, #tpu.memory_space<vmem>>, vector<1x32xf32>
    tpu.vector_store %arg19[%c1_389, %c960_390], %388 {strides = array<i32>} : memref<2x1152xf32, #tpu.memory_space<vmem>>, vector<1x32xf32>,
    %c75 = arith.constant 75 : index
    %c0_391 = arith.constant 0 : index
    %390 = vector.load %arg17[%c75, %c0_391] : memref<88x32xf32, #tpu.memory_space<vmem>>, vector<1x32xf32>
    %c1_392 = arith.constant 1 : index
    %c992_393 = arith.constant 992 : index
    %391 = vector.load %arg19[%c1_392, %c992_393] : memref<2x1152xf32, #tpu.memory_space<vmem>>, vector<1x32xf32>
    tpu.vector_store %arg19[%c1_392, %c992_393], %390 {strides = array<i32>} : memref<2x1152xf32, #tpu.memory_space<vmem>>, vector<1x32xf32>,
    %c76 = arith.constant 76 : index
    %c0_394 = arith.constant 0 : index
    %392 = vector.load %arg17[%c76, %c0_394] : memref<88x32xf32, #tpu.memory_space<vmem>>, vector<1x32xf32>
    %c1_395 = arith.constant 1 : index
    %c1024_396 = arith.constant 1024 : index
    %393 = vector.load %arg19[%c1_395, %c1024_396] : memref<2x1152xf32, #tpu.memory_space<vmem>>, vector<1x32xf32>
    tpu.vector_store %arg19[%c1_395, %c1024_396], %392 {strides = array<i32>} : memref<2x1152xf32, #tpu.memory_space<vmem>>, vector<1x32xf32>,
    %c77 = arith.constant 77 : index
    %c0_397 = arith.constant 0 : index
    %394 = vector.load %arg17[%c77, %c0_397] : memref<88x32xf32, #tpu.memory_space<vmem>>, vector<1x32xf32>
    %c1_398 = arith.constant 1 : index
    %c1056_399 = arith.constant 1056 : index
    %395 = vector.load %arg19[%c1_398, %c1056_399] : memref<2x1152xf32, #tpu.memory_space<vmem>>, vector<1x32xf32>
    tpu.vector_store %arg19[%c1_398, %c1056_399], %394 {strides = array<i32>} : memref<2x1152xf32, #tpu.memory_space<vmem>>, vector<1x32xf32>,
    %c78 = arith.constant 78 : index
    %c0_400 = arith.constant 0 : index
    %396 = vector.load %arg17[%c78, %c0_400] : memref<88x32xf32, #tpu.memory_space<vmem>>, vector<1x32xf32>
    %c1_401 = arith.constant 1 : index
    %c1088_402 = arith.constant 1088 : index
    %397 = vector.load %arg19[%c1_401, %c1088_402] : memref<2x1152xf32, #tpu.memory_space<vmem>>, vector<1x32xf32>
    tpu.vector_store %arg19[%c1_401, %c1088_402], %396 {strides = array<i32>} : memref<2x1152xf32, #tpu.memory_space<vmem>>, vector<1x32xf32>,
    %c79 = arith.constant 79 : index
    %c0_403 = arith.constant 0 : index
    %398 = vector.load %arg17[%c79, %c0_403] : memref<88x32xf32, #tpu.memory_space<vmem>>, vector<1x32xf32>
    %c1_404 = arith.constant 1 : index
    %c1120_405 = arith.constant 1120 : index
    %399 = vector.load %arg19[%c1_404, %c1120_405] : memref<2x1152xf32, #tpu.memory_space<vmem>>, vector<1x32xf32>
    tpu.vector_store %arg19[%c1_404, %c1120_405], %398 {strides = array<i32>} : memref<2x1152xf32, #tpu.memory_space<vmem>>, vector<1x32xf32>,
    %c0_406 = arith.constant 0 : index
    %c0_407 = arith.constant 0 : index
    %400 = vector.load %arg19[%c0_406, %c0_407] : memref<2x1152xf32, #tpu.memory_space<vmem>>, vector<2x1152xf32>
    %401 = arith.truncf %400 : vector<2x1152xf32> to vector<2x1152xbf16>
    %c0_408 = arith.constant 0 : index
    %c0_409 = arith.constant 0 : index
    %402 = vector.load %arg14[%c0_408, %c0_409] : memref<1152x288xbf16, #tpu.memory_space<vmem>>, vector<1152x288xbf16>
    %cst_410 = arith.constant dense<0.000000e+00> : vector<2x288xf32>
    %403 = tpu.matmul %401, %402, %cst_410 {dimension_numbers = #tpu.dot_dimension_numbers<[1], [0], [0], [1], [0, 0, 1, 1], [], []>} : vector<2x1152xbf16>, vector<1152x288xbf16>, vector<2x288xf32> -> vector<2x288xf32>
    %c0_411 = arith.constant 0 : index
    %c0_412 = arith.constant 0 : index
    %404 = vector.load %arg15[%c0_411, %c0_412] : memref<1x288xf32, #tpu.memory_space<vmem>>, vector<1x288xf32>
    %405 = vector.broadcast %404 : vector<1x288xf32> to vector<2x288xf32>
    %406 = arith.addf %403, %405 : vector<2x288xf32>
    %407 = tpu.iota {dimensions = array<i32: 1>} : vector<2x288xi32>
    %cst_413 = arith.constant 0.000000e+00 : f32
    %408 = vector.broadcast %cst_413 : f32 to vector<2x288xf32>
    %409 = arith.subf %408, %406 : vector<2x288xf32>
    %410 = math.exp %409 : vector<2x288xf32>
    %cst_414 = arith.constant 1.000000e+00 : f32
    %411 = vector.broadcast %cst_414 : f32 to vector<2x288xf32>
    %412 = arith.addf %411, %410 : vector<2x288xf32>
    %413 = tpu.reciprocal %412 {approx = true} : vector<2x288xf32> -> vector<2x288xf32>
    %cst_415 = arith.constant 0.899999976 : f32
    %414 = vector.broadcast %cst_415 : f32 to vector<2x288xf32>
    %415 = arith.mulf %414, %413 : vector<2x288xf32>
    %cst_416 = arith.constant 1.000000e-01 : f32
    %416 = vector.broadcast %cst_416 : f32 to vector<2x288xf32>
    %417 = arith.addf %416, %415 : vector<2x288xf32>
    %c144_i32 = arith.constant 144 : i32
    %418 = vector.broadcast %c144_i32 : i32 to vector<2x288xi32>
    %419 = arith.cmpi slt, %407, %418 : vector<2x288xi32>
    %420 = arith.select %419, %406, %417 : vector<2x288xi1>, vector<2x288xf32>
    %c0_417 = arith.constant 0 : index
    %c0_418 = arith.constant 0 : index
    %421 = vector.load %arg16[%c0_417, %c0_418] : memref<2x288xf32, #tpu.memory_space<vmem>>, vector<2x288xf32>
    tpu.vector_store %arg16[%c0_417, %c0_418], %420 {strides = array<i32>} : memref<2x288xf32, #tpu.memory_space<vmem>>, vector<2x288xf32>,
    return
  }
}

</mosaic_0001>

<bundles_post_ra>
// kernel: l2_mlp_encoder_forward.1
= control target key start
LH: loop header
LB: loop body
LE: loop exit
PB: predicated region body
PF: predicated region fallthrough
CT: control target
= control target key end

     0   :  { %v11819_v0 = vmov 5   ;;  %v11821_v1 = vmov 1   ;;  %vm54_vm0 = vcmask 261120   ;;  %vm75_vm1 = vcmask 31744   ;;  %s8483_s29 = smov 32   ;;  %s8484_s30 = smov 64   ;;  %s11791_s1 = inlined_call_operand.vmem [shape: f32[72,9], index: 1, kind: input, shape index: {}]   ;;  %s11792_s0 = inlined_call_operand.vmem [shape: f32[72,4], index: 0, kind: input, shape index: {}]   ;;  %s11793_s2 = inlined_call_operand.vmem [shape: bf16[288,32], index: 2, kind: input, shape index: {}]   ;;  %s11794_s3 = inlined_call_operand.vmem [shape: f32[1,32], index: 3, kind: input, shape index: {}]   ;;  %s11795_s4 = inlined_call_operand.vmem [shape: f32[1,32], index: 4, kind: input, shape index: {}]   ;;  %s11796_s5 = inlined_call_operand.vmem [shape: f32[1,32], index: 5, kind: input, shape index: {}]   ;;  %s11797_s6 = inlined_call_operand.vmem [shape: bf16[288,32], index: 6, kind: input, shape index: {}]   ;;  %s11798_s7 = inlined_call_operand.vmem [shape: f32[1,32], index: 7, kind: input, shape index: {}]   ;;  %s11799_s10 = inlined_call_operand.vmem [shape: bf16[288,32], index: 10, kind: input, shape index: {}]   ;;  %s11800_s8 = inlined_call_operand.vmem [shape: f32[1,32], index: 8, kind: input, shape index: {}]   ;;  %s11801_s9 = inlined_call_operand.vmem [shape: f32[1,32], index: 9, kind: input, shape index: {}]   ;;  %s11802_s11 = inlined_call_operand.vmem [shape: f32[1,32], index: 11, kind: input, shape index: {}]   ;;  %s11803_s12 = inlined_call_operand.vmem [shape: f32[1,32], index: 12, kind: input, shape index: {}]   ;;  %s11804_s14 = inlined_call_operand.vmem [shape: bf16[1152,288], index: 14, kind: input, shape index: {}]   ;;  %s11805_s13 = inlined_call_operand.vmem [shape: f32[1,32], index: 13, kind: input, shape index: {}]   ;;  %s11806_s15 = inlined_call_operand.vmem [shape: f32[1,288], index: 15, kind: input, shape index: {}]   ;;  %s11807_s16 = inlined_call_operand.vmem [shape: f32[2,288], index: 16, kind: output, shape index: {}]  }
   0x1   :  { %11833 = sst [smem:[#allocation45_spill]] %s11791_s1  ;;  %7919 = vset.pattern.permute.xlu0 %v11819_v0  ;;  %7920 = vset.pattern.permute.xlu1 %v11821_v1  ;;  %v11825_v4 = vmov 0.0   ;;  %v66_v5 = vld [vmem:[%s11792_s0] sm:$0xff]  ;;  %v67_v6 = vld [vmem:[%s11792_s0 + $0x8] sm:$0xff]  ;;  %v68_v7 = vld [vmem:[%s11792_s0 + $0x10] sm:$0xff]  ;;  %v11815_v13 = vmov 6  }
   0x2   :  { %s11834_s23 = sld [smem:[#allocation45_spill]]  ;;  %56 = vst.msk [vmem:[#allocation2 + $0x8] sm:$0xff] %vm54_vm0, %v11825_v4  ;;  %57 = vst.msk [vmem:[#allocation2 + $0x10] sm:$0xff] %vm54_vm0, %v11825_v4  ;;  %7812 = vmatprep.subr.bf16.mxu1 %v11825_v4  ;;  %v69_v9 = vld [vmem:[%s11792_s0 + $0x18] sm:$0xff]  ;;  %v70_v10 = vld [vmem:[%s11792_s0 + $0x20] sm:$0xff]  ;;  %v11813_v17 = vmov 2  }
   0x3   :  { %55 = vst.msk [vmem:[#allocation2] sm:$0xff] %vm54_vm0, %v11825_v4  ;;  %58 = vst.msk [vmem:[#allocation2 + $0x18] sm:$0xff] %vm54_vm0, %v11825_v4  ;;  %v71_v11 = vld [vmem:[%s11792_s0 + $0x28] sm:$0xff]  ;;  %v72_v12 = vld [vmem:[%s11792_s0 + $0x30] sm:$0xff]  ;;  %v11817_v19 = vmov 7   ;;  %v11811_v22 = vmov 3  }
   0x4   :  { %59 = vst.msk [vmem:[#allocation2 + $0x20] sm:$0xff] %vm54_vm0, %v11825_v4  ;;  %60 = vst.msk [vmem:[#allocation2 + $0x28] sm:$0xff] %vm54_vm0, %v11825_v4  ;;  %v73_v15 = vld [vmem:[%s11792_s0 + $0x38] sm:$0xff]  ;;  %v74_v16 = vld [vmem:[%s11792_s0 + $0x40] sm:$0xff]  ;;  %v11823_v25 = vmov 4   ;;  %s8485_s1 = smov 96  }
   0x5   :  { %61 = vst.msk [vmem:[#allocation2 + $0x30] sm:$0xff] %vm54_vm0, %v11825_v4  ;;  %62 = vst.msk [vmem:[#allocation2 + $0x38] sm:$0xff] %vm54_vm0, %v11825_v4  ;;  %v11809_v60 = vmov 0   ;;  %vm8488_vm2 = vmmov 0   ;;  %vm274_vm3 = vcmask 523520   ;;  %vm392_vm4 = vcmask 785920  }
   0x6   :  { %63 = vst.msk [vmem:[#allocation2 + $0x40] sm:$0xff] %vm54_vm0, %v11825_v4  ;;  %64 = vst.msk [vmem:[#allocation2 + $0x48] sm:$0xff] %vm54_vm0, %v11825_v4  ;;  %7816 = vmatprep.mubr.msk.bf16.mxu1 %vm8488_vm2, %v11825_v4  ;;  %vm510_vm5 = vcmask 1048320  }
   0x7   :  { %65 = vst.msk [vmem:[#allocation2 + $0x50] sm:$0xff] %vm54_vm0, %v11825_v4 }
   0x8   :  { %v8580_v2 = vld [vmem:[%s11834_s23] sm:$0xff]  ;;  %v8587_v3 = vld [vmem:[%s11834_s23 + $0x8] sm:$0xff]  ;;  %76 = vst.msk [vmem:[#allocation2 + $0x8] sm:$0xff] %vm75_vm1, %v66_v5  ;;  %77 = vst.msk [vmem:[#allocation2 + $0x10] sm:$0xff] %vm75_vm1, %v67_v6 }
   0x9   :  { %621 = vperm.xlu0 %7919, %v8580_v2   ;;  %186 = vperm.xlu1 %7920, %v8580_v2   ;;  %78 = vst.msk [vmem:[#allocation2 + $0x18] sm:$0xff] %vm75_vm1, %v68_v7  ;;  %v8629_v8 = vld [vmem:[%s11834_s23 + $0x18] sm:$0xff]  ;;  %79 = vst.msk [vmem:[#allocation2 + $0x20] sm:$0xff] %vm75_vm1, %v69_v9  ;;  %v8653_v14 = vld [vmem:[%s11834_s23 + $0x28] sm:$0xff] }
   0xa   :  { %80 = vst.msk [vmem:[#allocation2 + $0x28] sm:$0xff] %vm75_vm1, %v70_v10  ;;  %81 = vst.msk [vmem:[#allocation2 + $0x30] sm:$0xff] %vm75_vm1, %v71_v11  ;;  %v8666_v18 = vld [vmem:[%s11834_s23 + $0x38] sm:$0xff]  ;;  %v8679_v20 = vld [vmem:[%s11834_s23 + $0x10] sm:$0xff] }
   0xb   :  { %82 = vst.msk [vmem:[#allocation2 + $0x38] sm:$0xff] %vm75_vm1, %v72_v12  ;;  %83 = vst.msk [vmem:[#allocation2 + $0x40] sm:$0xff] %vm75_vm1, %v73_v15  ;;  %v8686_v21 = vld [vmem:[%s11834_s23 + $0x20] sm:$0xff]  ;;  %v8694_v23 = vld [vmem:[%s11834_s23 + $0x30] sm:$0xff] }
   0xc   :  { %84 = vst.msk [vmem:[#allocation2 + $0x48] sm:$0xff] %vm75_vm1, %v74_v16  ;;  %v8724_v24 = vld [vmem:[%s11834_s23 + $0x40] sm:$0xff] }
   0xd   :  { %626 = vperm.xlu0 %7919, %v8587_v3   ;;  %191 = vperm.xlu1 %7920, %v8587_v3  }
   0xf   :  { %v8752_v26 = vld [vmem:[#allocation2 + $0x9] sm:$0xff] }
  0x10   :  { %v167_v30 = vld [vmem:[#allocation2 + $0xa] sm:$0xff]  ;;  %v719_v34 = vld [vmem:[#allocation2 + $0x15] sm:$0xff]  ;;  %v720_v61 = vld [vmem:[#allocation2 + $0x1d] sm:$0xff] }
  0x11   :  { %636 = vperm.xlu0 %7919, %v8629_v8   ;;  %7921 = vset.pattern.permute.xlu1 %v11815_v13  ;;  %v285_v49 = vld [vmem:[#allocation2 + $0xb] sm:$0xff]  ;;  %v836_v53 = vld [vmem:[#allocation2 + $0x16] sm:$0xff]  ;;  %v8811_v59 = vld [vmem:[#allocation2 + $0x21] sm:$0xff] }
  0x12   :  { %743 = vperm.xlu1 %7921, %v8587_v3   ;;  %v286_v9 = vld [vmem:[#allocation2 + $0x13] sm:$0xff] }
  0x13   :  { %v8823_v10 = vld [vmem:[#allocation2 + $0x11] sm:$0xff] }
  0x15   :  { %646 = vperm.xlu0 %7919, %v8653_v14  }
  0x16   :  { %7922 = vset.pattern.permute.xlu1 %v11813_v17 }
  0x17   :  { %304 = vperm.xlu1 %7922, %v8580_v2  }
  0x19   :  { %656 = vperm.xlu0 %7919, %v8666_v18  }
  0x1b   :  { %7923 = vset.pattern.permute.xlu1 %v11817_v19 }
  0x1c   :  { %855 = vperm.xlu1 %7923, %v8580_v2  }
  0x1d   :  { %7938 = vset.pattern.permute.xlu0 %v11815_v13 }
  0x1e   :  { %738 = vperm.xlu0 %7938, %v8580_v2  }
  0x20   :  { %860 = vperm.xlu1 %7923, %v8587_v3  }
  0x22   :  { %748 = vperm.xlu0 %7938, %v8679_v20  }
  0x24   :  { %7924 = vset.pattern.permute.xlu1 %v11811_v22 }
  0x25   :  { %427 = vperm.xlu1 %7924, %v8587_v3  }
  0x26   :  { %758 = vperm.xlu0 %7938, %v8686_v21  }
  0x29   :  { %7925 = vset.pattern.permute.xlu1 %v11819_v0 }
  0x2a   :  { %768 = vperm.xlu0 %7938, %v8694_v23   ;;  %631 = vperm.xlu1 %7925, %v8679_v20  }
  0x2e   :  { %7940 = vset.pattern.permute.xlu0 %v11813_v17  ;;  %7926 = vset.pattern.permute.xlu1 %v11821_v1 }
  0x2f   :  { %309 = vperm.xlu0 %7940, %v8587_v3   ;;  %196 = vperm.xlu1 %7926, %v8679_v20  }
  0x33   :  { %201 = vperm.xlu1 %7926, %v8629_v8   ;;  %319 = vperm.xlu0 %7940, %v8629_v8  }
  0x37   :  { %7927 = vset.pattern.permute.xlu1 %v11815_v13  ;;  %329 = vperm.xlu0 %7940, %v8653_v14  }
  0x38   :  { %753 = vperm.xlu1 %7927, %v8629_v8  }
  0x3b   :  { %339 = vperm.xlu0 %7940, %v8666_v18  }
  0x3c   :  { %7928 = vset.pattern.permute.xlu1 %v11813_v17 }
  0x3d   :  { %314 = vperm.xlu1 %7928, %v8679_v20  }
  0x3f   :  { %7943 = vset.pattern.permute.xlu0 %v11811_v22 }
  0x40   :  { %422 = vperm.xlu0 %7943, %v8580_v2  }
  0x41   :  { %7929 = vset.pattern.permute.xlu1 %v11817_v19 }
  0x42   :  { %865 = vperm.xlu1 %7929, %v8679_v20  }
  0x44   :  { %432 = vperm.xlu0 %7943, %v8679_v20  }
  0x46   :  { %870 = vperm.xlu1 %7929, %v8629_v8  }
  0x48   :  { %442 = vperm.xlu0 %7943, %v8686_v21  }
  0x4a   :  { %7930 = vset.pattern.permute.xlu1 %v11811_v22 }
  0x4b   :  { %437 = vperm.xlu1 %7930, %v8629_v8  }
  0x4c   :  { %452 = vperm.xlu0 %7943, %v8694_v23  }
  0x4f   :  { %7931 = vset.pattern.permute.xlu1 %v11819_v0 }
  0x50   :  { %641 = vperm.xlu1 %7931, %v8686_v21   ;;  %7947 = vset.pattern.permute.xlu0 %v11821_v1 }
  0x51   :  { %226 = vperm.xlu0 %7947, %v8724_v24  }
  0x54   :  { %7932 = vset.pattern.permute.xlu1 %v11821_v1 }
  0x55   :  { %206 = vperm.xlu1 %7932, %v8686_v21   ;;  %7950 = vset.pattern.permute.xlu0 %v11817_v19 }
  0x56   :  { %895 = vperm.xlu0 %7950, %v8724_v24  }
  0x59   :  { %211 = vperm.xlu1 %7932, %v8653_v14  }
  0x5a   :  { %7953 = vset.pattern.permute.xlu0 %v11823_v25 }
  0x5b   :  { %545 = vperm.xlu0 %7953, %v8587_v3  }
  0x5d   :  { %7933 = vset.pattern.permute.xlu1 %v11815_v13 }
  0x5e   :  { %763 = vperm.xlu1 %7933, %v8653_v14  }
  0x5f   :  { %550 = vperm.xlu0 %7953, %v8679_v20  }
  0x62   :  { %7934 = vset.pattern.permute.xlu1 %v11813_v17 }
  0x63   :  { %324 = vperm.xlu1 %7934, %v8686_v21  }
  0x67   :  { %7935 = vset.pattern.permute.xlu1 %v11817_v19 }
  0x68   :  { %875 = vperm.xlu1 %7935, %v8686_v21  }
  0x6c   :  { %880 = vperm.xlu1 %7935, %v8653_v14  }
  0x70   :  { %7936 = vset.pattern.permute.xlu1 %v11811_v22 }
  0x71   :  { %447 = vperm.xlu1 %7936, %v8653_v14  }
  0x75   :  { %7937 = vset.pattern.permute.xlu1 %v11819_v0 }
  0x76   :  { %651 = vperm.xlu1 %7937, %v8694_v23  }
  0x7a   :  { %7939 = vset.pattern.permute.xlu1 %v11821_v1 }
  0x7b   :  { %216 = vperm.xlu1 %7939, %v8694_v23  }
  0x7f   :  { %221 = vperm.xlu1 %7939, %v8666_v18  }
  0x83   :  { %7941 = vset.pattern.permute.xlu1 %v11815_v13 }
  0x84   :  { %v622_v27 = vpop.permute.xlu0 %621  ;;  %773 = vperm.xlu1 %7941, %v8666_v18   ;;  %v8756_v28 = vpop.permute.xlu1 %186 }
  0x85   :  { %v664_v29 = vmul.f32 %v622_v27, %v8752_v26  ;;  %v837_v27 = vld [vmem:[#allocation2 + $0x1e] sm:$0xff] }
  0x87   :  { %682 = vrot.lane.b32.xlu0 %v664_v29, %s8483_s29 }
  0x88   :  { %7942 = vset.pattern.permute.xlu1 %v11813_v17  ;;  %v192_v31 = vpop.permute.xlu1 %191  ;;  %v8761_v32 = vpop.permute.xlu0 %626 }
  0x89   :  { %v230_v33 = vmul.f32 %v192_v31, %v167_v30  ;;  %334 = vperm.xlu1 %7942, %v8694_v23   ;;  %v665_v16 = vmul.f32 %v8761_v32, %v8823_v10  ;;  %v8062_v32 = vld [vmem:[%s11793_s2 + $0x78] sm:$0xff]  }
  0x8a   :  { %7556 = vmatprep.subr.bf16.mxu0 %v8062_v32 }
  0x8b   :  { %249 = vrot.lane.b32.xlu0 %v230_v33, %s8483_s29  ;;  %v8839_v33 = vld [vmem:[#allocation2 + $0x1f] sm:$0xff] }
  0x8c   :  { %v637_v35 = vpop.permute.xlu0 %636 }
  0x8d   :  { %7944 = vset.pattern.permute.xlu1 %v11817_v19  ;;  %v744_v36 = vpop.permute.xlu1 %743  ;;  %v667_v63 = vmul.f32 %v637_v35, %v8811_v59 }
  0x8e   :  { %v782_v37 = vmul.f32 %v744_v36, %v719_v34  ;;  %885 = vperm.xlu1 %7944, %v8694_v23   ;;  %v166_v34 = vld [vmem:[#allocation2 + $0x2] sm:$0xff]  ;;  %v718_v36 = vld [vmem:[#allocation2 + $0xd] sm:$0xff] }
  0x90   :  { %801 = vrot.lane.b32.xlu0 %v782_v37, %s8484_s30  ;;  %v8768_v38 = vpop.permute.xlu0 %646 }
  0x92   :  { %890 = vperm.xlu1 %7944, %v8666_v18   ;;  %v8771_v39 = vpop.permute.xlu1 %304 }
  0x94   :  { %v8773_v40 = vpop.permute.xlu0 %656 }
  0x96   :  { %7945 = vset.pattern.permute.xlu1 %v11811_v22 }
  0x97   :  { %457 = vperm.xlu1 %7945, %v8666_v18   ;;  %v8777_v41 = vpop.permute.xlu1 %855 }
  0x99   :  { %v8779_v42 = vpop.permute.xlu0 %738 }
  0x9b   :  { %7946 = vset.pattern.permute.xlu1 %v11819_v0  ;;  %v861_v43 = vpop.permute.xlu1 %860 }
  0x9c   :  { %661 = vperm.xlu1 %7946, %v8724_v24   ;;  %v899_v56 = vmul.f32 %v861_v43, %v836_v53  ;;  %v229_v43 = vmul.f32 %v8756_v28, %v166_v34  ;;  %v11827_v28 = vmov 8   ;;  %v8069_v34 = vld [vmem:[%s11793_s2 + $0x20] sm:$0xff]  }
  0x9d   :  { %v749_v44 = vpop.permute.xlu0 %748 }
  0x9e   :  { %v783_v6 = vmul.f32 %v749_v44, %v720_v61  ;;  %v781_v61 = vmul.f32 %v8779_v42, %v718_v36 }
  0xa0   :  { %7948 = vset.pattern.permute.xlu1 %v11815_v13  ;;  %v8784_v45 = vpop.permute.xlu1 %427 }
  0xa1   :  { %778 = vperm.xlu1 %7948, %v8724_v24   ;;  %v8787_v46 = vpop.permute.xlu0 %758 }
  0xa5   :  { %7949 = vset.pattern.permute.xlu1 %v11813_v17  ;;  %v8790_v47 = vpop.permute.xlu1 %631  ;;  %v8792_v48 = vpop.permute.xlu0 %768 }
  0xa6   :  { %344 = vperm.xlu1 %7949, %v8724_v24  }
  0xaa   :  { %v310_v50 = vpop.permute.xlu0 %309  ;;  %7951 = vset.pattern.permute.xlu1 %v11811_v22  ;;  %v8796_v51 = vpop.permute.xlu1 %196 }
  0xab   :  { %v348_v52 = vmul.f32 %v310_v50, %v285_v49  ;;  %462 = vperm.xlu1 %7951, %v8724_v24   ;;  %v8063_v49 = vld [vmem:[%s11793_s2 + $0x38] sm:$0xff]   ;;  %v8064_v50 = vld [vmem:[%s11793_s2 + $0x70] sm:$0xff]  }
  0xac   :  { %7557 = vmatpush3.bf16.msra.mxu0 %v8063_v49  ;;  %v723_v49 = vld [vmem:[#allocation2 + $0x35] sm:$0xff] }
  0xad   :  { %367 = vrot.lane.b32.xlu0 %v348_v52, %s8484_s30  ;;  %v284_v52 = vld [vmem:[#allocation2 + $0x3] sm:$0xff]  ;;  %7558 = vmatprep.subr.bf16.mxu0 %v8064_v50 }
  0xae   :  { %v8800_v54 = vpop.permute.xlu1 %201  ;;  %v8802_v55 = vpop.permute.xlu0 %319 }
  0xaf   :  { %7952 = vset.pattern.permute.xlu1 %v11823_v25 }
  0xb0   :  { %540 = vperm.xlu1 %7952, %v8580_v2  }
  0xb1   :  { %918 = vrot.lane.b32.xlu0 %v899_v56, %s8485_s1  ;;  %v8065_v56 = vld [vmem:[%s11793_s2 + $0x30] sm:$0xff]  }
  0xb2   :  { %v8807_v57 = vpop.permute.xlu0 %329  ;;  %7559 = vmatpush3.bf16.msra.mxu0 %v8065_v56 }
  0xb3   :  { %v8809_v58 = vpop.permute.xlu1 %753 }
  0xb4   :  { %7954 = vset.pattern.permute.xlu1 %v11809_v60 }
  0xb5   :  { %105 = vperm.xlu1 %7954, %v8580_v2   ;;  %560 = vperm.xlu0 %7953, %v8686_v21  }
  0xb6   :  { %v8816_v62 = vpop.permute.xlu0 %339 }
  0xb8   :  { %v315_v5 = vpop.permute.xlu1 %314 }
  0xb9   :  { %110 = vperm.xlu1 %7954, %v8587_v3   ;;  %688 = vrot.lane.b32.xlu0 %v667_v63, %s8483_s29  ;;  %v349_v12 = vmul.f32 %v315_v5, %v286_v9  ;;  %v8066_v5 = vld [vmem:[%s11793_s2 + $0x68] sm:$0xff]  }
  0xba   :  { %v8067_v9 = vld [vmem:[%s11793_s2 + $0x28] sm:$0xff]   ;;  %7560 = vmatprep.subr.bf16.mxu0 %v8066_v5 }
  0xbb   :  { %v8821_v7 = vpop.permute.xlu0 %422  ;;  %7561 = vmatpush3.bf16.msra.mxu0 %v8067_v9  ;;  %v8072_v9 = vld [vmem:[%s11793_s2 + $0x50] sm:$0xff]  }
  0xbd   :  { %v866_v11 = vpop.permute.xlu1 %865  ;;  %7955 = vset.pattern.permute.xlu1 %v11823_v25  ;;  %803 = vrot.lane.b32.xlu0 %v783_v6, %s8484_s30  ;;  %v835_v6 = vld [vmem:[#allocation2 + $0xe] sm:$0xff] }
  0xbe   :  { %555 = vperm.xlu1 %7955, %v8629_v8   ;;  %v900_v30 = vmul.f32 %v866_v11, %v837_v27  ;;  %v347_v11 = vmul.f32 %v8771_v39, %v284_v52  ;;  %v521_v27 = vld [vmem:[#allocation2 + $0x10] sm:$0xff]  ;;  %v898_v39 = vmul.f32 %v8777_v41, %v835_v6  ;;  %v8071_v41 = vld [vmem:[%s11793_s2 + $0x18] sm:$0xff]  }
  0xbf   :  { %v8828_v15 = vpop.permute.xlu0 %432  ;;  %v522_v52 = vld [vmem:[#allocation2 + $0x18] sm:$0xff] }
  0xc1   :  { %v8832_v29 = vpop.permute.xlu1 %870  ;;  %369 = vrot.lane.b32.xlu0 %v349_v12, %s8484_s30  ;;  %v171_v12 = vld [vmem:[#allocation2 + $0x2a] sm:$0xff] }
  0xc2   :  { %684 = vrot.lane.b32.xlu1 %v665_v16, %s8483_s29 }
  0xc3   :  { %7956 = vset.pattern.permute.xlu1 %v11809_v60  ;;  %v8837_v31 = vpop.permute.xlu0 %442 }
  0xc5   :  { %920 = vrot.lane.b32.xlu0 %v900_v30, %s8485_s1  ;;  %v8068_v30 = vld [vmem:[%s11793_s2 + $0x60] sm:$0xff]  }
  0xc6   :  { %v438_v35 = vpop.permute.xlu1 %437  ;;  %120 = vperm.xlu1 %7956, %v8629_v8   ;;  %7562 = vmatprep.subr.bf16.mxu0 %v8068_v30  ;;  %v8906_v30 = vld [vmem:[#allocation2 + $0xf] sm:$0xff] }
  0xc7   :  { %v468_v37 = vmul.f32 %v438_v35, %v8839_v33  ;;  %v8848_v44 = vpop.permute.xlu0 %452  ;;  %7563 = vmatpush3.bf16.msra.mxu0 %v8069_v34  ;;  %v8074_v34 = vld [vmem:[%s11793_s2 + $0x48] sm:$0xff]  }
  0xc9   :  { %489 = vrot.lane.b32.xlu0 %v468_v37, %s8485_s1  ;;  %v8070_v37 = vld [vmem:[%s11793_s2 + $0x58] sm:$0xff]  }
  0xca   :  { %247 = vrot.lane.b32.xlu1 %v229_v43, %s8483_s29  ;;  %v402_v43 = vld [vmem:[#allocation2 + $0x7] sm:$0xff]  ;;  %7564 = vmatprep.subr.bf16.mxu0 %v8070_v37  ;;  %v8932_v37 = vld [vmem:[#allocation2 + $0x19] sm:$0xff] }
  0xcb   :  { %v8858_v53 = vpop.permute.xlu1 %641  ;;  %7957 = vset.pattern.permute.xlu1 %v11827_v28  ;;  %7565 = vmatpush3.bf16.msra.mxu0 %v8071_v41 }
  0xcc   :  { %v8865_v63 = vpop.permute.xlu0 %226  ;;  %7566 = vmatprep.subr.bf16.mxu0 %v8072_v9 }
  0xcd   :  { %575 = vperm.xlu0 %7953, %v8666_v18  }
  0xce   :  { %799 = vrot.lane.b32.xlu1 %v781_v61, %s8484_s30  ;;  %v465_v61 = vmul.f32 %v8821_v7, %v402_v43 }
  0xd0   :  { %v8876_v42 = vpop.permute.xlu1 %206 }
  0xd1   :  { %v8878_v16 = vpop.permute.xlu0 %895 }
  0xd2   :  { %365 = vrot.lane.b32.xlu1 %v347_v11, %s8484_s30  ;;  %v289_v11 = vld [vmem:[#allocation2 + $0x2b] sm:$0xff] }
  0xd4   :  { %v212_v35 = vpop.permute.xlu1 %211 }
  0xd5   :  { %v234_v32 = vmul.f32 %v212_v35, %v171_v12  ;;  %v466_v35 = vmul.f32 %v8784_v45, %v8906_v30  ;;  %v840_v45 = vld [vmem:[#allocation2 + $0x36] sm:$0xff] }
  0xd6   :  { %916 = vrot.lane.b32.xlu1 %v898_v39, %s8485_s1  ;;  %v546_v36 = vpop.permute.xlu0 %545  ;;  %v8075_v39 = vld [vmem:[%s11793_s2 + $0x8] sm:$0xff]  }
  0xd7   :  { %257 = vrot.lane.b32.xlu0 %v234_v32, %s8483_s29  ;;  %v584_v50 = vmul.f32 %v546_v36, %v521_v27  ;;  %v8073_v27 = vld [vmem:[%s11793_s2 + $0x10] sm:$0xff]   ;;  %v8077_v36 = vld [vmem:[%s11793_s2] sm:$0xff]  }
  0xd8   :  { %7567 = vmatpush3.bf16.msra.mxu0 %v8073_v27 }
  0xd9   :  { %v764_v56 = vpop.permute.xlu1 %763  ;;  %593 = vst.msk [vmem:[#allocation3 + $0x20] sm:$0xff] %vm54_vm0, %v584_v50  ;;  %7568 = vmatprep.subr.bf16.mxu0 %v8074_v34 }
  0xda   :  { %v786_v5 = vmul.f32 %v764_v56, %v723_v49  ;;  %972 = vperm.xlu1 %7957, %v8580_v2   ;;  %v551_v6 = vpop.permute.xlu0 %550  ;;  %v352_v2 = vmul.f32 %v8807_v57, %v289_v11  ;;  %v8076_v57 = vld [vmem:[%s11793_s2 + $0x40] sm:$0xff]   ;;  %v666_v49 = vmul.f32 %v8790_v47, %v8932_v37 }
  0xdb   :  { %v585_v12 = vmul.f32 %v551_v6, %v522_v52  ;;  %v168_v52 = vld [vmem:[#allocation2 + $0x12] sm:$0xff]  ;;  %v721_v6 = vld [vmem:[#allocation2 + $0x25] sm:$0xff]  ;;  %v287_v11 = vld [vmem:[#allocation2 + $0x1b] sm:$0xff] }
  0xdc   :  { %809 = vrot.lane.b32.xlu0 %v786_v5, %s8484_s30  ;;  %7569 = vmatpush3.bf16.msra.mxu0 %v8075_v39  ;;  %v231_v56 = vmul.f32 %v8796_v51, %v168_v52  ;;  %v784_v51 = vmul.f32 %v8809_v58, %v721_v6  ;;  %v350_v27 = vmul.f32 %v8802_v55, %v287_v11  ;;  %v8078_v58 = vld [vmem:[%s11793_s2 + $0x88] sm:$0xff]   ;;  %v8974_v55 = vld [vmem:[#allocation2 + $0x17] sm:$0xff] }
  0xdd   :  { %594 = vst.msk [vmem:[#allocation3 + $0x38] sm:$0xff] %vm54_vm0, %v585_v12  ;;  %7570 = vmatprep.subr.bf16.mxu0 %v8076_v57  ;;  %7813 = vmatpush3.bf16.msra.mxu1 %v8078_v58 }
  0xde   :  { %v8910_v7 = vpop.permute.xlu1 %324  ;;  %483 = vrot.lane.b32.xlu1 %v465_v61, %s8485_s1  ;;  %v169_v61 = vld [vmem:[#allocation2 + $0x1a] sm:$0xff]  ;;  %7814 = vmatprep.subr.bf16.mxu1 %v11825_v4 }
  0xdf   :  { %7958 = vset.pattern.permute.xlu1 %v11823_v25  ;;  %v232_v47 = vmul.f32 %v8800_v54, %v169_v61  ;;  %v170_v61 = vld [vmem:[#allocation2 + $0x22] sm:$0xff] }
  0xe0   :  { %375 = vrot.lane.b32.xlu0 %v352_v2, %s8484_s30  ;;  %7571 = vmatpush3.bf16.msra.mxu0 %v8077_v36  ;;  %v838_v2 = vld [vmem:[#allocation2 + $0x26] sm:$0xff]  ;;  %v233_v6 = vmul.f32 %v8876_v42, %v170_v61 }
  0xe1   :  { %7836 = vmatprep.subr.bf16.mxu0 %v11825_v4  ;;  %v901_v34 = vmul.f32 %v8832_v29, %v838_v2  ;;  %v8079_v29 = vld [vmem:[%s11793_s2 + $0x80] sm:$0xff]   ;;  %v9044_v61 = vld [vmem:[%s11834_s23 + $0x8] sm:$0xff] }
  0xe2   :  { %485 = vrot.lane.b32.xlu1 %v466_v35, %s8485_s1  ;;  %v467_v35 = vmul.f32 %v8828_v15, %v8974_v55  ;;  %7815 = vmatpush3.bf16.msra.mxu1 %v8079_v29  ;;  %v288_v42 = vld [vmem:[#allocation2 + $0x23] sm:$0xff] }
  0xe3   :  { %v8927_v32 = vpop.permute.xlu1 %875  ;;  %v351_v29 = vmul.f32 %v8910_v7, %v288_v42  ;;  %v9034_v7 = vld [vmem:[#allocation2 + $0x27] sm:$0xff] }
  0xe6   :  { %565 = vperm.xlu1 %7958, %v8653_v14  }
  0xe7   :  { %v881_v43 = vpop.permute.xlu1 %880 }
  0xe8   :  { %v903_v50 = vmul.f32 %v881_v43, %v840_v45  ;;  %v8998_v43 = vld [vmem:[#allocation2 + $0x31] sm:$0xff] }
  0xea   :  { %926 = vrot.lane.b32.xlu0 %v903_v50, %s8485_s1  ;;  %686 = vrot.lane.b32.xlu1 %v666_v49, %s8483_s29 }
  0xeb   :  { %7959 = vset.pattern.permute.xlu1 %v11809_v60 }
  0xec   :  { %v8941_v41 = vpop.permute.xlu1 %447 }
  0xee   :  { %580 = vperm.xlu0 %7953, %v8724_v24   ;;  %125 = vperm.xlu1 %7959, %v8686_v21  }
  0xf1   :  { %v8946_v5 = vpop.permute.xlu1 %651 }
  0xf2   :  { %7964 = vset.pattern.permute.xlu0 %v11809_v60  ;;  %251 = vrot.lane.b32.xlu1 %v231_v56, %s8483_s29 }
  0xf3   :  { %115 = vperm.xlu0 %7964, %v8679_v20   ;;  %7960 = vset.pattern.permute.xlu1 %v11827_v28 }
  0xf6   :  { %v8953_v9 = vpop.permute.xlu1 %216  ;;  %253 = vrot.lane.b32.xlu1 %v232_v47, %s8483_s29  ;;  %v9010_v47 = vld [vmem:[#allocation2 + $0x3f] sm:$0xff] }
  0xf7   :  { %130 = vperm.xlu0 %7964, %v8653_v14  }
  0xf9   :  { %v683_v52 = vpop.permute.xlu0 %682 }
  0xfa   :  { %v8958_v12 = vpop.permute.xlu1 %221  ;;  %805 = vrot.lane.b32.xlu1 %v784_v51, %s8484_s30 }
  0xfb   :  { %135 = vperm.xlu0 %7964, %v8694_v23  }
  0xfd   :  { %v250_v51 = vpop.permute.xlu0 %249 }
  0xfe   :  { %371 = vrot.lane.b32.xlu1 %v350_v27, %s8484_s30  ;;  %v174_v27 = vld [vmem:[#allocation2 + $0x42] sm:$0xff] }
  0xff   :  { %v8964_v54 = vpop.permute.xlu1 %773  ;;  %145 = vperm.xlu0 %7964, %v8724_v24  }
 0x102   :  { %922 = vrot.lane.b32.xlu1 %v901_v34, %s8485_s1 }
 0x103   :  { %7965 = vset.pattern.permute.xlu0 %v11827_v28 }
 0x104   :  { %v335_v39 = vpop.permute.xlu1 %334  ;;  %977 = vperm.xlu0 %7965, %v8587_v3   ;;  %v724_v3 = vld [vmem:[#allocation2 + $0x3d] sm:$0xff] }
 0x105   :  { %v787_v15 = vmul.f32 %v8792_v48, %v724_v3  ;;  %v669_v48 = vmul.f32 %v8768_v38, %v8998_v43  ;;  %v722_v38 = vld [vmem:[#allocation2 + $0x2d] sm:$0xff] }
 0x106   :  { %987 = vperm.xlu1 %7960, %v8629_v8   ;;  %v8989_v8 = vld [vmem:[#allocation2 + $0x29] sm:$0xff]  ;;  %v785_v34 = vmul.f32 %v8787_v46, %v722_v38 }
 0x107   :  { %v668_v45 = vmul.f32 %v8858_v53, %v8989_v8 }
 0x108   :  { %982 = vperm.xlu0 %7965, %v8679_v20   ;;  %v290_v20 = vld [vmem:[#allocation2 + $0x33] sm:$0xff] }
 0x109   :  { %v886_v57 = vpop.permute.xlu1 %885  ;;  %v353_v49 = vmul.f32 %v335_v39, %v290_v20  ;;  %v9022_v39 = vpop.permute.xlu0 %801 }
 0x10a   :  { %487 = vrot.lane.b32.xlu1 %v467_v35, %s8485_s1  ;;  %v839_v35 = vld [vmem:[#allocation2 + $0x2e] sm:$0xff] }
 0x10b   :  { %7961 = vset.pattern.permute.xlu1 %v11823_v25  ;;  %v902_v46 = vmul.f32 %v8927_v32, %v839_v35  ;;  %v469_v32 = vmul.f32 %v8837_v31, %v9034_v7 }
 0x10c   :  { %997 = vperm.xlu0 %7965, %v8653_v14   ;;  %v841_v14 = vld [vmem:[#allocation2 + $0x3e] sm:$0xff] }
 0x10d   :  { %v8991_v36 = vpop.permute.xlu1 %890  ;;  %v904_v56 = vmul.f32 %v886_v57, %v841_v14  ;;  %v524_v14 = vld [vmem:[#allocation2 + $0x28] sm:$0xff] }
 0x10e   :  { %570 = vperm.xlu1 %7961, %v8694_v23  }
 0x110   :  { %811 = vrot.lane.b32.xlu0 %v787_v15, %s8484_s30 }
 0x112   :  { %v458_v50 = vpop.permute.xlu1 %457  ;;  %690 = vrot.lane.b32.xlu1 %v668_v45, %s8483_s29 }
 0x113   :  { %7962 = vset.pattern.permute.xlu1 %v11809_v60  ;;  %v472_v2 = vmul.f32 %v458_v50, %v9010_v47  ;;  %v85_v50 = vld [vmem:[#allocation2 + $0x1] sm:$0xff] }
 0x114   :  { %377 = vrot.lane.b32.xlu0 %v353_v49, %s8484_s30 }
 0x116   :  { %692 = vrot.lane.b32.xlu1 %v669_v48, %s8483_s29 }
 0x117   :  { %v9006_v53 = vpop.permute.xlu1 %661 }
 0x118   :  { %928 = vrot.lane.b32.xlu0 %v904_v56, %s8485_s1 }
 0x11a   :  { %140 = vperm.xlu1 %7962, %v8666_v18   ;;  %v237_v18 = vmul.f32 %v8865_v63, %v174_v27  ;;  %v520_v63 = vld [vmem:[#allocation2 + $0x8] sm:$0xff]  ;;  %v9055_v27 = vld [vmem:[#allocation2 + $0x39] sm:$0xff] }
 0x11c   :  { %v9013_v11 = vpop.permute.xlu1 %778  ;;  %1002 = vperm.xlu0 %7965, %v8694_v23   ;;  %v292_v23 = vld [vmem:[#allocation2 + $0x43] sm:$0xff] }
 0x11e   :  { %255 = vrot.lane.b32.xlu1 %v233_v6, %s8483_s29 }
 0x11f   :  { %7963 = vset.pattern.permute.xlu1 %v11827_v28  ;;  %v368_v57 = vpop.permute.xlu0 %367 }
 0x120   :  { %497 = vrot.lane.b32.xlu0 %v472_v2, %s8485_s1 }
 0x121   :  { %v345_v58 = vpop.permute.xlu1 %344 }
 0x122   :  { %807 = vrot.lane.b32.xlu1 %v785_v34, %s8484_s30  ;;  %v355_v3 = vmul.f32 %v345_v58, %v292_v23  ;;  %v523_v34 = vld [vmem:[#allocation2 + $0x20] sm:$0xff] }
 0x123   :  { %v919_v45 = vpop.permute.xlu0 %918 }
 0x124   :  { %263 = vrot.lane.b32.xlu0 %v237_v18, %s8483_s29  ;;  %v670_v18 = vmul.f32 %v8946_v5, %v9055_v27  ;;  %v172_v5 = vld [vmem:[#allocation2 + $0x32] sm:$0xff] }
 0x125   :  { %v235_v35 = vmul.f32 %v8953_v9, %v172_v5  ;;  %v527_v9 = vld [vmem:[#allocation2 + $0x40] sm:$0xff] }
 0x126   :  { %v9027_v15 = vpop.permute.xlu1 %462  ;;  %373 = vrot.lane.b32.xlu1 %v351_v29, %s8484_s30 }
 0x128   :  { %381 = vrot.lane.b32.xlu0 %v355_v3, %s8484_s30 }
 0x12a   :  { %924 = vrot.lane.b32.xlu1 %v902_v46, %s8485_s1 }
 0x12b   :  { %v541_v20 = vpop.permute.xlu1 %540 }
 0x12c   :  { %v583_v49 = vmul.f32 %v541_v20, %v520_v63  ;;  %1012 = vperm.xlu0 %7965, %v8724_v24   ;;  %v9047_v24 = vld [vmem:[#allocation2 + $0x2f] sm:$0xff] }
 0x12d   :  { %v470_v31 = vmul.f32 %v8941_v41, %v9047_v24  ;;  %v9065_v41 = vld [vmem:[#allocation2 + $0x41] sm:$0xff] }
 0x12e   :  { %592 = vst.msk [vmem:[#allocation3 + $0x8] sm:$0xff] %vm54_vm0, %v583_v49  ;;  %992 = vperm.xlu1 %7963, %v8686_v21   ;;  %v725_v49 = vld [vmem:[#allocation2 + $0x45] sm:$0xff] }
 0x12f   :  { %709 = vst.msk [vmem:[#allocation3 + $0x8] sm:$0xff] %vm274_vm3, %v683_v52 }
 0x130   :  { %v106_v48 = vpop.permute.xlu1 %105  ;;  %v561_v56 = vpop.permute.xlu0 %560  ;;  %7968 = vset.pattern.permute.xlu0 %v11821_v1 }
 0x131   :  { %v148_v6 = vmul.f32 %v106_v48, %v85_v50  ;;  %v587_v21 = vmul.f32 %v561_v56, %v524_v14  ;;  %1650 = vperm.xlu0 %7968, %v9044_v61   ;;  %v291_v14 = vld [vmem:[#allocation2 + $0x3b] sm:$0xff]  ;;  %v842_v48 = vld [vmem:[#allocation2 + $0x46] sm:$0xff] }
 0x132   :  { %491 = vrot.lane.b32.xlu1 %v469_v32, %s8485_s1 }
 0x133   :  { %157 = vst.msk [vmem:[#allocation3] sm:$0xff] %vm54_vm0, %v148_v6  ;;  %596 = vst.msk [vmem:[#allocation3 + $0x68] sm:$0xff] %vm54_vm0, %v587_v21  ;;  %v9104_v21 = vld [vmem:[%s11834_s23 + $0x38] sm:$0xff] }
 0x134   :  { %v111_v52 = vpop.permute.xlu1 %110  ;;  %v689_v38 = vpop.permute.xlu0 %688 }
 0x135   :  { %v149_v2 = vmul.f32 %v8752_v26, %v111_v52  ;;  %v671_v26 = vmul.f32 %v8773_v40, %v9065_v41 }
 0x136   :  { %493 = vrot.lane.b32.xlu1 %v470_v31, %s8485_s1  ;;  %v9106_v31 = vld [vmem:[#allocation2 + $0x37] sm:$0xff] }
 0x137   :  { %158 = vst.msk [vmem:[#allocation3 + $0x18] sm:$0xff] %vm54_vm0, %v149_v2  ;;  %v471_v2 = vmul.f32 %v8848_v44, %v9106_v31 }
 0x138   :  { %276 = vst.msk [vmem:[#allocation3 + $0x18] sm:$0xff] %vm274_vm3, %v250_v51  ;;  %v9063_v42 = vpop.permute.xlu0 %803 }
 0x139   :  { %v556_v58 = vpop.permute.xlu1 %555  ;;  %394 = vst.msk [vmem:[#allocation3 + $0x18] sm:$0xff] %vm392_vm4, %v368_v57  ;;  %v173_v57 = vld [vmem:[#allocation2 + $0x3a] sm:$0xff] }
 0x13a   :  { %v586_v23 = vmul.f32 %v556_v58, %v523_v34  ;;  %694 = vrot.lane.b32.xlu1 %v670_v18, %s8483_s29  ;;  %v236_v63 = vmul.f32 %v8958_v12, %v173_v57  ;;  %v354_v12 = vmul.f32 %v8816_v62, %v291_v14  ;;  %v609_v34 = vld [vmem:[#allocation2 + $0x49] sm:$0xff] }
 0x13b   :  { %v672_v5 = vmul.f32 %v9006_v53, %v609_v34  ;;  %v9133_v53 = vld [vmem:[#allocation2 + $0x47] sm:$0xff] }
 0x13c   :  { %595 = vst.msk [vmem:[#allocation3 + $0x50] sm:$0xff] %vm54_vm0, %v586_v23  ;;  %v9072_v29 = vpop.permute.xlu0 %369 }
 0x13d   :  { %712 = vst.msk [vmem:[#allocation3 + $0x50] sm:$0xff] %vm274_vm3, %v689_v38  ;;  %v685_v51 = vpop.permute.xlu1 %684 }
 0x13e   :  { %710 = vst.msk [vmem:[#allocation3 + $0x20] sm:$0xff] %vm274_vm3, %v685_v51  ;;  %696 = vrot.lane.b32.xlu1 %v671_v26, %s8483_s29  ;;  %v726_v51 = vld [vmem:[#allocation2 + $0x4d] sm:$0xff] }
 0x13f   :  { %827 = vst.msk [vmem:[#allocation3 + $0x20] sm:$0xff] %vm392_vm4, %v9022_v39  ;;  %v789_v57 = vmul.f32 %v9013_v11, %v726_v51 }
 0x140   :  { %944 = vst.msk [vmem:[#allocation3 + $0x20] sm:$0xff] %vm510_vm5, %v919_v45  ;;  %v9081_v40 = vpop.permute.xlu0 %920  ;;  %v788_v45 = vmul.f32 %v8964_v54, %v725_v49  ;;  %v905_v54 = vmul.f32 %v8991_v36, %v842_v48  ;;  %v9115_v36 = vld [vmem:[%s11834_s23 + $0x18] sm:$0xff] }
 0x141   :  { %v121_v3 = vpop.permute.xlu1 %120  ;;  %1660 = vperm.xlu0 %7968, %v9115_v36  }
 0x142   :  { %v151_v46 = vmul.f32 %v8932_v37, %v121_v3  ;;  %259 = vrot.lane.b32.xlu1 %v235_v35, %s8483_s29  ;;  %v525_v35 = vld [vmem:[#allocation2 + $0x30] sm:$0xff] }
 0x143   :  { %v843_v3 = vld [vmem:[#allocation2 + $0x4e] sm:$0xff] }
 0x144   :  { %160 = vst.msk [vmem:[#allocation3 + $0x48] sm:$0xff] %vm54_vm0, %v151_v46  ;;  %v9087_v20 = vpop.permute.xlu0 %489 }
 0x145   :  { %v248_v39 = vpop.permute.xlu1 %247 }
 0x146   :  { %275 = vst.msk [vmem:[#allocation3] sm:$0xff] %vm274_vm3, %v248_v39  ;;  %261 = vrot.lane.b32.xlu1 %v236_v63, %s8483_s29  ;;  %v906_v39 = vmul.f32 %v8878_v16, %v843_v3  ;;  %v473_v16 = vmul.f32 %v9027_v15, %v9133_v53 }
 0x147   :  { %v1037_v23 = vld [vmem:[#allocation3 + $0x20] sm:$0xff] }
 0x148   :  { %v576_v50 = vpop.permute.xlu0 %575 }
 0x149   :  { %v590_v37 = vmul.f32 %v576_v50, %v527_v9  ;;  %v800_v32 = vpop.permute.xlu1 %799 }
 0x14a   :  { %826 = vst.msk [vmem:[#allocation3 + $0x8] sm:$0xff] %vm392_vm4, %v800_v32  ;;  %813 = vrot.lane.b32.xlu1 %v788_v45, %s8484_s30 }
 0x14b   :  { %599 = vst.msk [vmem:[#allocation3 + $0xb0] sm:$0xff] %vm54_vm0, %v590_v37  ;;  %v528_v37 = vld [vmem:[#allocation2 + $0x48] sm:$0xff] }
 0x14c   :  { %v9108_v62 = vpop.permute.xlu0 %257 }
 0x14d   :  { %v366_v56 = vpop.permute.xlu1 %365 }
 0x14e   :  { %393 = vst.msk [vmem:[#allocation3] sm:$0xff] %vm392_vm4, %v366_v56  ;;  %379 = vrot.lane.b32.xlu1 %v354_v12, %s8484_s30 }
 0x150   :  { %v9123_v26 = vpop.permute.xlu0 %809 }
 0x151   :  { %v917_v6 = vpop.permute.xlu1 %916 }
 0x152   :  { %943 = vst.msk [vmem:[#allocation3 + $0x8] sm:$0xff] %vm510_vm5, %v917_v6  ;;  %930 = vrot.lane.b32.xlu1 %v905_v54, %s8485_s1 }
 0x154   :  { %v376_v46 = vpop.permute.xlu0 %375 }
 0x155   :  { %v973_v52 = vpop.permute.xlu1 %972 }
 0x156   :  { %v1015_v38 = vmul.f32 %v973_v52, %v8906_v30  ;;  %1007 = vperm.xlu1 %7963, %v9104_v21  }
 0x158   :  { %1024 = vst.msk [vmem:[#allocation3 + $0x10] sm:$0xff] %vm54_vm0, %v1015_v38 }
 0x159   :  { %v484_v18 = vpop.permute.xlu1 %483  ;;  %v1034_v58 = vld [vmem:[#allocation3 + $0x8] sm:$0xff] }
 0x15a   :  { %511 = vst.msk [vmem:[#allocation3] sm:$0xff] %vm510_vm5, %v484_v18  ;;  %495 = vrot.lane.b32.xlu1 %v471_v2, %s8485_s1  ;;  %v1061_v30 = vpack.c.bf16 %v1037_v23, %v1034_v58 }
 0x15b   :  { %7966 = vset.pattern.permute.xlu1 %v11819_v0 }
 0x15c   :  { %1273 = vmatprep.mubr.bf16.mxu0 %v1061_v30  ;;  %v9135_v9 = vpop.permute.xlu0 %926 }
 0x15d   :  { %v486_v44 = vpop.permute.xlu1 %485 }
 0x15e   :  { %512 = vst.msk [vmem:[#allocation3 + $0x18] sm:$0xff] %vm510_vm5, %v486_v44  ;;  %698 = vrot.lane.b32.xlu1 %v672_v5, %s8483_s29 }
 0x15f   :  { %v1035_v3 = vld [vmem:[#allocation3 + $0x10] sm:$0xff] }
 0x161   :  { %v566_v63 = vpop.permute.xlu1 %565  ;;  %v1033_v50 = vld [vmem:[#allocation3] sm:$0xff] }
 0x162   :  { %v588_v49 = vmul.f32 %v566_v63, %v525_v35  ;;  %815 = vrot.lane.b32.xlu1 %v789_v57, %s8484_s30  ;;  %v526_v35 = vld [vmem:[#allocation2 + $0x38] sm:$0xff] }
 0x164   :  { %597 = vst.msk [vmem:[#allocation3 + $0x80] sm:$0xff] %vm54_vm0, %v588_v49 }
 0x165   :  { %v687_v45 = vpop.permute.xlu1 %686  ;;  %v1036_v14 = vld [vmem:[#allocation3 + $0x18] sm:$0xff] }
 0x166   :  { %711 = vst.msk [vmem:[#allocation3 + $0x38] sm:$0xff] %vm274_vm3, %v687_v45  ;;  %932 = vrot.lane.b32.xlu1 %v906_v39, %s8485_s1  ;;  %v1060_v11 = vpack.c.bf16 %v1036_v14, %v1033_v50 }
 0x167   :  { %828 = vst.msk [vmem:[#allocation3 + $0x38] sm:$0xff] %vm392_vm4, %v9063_v42 }
 0x168   :  { %945 = vst.msk [vmem:[#allocation3 + $0x38] sm:$0xff] %vm510_vm5, %v9081_v40  ;;  %1274 = vmatmul.mubr.bf16.vlgmr.msra.gmra.mxu0 %v1060_v11  ;;  %v9154_v40 = vld [vmem:[%s11834_s23] sm:$0xff]  ;;  %v9219_v11 = vld [vmem:[%s11834_s23 + $0x10] sm:$0xff] }
 0x169   :  { %v581_v32 = vpop.permute.xlu0 %580  ;;  %v126_v12 = vpop.permute.xlu1 %125 }
 0x16a   :  { %v591_v48 = vmul.f32 %v581_v32, %v528_v37  ;;  %v152_v56 = vmul.f32 %v8811_v59, %v126_v12  ;;  %499 = vrot.lane.b32.xlu1 %v473_v16, %s8485_s1  ;;  %v9159_v59 = vld [vmem:[%s11834_s23 + $0x28] sm:$0xff] }
 0x16b   :  { %1670 = vperm.xlu0 %7968, %v9159_v59  }
 0x16c   :  { %600 = vst.msk [vmem:[#allocation3 + $0xc8] sm:$0xff] %vm54_vm0, %v591_v48  ;;  %161 = vst.msk [vmem:[#allocation3 + $0x60] sm:$0xff] %vm54_vm0, %v152_v56  ;;  %v9229_v56 = vld [vmem:[%s11834_s23 + $0x20] sm:$0xff] }
 0x16d   :  { %v252_v42 = vpop.permute.xlu1 %251 }
 0x16e   :  { %v116_v54 = vpop.permute.xlu0 %115  ;;  %2082 = vperm.xlu1 %7966, %v9044_v61  }
 0x16f   :  { %v150_v15 = vmul.f32 %v8823_v10, %v116_v54  ;;  %1680 = vperm.xlu0 %7968, %v9104_v21   ;;  %v1040_v51 = vld [vmem:[#allocation3 + $0x38] sm:$0xff] }
 0x171   :  { %159 = vst.msk [vmem:[#allocation3 + $0x30] sm:$0xff] %vm54_vm0, %v150_v15  ;;  %v254_v6 = vpop.permute.xlu1 %253 }
 0x172   :  { %277 = vst.msk [vmem:[#allocation3 + $0x30] sm:$0xff] %vm274_vm3, %v252_v42  ;;  %278 = vst.msk [vmem:[#allocation3 + $0x48] sm:$0xff] %vm274_vm3, %v254_v6  ;;  %v131_v10 = vpop.permute.xlu0 %130  ;;  %7967 = vset.pattern.permute.xlu1 %v11821_v1 }
 0x173   :  { %395 = vst.msk [vmem:[#allocation3 + $0x30] sm:$0xff] %vm392_vm4, %v9072_v29  ;;  %v153_v52 = vmul.f32 %v8989_v8, %v131_v10  ;;  %1645 = vperm.xlu1 %7967, %v9154_v40   ;;  %7987 = vset.pattern.permute.xlu0 %v11817_v19 }
 0x174   :  { %2316 = vperm.xlu0 %7987, %v9044_v61  }
 0x175   :  { %162 = vst.msk [vmem:[#allocation3 + $0x78] sm:$0xff] %vm54_vm0, %v153_v52  ;;  %v806_v38 = vpop.permute.xlu1 %805 }
 0x176   :  { %280 = vst.msk [vmem:[#allocation3 + $0x78] sm:$0xff] %vm274_vm3, %v9108_v62  ;;  %v136_v2 = vpop.permute.xlu0 %135 }
 0x177   :  { %829 = vst.msk [vmem:[#allocation3 + $0x50] sm:$0xff] %vm392_vm4, %v806_v38  ;;  %398 = vst.msk [vmem:[#allocation3 + $0x78] sm:$0xff] %vm392_vm4, %v376_v46  ;;  %v154_v34 = vmul.f32 %v8998_v43, %v136_v2  ;;  %7969 = vset.pattern.permute.xlu1 %v11815_v13 }
 0x178   :  { %2194 = vperm.xlu1 %7969, %v9154_v40   ;;  %2326 = vperm.xlu0 %7987, %v9115_v36  }
 0x179   :  { %163 = vst.msk [vmem:[#allocation3 + $0x90] sm:$0xff] %vm54_vm0, %v154_v34  ;;  %v372_v8 = vpop.permute.xlu1 %371 }
 0x17a   :  { %396 = vst.msk [vmem:[#allocation3 + $0x48] sm:$0xff] %vm392_vm4, %v372_v8  ;;  %v146_v29 = vpop.permute.xlu0 %145  ;;  %v960_v8 = vld [vmem:[#allocation2 + $0x4f] sm:$0xff] }
 0x17b   :  { %514 = vst.msk [vmem:[#allocation3 + $0x48] sm:$0xff] %vm510_vm5, %v9087_v20  ;;  %v156_v62 = vmul.f32 %v9065_v41, %v146_v29 }
 0x17c   :  { %2199 = vperm.xlu1 %7969, %v9044_v61   ;;  %2336 = vperm.xlu0 %7987, %v9159_v59  }
 0x17d   :  { %165 = vst.msk [vmem:[#allocation3 + $0xc0] sm:$0xff] %vm54_vm0, %v156_v62  ;;  %v923_v43 = vpop.permute.xlu1 %922 }
 0x17e   :  { %946 = vst.msk [vmem:[#allocation3 + $0x50] sm:$0xff] %vm510_vm5, %v923_v43 }
 0x17f   :  { %v978_v18 = vpop.permute.xlu0 %977 }
 0x180   :  { %v1016_v58 = vmul.f32 %v978_v18, %v8974_v55  ;;  %7970 = vset.pattern.permute.xlu1 %v11813_v17  ;;  %2346 = vperm.xlu0 %7987, %v9104_v21  }
 0x181   :  { %v988_v23 = vpop.permute.xlu1 %987  ;;  %1767 = vperm.xlu1 %7970, %v9044_v61  }
 0x182   :  { %1025 = vst.msk [vmem:[#allocation3 + $0x28] sm:$0xff] %vm54_vm0, %v1016_v58  ;;  %v1018_v41 = vmul.f32 %v988_v23, %v9034_v7  ;;  %v1042_v50 = vld [vmem:[#allocation3 + $0x48] sm:$0xff] }
 0x183   :  { %v983_v20 = vpop.permute.xlu0 %982 }
 0x184   :  { %1027 = vst.msk [vmem:[#allocation3 + $0x58] sm:$0xff] %vm54_vm0, %v1018_v41  ;;  %v1017_v30 = vmul.f32 %v983_v20, %v8839_v33  ;;  %7991 = vset.pattern.permute.xlu0 %v11819_v0 }
 0x185   :  { %v488_v5 = vpop.permute.xlu1 %487  ;;  %v1043_v44 = vld [vmem:[#allocation3 + $0x50] sm:$0xff]  ;;  %7971 = vset.pattern.permute.xlu1 %v11817_v19  ;;  %2077 = vperm.xlu0 %7991, %v9154_v40  }
 0x186   :  { %1026 = vst.msk [vmem:[#allocation3 + $0x40] sm:$0xff] %vm54_vm0, %v1017_v30  ;;  %v1064_v55 = vpack.c.bf16 %v1043_v44, %v1040_v51  ;;  %2311 = vperm.xlu1 %7971, %v9154_v40  }
 0x187   :  { %513 = vst.msk [vmem:[#allocation3 + $0x30] sm:$0xff] %vm510_vm5, %v488_v5  ;;  %v998_v7 = vpop.permute.xlu0 %997 }
 0x188   :  { %v1020_v57 = vmul.f32 %v998_v7, %v9106_v31  ;;  %1281 = vmatprep.mubr.bf16.mxu0 %v1064_v55 }
 0x189   :  { %v571_v33 = vpop.permute.xlu1 %570  ;;  %v1038_v46 = vld [vmem:[#allocation3 + $0x28] sm:$0xff]  ;;  %2087 = vperm.xlu0 %7991, %v9219_v11  }
 0x18a   :  { %1029 = vst.msk [vmem:[#allocation3 + $0x88] sm:$0xff] %vm54_vm0, %v1020_v57  ;;  %v589_v63 = vmul.f32 %v571_v33, %v526_v35  ;;  %v1062_v49 = vpack.c.bf16 %v1038_v46, %v1035_v3  ;;  %7972 = vset.pattern.permute.xlu1 %v11811_v22 }
 0x18b   :  { %v9207_v39 = vpop.permute.xlu0 %811  ;;  %1879 = vperm.xlu1 %7972, %v9154_v40   ;;  %v1044_v12 = vld [vmem:[#allocation3 + $0x58] sm:$0xff] }
 0x18c   :  { %598 = vst.msk [vmem:[#allocation3 + $0x98] sm:$0xff] %vm54_vm0, %v589_v63  ;;  %7817 = vmatmul.mubr.msk.bf16.vlgmr.msra.gmra.mxu1 %vm54_vm0, %v1062_v49 }
 0x18d   :  { %v691_v31 = vpop.permute.xlu1 %690  ;;  %7820 = vmatprep.mubr.msk.bf16.mxu1 %vm8488_vm2, %v11825_v4  ;;  %v1041_v16 = vld [vmem:[#allocation3 + $0x40] sm:$0xff]  ;;  %2097 = vperm.xlu0 %7991, %v9229_v56  }
 0x18e   :  { %v1039_v45 = vld [vmem:[#allocation3 + $0x30] sm:$0xff]  ;;  %713 = vst.msk [vmem:[#allocation3 + $0x68] sm:$0xff] %vm274_vm3, %v691_v31  ;;  %v1065_v48 = vpack.c.bf16 %v1044_v12, %v1041_v16 }
 0x18f   :  { %v1063_v14 = vpack.c.bf16 %v1042_v50, %v1039_v45  ;;  %v9221_v37 = vpop.permute.xlu0 %377  ;;  %1884 = vperm.xlu1 %7972, %v9044_v61  }
 0x191   :  { %1282 = vmatmul.mubr.bf16.gmra.mxu0 %v1063_v14  ;;  %v693_v32 = vpop.permute.xlu1 %692  ;;  %v1050_v5 = vld [vmem:[#allocation3 + $0x88] sm:$0xff] }
 0x192   :  { %714 = vst.msk [vmem:[#allocation3 + $0x80] sm:$0xff] %vm274_vm3, %v693_v32 }
 0x193   :  { %831 = vst.msk [vmem:[#allocation3 + $0x80] sm:$0xff] %vm392_vm4, %v9123_v26  ;;  %v9233_v42 = vpop.permute.xlu0 %928  ;;  %7973 = vset.pattern.permute.xlu1 %v11819_v0  ;;  %v9247_v26 = vld [vmem:[%s11834_s23 + $0x30] sm:$0xff] }
 0x194   :  { %948 = vst.msk [vmem:[#allocation3 + $0x80] sm:$0xff] %vm510_vm5, %v9135_v9  ;;  %7821 = vmatmul.mubr.msk.bf16.gmra.mxu1 %vm54_vm0, %v1065_v48  ;;  %2092 = vperm.xlu1 %7973, %v9115_v36  }
 0x195   :  { %v141_v54 = vpop.permute.xlu1 %140  ;;  %7824 = vmatprep.mubr.msk.bf16.mxu1 %vm8488_vm2, %v11825_v4  ;;  %2107 = vperm.xlu0 %7991, %v9247_v26  }
 0x196   :  { %v155_v15 = vmul.f32 %v9055_v27, %v141_v54 }
 0x197   :  { %v1003_v6 = vpop.permute.xlu0 %1002 }
 0x198   :  { %164 = vst.msk [vmem:[#allocation3 + $0xa8] sm:$0xff] %vm54_vm0, %v155_v15  ;;  %v1021_v9 = vmul.f32 %v1003_v6, %v9010_v47  ;;  %7974 = vset.pattern.permute.xlu1 %v11821_v1 }
 0x199   :  { %v256_v10 = vpop.permute.xlu1 %255  ;;  %1655 = vperm.xlu1 %7974, %v9219_v11  }
 0x19a   :  { %1030 = vst.msk [vmem:[#allocation3 + $0xa0] sm:$0xff] %vm54_vm0, %v1021_v9 }
 0x19b   :  { %279 = vst.msk [vmem:[#allocation3 + $0x60] sm:$0xff] %vm274_vm3, %v256_v10  ;;  %v9256_v27 = vpop.permute.xlu0 %497  ;;  %v1049_v41 = vld [vmem:[#allocation3 + $0x80] sm:$0xff] }
 0x19d   :  { %v808_v52 = vpop.permute.xlu1 %807  ;;  %7975 = vset.pattern.permute.xlu1 %v11815_v13 }
 0x19e   :  { %830 = vst.msk [vmem:[#allocation3 + $0x68] sm:$0xff] %vm392_vm4, %v808_v52  ;;  %2204 = vperm.xlu1 %7975, %v9219_v11  }
 0x19f   :  { %v264_v38 = vpop.permute.xlu0 %263 }
 0x1a0   :  { %283 = vst.msk [vmem:[#allocation3 + $0xc0] sm:$0xff] %vm274_vm3, %v264_v38 }
 0x1a1   :  { %v374_v47 = vpop.permute.xlu1 %373  ;;  %v1053_v32 = vld [vmem:[#allocation3 + $0xa0] sm:$0xff] }
 0x1a2   :  { %397 = vst.msk [vmem:[#allocation3 + $0x60] sm:$0xff] %vm392_vm4, %v374_v47  ;;  %2209 = vperm.xlu1 %7975, %v9115_v36  }
 0x1a3   :  { %v382_v2 = vpop.permute.xlu0 %381 }
 0x1a4   :  { %401 = vst.msk [vmem:[#allocation3 + $0xc0] sm:$0xff] %vm392_vm4, %v382_v2 }
 0x1a5   :  { %v925_v34 = vpop.permute.xlu1 %924 }
 0x1a6   :  { %947 = vst.msk [vmem:[#allocation3 + $0x68] sm:$0xff] %vm510_vm5, %v925_v34  ;;  %7976 = vset.pattern.permute.xlu1 %v11813_v17 }
 0x1a7   :  { %v1013_v29 = vpop.permute.xlu0 %1012  ;;  %1777 = vperm.xlu1 %7976, %v9115_v36  }
 0x1a8   :  { %v1023_v62 = vmul.f32 %v1013_v29, %v960_v8 }
 0x1a9   :  { %v993_v43 = vpop.permute.xlu1 %992 }
 0x1aa   :  { %v1019_v18 = vmul.f32 %v993_v43, %v9047_v24  ;;  %1032 = vst.msk [vmem:[#allocation3 + $0xd0] sm:$0xff] %vm54_vm0, %v1023_v62  ;;  %v9278_v24 = vld [vmem:[%s11834_s23 + $0x40] sm:$0xff] }
 0x1ab   :  { %7977 = vset.pattern.permute.xlu1 %v11817_v19  ;;  %2117 = vperm.xlu0 %7991, %v9278_v24  }
 0x1ac   :  { %1028 = vst.msk [vmem:[#allocation3 + $0x70] sm:$0xff] %vm54_vm0, %v1019_v18  ;;  %2321 = vperm.xlu1 %7977, %v9219_v11  }
 0x1ad   :  { %v492_v58 = vpop.permute.xlu1 %491  ;;  %v1046_v23 = vld [vmem:[#allocation3 + $0x68] sm:$0xff] }
 0x1ae   :  { %515 = vst.msk [vmem:[#allocation3 + $0x60] sm:$0xff] %vm510_vm5, %v492_v58  ;;  %v1067_v20 = vpack.c.bf16 %v1049_v41, %v1046_v23 }
 0x1af   :  { %7993 = vset.pattern.permute.xlu0 %v11813_v17 }
 0x1b0   :  { %1289 = vmatprep.mubr.bf16.mxu0 %v1067_v20  ;;  %7978 = vset.pattern.permute.xlu1 %v11811_v22 }
 0x1b1   :  { %v494_v30 = vpop.permute.xlu1 %493  ;;  %1889 = vperm.xlu1 %7978, %v9219_v11   ;;  %1762 = vperm.xlu0 %7993, %v9154_v40   ;;  %v1059_v10 = vld [vmem:[#allocation3 + $0xd0] sm:$0xff] }
 0x1b2   :  { %516 = vst.msk [vmem:[#allocation3 + $0x78] sm:$0xff] %vm510_vm5, %v494_v30 }
 0x1b3   :  { %v1047_v51 = vld [vmem:[#allocation3 + $0x70] sm:$0xff] }
 0x1b4   :  { %v1068_v44 = vpack.c.bf16 %v1050_v5, %v1047_v51  ;;  %v9416_v5 = vld [vmem:[%s11794_s3] ss:$0 sm:$0xff] }
 0x1b5   :  { %v695_v55 = vpop.permute.xlu1 %694  ;;  %1894 = vperm.xlu1 %7978, %v9115_v36   ;;  %v1045_v35 = vld [vmem:[#allocation3 + $0x60] sm:$0xff]  ;;  %1772 = vperm.xlu0 %7993, %v9219_v11  }
 0x1b6   :  { %715 = vst.msk [vmem:[#allocation3 + $0x98] sm:$0xff] %vm274_vm3, %v695_v55  ;;  %7825 = vmatmul.mubr.msk.bf16.gmra.mxu1 %vm54_vm0, %v1068_v44 }
 0x1b7   :  { %832 = vst.msk [vmem:[#allocation3 + $0x98] sm:$0xff] %vm392_vm4, %v9207_v39  ;;  %7828 = vmatprep.mubr.msk.bf16.mxu1 %vm8488_vm2, %v11825_v4 }
 0x1b8   :  { %949 = vst.msk [vmem:[#allocation3 + $0x98] sm:$0xff] %vm510_vm5, %v9233_v42 }
 0x1b9   :  { %v697_v7 = vpop.permute.xlu1 %696  ;;  %v1048_v57 = vld [vmem:[#allocation3 + $0x78] sm:$0xff]  ;;  %7979 = vset.pattern.permute.xlu1 %v11819_v0  ;;  %1782 = vperm.xlu0 %7993, %v9229_v56  }
 0x1ba   :  { %716 = vst.msk [vmem:[#allocation3 + $0xb0] sm:$0xff] %vm274_vm3, %v697_v7  ;;  %v1066_v33 = vpack.c.bf16 %v1048_v57, %v1045_v35  ;;  %2102 = vperm.xlu1 %7979, %v9159_v59  }
 0x1bc   :  { %1290 = vmatmul.mubr.bf16.gmra.mxu0 %v1066_v33 }
 0x1bd   :  { %v260_v3 = vpop.permute.xlu1 %259  ;;  %1792 = vperm.xlu0 %7993, %v9247_v26  }
 0x1be   :  { %281 = vst.msk [vmem:[#allocation3 + $0x90] sm:$0xff] %vm274_vm3, %v260_v3  ;;  %7980 = vset.pattern.permute.xlu1 %v11821_v1 }
 0x1bf   :  { %399 = vst.msk [vmem:[#allocation3 + $0x90] sm:$0xff] %vm392_vm4, %v9221_v37  ;;  %1665 = vperm.xlu1 %7980, %v9229_v56   ;;  %v1052_v14 = vld [vmem:[#allocation3 + $0x98] sm:$0xff] }
 0x1c1   :  { %v262_v46 = vpop.permute.xlu1 %261  ;;  %1802 = vperm.xlu0 %7993, %v9278_v24  }
 0x1c2   :  { %282 = vst.msk [vmem:[#allocation3 + $0xa8] sm:$0xff] %vm274_vm3, %v262_v46 }
 0x1c3   :  { %7981 = vset.pattern.permute.xlu1 %v11815_v13 }
 0x1c4   :  { %2214 = vperm.xlu1 %7981, %v9229_v56  }
 0x1c5   :  { %v814_v63 = vpop.permute.xlu1 %813  ;;  %7998 = vset.pattern.permute.xlu0 %v11823_v25 }
 0x1c6   :  { %833 = vst.msk [vmem:[#allocation3 + $0xb0] sm:$0xff] %vm392_vm4, %v814_v63  ;;  %1996 = vperm.xlu0 %7998, %v9154_v40  }
 0x1c8   :  { %2219 = vperm.xlu1 %7981, %v9159_v59  }
 0x1c9   :  { %v380_v49 = vpop.permute.xlu1 %379 }
 0x1ca   :  { %400 = vst.msk [vmem:[#allocation3 + $0xa8] sm:$0xff] %vm392_vm4, %v380_v49  ;;  %2021 = vperm.xlu0 %7998, %v9159_v59  }
 0x1cb   :  { %518 = vst.msk [vmem:[#allocation3 + $0xa8] sm:$0xff] %vm510_vm5, %v9256_v27  ;;  %v1074_v27 = vpack.c.bf16 %v1059_v10, %v1059_v10 }
 0x1cc   :  { %7982 = vset.pattern.permute.xlu1 %v11813_v17 }
 0x1cd   :  { %v931_v39 = vpop.permute.xlu1 %930  ;;  %1787 = vperm.xlu1 %7982, %v9159_v59  }
 0x1ce   :  { %950 = vst.msk [vmem:[#allocation3 + $0xb0] sm:$0xff] %vm510_vm5, %v931_v39  ;;  %2026 = vperm.xlu0 %7998, %v9247_v26  }
 0x1d1   :  { %v1008_v31 = vpop.permute.xlu1 %1007  ;;  %7983 = vset.pattern.permute.xlu1 %v11817_v19 }
 0x1d2   :  { %v1022_v45 = vmul.f32 %v1008_v31, %v9133_v53  ;;  %2331 = vperm.xlu1 %7983, %v9229_v56   ;;  %8007 = vset.pattern.permute.xlu0 %v11809_v60  ;;  %v1054_v15 = vld [vmem:[#allocation3 + $0xa8] sm:$0xff] }
 0x1d3   :  { %1569 = vperm.xlu0 %8007, %v9044_v61  }
 0x1d4   :  { %1031 = vst.msk [vmem:[#allocation3 + $0xb8] sm:$0xff] %vm54_vm0, %v1022_v45 }
 0x1d5   :  { %v496_v50 = vpop.permute.xlu1 %495  ;;  %v1055_v37 = vld [vmem:[#allocation3 + $0xb0] sm:$0xff] }
 0x1d6   :  { %517 = vst.msk [vmem:[#allocation3 + $0x90] sm:$0xff] %vm510_vm5, %v496_v50  ;;  %v1070_v16 = vpack.c.bf16 %v1055_v37, %v1052_v14  ;;  %7984 = vset.pattern.permute.xlu1 %v11811_v22 }
 0x1d7   :  { %1899 = vperm.xlu1 %7984, %v9229_v56   ;;  %1574 = vperm.xlu0 %8007, %v9219_v11  }
 0x1d8   :  { %1297 = vmatprep.mubr.bf16.mxu0 %v1070_v16 }
 0x1d9   :  { %v699_v53 = vpop.permute.xlu1 %698 }
 0x1da   :  { %717 = vst.msk [vmem:[#allocation3 + $0xc8] sm:$0xff] %vm274_vm3, %v699_v53 }
 0x1db   :  { %v1056_v12 = vld [vmem:[#allocation3 + $0xb8] sm:$0xff]  ;;  %1904 = vperm.xlu1 %7984, %v9159_v59   ;;  %1584 = vperm.xlu0 %8007, %v9229_v56  }
 0x1dc   :  { %v1071_v48 = vpack.c.bf16 %v1056_v12, %v1053_v32 }
 0x1dd   :  { %v816_v42 = vpop.permute.xlu1 %815  ;;  %v1051_v54 = vld [vmem:[#allocation3 + $0x90] sm:$0xff] }
 0x1de   :  { %834 = vst.msk [vmem:[#allocation3 + $0xc8] sm:$0xff] %vm392_vm4, %v816_v42  ;;  %7829 = vmatmul.mubr.msk.bf16.gmra.mxu1 %vm54_vm0, %v1071_v48  ;;  %v1069_v6 = vpack.c.bf16 %v1054_v15, %v1051_v54 }
 0x1df   :  { %7832 = vmatprep.mubr.msk.bf16.mxu1 %vm8488_vm2, %v11825_v4  ;;  %7985 = vset.pattern.permute.xlu1 %v11819_v0 }
 0x1e0   :  { %1298 = vmatmul.mubr.bf16.gmra.mxu0 %v1069_v6  ;;  %2112 = vperm.xlu1 %7985, %v9104_v21  }
 0x1e1   :  { %v933_v9 = vpop.permute.xlu1 %932 }
 0x1e2   :  { %951 = vst.msk [vmem:[#allocation3 + $0xc8] sm:$0xff] %vm510_vm5, %v933_v9 }
 0x1e4   :  { %7986 = vset.pattern.permute.xlu1 %v11821_v1 }
 0x1e5   :  { %v500_v52 = vpop.permute.xlu1 %499  ;;  %1675 = vperm.xlu1 %7986, %v9247_v26  }
 0x1e6   :  { %519 = vst.msk [vmem:[#allocation3 + $0xc0] sm:$0xff] %vm510_vm5, %v500_v52  ;;  %7833 = vmatmul.mubr.msk.bf16.gmra.mxu1 %vm54_vm0, %v1074_v27 }
 0x1e9   :  { %v1058_v38 = vld [vmem:[#allocation3 + $0xc8] sm:$0xff]  ;;  %7988 = vset.pattern.permute.xlu1 %v11815_v13  ;;  %v9357_v8 = vpop.permute.xlu1 %2082 }
 0x1ea   :  { %v1073_v47 = vpack.c.bf16 %v1058_v38, %v1058_v38  ;;  %2224 = vperm.xlu1 %7988, %v9247_v26  }
 0x1ec   :  { %1305 = vmatprep.mubr.bf16.mxu0 %v1073_v47 }
 0x1ed   :  { %v1057_v2 = vld [vmem:[#allocation3 + $0xc0] sm:$0xff] }
 0x1ee   :  { %v1072_v34 = vpack.c.bf16 %v1057_v2, %v1057_v2  ;;  %2229 = vperm.xlu1 %7988, %v9104_v21   ;;  %v9361_v29 = vpop.permute.xlu1 %1645 }
 0x1f0   :  { %1306 = vmatmul.mubr.bf16.gmra.mxu0 %v1072_v34 }
 0x1f1   :  { %7840 = vmatprep.mubr.msk.bf16.mxu0 %vm8488_vm2, %v11825_v4 }
 0x1f2   :  { %7989 = vset.pattern.permute.xlu1 %v11813_v17 }
 0x1f3   :  { %1797 = vperm.xlu1 %7989, %v9104_v21   ;;  %v9365_v62 = vpop.permute.xlu1 %2194 }
 0x1f7   :  { %7990 = vset.pattern.permute.xlu1 %v11817_v19 }
 0x1f8   :  { %2341 = vperm.xlu1 %7990, %v9247_v26  }
 0x1fc   :  { %7992 = vset.pattern.permute.xlu1 %v11811_v22 }
 0x1fd   :  { %1909 = vperm.xlu1 %7992, %v9247_v26   ;;  %v9369_v26 = vpop.permute.xlu1 %2199 }
 0x201   :  { %1914 = vperm.xlu1 %7992, %v9104_v21   ;;  %v9374_v21 = vpop.permute.xlu1 %1767 }
 0x205   :  { %7994 = vset.pattern.permute.xlu1 %v11821_v1  ;;  %v9379_v43 = vpop.permute.xlu1 %2311 }
 0x206   :  { %1685 = vperm.xlu1 %7994, %v9278_v24  }
 0x209   :  { %v9383_v18 = vpop.permute.xlu1 %1879 }
 0x20a   :  { %7995 = vset.pattern.permute.xlu1 %v11815_v13 }
 0x20b   :  { %2234 = vperm.xlu1 %7995, %v9278_v24  }
 0x20d   :  { %v9386_v58 = vpop.permute.xlu1 %1884 }
 0x20f   :  { %7996 = vset.pattern.permute.xlu1 %v11817_v19 }
 0x210   :  { %2351 = vperm.xlu1 %7996, %v9278_v24  }
 0x211   :  { %v9390_v23 = vpop.permute.xlu1 %2092 }
 0x214   :  { %7997 = vset.pattern.permute.xlu1 %v11811_v22 }
 0x215   :  { %1919 = vperm.xlu1 %7997, %v9278_v24  }
 0x219   :  { %7999 = vset.pattern.permute.xlu1 %v11823_v25 }
 0x21a   :  { %2001 = vperm.xlu1 %7999, %v9044_v61  }
 0x21e   :  { %8000 = vset.pattern.permute.xlu1 %v11809_v60 }
 0x21f   :  { %1564 = vperm.xlu1 %8000, %v9154_v40   ;;  %v9395_v40 = vpop.permute.xlu1 %1655 }
 0x223   :  { %8001 = vset.pattern.permute.xlu1 %v11823_v25  ;;  %v9400_v20 = vpop.permute.xlu1 %2204 }
 0x224   :  { %2006 = vperm.xlu1 %8001, %v9219_v11  }
 0x227   :  { %v9404_v24 = vpop.permute.xlu1 %2209 }
 0x228   :  { %2011 = vperm.xlu1 %8001, %v9115_v36   ;;  %v7572_v41 = vpop.f32.mrf.mxu0 }
 0x22c   :  { %8002 = vset.pattern.permute.xlu1 %v11809_v60 }
 0x22d   :  { %1579 = vperm.xlu1 %8002, %v9115_v36   ;;  %v7573_v36 = vpop.f32.mrf.mxu0 }
 0x231   :  { %8003 = vset.pattern.permute.xlu1 %v11827_v28 }
 0x232   :  { %2433 = vperm.xlu1 %8003, %v9044_v61   ;;  %v9409_v61 = vld [vmem:[%s11834_s23 + $0x38] sm:$0xff] }
 0x236   :  { %8004 = vset.pattern.permute.xlu1 %v11823_v25 }
 0x237   :  { %2016 = vperm.xlu1 %8004, %v9229_v56   ;;  %v7575_v56 = vpop.f32.mrf.mxu0 }
 0x239   :  { %v7576_v30 = vpop.f32.mrf.mxu0 }
 0x23a   :  { %v7577_v51 = vadd.f32 %v7576_v30, %v7575_v56 }
 0x23b   :  { %8005 = vset.pattern.permute.xlu1 %v11809_v60 }
 0x23c   :  { %1589 = vperm.xlu1 %8005, %v9159_v59   ;;  %v7574_v59 = vadd.f32 %v7573_v36, %v7572_v41  ;;  %v1279_v33 = vadd.f32 %v7577_v51, %v9416_v5 }
 0x23e   :  { %v1276_v44 = vadd.f32 %v7574_v59, %v9416_v5 }
 0x240   :  { %8006 = vset.pattern.permute.xlu1 %v11827_v28 }
 0x241   :  { %2438 = vperm.xlu1 %8006, %v9219_v11   ;;  %v9418_v11 = vpop.permute.xlu1 %1777 }
 0x245   :  { %8008 = vset.pattern.permute.xlu1 %v11823_v25  ;;  %v9423_v3 = vpop.permute.xlu1 %2321 }
 0x246   :  { %2031 = vperm.xlu1 %8008, %v9409_v61  }
 0x249   :  { %v9426_v12 = vpop.permute.xlu1 %1889 }
 0x24a   :  { %8009 = vset.pattern.permute.xlu1 %v11809_v60 }
 0x24c   :  { %v1347_v55 = vpop.f32.mrf.mxu1 }
 0x24d   :  { %v1348_v7 = vadd.f32 %v1347_v55, %v1276_v44  ;;  %v9429_v47 = vpop.permute.xlu1 %1894 }
 0x24e   :  { %v7818_v35 = vpop.f32.mrf.mxu1 }
 0x24f   :  { %v1394_v57 = vmin.f32 %v1348_v7, 0.0  ;;  %vm1385_vm6 = vcmp.gt.f32.partialorder %v1348_v7, 0.0 }
 0x250   :  { %v1350_v46 = vpop.f32.mrf.mxu1 }
 0x251   :  { %v7578_v63 = vpop.f32.mrf.mxu0  ;;  %v1403_v49 = vmul.f32 1.442695, %v1394_v57  ;;  %v1351_v39 = vadd.f32 %v1350_v46, %v1279_v33  ;;  %v9431_v56 = vpop.permute.xlu1 %2102 }
 0x252   :  { %v7819_v31 = vpop.f32.mrf.mxu1 }
 0x253   :  { %v7579_v45 = vpop.f32.mrf.mxu0  ;;  %8405 = vpow2.f32 %v1403_v49  ;;  %v1395_v50 = vmin.f32 %v1351_v39, 0.0  ;;  %vm1386_vm7 = vcmp.gt.f32.partialorder %v1351_v39, 0.0 }
 0x254   :  { %v7580_v14 = vadd.f32 %v7579_v45, %v7578_v63  ;;  %v1355_v37 = vpop.f32.mrf.mxu1 }
 0x255   :  { %v7581_v16 = vpop.f32.mrf.mxu0  ;;  %v1405_v53 = vmul.f32 1.442695, %v1395_v50  ;;  %v9439_v35 = vpop.permute.xlu1 %1665 }
 0x256   :  { %v1284_v32 = vadd.f32 %v7580_v14, %v9416_v5  ;;  %v7822_v42 = vpop.f32.mrf.mxu1  ;;  %11835 = vst [vmem:[#allocation5_spill] sm:$0xff] %v9439_v35 }
 0x257   :  { %v7582_v48 = vpop.f32.mrf.mxu0  ;;  %8407 = vpow2.f32 %v1405_v53 }
 0x258   :  { %v1356_v54 = vadd.f32 %v1355_v37, %v1284_v32  ;;  %v7583_v15 = vadd.f32 %v7582_v48, %v7581_v16  ;;  %v1358_v6 = vpop.f32.mrf.mxu1 }
 0x259   :  { %v9451_v14 = vpop.permute.xlu1 %2214 }
 0x25a   :  { %v1396_v9 = vmin.f32 %v1356_v54, 0.0  ;;  %v1287_v10 = vadd.f32 %v7583_v15, %v9416_v5  ;;  %v7823_v27 = vpop.f32.mrf.mxu1  ;;  %vm1387_vm8 = vcmp.gt.f32.partialorder %v1356_v54, 0.0 }
 0x25c   :  { %v1407_v52 = vmul.f32 1.442695, %v1396_v9  ;;  %v1359_v38 = vadd.f32 %v1358_v6, %v1287_v10 }
 0x25d   :  { %v9466_v27 = vpop.permute.xlu1 %2219 }
 0x25e   :  { %8409 = vpow2.f32 %v1407_v52  ;;  %v1397_v2 = vmin.f32 %v1359_v38, 0.0  ;;  %vm1388_vm9 = vcmp.gt.f32.partialorder %v1359_v38, 0.0  ;;  %11836 = vst [vmem:[#allocation6_spill] sm:$0xff] %v9466_v27 }
 0x260   :  { %v1409_v34 = vmul.f32 1.442695, %v1397_v2  ;;  %v8406_v41 = vpop.eup %8405 }
 0x261   :  { %v7210_v36 = vadd.f32 -1.0, %v8406_v41 }
 0x262   :  { %8411 = vpow2.f32 %v1409_v34 }
 0x263   :  { %v9433_v59 = vsel %vm1385_vm6, %v1348_v7, %v7210_v36  ;;  %v9471_v36 = vpop.permute.xlu1 %1787 }
 0x264   :  { %v8408_v30 = vpop.eup %8407  ;;  %v1463_v44 = vmul.f32 %v9433_v59, %v9433_v59  ;;  %v1439_v57 = vsel %vm54_vm0, %v9433_v59, 0.0  ;;  %11837 = vst [vmem:[#allocation7_spill] sm:$0xff] %v9471_v36 }
 0x265   :  { %v7211_v51 = vadd.f32 -1.0, %v8408_v30 }
 0x266   :  { %v1472_v49 = vsel %vm54_vm0, %v1463_v44, 0.0  ;;  %v9475_v44 = vpop.permute.xlu0 %1650 }
 0x267   :  { %v9437_v55 = vsel %vm1386_vm7, %v1351_v39, %v7211_v51  ;;  %v9473_v51 = vpop.permute.xlu1 %2331 }
 0x268   :  { %v1440_v33 = vsel %vm54_vm0, %v9437_v55, 0.0  ;;  %v1464_v7 = vmul.f32 %v9437_v55, %v9437_v55  ;;  %11838 = vst [vmem:[#allocation8_spill] sm:$0xff] %v9473_v51 }
 0x269   :  { %v1441_v46 = vadd.f32 %v1440_v33, %v1439_v57 }
 0x26a   :  { %v1473_v31 = vsel %vm54_vm0, %v1464_v7, 0.0  ;;  %v9479_v7 = vpop.permute.xlu0 %1660 }
 0x26b   :  { %v8410_v63 = vpop.eup %8409  ;;  %v1474_v45 = vadd.f32 %v1473_v31, %v1472_v49  ;;  %v9477_v57 = vpop.permute.xlu1 %1899 }
 0x26c   :  { %v7212_v39 = vadd.f32 -1.0, %v8410_v63  ;;  %11839 = vst [vmem:[#allocation9_spill] sm:$0xff] %v9477_v57 }
 0x26e   :  { %v9449_v50 = vsel %vm1387_vm8, %v1356_v54, %v7212_v39  ;;  %v9483_v49 = vpop.permute.xlu0 %1670 }
 0x26f   :  { %v8412_v37 = vpop.eup %8411  ;;  %v1442_v16 = vsel %vm54_vm0, %v9449_v50, 0.0  ;;  %v1465_v53 = vmul.f32 %v9449_v50, %v9449_v50  ;;  %11841 = vst [vmem:[#allocation11_spill] sm:$0xff] %v9483_v49 }
 0x270   :  { %v1443_v32 = vadd.f32 %v1442_v16, %v1441_v46  ;;  %v7213_v48 = vadd.f32 -1.0, %v8412_v37  ;;  %v9481_v46 = vpop.permute.xlu1 %1904 }
 0x271   :  { %v1475_v42 = vsel %vm54_vm0, %v1465_v53, 0.0  ;;  %11840 = vst [vmem:[#allocation10_spill] sm:$0xff] %v9481_v46 }
 0x272   :  { %v1476_v15 = vadd.f32 %v1475_v42, %v1474_v45  ;;  %v9458_v6 = vsel %vm1388_vm9, %v1359_v38, %v7213_v48  ;;  %v9487_v16 = vpop.permute.xlu0 %1680 }
 0x273   :  { %v1444_v54 = vsel %vm54_vm0, %v9458_v6, 0.0  ;;  %v1466_v9 = vmul.f32 %v9458_v6, %v9458_v6  ;;  %11843 = vst [vmem:[#allocation13_spill] sm:$0xff] %v9487_v16 }
 0x274   :  { %v9464_v10 = vadd.f32 %v1444_v54, %v1443_v32  ;;  %v9485_v31 = vpop.permute.xlu1 %2112 }
 0x275   :  { %v1477_v52 = vsel %vm54_vm0, %v1466_v9, 0.0  ;;  %11842 = vst [vmem:[#allocation12_spill] sm:$0xff] %v9485_v31 }
 0x276   :  { %v9469_v2 = vadd.f32 %v1477_v52, %v1476_v15  ;;  %v1363_v34 = vpop.f32.mrf.mxu1  ;;  %v9493_v15 = vpop.permute.xlu0 %2316 }
 0x278   :  { %v7826_v41 = vpop.f32.mrf.mxu1  ;;  %v9489_v53 = vpop.permute.xlu1 %1675 }
 0x279   :  { %11844 = vst [vmem:[#allocation14_spill] sm:$0xff] %v9489_v53 }
 0x27a   :  { %v1366_v38 = vpop.f32.mrf.mxu1  ;;  %v9497_v13 = vpop.permute.xlu0 %2326 }
 0x27c   :  { %v7827_v30 = vpop.f32.mrf.mxu1  ;;  %v7584_v33 = vpop.f32.mrf.mxu0 }
 0x27d   :  { %v9495_v54 = vpop.permute.xlu1 %2224 }
 0x27e   :  { %v7585_v63 = vpop.f32.mrf.mxu0  ;;  %11845 = vst [vmem:[#allocation15_spill] sm:$0xff] %v9495_v54 }
 0x27f   :  { %v7586_v37 = vadd.f32 %v7585_v63, %v7584_v33 }
 0x280   :  { %v7587_v45 = vpop.f32.mrf.mxu0 }
 0x281   :  { %v1292_v48 = vadd.f32 %v7586_v37, %v9416_v5 }
 0x282   :  { %v7588_v39 = vpop.f32.mrf.mxu0 }
 0x283   :  { %v7589_v32 = vadd.f32 %v7588_v39, %v7587_v45  ;;  %v1364_v52 = vadd.f32 %v1363_v34, %v1292_v48  ;;  %v9499_v45 = vpop.permute.xlu1 %2229 }
 0x284   :  { %11846 = vst [vmem:[#allocation16_spill] sm:$0xff] %v9499_v45 }
 0x285   :  { %v1295_v42 = vadd.f32 %v7589_v32, %v9416_v5  ;;  %v1398_v63 = vmin.f32 %v1364_v52, 0.0  ;;  %vm1389_vm10 = vcmp.gt.f32.partialorder %v1364_v52, 0.0 }
 0x287   :  { %v1367_v60 = vadd.f32 %v1366_v38, %v1295_v42  ;;  %v1411_v25 = vmul.f32 1.442695, %v1398_v63  ;;  %v9505_v28 = vpop.permute.xlu1 %1797 }
 0x288   :  { %11848 = vst [vmem:[#allocation18_spill] sm:$0xff] %v9505_v28 }
 0x289   :  { %v1399_v32 = vmin.f32 %v1367_v60, 0.0  ;;  %8413 = vpow2.f32 %v1411_v25  ;;  %vm1390_vm11 = vcmp.gt.f32.partialorder %v1367_v60, 0.0 }
 0x28b   :  { %v1413_v38 = vmul.f32 1.442695, %v1399_v32 }
 0x28d   :  { %8415 = vpow2.f32 %v1413_v38 }
 0x29e   :  { %v1371_v9 = vpop.f32.mrf.mxu1 }
 0x2a0   :  { %v7830_v41 = vpop.f32.mrf.mxu1  ;;  %v7590_v30 = vpop.f32.mrf.mxu0 }
 0x2a2   :  { %v7591_v22 = vpop.f32.mrf.mxu0  ;;  %v1374_v33 = vpop.f32.mrf.mxu1 }
 0x2a3   :  { %v7592_v17 = vadd.f32 %v7591_v22, %v7590_v30  ;;  %v9503_v22 = vpop.permute.xlu0 %2336 }
 0x2a4   :  { %v7831_v39 = vpop.f32.mrf.mxu1  ;;  %v7593_v37 = vpop.f32.mrf.mxu0  ;;  %11847 = vst [vmem:[#allocation17_spill] sm:$0xff] %v9503_v22 }
 0x2a5   :  { %v1300_v19 = vadd.f32 %v7592_v17, %v9416_v5 }
 0x2a6   :  { %v7594_v0 = vpop.f32.mrf.mxu0  ;;  %v1379_v1 = vpop.f32.mrf.mxu1 }
 0x2a7   :  { %v1372_v34 = vadd.f32 %v1371_v9, %v1300_v19  ;;  %v7595_v48 = vadd.f32 %v7594_v0, %v7593_v37  ;;  %v9507_v19 = vpop.permute.xlu0 %2346  ;;  %v9509_v9 = vpop.permute.xlu1 %2341 }
 0x2a8   :  { %v7834_v41 = vpop.f32.mrf.mxu1  ;;  %11849 = vst [vmem:[#allocation19_spill] sm:$0xff] %v9507_v19  ;;  %11850 = vst [vmem:[#allocation20_spill] sm:$0xff] %v9509_v9 }
 0x2a9   :  { %v1400_v42 = vmin.f32 %v1372_v34, 0.0  ;;  %v1303_v4 = vadd.f32 %v7595_v48, %v9416_v5  ;;  %vm1391_vm12 = vcmp.gt.f32.partialorder %v1372_v34, 0.0 }
 0x2aa   :  { %v1382_v30 = vpop.f32.mrf.mxu1 }
 0x2ab   :  { %v1415_v39 = vmul.f32 1.442695, %v1400_v42  ;;  %v1375_v45 = vadd.f32 %v1374_v33, %v1303_v4  ;;  %v9512_v30 = vpop.permute.xlu0 %2077  ;;  %v9514_v4 = vpop.permute.xlu1 %1909 }
 0x2ac   :  { %v7835_v16 = vpop.f32.mrf.mxu1  ;;  %11851 = vst [vmem:[#allocation21_spill] sm:$0xff] %v9514_v4  ;;  %v8414_v33 = vpop.eup %8413 }
 0x2ad   :  { %v1401_v17 = vmin.f32 %v1375_v45, 0.0  ;;  %8417 = vpow2.f32 %v1415_v39  ;;  %v8416_v42 = vpop.eup %8415  ;;  %v7214_v39 = vadd.f32 -1.0, %v8414_v33  ;;  %vm1392_vm13 = vcmp.gt.f32.partialorder %v1375_v45, 0.0 }
 0x2af   :  { %v1417_v63 = vmul.f32 1.442695, %v1401_v17  ;;  %v9516_v28 = vpop.permute.xlu0 %2087 }
 0x2b0   :  { %v7596_v0 = vpop.f32.mrf.mxu0 }
 0x2b1   :  { %8419 = vpow2.f32 %v1417_v63  ;;  %v9518_v63 = vpop.permute.xlu1 %1914 }
 0x2b2   :  { %v7597_v37 = vpop.f32.mrf.mxu0  ;;  %11852 = vst [vmem:[#allocation22_spill] sm:$0xff] %v9518_v63 }
 0x2b3   :  { %v7598_v32 = vadd.f32 %v7597_v37, %v7596_v0  ;;  %v7215_v0 = vadd.f32 -1.0, %v8416_v42 }
 0x2b4   :  { %v7599_v48 = vpop.f32.mrf.mxu0 }
 0x2b5   :  { %v1308_v41 = vadd.f32 %v7598_v32, %v9416_v5  ;;  %v9520_v5 = vsel %vm1389_vm10, %v1364_v52, %v7214_v39  ;;  %v9522_v48 = vsel %vm1390_vm11, %v1367_v60, %v7215_v0  ;;  %v9528_v33 = vpop.permute.xlu1 %1685 }
 0x2b6   :  { %v7600_v25 = vpop.f32.mrf.mxu0  ;;  %11854 = vst [vmem:[#allocation24_spill] sm:$0xff] %v9528_v33  ;;  %v1446_v42 = vsel %vm54_vm0, %v9520_v5, 0.0  ;;  %v1468_v52 = vmul.f32 %v9522_v48, %v9522_v48  ;;  %v1448_v39 = vsel %vm54_vm0, %v9522_v48, 0.0 }
 0x2b7   :  { %v1380_v16 = vadd.f32 %v1379_v1, %v1308_v41  ;;  %v1467_v41 = vmul.f32 %v9520_v5, %v9520_v5  ;;  %v9526_v25 = vpop.permute.xlu0 %2097 }
 0x2b8   :  { %11853 = vst [vmem:[#allocation23_spill] sm:$0xff] %v9526_v25  ;;  %v1481_v0 = vsel %vm54_vm0, %v1468_v52, 0.0 }
 0x2b9   :  { %v1402_v38 = vmin.f32 %v1380_v16, 0.0  ;;  %vm1393_vm14 = vcmp.gt.f32.partialorder %v1380_v16, 0.0 }
 0x2ba   :  { %v8418_v19 = vpop.eup %8417 }
 0x2bb   :  { %v1419_v17 = vmul.f32 1.442695, %v1402_v38  ;;  %v7216_v32 = vadd.f32 -1.0, %v8418_v19  ;;  %v1479_v19 = vsel %vm54_vm0, %v1467_v41, 0.0 }
 0x2bc   :  { %v1480_v41 = vadd.f32 %v1479_v19, %v9469_v2 }
 0x2bd   :  { %8421 = vpow2.f32 %v1419_v17  ;;  %v9530_v38 = vsel %vm1391_vm12, %v1372_v34, %v7216_v32  ;;  %v1447_v34 = vadd.f32 %v1446_v42, %v9464_v10 }
 0x2be   :  { %v8420_v37 = vpop.eup %8419  ;;  %v1469_v17 = vmul.f32 %v9530_v38, %v9530_v38  ;;  %v1482_v42 = vadd.f32 %v1481_v0, %v1480_v41 }
 0x2bf   :  { %v7217_v1 = vadd.f32 -1.0, %v8420_v37  ;;  %v1450_v37 = vsel %vm54_vm0, %v9530_v38, 0.0  ;;  %v1449_v4 = vadd.f32 %v1448_v39, %v1447_v34 }
 0x2c0   :  { %v1483_v53 = vsel %vm54_vm0, %v1469_v17, 0.0 }
 0x2c1   :  { %v9536_v60 = vsel %vm1392_vm13, %v1375_v45, %v7217_v1  ;;  %v9549_v45 = vpop.permute.xlu0 %2107  ;;  %v9551_v1 = vpop.permute.xlu1 %2234  ;;  %v1451_v52 = vadd.f32 %v1450_v37, %v1449_v4  ;;  %v1484_v9 = vadd.f32 %v1483_v53, %v1482_v42 }
 0x2c2   :  { %v1470_v32 = vmul.f32 %v9536_v60, %v9536_v60  ;;  %11855 = vst [vmem:[#allocation25_spill] sm:$0xff] %v9549_v45  ;;  %11856 = vst [vmem:[#allocation26_spill] sm:$0xff] %v9551_v1  ;;  %v1452_v10 = vsel %vm54_vm0, %v9536_v60, 0.0 }
 0x2c3   :  { %v1453_v57 = vadd.f32 %v1452_v10, %v1451_v52 }
 0x2c4   :  { %v1485_v31 = vsel %vm54_vm0, %v1470_v32, 0.0 }
 0x2c5   :  { %v9559_v2 = vpop.permute.xlu0 %2117  ;;  %v9561_v19 = vpop.permute.xlu1 %2351  ;;  %v1486_v39 = vadd.f32 %v1485_v31, %v1484_v9 }
 0x2c6   :  { %11857 = vst [vmem:[#allocation27_spill] sm:$0xff] %v9559_v2  ;;  %11858 = vst [vmem:[#allocation28_spill] sm:$0xff] %v9561_v19 }
 0x2c9   :  { %v9564_v32 = vpop.permute.xlu0 %1762  ;;  %v9566_v53 = vpop.permute.xlu1 %1919 }
 0x2ca   :  { %v8422_v33 = vpop.eup %8421  ;;  %11859 = vst [vmem:[#allocation29_spill] sm:$0xff] %v9566_v53 }
 0x2cb   :  { %v7218_v63 = vadd.f32 -1.0, %v8422_v33 }
 0x2cd   :  { %v1438_v54 = vsel %vm1393_vm14, %v1380_v16, %v7218_v63  ;;  %v9568_v2 = vpop.permute.xlu0 %1772  ;;  %v9570_v31 = vpop.permute.xlu1 %2001 }
 0x2ce   :  { %v1454_v1 = vsel %vm54_vm0, %v1438_v54, 0.0  ;;  %v1471_v22 = vmul.f32 %v1438_v54, %v1438_v54 }
 0x2cf   :  { %v1455_v17 = vadd.f32 %v1454_v1, %v1453_v57 }
 0x2d0   :  { %v1487_v34 = vsel %vm54_vm0, %v1471_v22, 0.0 }
 0x2d1   :  { %v1456_v0 = vrot.slane %v1455_v17, 4  ;;  %v1488_v4 = vadd.f32 %v1487_v34, %v1486_v39  ;;  %v9572_v34 = vpop.permute.xlu0 %1782 }
 0x2d3   :  { %v1457_v33 = vadd.f32 %v1456_v0, %v1455_v17  ;;  %v1489_v37 = vrot.slane %v1488_v4, 4  ;;  %v9574_v0 = vpop.permute.xlu1 %1564 }
 0x2d5   :  { %v1458_v16 = vrot.slane %v1457_v33, 2  ;;  %v1490_v63 = vadd.f32 %v1489_v37, %v1488_v4 }
 0x2d7   :  { %v1459_v41 = vadd.f32 %v1458_v16, %v1457_v33  ;;  %v1491_v10 = vrot.slane %v1490_v63, 2  ;;  %v9576_v33 = vpop.permute.xlu0 %1792  ;;  %v9578_v37 = vpop.permute.xlu1 %2006  ;;  %v11829_v16 = vlaneseq }
 0x2d8   :  { %11860 = vst [vmem:[#allocation30_spill] sm:$0xff] %v9576_v33 }
 0x2d9   :  { %v1460_v42 = vrot.slane %v1459_v41, 1  ;;  %v1492_v52 = vadd.f32 %v1491_v10, %v1490_v63  ;;  %v9585_v10 = vshrl.u32 %v11829_v16, 7 }
 0x2db   :  { %v1461_v57 = vadd.f32 %v1460_v42, %v1459_v41  ;;  %v1493_v22 = vrot.slane %v1492_v52, 1  ;;  %v9580_v63 = vpop.permute.xlu0 %1802  ;;  %v9582_v41 = vpop.permute.xlu1 %2011  ;;  %11862 = vst [vmem:[#allocation32_spill] sm:$0xff] %v9585_v10  ;;  %v1498_v42 = vld [vmem:[%s11795_s4] sm:$0x1] }
 0x2dc   :  { %11861 = vst [vmem:[#allocation31_spill] sm:$0xff] %v9580_v63 }
 0x2dd   :  { %v1462_v9 = vmul.f32 0.013888889, %v1461_v57  ;;  %v1494_v1 = vadd.f32 %v1493_v22, %v1492_v52  ;;  %v9591_v52 = vsub.s32 0, %v9585_v10 }
 0x2df   :  { %v1495_v39 = vmul.f32 0.013888889, %v1494_v1  ;;  %v1496_v17 = vmul.f32 %v1462_v9, %v1462_v9  ;;  %v9593_v57 = vpop.permute.xlu0 %1996  ;;  %v1580_v22 = vpop.permute.xlu1 %1579 }
 0x2e1   :  { %v1497_v53 = vsub.f32 %v1495_v39, %v1496_v17 }
 0x2e3   :  { %v1499_v4 = vadd.f32 1e-05, %v1497_v53  ;;  %v9603_v33 = vpop.permute.xlu0 %2021  ;;  %v9605_v36 = vpop.permute.xlu1 %2433 }
 0x2e5   :  { %8423 = vrsqrt.f32 %v1499_v4  ;;  %v1517_v4 = vld [vmem:[%s11796_s5] sm:$0x1] }
 0x2f2   :  { %v8424_v53 = vpop.eup %8423 }
 0x2f3   :  { %v1501_v1 = vmul.f32 %v8424_v53, %v1498_v42 }
 0x2f5   :  { %v1506_v39 = vrot.slane %v1501_v1, %v9591_v52  ;;  %v1518_v17 = vmul.f32 %v1501_v1, %v1462_v9 }
 0x2f7   :  { %v1508_v16 = vmul.f32 %v1506_v39, %v9433_v59  ;;  %v1509_v19 = vmul.f32 %v1506_v39, %v9437_v55  ;;  %v1510_v63 = vmul.f32 %v1506_v39, %v9449_v50  ;;  %v1511_v10 = vmul.f32 %v1506_v39, %v9458_v6 }
 0x2f8   :  { %v1519_v42 = vsub.f32 %v1517_v4, %v1518_v17  ;;  %v1512_v53 = vmul.f32 %v1506_v39, %v9520_v5  ;;  %v1513_v1 = vmul.f32 %v1506_v39, %v9522_v48  ;;  %v1514_v27 = vmul.f32 %v1506_v39, %v9530_v38  ;;  %v2027_v17 = vpop.permute.xlu0 %2026  ;;  %v2017_v4 = vpop.permute.xlu1 %2016 }
 0x2f9   :  { %v1515_v59 = vmul.f32 %v1506_v39, %v9536_v60  ;;  %v1516_v55 = vmul.f32 %v1506_v39, %v1438_v54 }
 0x2fa   :  { %v1524_v9 = vrot.slane %v1519_v42, %v9591_v52 }
 0x2fc   :  { %v1526_v49 = vadd.f32 %v1524_v9, %v1508_v16  ;;  %v1527_v50 = vadd.f32 %v1524_v9, %v1509_v19  ;;  %v1528_v35 = vadd.f32 %v1524_v9, %v1510_v63  ;;  %v1529_v6 = vadd.f32 %v1524_v9, %v1511_v10  ;;  %v1590_v54 = vpop.permute.xlu1 %1589 }
 0x2fd   :  { %v1530_v45 = vadd.f32 %v1524_v9, %v1512_v53  ;;  %v1531_v46 = vadd.f32 %v1524_v9, %v1513_v1  ;;  %v1532_v25 = vadd.f32 %v1524_v9, %v1514_v27  ;;  %v1533_v51 = vadd.f32 %v1524_v9, %v1515_v59  ;;  %v1570_v27 = vpop.permute.xlu0 %1569 }
 0x2fe   :  { %v1534_v5 = vadd.f32 %v1524_v9, %v1516_v55  ;;  %1535 = vst.msk [vmem:[#allocation2 + $0x8] sm:$0xff] %vm54_vm0, %v1526_v49  ;;  %1536 = vst.msk [vmem:[#allocation2 + $0x10] sm:$0xff] %vm54_vm0, %v1527_v50  ;;  %v8080_v49 = vld [vmem:[%s11797_s6 + $0x78] sm:$0xff]  }
 0x2ff   :  { %1537 = vst.msk [vmem:[#allocation2 + $0x18] sm:$0xff] %vm54_vm0, %v1528_v35  ;;  %1538 = vst.msk [vmem:[#allocation2 + $0x20] sm:$0xff] %vm54_vm0, %v1529_v6  ;;  %7609 = vmatprep.subr.bf16.mxu1 %v8080_v49 }
 0x300   :  { %1539 = vst.msk [vmem:[#allocation2 + $0x28] sm:$0xff] %vm54_vm0, %v1530_v45  ;;  %1540 = vst.msk [vmem:[#allocation2 + $0x30] sm:$0xff] %vm54_vm0, %v1531_v46  ;;  %v2439_v45 = vpop.permute.xlu1 %2438 }
 0x301   :  { %1541 = vst.msk [vmem:[#allocation2 + $0x38] sm:$0xff] %vm54_vm0, %v1532_v25  ;;  %1542 = vst.msk [vmem:[#allocation2 + $0x40] sm:$0xff] %vm54_vm0, %v1533_v51  ;;  %v1575_v25 = vpop.permute.xlu0 %1574 }
 0x302   :  { %1543 = vst.msk [vmem:[#allocation2 + $0x48] sm:$0xff] %vm54_vm0, %v1534_v5 }
 0x304   :  { %v2032_v50 = vpop.permute.xlu1 %2031 }
 0x305   :  { %v2057_v48 = vld [vmem:[#allocation2 + $0x9] sm:$0xff]  ;;  %v1544_v63 = vld [vmem:[#allocation2 + $0x1] sm:$0xff]  ;;  %v1585_v55 = vpop.permute.xlu0 %1584 }
 0x306   :  { %v9624_v35 = vld [vmem:[#allocation2 + $0x19] sm:$0xff]  ;;  %v2120_v38 = vmul.f32 %v9512_v30, %v2057_v48  ;;  %v1608_v46 = vmul.f32 %v2057_v48, %v1570_v27  ;;  %v1977_v16 = vld [vmem:[#allocation2 + $0x10] sm:$0xff]  ;;  %v1607_v10 = vmul.f32 %v9574_v0, %v1544_v63  ;;  %v1976_v9 = vld [vmem:[#allocation2 + $0x8] sm:$0xff] }
 0x307   :  { %v1610_v60 = vmul.f32 %v9624_v35, %v1580_v22  ;;  %v9630_v51 = vld [vmem:[#allocation2 + $0x29] sm:$0xff]  ;;  %v2040_v30 = vmul.f32 %v9570_v31, %v1977_v16  ;;  %v1978_v22 = vld [vmem:[#allocation2 + $0x18] sm:$0xff]  ;;  %v1979_v39 = vld [vmem:[#allocation2 + $0x20] sm:$0xff]  ;;  %v2039_v31 = vmul.f32 %v9593_v57, %v1976_v9 }
 0x308   :  { %2138 = vrot.lane.b32.xlu0 %v2120_v38, %s8483_s29  ;;  %1617 = vst.msk [vmem:[#allocation3 + $0x18] sm:$0xff] %vm54_vm0, %v1608_v46  ;;  %v1612_v19 = vmul.f32 %v9630_v51, %v1590_v54  ;;  %v2041_v42 = vmul.f32 %v9578_v37, %v1978_v22  ;;  %v2042_v53 = vmul.f32 %v9582_v41, %v1979_v39  ;;  %v1981_v1 = vld [vmem:[#allocation2 + $0x30] sm:$0xff]  ;;  %1616 = vst.msk [vmem:[#allocation3] sm:$0xff] %vm54_vm0, %v1607_v10  ;;  %v1982_v5 = vld [vmem:[#allocation2 + $0x38] sm:$0xff] }
 0x309   :  { %1619 = vst.msk [vmem:[#allocation3 + $0x48] sm:$0xff] %vm54_vm0, %v1610_v60  ;;  %2049 = vst.msk [vmem:[#allocation3 + $0x20] sm:$0xff] %vm54_vm0, %v2040_v30  ;;  %v9640_v59 = vld [vmem:[#allocation2 + $0x17] sm:$0xff]  ;;  %v2044_v0 = vmul.f32 %v9603_v33, %v1981_v1  ;;  %v1980_v27 = vld [vmem:[#allocation2 + $0x28] sm:$0xff]  ;;  %v2045_v41 = vmul.f32 %v2027_v17, %v1982_v5 }
 0x30a   :  { %1621 = vst.msk [vmem:[#allocation3 + $0x78] sm:$0xff] %vm54_vm0, %v1612_v19  ;;  %v2472_v6 = vmul.f32 %v9605_v36, %v9640_v59  ;;  %v1546_v37 = vld [vmem:[#allocation2 + $0x11] sm:$0xff]  ;;  %2050 = vst.msk [vmem:[#allocation3 + $0x38] sm:$0xff] %vm54_vm0, %v2041_v42  ;;  %v2043_v54 = vmul.f32 %v2017_v4, %v1980_v27  ;;  %v9649_v48 = vld [vmem:[#allocation2 + $0x1f] sm:$0xff] }
 0x30b   :  { %2051 = vst.msk [vmem:[#allocation3 + $0x50] sm:$0xff] %vm54_vm0, %v2042_v53  ;;  %v1609_v49 = vmul.f32 %v1575_v25, %v1546_v37  ;;  %v9651_v38 = vld [vmem:[#allocation2 + $0x21] sm:$0xff]  ;;  %v2121_v33 = vmul.f32 %v9357_v8, %v1546_v37  ;;  %2048 = vst.msk [vmem:[#allocation3 + $0x8] sm:$0xff] %vm54_vm0, %v2039_v31  ;;  %v2473_v36 = vmul.f32 %v2439_v45, %v9649_v48  ;;  %v1626_v4 = vld [vmem:[#allocation2 + $0xa] sm:$0xff] }
 0x30c   :  { %v1983_v57 = vld [vmem:[#allocation2 + $0x40] sm:$0xff]  ;;  %2053 = vst.msk [vmem:[#allocation3 + $0x80] sm:$0xff] %vm54_vm0, %v2044_v0  ;;  %2481 = vst.msk [vmem:[#allocation3 + $0x28] sm:$0xff] %vm54_vm0, %v2472_v6  ;;  %v1611_v60 = vmul.f32 %v1585_v55, %v9651_v38  ;;  %v2174_v25 = vld [vmem:[#allocation2 + $0xd] sm:$0xff]  ;;  %v1689_v45 = vmul.f32 %v9475_v44, %v1626_v4  ;;  %v2122_v37 = vmul.f32 %v9516_v28, %v9624_v35 }
 0x30d   :  { %v2046_v17 = vmul.f32 %v2032_v50, %v1983_v57  ;;  %v1625_v46 = vld [vmem:[#allocation2 + $0x2] sm:$0xff]  ;;  %2054 = vst.msk [vmem:[#allocation3 + $0x98] sm:$0xff] %vm54_vm0, %v2045_v41  ;;  %2052 = vst.msk [vmem:[#allocation3 + $0x68] sm:$0xff] %vm54_vm0, %v2043_v54  ;;  %2140 = vrot.lane.b32.xlu1 %v2121_v33, %s8483_s29  ;;  %v2175_v19 = vld [vmem:[#allocation2 + $0x15] sm:$0xff]  ;;  %v2237_v16 = vmul.f32 %v9365_v62, %v2174_v25 }
 0x30e   :  { %1618 = vst.msk [vmem:[#allocation3 + $0x30] sm:$0xff] %vm54_vm0, %v1609_v49  ;;  %v1688_v8 = vmul.f32 %v9361_v29, %v1625_v46  ;;  %2482 = vst.msk [vmem:[#allocation3 + $0x40] sm:$0xff] %vm54_vm0, %v2473_v36  ;;  %v1742_v30 = vld [vmem:[#allocation2 + $0x3] sm:$0xff]  ;;  %v2238_v63 = vmul.f32 %v9369_v26, %v2175_v19  ;;  %v1743_v29 = vld [vmem:[#allocation2 + $0xb] sm:$0xff]  ;;  %v2123_v49 = vmul.f32 %v9390_v23, %v9651_v38 }
 0x30f   :  { %1620 = vst.msk [vmem:[#allocation3 + $0x60] sm:$0xff] %vm54_vm0, %v1611_v60  ;;  %2055 = vst.msk [vmem:[#allocation3 + $0xb0] sm:$0xff] %vm54_vm0, %v2046_v17  ;;  %v2291_v10 = vld [vmem:[#allocation2 + $0xe] sm:$0xff]  ;;  %v8081_v22 = vld [vmem:[%s11797_s6 + $0x38] sm:$0xff]   ;;  %v1805_v44 = vmul.f32 %v9564_v32, %v1742_v30  ;;  %v1806_v26 = vmul.f32 %v9374_v21, %v1743_v29 }
 0x310   :  { %1706 = vrot.lane.b32.xlu0 %v1688_v8, %s8483_s29  ;;  %v8082_v39 = vld [vmem:[%s11797_s6 + $0x70] sm:$0xff]   ;;  %7610 = vmatpush3.bf16.msra.mxu1 %v8081_v22  ;;  %v8084_v32 = vld [vmem:[%s11797_s6 + $0x68] sm:$0xff]   ;;  %v2354_v53 = vmul.f32 %v9379_v43, %v2291_v10  ;;  %v8086_v55 = vld [vmem:[%s11797_s6 + $0x60] sm:$0xff]  }
 0x311   :  { %1708 = vrot.lane.b32.xlu1 %v1689_v45, %s8483_s29  ;;  %v8083_v62 = vld [vmem:[%s11797_s6 + $0x30] sm:$0xff]   ;;  %7611 = vmatprep.subr.bf16.mxu1 %v8082_v39  ;;  %v8085_v1 = vld [vmem:[%s11797_s6 + $0x28] sm:$0xff]   ;;  %v1628_v31 = vld [vmem:[#allocation2 + $0x1a] sm:$0xff] }
 0x312   :  { %v2292_v42 = vld [vmem:[#allocation2 + $0x16] sm:$0xff]  ;;  %v1859_v50 = vld [vmem:[#allocation2 + $0x7] sm:$0xff]  ;;  %v2293_v46 = vld [vmem:[#allocation2 + $0x1e] sm:$0xff] }
 0x313   :  { %v9691_v9 = vld [vmem:[#allocation2 + $0xf] sm:$0xff]  ;;  %v2355_v21 = vmul.f32 %v9493_v15, %v2292_v42  ;;  %v8087_v0 = vld [vmem:[%s11797_s6 + $0x20] sm:$0xff]   ;;  %v1922_v15 = vmul.f32 %v9383_v18, %v1859_v50  ;;  %v8088_v6 = vld [vmem:[%s11797_s6 + $0x58] sm:$0xff]   ;;  %v2356_v25 = vmul.f32 %v9423_v3, %v2293_v46  ;;  %v1925_v3 = vmul.f32 %v9649_v48, %v9429_v47 }
 0x314   :  { %2255 = vrot.lane.b32.xlu0 %v2237_v16, %s8484_s30  ;;  %7612 = vmatpush3.bf16.msra.mxu1 %v8083_v62  ;;  %v1923_v43 = vmul.f32 %v9386_v58, %v9691_v9  ;;  %v2177_v5 = vld [vmem:[#allocation2 + $0x25] sm:$0xff]  ;;  %v1691_v58 = vmul.f32 %v9479_v7, %v1628_v31  ;;  %v8089_v27 = vld [vmem:[%s11797_s6 + $0x18] sm:$0xff]   ;;  %v8090_v18 = vld [vmem:[%s11797_s6 + $0x50] sm:$0xff]  }
 0x315   :  { %2257 = vrot.lane.b32.xlu1 %v2238_v63, %s8484_s30  ;;  %7613 = vmatprep.subr.bf16.mxu1 %v8084_v32  ;;  %v2240_v41 = vmul.f32 %v9404_v24, %v2177_v5  ;;  %v1745_v7 = vld [vmem:[#allocation2 + $0x1b] sm:$0xff]  ;;  %v8091_v54 = vld [vmem:[%s11797_s6 + $0x10] sm:$0xff]   ;;  %v8092_v28 = vld [vmem:[%s11797_s6 + $0x48] sm:$0xff]  }
 0x316   :  { %v1627_v35 = vld [vmem:[#allocation2 + $0x12] sm:$0xff]  ;;  %v1808_v24 = vmul.f32 %v9418_v11, %v1745_v7  ;;  %v2294_v57 = vld [vmem:[#allocation2 + $0x26] sm:$0xff]  ;;  %v2176_v36 = vld [vmem:[#allocation2 + $0x1d] sm:$0xff] }
 0x317   :  { %v8093_v33 = vld [vmem:[%s11797_s6 + $0x8] sm:$0xff]   ;;  %v1690_v23 = vmul.f32 %v9395_v40, %v1627_v35  ;;  %v8094_v38 = vld [vmem:[%s11797_s6 + $0x40] sm:$0xff]   ;;  %v2357_v60 = vmul.f32 %v9497_v13, %v2294_v57  ;;  %v2239_v17 = vmul.f32 %v9400_v20, %v2176_v36  ;;  %v1744_v40 = vld [vmem:[#allocation2 + $0x13] sm:$0xff] }
 0x318   :  { %1823 = vrot.lane.b32.xlu0 %v1805_v44, %s8484_s30  ;;  %7614 = vmatpush3.bf16.msra.mxu1 %v8085_v1  ;;  %v8095_v11 = vld [vmem:[%s11797_s6] sm:$0xff]   ;;  %v9752_v4 = vld [vmem:[#allocation2 + $0x31] sm:$0xff]  ;;  %v1807_v13 = vmul.f32 %v9568_v2, %v1744_v40  ;;  %v1924_v2 = vmul.f32 %v9640_v59, %v9426_v12  ;;  %v8096_v31 = vld [vmem:[%s11797_s6 + $0x88] sm:$0xff]  }
 0x319   :  { %1825 = vrot.lane.b32.xlu1 %v1806_v26, %s8484_s30  ;;  %7615 = vmatprep.subr.bf16.mxu1 %v8086_v55  ;;  %v2125_v8 = vmul.f32 %v9431_v56, %v9752_v4  ;;  %v2178_v20 = vld [vmem:[#allocation2 + $0x2d] sm:$0xff]  ;;  %v1746_v19 = vld [vmem:[#allocation2 + $0x23] sm:$0xff]  ;;  %v11863_v16 = vld [vmem:[#allocation8_spill] sm:$0xff]  ;;  %v11868_v26 = vmov 8  }
 0x31a   :  { %v2241_v45 = vmul.f32 %v9451_v14, %v2178_v20  ;;  %v2295_v56 = vld [vmem:[#allocation2 + $0x2e] sm:$0xff]  ;;  %v9781_v29 = vld [vmem:[#allocation2 + $0x39] sm:$0xff]  ;;  %v1629_v48 = vld [vmem:[#allocation2 + $0x22] sm:$0xff]  ;;  %7837 = vmatpush3.bf16.msra.mxu0 %v8096_v31 }
 0x31b   :  { %v2358_v14 = vmul.f32 %v11863_v16, %v2295_v56  ;;  %v9773_v30 = vld [vmem:[#allocation2 + $0x2f] sm:$0xff]  ;;  %v11866_v10 = vld [vmem:[#allocation25_spill] sm:$0xff]  ;;  %v11877_v36 = vld [vmem:[#allocation20_spill] sm:$0xff] }
 0x31c   :  { %2372 = vrot.lane.b32.xlu0 %v2354_v53, %s8485_s1  ;;  %7616 = vmatpush3.bf16.msra.mxu1 %v8087_v0  ;;  %v11864_v12 = vld [vmem:[#allocation23_spill] sm:$0xff]  ;;  %v11867_v22 = vld [vmem:[#allocation5_spill] sm:$0xff]  ;;  %v1630_v39 = vld [vmem:[#allocation2 + $0x2a] sm:$0xff] }
 0x31d   :  { %2374 = vrot.lane.b32.xlu1 %v2355_v21, %s8485_s1  ;;  %7617 = vmatprep.subr.bf16.mxu1 %v8088_v6  ;;  %v2124_v59 = vmul.f32 %v11864_v12, %v9630_v51  ;;  %v9786_v47 = vld [vmem:[%s11834_s23 + $0x30] sm:$0xff]  ;;  %v2126_v51 = vmul.f32 %v11866_v10, %v9781_v29  ;;  %v1692_v44 = vmul.f32 %v11867_v22, %v1629_v48  ;;  %v9797_v62 = vld [vmem:[%s11834_s23 + $0x40] sm:$0xff] }
 0x31e   :  { %v11869_v32 = vld [vmem:[#allocation11_spill] sm:$0xff]  ;;  %v9807_v1 = vld [vmem:[%s11834_s23] sm:$0xff]  ;;  %v11870_v21 = vld [vmem:[#allocation6_spill] sm:$0xff] }
 0x31f   :  { %v1693_v42 = vmul.f32 %v11869_v32, %v1630_v39  ;;  %v2179_v53 = vld [vmem:[#allocation2 + $0x35] sm:$0xff]  ;;  %v1747_v50 = vld [vmem:[#allocation2 + $0x2b] sm:$0xff]  ;;  %v9827_v5 = vld [vmem:[%s11834_s23 + $0x20] sm:$0xff] }
 0x320   :  { %1942 = vrot.lane.b32.xlu0 %v1923_v43, %s8485_s1  ;;  %7618 = vmatpush3.bf16.msra.mxu1 %v8089_v27  ;;  %v2242_v55 = vmul.f32 %v11870_v21, %v2179_v53  ;;  %v9816_v43 = vld [vmem:[%s11834_s23 + $0x18] sm:$0xff]  ;;  %v8097_v27 = vld [vmem:[%s11797_s6 + $0x80] sm:$0xff]   ;;  %v11880_v20 = vld [vmem:[#allocation22_spill] sm:$0xff] }
 0x321   :  { %1940 = vrot.lane.b32.xlu1 %v1922_v15, %s8485_s1  ;;  %7619 = vmatprep.subr.bf16.mxu1 %v8090_v18  ;;  %v11871_v0 = vld [vmem:[#allocation7_spill] sm:$0xff]  ;;  %v2180_v18 = vld [vmem:[#allocation2 + $0x3d] sm:$0xff]  ;;  %v9844_v35 = vld [vmem:[#allocation2 + $0x27] sm:$0xff] }
 0x322   :  { %v1810_v15 = vmul.f32 %v11871_v0, %v1747_v50  ;;  %v2296_v6 = vld [vmem:[#allocation2 + $0x36] sm:$0xff]  ;;  %v9858_v40 = vld [vmem:[#allocation2 + $0x3f] sm:$0xff]  ;;  %v11888_v50 = vmov 1  }
 0x323   :  { %v11874_v7 = vld [vmem:[#allocation15_spill] sm:$0xff]  ;;  %v11882_v56 = vld [vmem:[#allocation24_spill] sm:$0xff]  ;;  %v11883_v16 = vld [vmem:[#allocation13_spill] sm:$0xff] }
 0x324   :  { %1712 = vrot.lane.b32.xlu0 %v1691_v58, %s8483_s29  ;;  %7620 = vmatpush3.bf16.msra.mxu1 %v8091_v54  ;;  %v11872_v58 = vmov 0.0   ;;  %v2243_v54 = vmul.f32 %v11874_v7, %v2180_v18  ;;  %v1750_v12 = vld [vmem:[#allocation2 + $0x43] sm:$0xff]  ;;  %v11885_v10 = vld [vmem:[#allocation16_spill] sm:$0xff] }
 0x325   :  { %2142 = vrot.lane.b32.xlu1 %v2122_v37, %s8483_s29  ;;  %7621 = vmatprep.subr.bf16.mxu1 %v8092_v28  ;;  %v11873_v37 = vld [vmem:[#allocation17_spill] sm:$0xff]  ;;  %v1748_v28 = vld [vmem:[#allocation2 + $0x33] sm:$0xff] }
 0x326   :  { %7838 = vmatprep.subr.bf16.mxu0 %v11872_v58  ;;  %v1749_v22 = vld [vmem:[#allocation2 + $0x3b] sm:$0xff]  ;;  %v2298_v32 = vld [vmem:[#allocation2 + $0x46] sm:$0xff] }
 0x327   :  { %7839 = vmatpush3.bf16.msra.mxu0 %v8097_v27  ;;  %v11889_v18 = vld [vmem:[#allocation21_spill] sm:$0xff] }
 0x328   :  { %2261 = vrot.lane.b32.xlu0 %v2240_v41, %s8484_s30  ;;  %7622 = vmatpush3.bf16.msra.mxu1 %v8093_v33  ;;  %v2359_v41 = vmul.f32 %v11873_v37, %v2296_v6  ;;  %v2297_v33 = vld [vmem:[#allocation2 + $0x3e] sm:$0xff]  ;;  %v2065_v7 = vld [vmem:[#allocation2 + $0x49] sm:$0xff] }
 0x329   :  { %2144 = vrot.lane.b32.xlu1 %v2123_v49, %s8483_s29  ;;  %7623 = vmatprep.subr.bf16.mxu1 %v8094_v38  ;;  %v9841_v49 = vld [vmem:[%s11834_s23 + $0x28] sm:$0xff]  ;;  %v8473_v6 = vld [vmem:[%s11834_s23 + $0x38] sm:$0xff] }
 0x32a   :  { %7860 = vmatprep.subr.bf16.mxu0 %v11872_v58 }
 0x32c   :  { %1829 = vrot.lane.b32.xlu0 %v1808_v24, %s8484_s30  ;;  %7624 = vmatpush3.bf16.msra.mxu1 %v8095_v11  ;;  %v11875_v24 = vld [vmem:[#allocation30_spill] sm:$0xff]  ;;  %v11878_v11 = vmov 4  }
 0x32d   :  { %1710 = vrot.lane.b32.xlu1 %v1690_v23, %s8483_s29  ;;  %v1811_v57 = vmul.f32 %v11875_v24, %v1748_v28  ;;  %v11876_v23 = vld [vmem:[#allocation9_spill] sm:$0xff]  ;;  %v11890_v28 = vmov 5   ;;  %v11891_v24 = vld [vmem:[#allocation27_spill] sm:$0xff] }
 0x32e   :  { %v1926_v38 = vmul.f32 %v11876_v23, %v9844_v35  ;;  %v2182_v23 = vld [vmem:[#allocation2 + $0x4d] sm:$0xff] }
 0x330   :  { %2378 = vrot.lane.b32.xlu0 %v2357_v60, %s8485_s1  ;;  %v2360_v60 = vmul.f32 %v11877_v36, %v2297_v33  ;;  %v11892_v36 = vld [vmem:[#allocation26_spill] sm:$0xff] }
 0x331   :  { %2259 = vrot.lane.b32.xlu1 %v2239_v17, %s8484_s30  ;;  %v9855_v17 = vld [vmem:[#allocation2 + $0x41] sm:$0xff] }
 0x334   :  { %1599 = vperm.xlu0 %8007, %v9409_v61   ;;  %v1809_v61 = vmul.f32 %v9572_v34, %v1746_v19  ;;  %v11865_v34 = vld [vmem:[#allocation10_spill] sm:$0xff] }
 0x335   :  { %1827 = vrot.lane.b32.xlu1 %v1807_v13, %s8484_s30  ;;  %v1927_v63 = vmul.f32 %v11865_v34, %v9773_v30  ;;  %v11879_v13 = vld [vmem:[#allocation12_spill] sm:$0xff] }
 0x336   :  { %v2127_v46 = vmul.f32 %v11879_v13, %v9855_v17 }
 0x338   :  { %2148 = vrot.lane.b32.xlu0 %v2125_v8, %s8483_s29  ;;  %v1631_v8 = vld [vmem:[#allocation2 + $0x32] sm:$0xff] }
 0x339   :  { %2376 = vrot.lane.b32.xlu1 %v2356_v25, %s8485_s1  ;;  %v1929_v25 = vmul.f32 %v11880_v20, %v9858_v40  ;;  %v11893_v20 = vld [vmem:[#allocation28_spill] sm:$0xff] }
 0x33c   :  { %2263 = vrot.lane.b32.xlu0 %v2241_v45, %s8484_s30  ;;  %v11881_v45 = vld [vmem:[#allocation14_spill] sm:$0xff] }
 0x33d   :  { %1944 = vrot.lane.b32.xlu1 %v1924_v2, %s8485_s1  ;;  %v1694_v19 = vmul.f32 %v11881_v45, %v1631_v8  ;;  %v1633_v2 = vld [vmem:[#allocation2 + $0x42] sm:$0xff] }
 0x340   :  { %1831 = vrot.lane.b32.xlu0 %v1809_v61, %s8484_s30  ;;  %v1632_v61 = vld [vmem:[#allocation2 + $0x3a] sm:$0xff] }
 0x341   :  { %1946 = vrot.lane.b32.xlu1 %v1925_v3, %s8485_s1  ;;  %v1696_v3 = vmul.f32 %v11882_v56, %v1633_v2  ;;  %v11894_v56 = vld [vmem:[#allocation29_spill] sm:$0xff] }
 0x344   :  { %2380 = vrot.lane.b32.xlu0 %v2358_v14, %s8485_s1  ;;  %v1695_v14 = vmul.f32 %v11883_v16, %v1632_v61 }
 0x345   :  { %2146 = vrot.lane.b32.xlu1 %v2124_v59, %s8483_s29  ;;  %v2181_v59 = vld [vmem:[#allocation2 + $0x45] sm:$0xff] }
 0x348   :  { %1950 = vrot.lane.b32.xlu0 %v1927_v63, %s8485_s1  ;;  %v11884_v63 = vld [vmem:[#allocation31_spill] sm:$0xff] }
 0x349   :  { %1594 = vperm.xlu1 %8009, %v9786_v47   ;;  %v1813_v48 = vmul.f32 %v11884_v63, %v1750_v12 }
 0x34c   :  { %2150 = vrot.lane.b32.xlu0 %v2126_v51, %s8483_s29  ;;  %v2244_v51 = vmul.f32 %v11885_v10, %v2181_v59 }
 0x34d   :  { %1714 = vrot.lane.b32.xlu1 %v1692_v44, %s8483_s29  ;;  %v11886_v44 = vld [vmem:[#allocation18_spill] sm:$0xff] }
 0x34e   :  { %8010 = vset.pattern.permute.xlu1 %v11868_v26  ;;  %v1812_v39 = vmul.f32 %v11886_v44, %v1749_v22  ;;  %v9933_v44 = vld [vmem:[%s11834_s23 + $0x38] sm:$0xff] }
 0x350   :  { %1604 = vperm.xlu0 %8007, %v9797_v62  }
 0x351   :  { %1716 = vrot.lane.b32.xlu1 %v1693_v42, %s8483_s29  ;;  %v11887_v42 = vld [vmem:[#allocation19_spill] sm:$0xff] }
 0x352   :  { %v2361_v53 = vmul.f32 %v11887_v42, %v2298_v32  ;;  %v11895_v42 = vmov 7  }
 0x354   :  { %8012 = vset.pattern.permute.xlu0 %v11868_v26 }
 0x355   :  { %2428 = vperm.xlu0 %8012, %v9807_v1   ;;  %2265 = vrot.lane.b32.xlu1 %v2242_v55, %s8484_s30  ;;  %v9887_v55 = vld [vmem:[%s11834_s23 + $0x8] sm:$0xff] }
 0x359   :  { %2443 = vperm.xlu0 %8012, %v9816_v43   ;;  %1833 = vrot.lane.b32.xlu1 %v1810_v15, %s8484_s30  ;;  %v9893_v15 = vld [vmem:[#allocation2 + $0x37] sm:$0xff] }
 0x35a   :  { %v1928_v37 = vmul.f32 %v11889_v18, %v9893_v15  ;;  %v11897_v18 = vmov 2  }
 0x35d   :  { %2448 = vperm.xlu0 %8012, %v9827_v5   ;;  %2382 = vrot.lane.b32.xlu1 %v2359_v41, %s8485_s1 }
 0x361   :  { %2267 = vrot.lane.b32.xlu0 %v2243_v54, %s8484_s30  ;;  %2453 = vperm.xlu1 %8010, %v9841_v49  }
 0x365   :  { %1835 = vrot.lane.b32.xlu0 %v1811_v57, %s8484_s30  ;;  %1948 = vrot.lane.b32.xlu1 %v1926_v38, %s8485_s1  ;;  %v2128_v57 = vmul.f32 %v11891_v24, %v2065_v7 }
 0x366   :  { %8011 = vset.pattern.permute.xlu1 %v11878_v11 }
 0x369   :  { %2384 = vrot.lane.b32.xlu0 %v2360_v60, %s8485_s1  ;;  %2036 = vperm.xlu1 %8011, %v9797_v62   ;;  %v2245_v60 = vmul.f32 %v11892_v36, %v2182_v23  ;;  %v9968_v23 = vld [vmem:[%s11834_s23 + $0x10] sm:$0xff] }
 0x36d   :  { %2458 = vperm.xlu0 %8012, %v9786_v47   ;;  %2152 = vrot.lane.b32.xlu1 %v2127_v46, %s8483_s29  ;;  %v2299_v46 = vld [vmem:[#allocation2 + $0x4e] sm:$0xff] }
 0x36e   :  { %8013 = vset.pattern.permute.xlu1 %v11868_v26 }
 0x371   :  { %1954 = vrot.lane.b32.xlu0 %v1929_v25, %s8485_s1  ;;  %1718 = vrot.lane.b32.xlu1 %v1694_v19, %s8483_s29  ;;  %v2362_v25 = vmul.f32 %v11893_v20, %v2299_v46  ;;  %v9917_v19 = vld [vmem:[#allocation2 + $0x47] sm:$0xff] }
 0x375   :  { %1722 = vrot.lane.b32.xlu0 %v1696_v3, %s8483_s29  ;;  %1720 = vrot.lane.b32.xlu1 %v1695_v14, %s8483_s29  ;;  %v1930_v3 = vmul.f32 %v11894_v56, %v9917_v19 }
 0x379   :  { %1839 = vrot.lane.b32.xlu0 %v1813_v48, %s8484_s30  ;;  %2269 = vrot.lane.b32.xlu1 %v2244_v51, %s8484_s30 }
 0x37a   :  { %v2139_v34 = vpop.permute.xlu0 %2138 }
 0x37b   :  { %2165 = vst.msk [vmem:[#allocation3 + $0x8] sm:$0xff] %vm274_vm3, %v2139_v34 }
 0x37d   :  { %2468 = vperm.xlu0 %8012, %v9797_v62   ;;  %1837 = vrot.lane.b32.xlu1 %v1812_v39, %s8484_s30 }
 0x37f   :  { %v2141_v21 = vpop.permute.xlu1 %2140 }
 0x380   :  { %2166 = vst.msk [vmem:[#allocation3 + $0x20] sm:$0xff] %vm274_vm3, %v2141_v21 }
 0x381   :  { %8016 = vset.pattern.permute.xlu0 %v11888_v50  ;;  %2386 = vrot.lane.b32.xlu1 %v2361_v53, %s8485_s1  ;;  %v11896_v53 = vmov 6  }
 0x382   :  { %v1707_v31 = vpop.permute.xlu0 %1706  ;;  %3106 = vperm.xlu0 %8016, %v9887_v55  }
 0x383   :  { %1733 = vst.msk [vmem:[#allocation3] sm:$0xff] %vm274_vm3, %v1707_v31  ;;  %v1709_v0 = vpop.permute.xlu1 %1708 }
 0x384   :  { %1734 = vst.msk [vmem:[#allocation3 + $0x18] sm:$0xff] %vm274_vm3, %v1709_v0 }
 0x385   :  { %2463 = vperm.xlu1 %8013, %v8473_v6  }
 0x386   :  { %v2256_v27 = vpop.permute.xlu0 %2255  ;;  %3116 = vperm.xlu0 %8016, %v9816_v43  }
 0x387   :  { %2282 = vst.msk [vmem:[#allocation3 + $0x8] sm:$0xff] %vm392_vm4, %v2256_v27  ;;  %v2258_v41 = vpop.permute.xlu1 %2257 }
 0x388   :  { %2283 = vst.msk [vmem:[#allocation3 + $0x20] sm:$0xff] %vm392_vm4, %v2258_v41 }
 0x389   :  { %1952 = vrot.lane.b32.xlu1 %v1928_v37, %s8485_s1 }
 0x38a   :  { %v1824_v54 = vpop.permute.xlu0 %1823  ;;  %3126 = vperm.xlu0 %8016, %v9841_v49   ;;  %8014 = vset.pattern.permute.xlu1 %v11890_v28 }
 0x38b   :  { %1850 = vst.msk [vmem:[#allocation3] sm:$0xff] %vm392_vm4, %v1824_v54  ;;  %v1826_v33 = vpop.permute.xlu1 %1825 }
 0x38c   :  { %1851 = vst.msk [vmem:[#allocation3 + $0x18] sm:$0xff] %vm392_vm4, %v1826_v33  ;;  %v11898_v33 = vmov 3  }
 0x38d   :  { %2154 = vrot.lane.b32.xlu1 %v2128_v57, %s8483_s29 }
 0x38e   :  { %v2373_v38 = vpop.permute.xlu0 %2372  ;;  %3136 = vperm.xlu0 %8016, %v9933_v44  }
 0x38f   :  { %2399 = vst.msk [vmem:[#allocation3 + $0x8] sm:$0xff] %vm510_vm5, %v2373_v38  ;;  %v2375_v13 = vpop.permute.xlu1 %2374 }
 0x390   :  { %2400 = vst.msk [vmem:[#allocation3 + $0x20] sm:$0xff] %vm510_vm5, %v2375_v13 }
 0x391   :  { %2271 = vrot.lane.b32.xlu1 %v2245_v60, %s8484_s30 }
 0x392   :  { %v1943_v8 = vpop.permute.xlu0 %1942  ;;  %8035 = vset.pattern.permute.xlu0 %v11895_v42 }
 0x393   :  { %1968 = vst.msk [vmem:[#allocation3 + $0x18] sm:$0xff] %vm510_vm5, %v1943_v8  ;;  %v1941_v45 = vpop.permute.xlu1 %1940  ;;  %3772 = vperm.xlu0 %8035, %v9887_v55  }
 0x394   :  { %1967 = vst.msk [vmem:[#allocation3] sm:$0xff] %vm510_vm5, %v1941_v45 }
 0x395   :  { %2388 = vrot.lane.b32.xlu1 %v2362_v25, %s8485_s1 }
 0x396   :  { %v1713_v2 = vpop.permute.xlu0 %1712  ;;  %v2490_v61 = vld [vmem:[#allocation3 + $0x8] sm:$0xff] }
 0x397   :  { %1736 = vst.msk [vmem:[#allocation3 + $0x48] sm:$0xff] %vm274_vm3, %v1713_v2  ;;  %v2143_v16 = vpop.permute.xlu1 %2142  ;;  %v2493_v14 = vld [vmem:[#allocation3 + $0x20] sm:$0xff]  ;;  %3782 = vperm.xlu0 %8035, %v9816_v43  }
 0x398   :  { %2167 = vst.msk [vmem:[#allocation3 + $0x38] sm:$0xff] %vm274_vm3, %v2143_v16  ;;  %v2517_v12 = vpack.c.bf16 %v2493_v14, %v2490_v61 }
 0x399   :  { %1956 = vrot.lane.b32.xlu1 %v1930_v3, %s8485_s1 }
 0x39a   :  { %v2262_v59 = vpop.permute.xlu0 %2261  ;;  %v2492_v34 = vld [vmem:[#allocation3 + $0x18] sm:$0xff]  ;;  %2729 = vmatprep.mubr.bf16.mxu1 %v2517_v12 }
 0x39b   :  { %v2145_v63 = vpop.permute.xlu1 %2144  ;;  %v2489_v48 = vld [vmem:[#allocation3] sm:$0xff]  ;;  %3792 = vperm.xlu0 %8035, %v9841_v49  }
 0x39c   :  { %2168 = vst.msk [vmem:[#allocation3 + $0x50] sm:$0xff] %vm274_vm3, %v2145_v63  ;;  %v2516_v10 = vpack.c.bf16 %v2492_v34, %v2489_v48  ;;  %v2494_v48 = vld [vmem:[#allocation3 + $0x28] sm:$0xff] }
 0x39d   :  { %2285 = vst.msk [vmem:[#allocation3 + $0x50] sm:$0xff] %vm392_vm4, %v2262_v59  ;;  %3538 = vperm.xlu1 %8014, %v9887_v55  }
 0x39e   :  { %v1830_v51 = vpop.permute.xlu0 %1829  ;;  %2730 = vmatmul.mubr.bf16.vlgmr.msra.gmra.mxu1 %v2516_v10 }
 0x39f   :  { %1853 = vst.msk [vmem:[#allocation3 + $0x48] sm:$0xff] %vm392_vm4, %v1830_v51  ;;  %v1711_v22 = vpop.permute.xlu1 %1710  ;;  %3802 = vperm.xlu0 %8035, %v9933_v44  }
 0x3a0   :  { %1735 = vst.msk [vmem:[#allocation3 + $0x30] sm:$0xff] %vm274_vm3, %v1711_v22 }
 0x3a1   :  { %8015 = vset.pattern.permute.xlu1 %v11888_v50 }
 0x3a2   :  { %v2379_v39 = vpop.permute.xlu0 %2378  ;;  %3101 = vperm.xlu1 %8015, %v9807_v1  }
 0x3a3   :  { %2402 = vst.msk [vmem:[#allocation3 + $0x50] sm:$0xff] %vm510_vm5, %v2379_v39  ;;  %v2260_v32 = vpop.permute.xlu1 %2259  ;;  %8039 = vset.pattern.permute.xlu0 %v11890_v28 }
 0x3a4   :  { %2284 = vst.msk [vmem:[#allocation3 + $0x38] sm:$0xff] %vm392_vm4, %v2260_v32  ;;  %3533 = vperm.xlu0 %8039, %v9807_v1  }
 0x3a6   :  { %8017 = vset.pattern.permute.xlu1 %v11896_v53 }
 0x3a7   :  { %v1828_v21 = vpop.permute.xlu1 %1827  ;;  %3650 = vperm.xlu1 %8017, %v9807_v1  }
 0x3a8   :  { %1852 = vst.msk [vmem:[#allocation3 + $0x30] sm:$0xff] %vm392_vm4, %v1828_v21  ;;  %3543 = vperm.xlu0 %8039, %v9968_v23  }
 0x3aa   :  { %v2499_v54 = vld [vmem:[#allocation3 + $0x50] sm:$0xff] }
 0x3ab   :  { %v2377_v31 = vpop.permute.xlu1 %2376  ;;  %3655 = vperm.xlu1 %8017, %v9887_v55  }
 0x3ac   :  { %2401 = vst.msk [vmem:[#allocation3 + $0x38] sm:$0xff] %vm510_vm5, %v2377_v31  ;;  %3553 = vperm.xlu0 %8039, %v9827_v5  }
 0x3af   :  { %v1600_v0 = vpop.permute.xlu0 %1599  ;;  %v1945_v6 = vpop.permute.xlu1 %1944  ;;  %8018 = vset.pattern.permute.xlu1 %v11897_v18 }
 0x3b0   :  { %v1614_v27 = vmul.f32 %v9781_v29, %v1600_v0  ;;  %1969 = vst.msk [vmem:[#allocation3 + $0x30] sm:$0xff] %vm510_vm5, %v1945_v6  ;;  %3223 = vperm.xlu1 %8018, %v9887_v55   ;;  %3563 = vperm.xlu0 %8039, %v9786_v47  }
 0x3b2   :  { %1623 = vst.msk [vmem:[#allocation3 + $0xa8] sm:$0xff] %vm54_vm0, %v1614_v27 }
 0x3b3   :  { %v2149_v37 = vpop.permute.xlu0 %2148  ;;  %v1947_v41 = vpop.permute.xlu1 %1946  ;;  %v2496_v7 = vld [vmem:[#allocation3 + $0x38] sm:$0xff] }
 0x3b4   :  { %2170 = vst.msk [vmem:[#allocation3 + $0x80] sm:$0xff] %vm274_vm3, %v2149_v37  ;;  %v2520_v24 = vpack.c.bf16 %v2499_v54, %v2496_v7  ;;  %8019 = vset.pattern.permute.xlu1 %v11895_v42  ;;  %3573 = vperm.xlu0 %8039, %v9797_v62  }
 0x3b5   :  { %1970 = vst.msk [vmem:[#allocation3 + $0x48] sm:$0xff] %vm510_vm5, %v1947_v41  ;;  %3767 = vperm.xlu1 %8019, %v9807_v1   ;;  %v1984_v41 = vld [vmem:[#allocation2 + $0x48] sm:$0xff] }
 0x3b6   :  { %2737 = vmatprep.mubr.bf16.mxu1 %v2520_v24 }
 0x3b7   :  { %v2264_v29 = vpop.permute.xlu0 %2263  ;;  %v2147_v57 = vpop.permute.xlu1 %2146  ;;  %v2495_v36 = vld [vmem:[#allocation3 + $0x30] sm:$0xff] }
 0x3b8   :  { %2169 = vst.msk [vmem:[#allocation3 + $0x68] sm:$0xff] %vm274_vm3, %v2147_v57  ;;  %8041 = vset.pattern.permute.xlu0 %v11897_v18 }
 0x3b9   :  { %2286 = vst.msk [vmem:[#allocation3 + $0x68] sm:$0xff] %vm392_vm4, %v2264_v29  ;;  %8020 = vset.pattern.permute.xlu1 %v11898_v33  ;;  %3218 = vperm.xlu0 %8041, %v9807_v1  }
 0x3ba   :  { %3335 = vperm.xlu1 %8020, %v9807_v1  }
 0x3bb   :  { %v1832_v38 = vpop.permute.xlu0 %1831 }
 0x3bc   :  { %v2498_v60 = vld [vmem:[#allocation3 + $0x48] sm:$0xff] }
 0x3bd   :  { %v2519_v13 = vpack.c.bf16 %v2498_v60, %v2495_v36  ;;  %3228 = vperm.xlu0 %8041, %v9968_v23  }
 0x3be   :  { %3340 = vperm.xlu1 %8020, %v9887_v55  }
 0x3bf   :  { %2738 = vmatmul.mubr.bf16.gmra.mxu1 %v2519_v13  ;;  %v2381_v46 = vpop.permute.xlu0 %2380 }
 0x3c0   :  { %2403 = vst.msk [vmem:[#allocation3 + $0x68] sm:$0xff] %vm510_vm5, %v2381_v46 }
 0x3c1   :  { %3238 = vperm.xlu0 %8041, %v9827_v5  }
 0x3c2   :  { %8021 = vset.pattern.permute.xlu1 %v11890_v28 }
 0x3c3   :  { %v1951_v8 = vpop.permute.xlu0 %1950  ;;  %3548 = vperm.xlu1 %8021, %v9816_v43  }
 0x3c4   :  { %v1595_v20 = vpop.permute.xlu1 %1594 }
 0x3c5   :  { %v1613_v25 = vmul.f32 %v9752_v4, %v1595_v20  ;;  %3248 = vperm.xlu0 %8041, %v9786_v47  }
 0x3c7   :  { %v2151_v45 = vpop.permute.xlu0 %2150  ;;  %1622 = vst.msk [vmem:[#allocation3 + $0x90] sm:$0xff] %vm54_vm0, %v1613_v25  ;;  %8022 = vset.pattern.permute.xlu1 %v11888_v50  ;;  %v2502_v31 = vld [vmem:[#allocation3 + $0x68] sm:$0xff] }
 0x3c8   :  { %2171 = vst.msk [vmem:[#allocation3 + $0x98] sm:$0xff] %vm274_vm3, %v2151_v45  ;;  %v1715_v2 = vpop.permute.xlu1 %1714  ;;  %3111 = vperm.xlu1 %8022, %v9968_v23  }
 0x3c9   :  { %1737 = vst.msk [vmem:[#allocation3 + $0x60] sm:$0xff] %vm274_vm3, %v1715_v2  ;;  %3258 = vperm.xlu0 %8041, %v9797_v62  }
 0x3ca   :  { %1854 = vst.msk [vmem:[#allocation3 + $0x60] sm:$0xff] %vm392_vm4, %v1832_v38 }
 0x3cb   :  { %v1605_v61 = vpop.permute.xlu0 %1604 }
 0x3cc   :  { %v1615_v56 = vmul.f32 %v9855_v17, %v1605_v61  ;;  %v1717_v4 = vpop.permute.xlu1 %1716  ;;  %8023 = vset.pattern.permute.xlu1 %v11896_v53 }
 0x3cd   :  { %1738 = vst.msk [vmem:[#allocation3 + $0x78] sm:$0xff] %vm274_vm3, %v1717_v4  ;;  %3660 = vperm.xlu1 %8023, %v9968_v23   ;;  %8046 = vset.pattern.permute.xlu0 %v11878_v11 }
 0x3ce   :  { %1624 = vst.msk [vmem:[#allocation3 + $0xc0] sm:$0xff] %vm54_vm0, %v1615_v56  ;;  %3452 = vperm.xlu0 %8046, %v9807_v1   ;;  %v2416_v56 = vld [vmem:[#allocation2 + $0x4f] sm:$0xff] }
 0x3d0   :  { %v2429_v3 = vpop.permute.xlu0 %2428  ;;  %v2266_v16 = vpop.permute.xlu1 %2265 }
 0x3d1   :  { %v2471_v14 = vmul.f32 %v2429_v3, %v9691_v9  ;;  %2287 = vst.msk [vmem:[#allocation3 + $0x80] sm:$0xff] %vm392_vm4, %v2266_v16  ;;  %3665 = vperm.xlu1 %8023, %v9816_v43  }
 0x3d2   :  { %3477 = vperm.xlu0 %8046, %v9841_v49  }
 0x3d3   :  { %2480 = vst.msk [vmem:[#allocation3 + $0x10] sm:$0xff] %vm54_vm0, %v2471_v14 }
 0x3d4   :  { %v2444_v17 = vpop.permute.xlu0 %2443  ;;  %v1834_v12 = vpop.permute.xlu1 %1833 }
 0x3d5   :  { %v2474_v59 = vmul.f32 %v2444_v17, %v9844_v35  ;;  %1855 = vst.msk [vmem:[#allocation3 + $0x78] sm:$0xff] %vm392_vm4, %v1834_v12  ;;  %8024 = vset.pattern.permute.xlu1 %v11897_v18 }
 0x3d6   :  { %1972 = vst.msk [vmem:[#allocation3 + $0x78] sm:$0xff] %vm510_vm5, %v1951_v8  ;;  %3233 = vperm.xlu1 %8024, %v9816_v43  }
 0x3d7   :  { %2483 = vst.msk [vmem:[#allocation3 + $0x58] sm:$0xff] %vm54_vm0, %v2474_v59 }
 0x3d8   :  { %v2449_v9 = vpop.permute.xlu0 %2448  ;;  %v2383_v34 = vpop.permute.xlu1 %2382 }
 0x3d9   :  { %v2475_v63 = vmul.f32 %v2449_v9, %v9773_v30  ;;  %2404 = vst.msk [vmem:[#allocation3 + $0x80] sm:$0xff] %vm510_vm5, %v2383_v34 }
 0x3da   :  { %v2491_v35 = vld [vmem:[#allocation3 + $0x10] sm:$0xff]  ;;  %8025 = vset.pattern.permute.xlu1 %v11895_v42 }
 0x3db   :  { %2484 = vst.msk [vmem:[#allocation3 + $0x70] sm:$0xff] %vm54_vm0, %v2475_v63  ;;  %v2518_v10 = vpack.c.bf16 %v2494_v48, %v2491_v35  ;;  %3777 = vperm.xlu1 %8025, %v9968_v23   ;;  %v10064_v35 = vld [vmem:[%s11834_s23 + $0x30] sm:$0xff] }
 0x3dc   :  { %v2268_v51 = vpop.permute.xlu0 %2267  ;;  %v2454_v22 = vpop.permute.xlu1 %2453  ;;  %3482 = vperm.xlu0 %8046, %v10064_v35  }
 0x3dd   :  { %2288 = vst.msk [vmem:[#allocation3 + $0x98] sm:$0xff] %vm392_vm4, %v2268_v51  ;;  %7841 = vmatmul.mubr.msk.bf16.vlgmr.msra.gmra.mxu0 %vm54_vm0, %v2518_v10  ;;  %v2476_v30 = vmul.f32 %v2454_v22, %v9893_v15  ;;  %v2497_v15 = vld [vmem:[#allocation3 + $0x40] sm:$0xff]  ;;  %v2504_v60 = vld [vmem:[#allocation3 + $0x78] sm:$0xff]  ;;  %v11899_v51 = vmov 0  }
 0x3de   :  { %7844 = vmatprep.mubr.msk.bf16.mxu0 %vm8488_vm2, %v11872_v58  ;;  %v2500_v32 = vld [vmem:[#allocation3 + $0x58] sm:$0xff] }
 0x3df   :  { %2485 = vst.msk [vmem:[#allocation3 + $0x88] sm:$0xff] %vm54_vm0, %v2476_v30  ;;  %8026 = vset.pattern.permute.xlu1 %v11898_v33  ;;  %v2521_v27 = vpack.c.bf16 %v2500_v32, %v2497_v15 }
 0x3e0   :  { %v1836_v39 = vpop.permute.xlu0 %1835  ;;  %v1949_v21 = vpop.permute.xlu1 %1948  ;;  %v2505_v0 = vld [vmem:[#allocation3 + $0x80] sm:$0xff]  ;;  %3345 = vperm.xlu1 %8026, %v9968_v23   ;;  %8055 = vset.pattern.permute.xlu0 %v11899_v51 }
 0x3e1   :  { %1971 = vst.msk [vmem:[#allocation3 + $0x60] sm:$0xff] %vm510_vm5, %v1949_v21  ;;  %v2523_v6 = vpack.c.bf16 %v2505_v0, %v2502_v31  ;;  %3025 = vperm.xlu0 %8055, %v9887_v55   ;;  %v10084_v0 = vld [vmem:[%s11834_s23 + $0x20] sm:$0xff] }
 0x3e2   :  { %v2503_v46 = vld [vmem:[#allocation3 + $0x70] sm:$0xff] }
 0x3e3   :  { %2745 = vmatprep.mubr.bf16.mxu1 %v2523_v6 }
 0x3e4   :  { %v2385_v37 = vpop.permute.xlu0 %2384  ;;  %v2037_v7 = vpop.permute.xlu1 %2036  ;;  %3350 = vperm.xlu1 %8026, %v9816_v43  }
 0x3e5   :  { %2405 = vst.msk [vmem:[#allocation3 + $0x98] sm:$0xff] %vm510_vm5, %v2385_v37  ;;  %7845 = vmatmul.mubr.msk.bf16.gmra.mxu0 %vm54_vm0, %v2521_v27  ;;  %v2047_v54 = vmul.f32 %v2037_v7, %v1984_v41  ;;  %3030 = vperm.xlu0 %8055, %v9968_v23  }
 0x3e6   :  { %7848 = vmatprep.mubr.msk.bf16.mxu0 %vm8488_vm2, %v11872_v58  ;;  %v2506_v29 = vld [vmem:[#allocation3 + $0x88] sm:$0xff] }
 0x3e7   :  { %2056 = vst.msk [vmem:[#allocation3 + $0xc8] sm:$0xff] %vm54_vm0, %v2047_v54  ;;  %v2524_v8 = vpack.c.bf16 %v2506_v29, %v2503_v46  ;;  %v3014_v46 = vld [vmem:[%s11834_s23 + $0x28] sm:$0xff] }
 0x3e8   :  { %v2459_v24 = vpop.permute.xlu0 %2458  ;;  %v2153_v57 = vpop.permute.xlu1 %2152  ;;  %v2501_v36 = vld [vmem:[#allocation3 + $0x60] sm:$0xff]  ;;  %8027 = vset.pattern.permute.xlu1 %v11890_v28 }
 0x3e9   :  { %v2477_v38 = vmul.f32 %v2459_v24, %v9858_v40  ;;  %2172 = vst.msk [vmem:[#allocation3 + $0xb0] sm:$0xff] %vm274_vm3, %v2153_v57  ;;  %v2522_v13 = vpack.c.bf16 %v2504_v60, %v2501_v36  ;;  %3558 = vperm.xlu1 %8027, %v9841_v49   ;;  %3040 = vperm.xlu0 %8055, %v10084_v0  }
 0x3eb   :  { %2486 = vst.msk [vmem:[#allocation3 + $0xa0] sm:$0xff] %vm54_vm0, %v2477_v38  ;;  %2746 = vmatmul.mubr.bf16.gmra.mxu1 %v2522_v13 }
 0x3ec   :  { %v1955_v20 = vpop.permute.xlu0 %1954  ;;  %v1719_v25 = vpop.permute.xlu1 %1718  ;;  %v2508_v9 = vld [vmem:[#allocation3 + $0x98] sm:$0xff] }
 0x3ed   :  { %7849 = vmatmul.mubr.msk.bf16.gmra.mxu0 %vm54_vm0, %v2524_v8  ;;  %1739 = vst.msk [vmem:[#allocation3 + $0x90] sm:$0xff] %vm274_vm3, %v1719_v25  ;;  %8028 = vset.pattern.permute.xlu1 %v11888_v50 }
 0x3ee   :  { %7852 = vmatprep.mubr.msk.bf16.mxu0 %vm8488_vm2, %v11872_v58  ;;  %1856 = vst.msk [vmem:[#allocation3 + $0x90] sm:$0xff] %vm392_vm4, %v1836_v39  ;;  %3121 = vperm.xlu1 %8028, %v9827_v5  }
 0x3ef   :  { %3055 = vperm.xlu0 %8055, %v9933_v44  }
 0x3f0   :  { %v1723_v40 = vpop.permute.xlu0 %1722  ;;  %v1721_v45 = vpop.permute.xlu1 %1720 }
 0x3f1   :  { %1741 = vst.msk [vmem:[#allocation3 + $0xc0] sm:$0xff] %vm274_vm3, %v1723_v40  ;;  %1740 = vst.msk [vmem:[#allocation3 + $0xa8] sm:$0xff] %vm274_vm3, %v1721_v45 }
 0x3f2   :  { %8029 = vset.pattern.permute.xlu1 %v11896_v53  ;;  %v2509_v48 = vld [vmem:[#allocation3 + $0xa0] sm:$0xff] }
 0x3f3   :  { %3670 = vperm.xlu1 %8029, %v9827_v5  }
 0x3f4   :  { %v1840_v2 = vpop.permute.xlu0 %1839  ;;  %v2270_v61 = vpop.permute.xlu1 %2269 }
 0x3f5   :  { %1858 = vst.msk [vmem:[#allocation3 + $0xc0] sm:$0xff] %vm392_vm4, %v1840_v2  ;;  %2289 = vst.msk [vmem:[#allocation3 + $0xb0] sm:$0xff] %vm392_vm4, %v2270_v61 }
 0x3f7   :  { %3675 = vperm.xlu1 %8029, %v9841_v49  }
 0x3f8   :  { %v2469_v4 = vpop.permute.xlu0 %2468  ;;  %v1838_v3 = vpop.permute.xlu1 %1837 }
 0x3f9   :  { %v2479_v16 = vmul.f32 %v2469_v4, %v2416_v56  ;;  %1857 = vst.msk [vmem:[#allocation3 + $0xa8] sm:$0xff] %vm392_vm4, %v1838_v3 }
 0x3fa   :  { %1974 = vst.msk [vmem:[#allocation3 + $0xa8] sm:$0xff] %vm510_vm5, %v1955_v20 }
 0x3fb   :  { %2488 = vst.msk [vmem:[#allocation3 + $0xd0] sm:$0xff] %vm54_vm0, %v2479_v16  ;;  %8030 = vset.pattern.permute.xlu1 %v11897_v18 }
 0x3fc   :  { %v2387_v14 = vpop.permute.xlu1 %2386  ;;  %3243 = vperm.xlu1 %8030, %v9841_v49  }
 0x3fd   :  { %2406 = vst.msk [vmem:[#allocation3 + $0xb0] sm:$0xff] %vm510_vm5, %v2387_v14  ;;  %v10192_v40 = vpop.permute.xlu0 %3106 }
 0x400   :  { %v2464_v17 = vpop.permute.xlu1 %2463  ;;  %8031 = vset.pattern.permute.xlu1 %v11895_v42 }
 0x401   :  { %v2478_v12 = vmul.f32 %v2464_v17, %v9917_v19  ;;  %3787 = vperm.xlu1 %8031, %v9827_v5   ;;  %v2510_v32 = vld [vmem:[#allocation3 + $0xa8] sm:$0xff]  ;;  %v10196_v2 = vpop.permute.xlu0 %3116 }
 0x402   :  { %v2515_v21 = vld [vmem:[#allocation3 + $0xd0] sm:$0xff] }
 0x403   :  { %2487 = vst.msk [vmem:[#allocation3 + $0xb8] sm:$0xff] %vm54_vm0, %v2478_v12  ;;  %v2530_v31 = vpack.c.bf16 %v2515_v21, %v2515_v21 }
 0x404   :  { %v1953_v59 = vpop.permute.xlu1 %1952  ;;  %v2511_v34 = vld [vmem:[#allocation3 + $0xb0] sm:$0xff] }
 0x405   :  { %1973 = vst.msk [vmem:[#allocation3 + $0x90] sm:$0xff] %vm510_vm5, %v1953_v59  ;;  %v2526_v63 = vpack.c.bf16 %v2511_v34, %v2508_v9  ;;  %8032 = vset.pattern.permute.xlu1 %v11898_v33  ;;  %v10200_v56 = vpop.permute.xlu0 %3126 }
 0x406   :  { %3355 = vperm.xlu1 %8032, %v9827_v5   ;;  %11914 = vst [vmem:[#allocation22_spill] sm:$0xff] %v10200_v56 }
 0x407   :  { %2753 = vmatprep.mubr.bf16.mxu1 %v2526_v63 }
 0x408   :  { %v2155_v19 = vpop.permute.xlu1 %2154 }
 0x409   :  { %2173 = vst.msk [vmem:[#allocation3 + $0xc8] sm:$0xff] %vm274_vm3, %v2155_v19  ;;  %v10204_v3 = vpop.permute.xlu0 %3136 }
 0x40a   :  { %v2512_v10 = vld [vmem:[#allocation3 + $0xb8] sm:$0xff]  ;;  %3360 = vperm.xlu1 %8032, %v9841_v49   ;;  %11916 = vst [vmem:[#allocation24_spill] sm:$0xff] %v10204_v3 }
 0x40b   :  { %v2527_v22 = vpack.c.bf16 %v2512_v10, %v2509_v48 }
 0x40c   :  { %v2272_v30 = vpop.permute.xlu1 %2271  ;;  %v2507_v39 = vld [vmem:[#allocation3 + $0x90] sm:$0xff] }
 0x40d   :  { %2290 = vst.msk [vmem:[#allocation3 + $0xc8] sm:$0xff] %vm392_vm4, %v2272_v30  ;;  %7853 = vmatmul.mubr.msk.bf16.gmra.mxu0 %vm54_vm0, %v2527_v22  ;;  %v2525_v5 = vpack.c.bf16 %v2510_v32, %v2507_v39 }
 0x40e   :  { %7856 = vmatprep.mubr.msk.bf16.mxu0 %vm8488_vm2, %v11872_v58  ;;  %8033 = vset.pattern.permute.xlu1 %v11890_v28  ;;  %v10208_v59 = vpop.permute.xlu0 %3772 }
 0x40f   :  { %2754 = vmatmul.mubr.bf16.gmra.mxu1 %v2525_v5  ;;  %3568 = vperm.xlu1 %8033, %v9933_v44  }
 0x410   :  { %v2389_v49 = vpop.permute.xlu1 %2388 }
 0x411   :  { %2407 = vst.msk [vmem:[#allocation3 + $0xc8] sm:$0xff] %vm510_vm5, %v2389_v49 }
 0x412   :  { %v10212_v48 = vpop.permute.xlu0 %3782 }
 0x413   :  { %8034 = vset.pattern.permute.xlu1 %v11888_v50  ;;  %11919 = vst [vmem:[#allocation16_spill] sm:$0xff] %v10212_v48 }
 0x414   :  { %v1957_v6 = vpop.permute.xlu1 %1956  ;;  %3131 = vperm.xlu1 %8034, %v9786_v47  }
 0x415   :  { %1975 = vst.msk [vmem:[#allocation3 + $0xc0] sm:$0xff] %vm510_vm5, %v1957_v6  ;;  %7857 = vmatmul.mubr.msk.bf16.gmra.mxu0 %vm54_vm0, %v2530_v31 }
 0x416   :  { %7864 = vmatprep.mubr.msk.bf16.mxu0 %vm8488_vm2, %v11872_v58  ;;  %v10216_v49 = vpop.permute.xlu0 %3792 }
 0x417   :  { %11921 = vst [vmem:[#allocation19_spill] sm:$0xff] %v10216_v49 }
 0x418   :  { %v2514_v28 = vld [vmem:[#allocation3 + $0xc8] sm:$0xff]  ;;  %8036 = vset.pattern.permute.xlu1 %v11896_v53  ;;  %v10093_v15 = vpop.permute.xlu1 %3538 }
 0x419   :  { %v2529_v27 = vpack.c.bf16 %v2514_v28, %v2514_v28  ;;  %3680 = vperm.xlu1 %8036, %v9786_v47  }
 0x41b   :  { %2761 = vmatprep.mubr.bf16.mxu1 %v2529_v27  ;;  %v10220_v27 = vpop.permute.xlu0 %3802 }
 0x41c   :  { %v2513_v37 = vld [vmem:[#allocation3 + $0xc0] sm:$0xff]  ;;  %11923 = vst [vmem:[#allocation27_spill] sm:$0xff] %v10220_v27 }
 0x41d   :  { %v2528_v41 = vpack.c.bf16 %v2513_v37, %v2513_v37  ;;  %3685 = vperm.xlu1 %8036, %v9933_v44   ;;  %v10098_v7 = vpop.permute.xlu1 %3101 }
 0x41f   :  { %2762 = vmatmul.mubr.bf16.gmra.mxu1 %v2528_v41 }
 0x421   :  { %8037 = vset.pattern.permute.xlu1 %v11897_v18 }
 0x422   :  { %3253 = vperm.xlu1 %8037, %v9933_v44   ;;  %v10102_v54 = vpop.permute.xlu1 %3650 }
 0x426   :  { %8038 = vset.pattern.permute.xlu1 %v11895_v42  ;;  %v10105_v24 = vpop.permute.xlu1 %3655 }
 0x427   :  { %3797 = vperm.xlu1 %8038, %v9786_v47  }
 0x42b   :  { %8040 = vset.pattern.permute.xlu1 %v11898_v33  ;;  %v10109_v29 = vpop.permute.xlu1 %3223 }
 0x42c   :  { %3365 = vperm.xlu1 %8040, %v9786_v47   ;;  %v3017_v47 = vld [vmem:[%s11834_s23 + $0x40] sm:$0xff] }
 0x42d   :  { %3060 = vperm.xlu0 %8055, %v3017_v47  }
 0x430   :  { %3370 = vperm.xlu1 %8040, %v9933_v44   ;;  %v10113_v57 = vpop.permute.xlu1 %3767 }
 0x431   :  { %8060 = vset.pattern.permute.xlu0 %v11868_v26 }
 0x434   :  { %8042 = vset.pattern.permute.xlu1 %v11888_v50  ;;  %v3873_v50 = vld [vmem:[%s11834_s23] sm:$0xff] }
 0x435   :  { %3141 = vperm.xlu1 %8042, %v9797_v62   ;;  %v10117_v18 = vpop.permute.xlu1 %3335  ;;  %3884 = vperm.xlu0 %8060, %v3873_v50   ;;  %v10224_v50 = vpop.permute.xlu0 %3533 }
 0x439   :  { %8043 = vset.pattern.permute.xlu1 %v11896_v53  ;;  %v10121_v38 = vpop.permute.xlu1 %3340  ;;  %v3876_v53 = vld [vmem:[%s11834_s23 + $0x18] sm:$0xff] }
 0x43a   :  { %3690 = vperm.xlu1 %8043, %v9797_v62   ;;  %3899 = vperm.xlu0 %8060, %v3876_v53  }
 0x43e   :  { %8044 = vset.pattern.permute.xlu1 %v11895_v42  ;;  %v10128_v36 = vpop.permute.xlu1 %3548  ;;  %3904 = vperm.xlu0 %8060, %v10084_v0  }
 0x43f   :  { %3807 = vperm.xlu1 %8044, %v9797_v62  }
 0x442   :  { %3914 = vperm.xlu0 %8060, %v10064_v35  }
 0x443   :  { %8045 = vset.pattern.permute.xlu1 %v11898_v33  ;;  %v10136_v42 = vpop.permute.xlu1 %3111 }
 0x444   :  { %3375 = vperm.xlu1 %8045, %v9797_v62   ;;  %11900 = vst [vmem:[#allocation8_spill] sm:$0xff] %v10136_v42 }
 0x448   :  { %8047 = vset.pattern.permute.xlu1 %v11878_v11  ;;  %v10143_v33 = vpop.permute.xlu1 %3660 }
 0x449   :  { %3457 = vperm.xlu1 %8047, %v9887_v55   ;;  %11901 = vst [vmem:[#allocation23_spill] sm:$0xff] %v10143_v33 }
 0x44c   :  { %v10149_v62 = vpop.permute.xlu1 %3665 }
 0x44d   :  { %8048 = vset.pattern.permute.xlu1 %v11899_v51  ;;  %11902 = vst [vmem:[#allocation10_spill] sm:$0xff] %v10149_v62 }
 0x44e   :  { %3020 = vperm.xlu1 %8048, %v9807_v1  }
 0x451   :  { %v10154_v60 = vpop.permute.xlu1 %3233 }
 0x452   :  { %8049 = vset.pattern.permute.xlu1 %v11878_v11  ;;  %11903 = vst [vmem:[#allocation25_spill] sm:$0xff] %v10154_v60 }
 0x453   :  { %3462 = vperm.xlu1 %8049, %v9968_v23  }
 0x456   :  { %v10158_v13 = vpop.permute.xlu1 %3777 }
 0x457   :  { %3467 = vperm.xlu1 %8049, %v9816_v43   ;;  %11904 = vst [vmem:[#allocation5_spill] sm:$0xff] %v10158_v13 }
 0x45b   :  { %8050 = vset.pattern.permute.xlu1 %v11899_v51  ;;  %v10162_v1 = vpop.permute.xlu1 %3345 }
 0x45c   :  { %3035 = vperm.xlu1 %8050, %v9816_v43   ;;  %11905 = vst [vmem:[#allocation11_spill] sm:$0xff] %v10162_v1 }
 0x45f   :  { %v10170_v8 = vpop.permute.xlu1 %3350 }
 0x460   :  { %8051 = vset.pattern.permute.xlu1 %v11868_v26  ;;  %11906 = vst [vmem:[#allocation6_spill] sm:$0xff] %v10170_v8 }
 0x461   :  { %3889 = vperm.xlu1 %8051, %v9887_v55  }
 0x464   :  { %v10174_v43 = vpop.permute.xlu1 %3558 }
 0x465   :  { %8052 = vset.pattern.permute.xlu1 %v11878_v11  ;;  %11907 = vst [vmem:[#allocation7_spill] sm:$0xff] %v10174_v43 }
 0x466   :  { %3472 = vperm.xlu1 %8052, %v10084_v0  }
 0x469   :  { %v10178_v55 = vpop.permute.xlu1 %3121 }
 0x46a   :  { %8053 = vset.pattern.permute.xlu1 %v11899_v51  ;;  %11908 = vst [vmem:[#allocation17_spill] sm:$0xff] %v10178_v55 }
 0x46b   :  { %3045 = vperm.xlu1 %8053, %v3014_v46  }
 0x46e   :  { %v10182_v20 = vpop.permute.xlu1 %3670 }
 0x46f   :  { %8054 = vset.pattern.permute.xlu1 %v11868_v26  ;;  %11909 = vst [vmem:[#allocation15_spill] sm:$0xff] %v10182_v20 }
 0x470   :  { %3894 = vperm.xlu1 %8054, %v9968_v23  }
 0x472   :  { %v10185_v25 = vpop.permute.xlu1 %3675 }
 0x473   :  { %11910 = vst [vmem:[#allocation30_spill] sm:$0xff] %v10185_v25 }
 0x474   :  { %8056 = vset.pattern.permute.xlu1 %v11878_v11 }
 0x475   :  { %3487 = vperm.xlu1 %8056, %v9933_v44  }
 0x477   :  { %v10189_v23 = vpop.permute.xlu1 %3243 }
 0x478   :  { %11911 = vst [vmem:[#allocation9_spill] sm:$0xff] %v10189_v23 }
 0x479   :  { %8057 = vset.pattern.permute.xlu1 %v11899_v51 }
 0x47a   :  { %3050 = vperm.xlu1 %8057, %v10064_v35  }
 0x47c   :  { %v10194_v45 = vpop.permute.xlu1 %3787 }
 0x47d   :  { %11912 = vst [vmem:[#allocation20_spill] sm:$0xff] %v10194_v45 }
 0x47e   :  { %8058 = vset.pattern.permute.xlu1 %v11868_v26 }
 0x47f   :  { %3909 = vperm.xlu1 %8058, %v3014_v46  }
 0x481   :  { %v10198_v61 = vpop.permute.xlu1 %3355 }
 0x482   :  { %11913 = vst [vmem:[#allocation12_spill] sm:$0xff] %v10198_v61 }
 0x483   :  { %8059 = vset.pattern.permute.xlu1 %v11878_v11 }
 0x484   :  { %3492 = vperm.xlu1 %8059, %v3017_v47  }
 0x485   :  { %v10202_v4 = vpop.permute.xlu1 %3360 }
 0x486   :  { %11915 = vst [vmem:[#allocation14_spill] sm:$0xff] %v10202_v4 }
 0x488   :  { %8061 = vset.pattern.permute.xlu1 %v11868_v26  ;;  %v7625_v26 = vpop.f32.mrf.mxu1 }
 0x489   :  { %3919 = vperm.xlu1 %8061, %v9933_v44  }
 0x48a   :  { %v10206_v17 = vpop.permute.xlu1 %3568  ;;  %v7626_v44 = vpop.f32.mrf.mxu1 }
 0x48b   :  { %11917 = vst [vmem:[#allocation13_spill] sm:$0xff] %v10206_v17  ;;  %v7627_v53 = vadd.f32 %v7626_v44, %v7625_v26 }
 0x48c   :  { %v7628_v34 = vpop.f32.mrf.mxu1 }
 0x48e   :  { %v7629_v10 = vpop.f32.mrf.mxu1 }
 0x48f   :  { %v10210_v35 = vpop.permute.xlu1 %3131  ;;  %v7630_v46 = vadd.f32 %v7629_v10, %v7628_v34  ;;  %v8098_v34 = vld [vmem:[%s11799_s10 + $0x88] sm:$0xff]  }
 0x490   :  { %11918 = vst [vmem:[#allocation31_spill] sm:$0xff] %v10210_v35  ;;  %v7631_v30 = vpop.f32.mrf.mxu1  ;;  %7861 = vmatpush3.bf16.msra.mxu0 %v8098_v34 }
 0x491   :  { %7862 = vmatprep.subr.bf16.mxu0 %v11872_v58 }
 0x492   :  { %v7632_v21 = vpop.f32.mrf.mxu1 }
 0x493   :  { %v7633_v26 = vadd.f32 %v7632_v21, %v7631_v30 }
 0x494   :  { %v10214_v32 = vpop.permute.xlu1 %3680  ;;  %v7634_v28 = vpop.f32.mrf.mxu1 }
 0x495   :  { %11920 = vst [vmem:[#allocation18_spill] sm:$0xff] %v10214_v32 }
 0x496   :  { %v7635_v37 = vpop.f32.mrf.mxu1 }
 0x498   :  { %v10218_v6 = vpop.permute.xlu1 %3685 }
 0x499   :  { %11922 = vst [vmem:[#allocation21_spill] sm:$0xff] %v10218_v6 }
 0x49d   :  { %v2803_v11 = vpop.f32.mrf.mxu0  ;;  %v10222_v41 = vpop.permute.xlu1 %3253 }
 0x49e   :  { %11924 = vst [vmem:[#allocation26_spill] sm:$0xff] %v10222_v41 }
 0x49f   :  { %v7842_v16 = vpop.f32.mrf.mxu0 }
 0x4a0   :  { %v10229_v16 = vld [vmem:[%s11798_s7] ss:$0 sm:$0xff] }
 0x4a1   :  { %v2806_v14 = vpop.f32.mrf.mxu0 }
 0x4a3   :  { %v7843_v12 = vpop.f32.mrf.mxu0 }
 0x4a5   :  { %v2811_v9 = vpop.f32.mrf.mxu0 }
 0x4a7   :  { %v7846_v63 = vpop.f32.mrf.mxu0 }
 0x4a8   :  { %v10231_v63 = vpop.permute.xlu1 %3797 }
 0x4a9   :  { %v2814_v19 = vpop.f32.mrf.mxu0  ;;  %11925 = vst [vmem:[#allocation28_spill] sm:$0xff] %v10231_v63 }
 0x4ab   :  { %v7847_v22 = vpop.f32.mrf.mxu0  ;;  %v7637_v47 = vpop.f32.mrf.mxu1 }
 0x4ac   :  { %v2732_v22 = vadd.f32 %v7627_v53, %v10229_v16  ;;  %v10241_v44 = vpop.permute.xlu1 %3365  ;;  %v7636_v53 = vadd.f32 %v7635_v37, %v7634_v28 }
 0x4ad   :  { %v2819_v39 = vpop.f32.mrf.mxu0  ;;  %v7638_v12 = vpop.f32.mrf.mxu1  ;;  %11926 = vst [vmem:[#allocation29_spill] sm:$0xff] %v10241_v44 }
 0x4ae   :  { %v10237_v51 = vadd.f32 %v2803_v11, %v2732_v22  ;;  %v7639_v3 = vadd.f32 %v7638_v12, %v7637_v47  ;;  %v8099_v11 = vld [vmem:[%s11799_s10 + $0x80] sm:$0xff]   ;;  %v2743_v28 = vadd.f32 %v7636_v53, %v10229_v16 }
 0x4af   :  { %v7850_v5 = vpop.f32.mrf.mxu0  ;;  %v7640_v27 = vpop.f32.mrf.mxu1  ;;  %7863 = vmatpush3.bf16.msra.mxu0 %v8099_v11 }
 0x4b0   :  { %v2735_v5 = vadd.f32 %v7630_v46, %v10229_v16  ;;  %v2850_v10 = vmin.f32 %v10237_v51, 0.0  ;;  %v2748_v37 = vadd.f32 %v7639_v3, %v10229_v16  ;;  %v10259_v47 = vpop.permute.xlu1 %3370  ;;  %vm2841_vm1 = vcmp.gt.f32.partialorder %v10237_v51, 0.0 }
 0x4b1   :  { %v2822_v31 = vpop.f32.mrf.mxu0  ;;  %v7641_v6 = vpop.f32.mrf.mxu1  ;;  %11928 = vst [vmem:[#allocation34_spill] sm:$0xff] %v10259_v47 }
 0x4b2   :  { %v10239_v41 = vadd.f32 %v2806_v14, %v2735_v5  ;;  %v2740_v14 = vadd.f32 %v7633_v26, %v10229_v16  ;;  %v7642_v30 = vadd.f32 %v7641_v6, %v7640_v27  ;;  %v2859_v21 = vmul.f32 1.442695, %v2850_v10 }
 0x4b3   :  { %v7851_v0 = vpop.f32.mrf.mxu0  ;;  %v10261_v5 = vadd.f32 %v2814_v19, %v2743_v28  ;;  %v10267_v27 = vadd.f32 %v2819_v39, %v2748_v37 }
 0x4b4   :  { %v10235_v0 = vpop.permute.xlu0 %3543  ;;  %v2851_v46 = vmin.f32 %v10239_v41, 0.0  ;;  %v10255_v22 = vadd.f32 %v2811_v9, %v2740_v14  ;;  %v2751_v34 = vadd.f32 %v7642_v30, %v10229_v16  ;;  %v10272_v53 = vpop.permute.xlu1 %3141  ;;  %vm2842_vm15 = vcmp.gt.f32.partialorder %v10239_v41, 0.0 }
 0x4b5   :  { %v2853_v10 = vmin.f32 %v10261_v5, 0.0  ;;  %11930 = vst [vmem:[#allocation36_spill] sm:$0xff] %v10272_v53  ;;  %v2854_v14 = vmin.f32 %v10267_v27, 0.0  ;;  %vm2844_vm7 = vcmp.gt.f32.partialorder %v10261_v5, 0.0  ;;  %vm2845_vm8 = vcmp.gt.f32.partialorder %v10267_v27, 0.0 }
 0x4b6   :  { %v2861_v12 = vmul.f32 1.442695, %v2851_v46  ;;  %v2852_v6 = vmin.f32 %v10255_v22, 0.0  ;;  %v10270_v3 = vadd.f32 %v2822_v31, %v2751_v34  ;;  %vm2843_vm6 = vcmp.gt.f32.partialorder %v10255_v22, 0.0 }
 0x4b7   :  { %v2865_v39 = vmul.f32 1.442695, %v2853_v10  ;;  %v2867_v53 = vmul.f32 1.442695, %v2854_v14 }
 0x4b8   :  { %v10248_v35 = vpop.permute.xlu0 %3553  ;;  %v2863_v11 = vmul.f32 1.442695, %v2852_v6  ;;  %8425 = vpow2.f32 %v2861_v12  ;;  %v2855_v37 = vmin.f32 %v10270_v3, 0.0  ;;  %vm2846_vm9 = vcmp.gt.f32.partialorder %v10270_v3, 0.0 }
 0x4b9   :  { %11927 = vst [vmem:[#allocation33_spill] sm:$0xff] %v10248_v35  ;;  %8427 = vpow2.f32 %v2859_v21 }
 0x4ba   :  { %8429 = vpow2.f32 %v2863_v11 }
 0x4bb   :  { %8431 = vpow2.f32 %v2865_v39 }
 0x4bc   :  { %v10264_v44 = vpop.permute.xlu0 %3563  ;;  %8433 = vpow2.f32 %v2867_v53 }
 0x4bd   :  { %11929 = vst [vmem:[#allocation35_spill] sm:$0xff] %v10264_v44 }
 0x4c0   :  { %v10275_v28 = vpop.permute.xlu0 %3573 }
 0x4c1   :  { %11931 = vst [vmem:[#allocation37_spill] sm:$0xff] %v10275_v28 }
 0x4cd   :  { %v2827_v17 = vpop.f32.mrf.mxu0 }
 0x4cf   :  { %v7854_v9 = vpop.f32.mrf.mxu0  ;;  %v7643_v26 = vpop.f32.mrf.mxu1 }
 0x4d1   :  { %v7644_v46 = vpop.f32.mrf.mxu1  ;;  %v2830_v19 = vpop.f32.mrf.mxu0 }
 0x4d2   :  { %v7645_v30 = vadd.f32 %v7644_v46, %v7643_v26  ;;  %v10281_v26 = vpop.permute.xlu1 %3690  ;;  %v10285_v46 = vpop.permute.xlu0 %3218 }
 0x4d3   :  { %v7855_v61 = vpop.f32.mrf.mxu0  ;;  %v7646_v47 = vpop.f32.mrf.mxu1  ;;  %11932 = vst [vmem:[#allocation38_spill] sm:$0xff] %v10281_v26 }
 0x4d4   :  { %v2756_v9 = vadd.f32 %v7645_v30, %v10229_v16  ;;  %v2869_v61 = vmul.f32 1.442695, %v2855_v37  ;;  %v8426_v37 = vpop.eup %8425 }
 0x4d5   :  { %v7647_v31 = vpop.f32.mrf.mxu1  ;;  %v2835_v34 = vpop.f32.mrf.mxu0 }
 0x4d6   :  { %v10279_v49 = vadd.f32 %v2827_v17, %v2756_v9  ;;  %v7648_v6 = vadd.f32 %v7647_v31, %v7646_v47  ;;  %8435 = vpow2.f32 %v2869_v61  ;;  %v10292_v14 = vpop.permute.xlu0 %3228  ;;  %v8428_v31 = vpop.eup %8427 }
 0x4d7   :  { %v7858_v63 = vpop.f32.mrf.mxu0  ;;  %11934 = vst [vmem:[#allocation40_spill] sm:$0xff] %v10292_v14  ;;  %v8430_v53 = vpop.eup %8429 }
 0x4d8   :  { %v2856_v12 = vmin.f32 %v10279_v49, 0.0  ;;  %v2759_v10 = vadd.f32 %v7648_v6, %v10229_v16  ;;  %v10290_v63 = vpop.permute.xlu1 %3807  ;;  %vm2847_vm10 = vcmp.gt.f32.partialorder %v10279_v49, 0.0 }
 0x4d9   :  { %v2838_v30 = vpop.f32.mrf.mxu0  ;;  %11933 = vst [vmem:[#allocation39_spill] sm:$0xff] %v10290_v63  ;;  %v7245_v63 = vadd.f32 -1.0, %v8430_v53 }
 0x4da   :  { %v2871_v21 = vmul.f32 1.442695, %v2856_v12  ;;  %v10287_v28 = vadd.f32 %v2830_v19, %v2759_v10  ;;  %v7244_v10 = vadd.f32 -1.0, %v8426_v37  ;;  %v10297_v30 = vpop.permute.xlu0 %3238 }
 0x4db   :  { %v7859_v11 = vpop.f32.mrf.mxu0  ;;  %11936 = vst [vmem:[#allocation42_spill] sm:$0xff] %v10297_v30 }
 0x4dc   :  { %v2857_v17 = vmin.f32 %v10287_v28, 0.0  ;;  %8437 = vpow2.f32 %v2871_v21  ;;  %v10294_v19 = vpop.permute.xlu1 %3375  ;;  %v8432_v11 = vpop.eup %8431  ;;  %v7243_v21 = vadd.f32 -1.0, %v8428_v31  ;;  %vm2848_vm11 = vcmp.gt.f32.partialorder %v10287_v28, 0.0 }
 0x4dd   :  { %11935 = vst [vmem:[#allocation41_spill] sm:$0xff] %v10294_v19 }
 0x4de   :  { %v2873_v47 = vmul.f32 1.442695, %v2857_v17 }
 0x4df   :  { %v7649_v39 = vpop.f32.mrf.mxu1 }
 0x4e0   :  { %8439 = vpow2.f32 %v2873_v47  ;;  %v8434_v47 = vpop.eup %8433  ;;  %v10311_v31 = vpop.permute.xlu1 %3457 }
 0x4e1   :  { %v7650_v9 = vpop.f32.mrf.mxu1  ;;  %v7247_v53 = vadd.f32 -1.0, %v8434_v47 }
 0x4e2   :  { %v7651_v6 = vadd.f32 %v7650_v9, %v7649_v39  ;;  %v10304_v39 = vsel %vm2842_vm15, %v10239_v41, %v7244_v10  ;;  %v7246_v9 = vadd.f32 -1.0, %v8432_v11 }
 0x4e3   :  { %v7652_v12 = vpop.f32.mrf.mxu1  ;;  %v2920_v10 = vmul.f32 %v10304_v39, %v10304_v39 }
 0x4e4   :  { %v2764_v61 = vadd.f32 %v7651_v6, %v10229_v16  ;;  %v8436_v16 = vpop.eup %8435  ;;  %v10308_v6 = vsel %vm2841_vm1, %v10237_v51, %v7243_v21  ;;  %v10324_v11 = vsel %vm2844_vm7, %v10261_v5, %v7246_v9 }
 0x4e5   :  { %v7653_v17 = vpop.f32.mrf.mxu1  ;;  %v2919_v51 = vmul.f32 %v10308_v6, %v10308_v6  ;;  %v7248_v21 = vadd.f32 -1.0, %v8436_v16  ;;  %v2895_v47 = vsel %vm54_vm0, %v10308_v6, 0.0  ;;  %v2929_v5 = vsel %vm54_vm0, %v2920_v10, 0.0 }
 0x4e6   :  { %v10299_v26 = vadd.f32 %v2835_v34, %v2764_v61  ;;  %v10314_v34 = vsel %vm2843_vm6, %v10255_v22, %v7245_v63  ;;  %v10316_v61 = vpop.permute.xlu0 %3248  ;;  %v2896_v63 = vsel %vm54_vm0, %v10304_v39, 0.0  ;;  %v2922_v16 = vmul.f32 %v10324_v11, %v10324_v11 }
 0x4e7   :  { %11937 = vst [vmem:[#allocation43_spill] sm:$0xff] %v10316_v61  ;;  %v2921_v17 = vmul.f32 %v10314_v34, %v10314_v34  ;;  %v2898_v9 = vsel %vm54_vm0, %v10314_v34, 0.0  ;;  %v2928_v23 = vsel %vm54_vm0, %v2919_v51, 0.0  ;;  %v2897_v61 = vadd.f32 %v2896_v63, %v2895_v47 }
 0x4e8   :  { %v2858_v37 = vmin.f32 %v10299_v26, 0.0  ;;  %v10346_v25 = vsel %vm2846_vm9, %v10270_v3, %v7248_v21  ;;  %v2900_v10 = vsel %vm54_vm0, %v10324_v11, 0.0  ;;  %v2930_v56 = vadd.f32 %v2929_v5, %v2928_v23 }
 0x4e9   :  { %v8438_v41 = vpop.eup %8437  ;;  %v2899_v44 = vadd.f32 %v2898_v9, %v2897_v61  ;;  %v2933_v3 = vsel %vm54_vm0, %v2922_v16, 0.0  ;;  %vm2849_vm12 = vcmp.gt.f32.partialorder %v10299_v26, 0.0  ;;  %vm4485_vm9 = vcmask 778752  }
 0x4ea   :  { %v2875_v12 = vmul.f32 1.442695, %v2858_v37  ;;  %v10334_v37 = vsel %vm2845_vm8, %v10267_v27, %v7247_v53  ;;  %v7249_v19 = vadd.f32 -1.0, %v8438_v41  ;;  %v10348_v53 = vpop.permute.xlu0 %3258  ;;  %v2931_v41 = vsel %vm54_vm0, %v2921_v17, 0.0 }
 0x4eb   :  { %11938 = vst [vmem:[#allocation44_spill] sm:$0xff] %v10348_v53  ;;  %v2923_v32 = vmul.f32 %v10334_v37, %v10334_v37  ;;  %v2902_v21 = vsel %vm54_vm0, %v10334_v37, 0.0  ;;  %v2932_v63 = vadd.f32 %v2931_v41, %v2930_v56  ;;  %v2901_v17 = vadd.f32 %v2900_v10, %v2899_v44 }
 0x4ec   :  { %8441 = vpow2.f32 %v2875_v12  ;;  %v10342_v12 = vpop.permute.xlu1 %3020  ;;  %v10357_v51 = vsel %vm2847_vm10, %v10279_v49, %v7249_v19  ;;  %v2904_v49 = vsel %vm54_vm0, %v10346_v25, 0.0  ;;  %vm4457_vm8 = vcmask 253952  }
 0x4ed   :  { %v8440_v22 = vpop.eup %8439  ;;  %v2935_v23 = vsel %vm54_vm0, %v2923_v32, 0.0  ;;  %v2925_v19 = vmul.f32 %v10357_v51, %v10357_v51  ;;  %v2934_v5 = vadd.f32 %v2933_v3, %v2932_v63  ;;  %v2903_v9 = vadd.f32 %v2902_v21, %v2901_v17 }
 0x4ee   :  { %v7250_v27 = vadd.f32 -1.0, %v8440_v22  ;;  %v2924_v22 = vmul.f32 %v10346_v25, %v10346_v25  ;;  %v10375_v16 = vpop.permute.xlu0 %3452  ;;  %v2906_v44 = vsel %vm54_vm0, %v10357_v51, 0.0  ;;  %vm4499_vm10 = vcmask 1041152  }
 0x4ef   :  { %v2939_v10 = vsel %vm54_vm0, %v2925_v19, 0.0 }
 0x4f0   :  { %v10366_v47 = vsel %vm2848_vm11, %v10287_v28, %v7250_v27  ;;  %v10373_v61 = vpop.permute.xlu1 %3462  ;;  %v2937_v56 = vsel %vm54_vm0, %v2924_v22, 0.0  ;;  %v2936_v28 = vadd.f32 %v2935_v23, %v2934_v5  ;;  %v2905_v27 = vadd.f32 %v2904_v49, %v2903_v9 }
 0x4f1   :  { %v2926_v32 = vmul.f32 %v10366_v47, %v10366_v47  ;;  %v2908_v53 = vsel %vm54_vm0, %v10366_v47, 0.0  ;;  %vm7176_vm11 = vcmask 1041408  }
 0x4f2   :  { %v2938_v3 = vadd.f32 %v2937_v56, %v2936_v28  ;;  %v2907_v21 = vadd.f32 %v2906_v44, %v2905_v27  ;;  %v10390_v49 = vpop.permute.xlu0 %3477 }
 0x4f3   :  { %v2941_v17 = vsel %vm54_vm0, %v2926_v32, 0.0 }
 0x4f4   :  { %v10387_v22 = vpop.permute.xlu1 %3467  ;;  %v2940_v55 = vadd.f32 %v2939_v10, %v2938_v3  ;;  %v2909_v4 = vadd.f32 %v2908_v53, %v2907_v21 }
 0x4f6   :  { %v2942_v9 = vadd.f32 %v2941_v17, %v2940_v55  ;;  %v10396_v45 = vpop.permute.xlu0 %3482 }
 0x4f8   :  { %v10394_v32 = vpop.permute.xlu1 %3035 }
 0x4f9   :  { %v8442_v41 = vpop.eup %8441 }
 0x4fa   :  { %v7251_v63 = vadd.f32 -1.0, %v8442_v41  ;;  %v10400_v55 = vpop.permute.xlu0 %3025 }
 0x4fc   :  { %v2894_v23 = vsel %vm2849_vm12, %v10299_v26, %v7251_v63  ;;  %v10398_v21 = vpop.permute.xlu1 %3889  ;;  %vm7177_vm12 = vcmask 1043458  }
 0x4fd   :  { %v2910_v19 = vsel %vm54_vm0, %v2894_v23, 0.0  ;;  %v2927_v5 = vmul.f32 %v2894_v23, %v2894_v23 }
 0x4fe   :  { %v2911_v35 = vadd.f32 %v2910_v19, %v2909_v4 }
 0x4ff   :  { %v2943_v56 = vsel %vm54_vm0, %v2927_v5, 0.0 }
 0x500   :  { %v2912_v44 = vrot.slane %v2911_v35, 4  ;;  %v2944_v28 = vadd.f32 %v2943_v56, %v2942_v9  ;;  %v10402_v9 = vpop.permute.xlu1 %3472 }
 0x502   :  { %v2913_v27 = vadd.f32 %v2912_v44, %v2911_v35  ;;  %v2945_v41 = vrot.slane %v2944_v28, 4  ;;  %v10404_v44 = vpop.permute.xlu0 %3030 }
 0x504   :  { %v2914_v53 = vrot.slane %v2913_v27, 2  ;;  %v2946_v10 = vadd.f32 %v2945_v41, %v2944_v28 }
 0x506   :  { %v2915_v26 = vadd.f32 %v2914_v53, %v2913_v27  ;;  %v2947_v3 = vrot.slane %v2946_v10, 2  ;;  %v3046_v27 = vpop.permute.xlu1 %3045  ;;  %v10406_v41 = vpop.permute.xlu0 %3040 }
 0x508   :  { %v2916_v63 = vrot.slane %v2915_v26, 1  ;;  %v2948_v8 = vadd.f32 %v2947_v3, %v2946_v10 }
 0x50a   :  { %v2917_v4 = vadd.f32 %v2916_v63, %v2915_v26  ;;  %v2949_v17 = vrot.slane %v2948_v8, 1  ;;  %v10408_v53 = vpop.permute.xlu1 %3894  ;;  %v10410_v10 = vpop.permute.xlu0 %3055 }
 0x50c   :  { %v2918_v19 = vmul.f32 0.013888889, %v2917_v4  ;;  %v2950_v5 = vadd.f32 %v2949_v17, %v2948_v8  ;;  %v2954_v8 = vld [vmem:[%s11800_s8] sm:$0x1] }
 0x50e   :  { %v2951_v35 = vmul.f32 0.013888889, %v2950_v5  ;;  %v2952_v56 = vmul.f32 %v2918_v19, %v2918_v19  ;;  %v10415_v26 = vpop.permute.xlu1 %3487  ;;  %v10417_v3 = vpop.permute.xlu0 %3060  ;;  %v2973_v5 = vld [vmem:[%s11801_s9] sm:$0x1] }
 0x510   :  { %v2953_v30 = vsub.f32 %v2951_v35, %v2952_v56 }
 0x512   :  { %v2955_v28 = vadd.f32 1e-05, %v2953_v30  ;;  %v10423_v35 = vpop.permute.xlu1 %3050  ;;  %v10425_v56 = vpop.permute.xlu0 %3884 }
 0x514   :  { %8443 = vrsqrt.f32 %v2955_v28 }
 0x516   :  { %v10436_v60 = vpop.permute.xlu0 %3899 }
 0x521   :  { %v8444_v63 = vpop.eup %8443 }
 0x522   :  { %v2957_v4 = vmul.f32 %v8444_v63, %v2954_v8 }
 0x524   :  { %v2974_v17 = vmul.f32 %v2957_v4, %v2918_v19  ;;  %v2962_v30 = vrot.slane %v2957_v4, %v9591_v52 }
 0x526   :  { %v2975_v28 = vsub.f32 %v2973_v5, %v2974_v17  ;;  %v2964_v1 = vmul.f32 %v2962_v30, %v10308_v6  ;;  %v2965_v20 = vmul.f32 %v2962_v30, %v10304_v39  ;;  %v2966_v13 = vmul.f32 %v2962_v30, %v10314_v34  ;;  %v3910_v17 = vpop.permute.xlu1 %3909 }
 0x527   :  { %v2967_v8 = vmul.f32 %v2962_v30, %v10324_v11  ;;  %v2968_v19 = vmul.f32 %v2962_v30, %v10334_v37  ;;  %v2969_v4 = vmul.f32 %v2962_v30, %v10346_v25  ;;  %v2970_v43 = vmul.f32 %v2962_v30, %v10357_v51 }
 0x528   :  { %v2980_v63 = vrot.slane %v2975_v28, %v9591_v52  ;;  %v2971_v14 = vmul.f32 %v2962_v30, %v10366_v47  ;;  %v2972_v48 = vmul.f32 %v2962_v30, %v2894_v23 }
 0x52a   :  { %v2982_v5 = vadd.f32 %v2980_v63, %v2964_v1  ;;  %v2983_v6 = vadd.f32 %v2980_v63, %v2965_v20  ;;  %v2984_v33 = vadd.f32 %v2980_v63, %v2966_v13  ;;  %v2985_v39 = vadd.f32 %v2980_v63, %v2967_v8  ;;  %v8100_v13 = vld [vmem:[%s11799_s10 + $0x78] sm:$0xff]   ;;  %v10453_v1 = vpop.permute.xlu1 %3492 }
 0x52b   :  { %v2986_v34 = vadd.f32 %v2980_v63, %v2968_v19  ;;  %v2987_v11 = vadd.f32 %v2980_v63, %v2969_v4  ;;  %v2988_v42 = vadd.f32 %v2980_v63, %v2970_v43  ;;  %v2989_v37 = vadd.f32 %v2980_v63, %v2971_v14  ;;  %v10455_v43 = vpop.permute.xlu0 %3904  ;;  %7662 = vmatprep.subr.bf16.mxu1 %v8100_v13 }
 0x52c   :  { %v2990_v62 = vadd.f32 %v2980_v63, %v2972_v48  ;;  %2991 = vst.msk [vmem:[#allocation2 + $0x8] sm:$0xff] %vm54_vm0, %v2982_v5  ;;  %2992 = vst.msk [vmem:[#allocation2 + $0x10] sm:$0xff] %vm54_vm0, %v2983_v6 }
 0x52d   :  { %2993 = vst.msk [vmem:[#allocation2 + $0x18] sm:$0xff] %vm54_vm0, %v2984_v33  ;;  %2994 = vst.msk [vmem:[#allocation2 + $0x20] sm:$0xff] %vm54_vm0, %v2985_v39  ;;  %v8101_v33 = vld [vmem:[%s11799_s10 + $0x38] sm:$0xff]  }
 0x52e   :  { %2995 = vst.msk [vmem:[#allocation2 + $0x28] sm:$0xff] %vm54_vm0, %v2986_v34  ;;  %2996 = vst.msk [vmem:[#allocation2 + $0x30] sm:$0xff] %vm54_vm0, %v2987_v11  ;;  %7663 = vmatpush3.bf16.msra.mxu1 %v8101_v33  ;;  %v3920_v23 = vpop.permute.xlu1 %3919 }
 0x52f   :  { %2997 = vst.msk [vmem:[#allocation2 + $0x38] sm:$0xff] %vm54_vm0, %v2988_v42  ;;  %2998 = vst.msk [vmem:[#allocation2 + $0x40] sm:$0xff] %vm54_vm0, %v2989_v37  ;;  %v8102_v42 = vld [vmem:[%s11799_s10 + $0x70] sm:$0xff]   ;;  %v3915_v8 = vpop.permute.xlu0 %3914 }
 0x530   :  { %2999 = vst.msk [vmem:[#allocation2 + $0x48] sm:$0xff] %vm54_vm0, %v2990_v62  ;;  %v8103_v62 = vld [vmem:[%s11799_s10 + $0x30] sm:$0xff]   ;;  %7664 = vmatprep.subr.bf16.mxu1 %v8102_v42 }
 0x532   :  { %7665 = vmatpush3.bf16.msra.mxu1 %v8103_v62 }
 0x533   :  { %v3433_v63 = vld [vmem:[#allocation2 + $0x10] sm:$0xff]  ;;  %v3432_v34 = vld [vmem:[#allocation2 + $0x8] sm:$0xff] }
 0x534   :  { %v10463_v20 = vld [vmem:[#allocation2 + $0x19] sm:$0xff]  ;;  %v3496_v4 = vmul.f32 %v10311_v31, %v3433_v63  ;;  %v3495_v31 = vmul.f32 %v10375_v16, %v3432_v34  ;;  %v3002_v16 = vld [vmem:[#allocation2 + $0x11] sm:$0xff] }
 0x535   :  { %v10467_v48 = vld [vmem:[#allocation2 + $0x29] sm:$0xff]  ;;  %v3066_v14 = vmul.f32 %v10463_v20, %v10394_v32  ;;  %v3434_v39 = vld [vmem:[#allocation2 + $0x18] sm:$0xff] }
 0x536   :  { %v10465_v25 = vld [vmem:[#allocation2 + $0x37] sm:$0xff]  ;;  %v3068_v47 = vmul.f32 %v10467_v48, %v3046_v27  ;;  %v10474_v30 = vld [vmem:[#allocation2 + $0x3f] sm:$0xff]  ;;  %3505 = vst.msk [vmem:[#allocation3 + $0x20] sm:$0xff] %vm54_vm0, %v3496_v4  ;;  %3504 = vst.msk [vmem:[#allocation3 + $0x8] sm:$0xff] %vm54_vm0, %v3495_v31 }
 0x537   :  { %v10471_v51 = vld [vmem:[#allocation2 + $0x39] sm:$0xff]  ;;  %3075 = vst.msk [vmem:[#allocation3 + $0x48] sm:$0xff] %vm54_vm0, %v3066_v14  ;;  %v10479_v19 = vld [vmem:[#allocation2 + $0x47] sm:$0xff]  ;;  %v3932_v32 = vmul.f32 %v3910_v17, %v10465_v25  ;;  %v3933_v11 = vmul.f32 %v3915_v8, %v10474_v30  ;;  %v3497_v17 = vmul.f32 %v10373_v61, %v3434_v39  ;;  %v3437_v13 = vld [vmem:[#allocation2 + $0x30] sm:$0xff]  ;;  %v3577_v8 = vmul.f32 %v10093_v15, %v3002_v16 }
 0x538   :  { %v3070_v28 = vmul.f32 %v10471_v51, %v10410_v10  ;;  %3077 = vst.msk [vmem:[#allocation3 + $0x78] sm:$0xff] %vm54_vm0, %v3068_v47  ;;  %v3000_v27 = vld [vmem:[#allocation2 + $0x1] sm:$0xff]  ;;  %v3934_v5 = vmul.f32 %v3920_v23, %v10479_v19  ;;  %v3438_v33 = vld [vmem:[#allocation2 + $0x38] sm:$0xff]  ;;  %v3001_v61 = vld [vmem:[#allocation2 + $0x9] sm:$0xff] }
 0x539   :  { %v3063_v6 = vmul.f32 %v10342_v12, %v3000_v27  ;;  %v3435_v10 = vld [vmem:[#allocation2 + $0x20] sm:$0xff]  ;;  %3941 = vst.msk [vmem:[#allocation3 + $0x88] sm:$0xff] %vm54_vm0, %v3932_v32  ;;  %v10493_v42 = vld [vmem:[#allocation2 + $0x17] sm:$0xff]  ;;  %v3500_v12 = vmul.f32 %v10390_v49, %v3437_v13  ;;  %v3501_v62 = vmul.f32 %v10396_v45, %v3438_v33  ;;  %v3436_v47 = vld [vmem:[#allocation2 + $0x28] sm:$0xff]  ;;  %v3065_v45 = vmul.f32 %v10404_v44, %v3002_v16 }
 0x53a   :  { %3079 = vst.msk [vmem:[#allocation3 + $0xa8] sm:$0xff] %vm54_vm0, %v3070_v28  ;;  %v3498_v37 = vmul.f32 %v10387_v22, %v3435_v10  ;;  %3943 = vst.msk [vmem:[#allocation3 + $0xb8] sm:$0xff] %vm54_vm0, %v3934_v5  ;;  %v3928_v14 = vmul.f32 %v10398_v21, %v10493_v42  ;;  %v3064_v22 = vmul.f32 %v10400_v55, %v3001_v61  ;;  %v10508_v23 = vld [vmem:[#allocation2 + $0x21] sm:$0xff]  ;;  %v10523_v32 = vld [vmem:[#allocation2 + $0x31] sm:$0xff]  ;;  %3596 = vrot.lane.b32.xlu1 %v3577_v8, %s8483_s29 }
 0x53b   :  { %3072 = vst.msk [vmem:[#allocation3] sm:$0xff] %vm54_vm0, %v3063_v6  ;;  %3942 = vst.msk [vmem:[#allocation3 + $0xa0] sm:$0xff] %vm54_vm0, %v3933_v11  ;;  %v3499_v49 = vmul.f32 %v10402_v9, %v3436_v47  ;;  %v10510_v21 = vld [vmem:[#allocation2 + $0x1f] sm:$0xff]  ;;  %v3067_v55 = vmul.f32 %v10406_v41, %v10508_v23  ;;  %v10525_v4 = vld [vmem:[#allocation2 + $0xf] sm:$0xff]  ;;  %v3576_v15 = vmul.f32 %v10224_v50, %v3001_v61 }
 0x53c   :  { %3506 = vst.msk [vmem:[#allocation3 + $0x38] sm:$0xff] %vm54_vm0, %v3497_v17  ;;  %3507 = vst.msk [vmem:[#allocation3 + $0x50] sm:$0xff] %vm54_vm0, %v3498_v37  ;;  %v3439_v28 = vld [vmem:[#allocation2 + $0x40] sm:$0xff]  ;;  %v3929_v9 = vmul.f32 %v10408_v53, %v10510_v21  ;;  %v3069_v53 = vmul.f32 %v10423_v35, %v10523_v32  ;;  %v3440_v5 = vld [vmem:[#allocation2 + $0x48] sm:$0xff] }
 0x53d   :  { %3509 = vst.msk [vmem:[#allocation3 + $0x80] sm:$0xff] %vm54_vm0, %v3500_v12  ;;  %3510 = vst.msk [vmem:[#allocation3 + $0x98] sm:$0xff] %vm54_vm0, %v3501_v62  ;;  %v3502_v44 = vmul.f32 %v10415_v26, %v3439_v28  ;;  %v10521_v63 = vld [vmem:[#allocation2 + $0x41] sm:$0xff]  ;;  %v3927_v26 = vmul.f32 %v10425_v56, %v10525_v4  ;;  %v10539_v6 = vld [vmem:[#allocation2 + $0x2f] sm:$0xff]  ;;  %3594 = vrot.lane.b32.xlu0 %v3576_v15, %s8483_s29 }
 0x53e   :  { %3937 = vst.msk [vmem:[#allocation3 + $0x28] sm:$0xff] %vm54_vm0, %v3928_v14  ;;  %3073 = vst.msk [vmem:[#allocation3 + $0x18] sm:$0xff] %vm54_vm0, %v3064_v22  ;;  %v3071_v41 = vmul.f32 %v10417_v3, %v10521_v63  ;;  %v10537_v27 = vld [vmem:[#allocation2 + $0x27] sm:$0xff]  ;;  %v3503_v3 = vmul.f32 %v10453_v1, %v3440_v5  ;;  %v3931_v35 = vmul.f32 %v10455_v43, %v10539_v6  ;;  %v3631_v1 = vld [vmem:[#allocation2 + $0x15] sm:$0xff] }
 0x53f   :  { %3508 = vst.msk [vmem:[#allocation3 + $0x68] sm:$0xff] %vm54_vm0, %v3499_v49  ;;  %3074 = vst.msk [vmem:[#allocation3 + $0x30] sm:$0xff] %vm54_vm0, %v3065_v45  ;;  %v3930_v50 = vmul.f32 %v10436_v60, %v10537_v27  ;;  %v3082_v56 = vld [vmem:[#allocation2 + $0xa] sm:$0xff]  ;;  %v3081_v39 = vld [vmem:[#allocation2 + $0x2] sm:$0xff]  ;;  %v3694_v10 = vmul.f32 %v10105_v24, %v3631_v1 }
 0x540   :  { %3076 = vst.msk [vmem:[#allocation3 + $0x60] sm:$0xff] %vm54_vm0, %v3067_v55  ;;  %3938 = vst.msk [vmem:[#allocation3 + $0x40] sm:$0xff] %vm54_vm0, %v3929_v9  ;;  %v3145_v34 = vmul.f32 %v10192_v40, %v3082_v56  ;;  %v3144_v60 = vmul.f32 %v10098_v7, %v3081_v39  ;;  %v3630_v43 = vld [vmem:[#allocation2 + $0xd] sm:$0xff]  ;;  %v3198_v31 = vld [vmem:[#allocation2 + $0x3] sm:$0xff] }
 0x541   :  { %3511 = vst.msk [vmem:[#allocation3 + $0xb0] sm:$0xff] %vm54_vm0, %v3502_v44  ;;  %3080 = vst.msk [vmem:[#allocation3 + $0xc0] sm:$0xff] %vm54_vm0, %v3071_v41  ;;  %v3693_v11 = vmul.f32 %v10102_v54, %v3630_v43  ;;  %v3199_v40 = vld [vmem:[#allocation2 + $0xb] sm:$0xff]  ;;  %v3261_v33 = vmul.f32 %v10285_v46, %v3198_v31  ;;  %v3748_v12 = vld [vmem:[#allocation2 + $0x16] sm:$0xff] }
 0x542   :  { %3078 = vst.msk [vmem:[#allocation3 + $0x90] sm:$0xff] %vm54_vm0, %v3069_v53  ;;  %3936 = vst.msk [vmem:[#allocation3 + $0x10] sm:$0xff] %vm54_vm0, %v3927_v26  ;;  %3164 = vrot.lane.b32.xlu1 %v3145_v34, %s8483_s29  ;;  %3162 = vrot.lane.b32.xlu0 %v3144_v60, %s8483_s29  ;;  %v3262_v7 = vmul.f32 %v10109_v29, %v3199_v40  ;;  %v3747_v24 = vld [vmem:[#allocation2 + $0xe] sm:$0xff]  ;;  %v8106_v46 = vld [vmem:[%s11799_s10 + $0x60] sm:$0xff]   ;;  %v3811_v62 = vmul.f32 %v10208_v59, %v3748_v12 }
 0x543   :  { %3939 = vst.msk [vmem:[#allocation3 + $0x58] sm:$0xff] %vm54_vm0, %v3930_v50  ;;  %3512 = vst.msk [vmem:[#allocation3 + $0xc8] sm:$0xff] %vm54_vm0, %v3503_v3  ;;  %v8104_v54 = vld [vmem:[%s11799_s10 + $0x68] sm:$0xff]   ;;  %v3810_v14 = vmul.f32 %v10113_v57, %v3747_v24  ;;  %v8107_v45 = vld [vmem:[%s11799_s10 + $0x20] sm:$0xff]   ;;  %v3379_v57 = vmul.f32 %v10525_v4, %v10121_v38 }
 0x544   :  { %3940 = vst.msk [vmem:[#allocation3 + $0x70] sm:$0xff] %vm54_vm0, %v3931_v35  ;;  %v8105_v29 = vld [vmem:[%s11799_s10 + $0x28] sm:$0xff]   ;;  %7666 = vmatprep.subr.bf16.mxu1 %v8104_v54  ;;  %v8108_v59 = vld [vmem:[%s11799_s10 + $0x58] sm:$0xff]   ;;  %v3962_v9 = vld [vmem:[#allocation3 + $0x88] sm:$0xff] }
 0x545   :  { %v3950_v17 = vld [vmem:[#allocation3 + $0x28] sm:$0xff]  ;;  %7667 = vmatpush3.bf16.msra.mxu1 %v8105_v29  ;;  %v8109_v38 = vld [vmem:[%s11799_s10 + $0x18] sm:$0xff]   ;;  %v8110_v44 = vld [vmem:[%s11799_s10 + $0x50] sm:$0xff]  }
 0x546   :  { %3713 = vrot.lane.b32.xlu1 %v3694_v10, %s8484_s30  ;;  %3711 = vrot.lane.b32.xlu0 %v3693_v11, %s8484_s30  ;;  %v3315_v16 = vld [vmem:[#allocation2 + $0x7] sm:$0xff]  ;;  %v3084_v28 = vld [vmem:[#allocation2 + $0x1a] sm:$0xff]  ;;  %v3083_v53 = vld [vmem:[#allocation2 + $0x12] sm:$0xff] }
 0x547   :  { %v3953_v61 = vld [vmem:[#allocation3 + $0x40] sm:$0xff]  ;;  %7668 = vmatprep.subr.bf16.mxu1 %v8106_v46  ;;  %v3378_v49 = vmul.f32 %v10117_v18, %v3315_v16  ;;  %v3578_v18 = vmul.f32 %v10235_v0, %v10463_v20  ;;  %v3147_v8 = vmul.f32 %v10196_v2, %v3084_v28  ;;  %v3633_v4 = vld [vmem:[#allocation2 + $0x25] sm:$0xff]  ;;  %v3579_v20 = vmul.f32 %v10128_v36, %v10508_v23  ;;  %v8111_v2 = vld [vmem:[%s11799_s10 + $0x10] sm:$0xff]  }
 0x548   :  { %v11939_v15 = vld [vmem:[#allocation10_spill] sm:$0xff]  ;;  %v3201_v5 = vld [vmem:[#allocation2 + $0x1b] sm:$0xff]  ;;  %v11942_v10 = vld [vmem:[#allocation23_spill] sm:$0xff] }
 0x549   :  { %v3947_v37 = vld [vmem:[#allocation3 + $0x10] sm:$0xff]  ;;  %7669 = vmatpush3.bf16.msra.mxu1 %v8107_v45  ;;  %v3696_v41 = vmul.f32 %v11939_v15, %v3633_v4  ;;  %v11940_v36 = vld [vmem:[#allocation8_spill] sm:$0xff]  ;;  %v3968_v39 = vld [vmem:[#allocation3 + $0xb8] sm:$0xff] }
 0x54a   :  { %v3974_v13 = vpack.c.bf16 %v3950_v17, %v3947_v37  ;;  %3281 = vrot.lane.b32.xlu1 %v3262_v7, %s8484_s30  ;;  %3279 = vrot.lane.b32.xlu0 %v3261_v33, %s8484_s30  ;;  %v3956_v47 = vld [vmem:[#allocation3 + $0x58] sm:$0xff]  ;;  %v8112_v26 = vld [vmem:[%s11799_s10 + $0x48] sm:$0xff]   ;;  %v3146_v23 = vmul.f32 %v11940_v36, %v3083_v53  ;;  %v3965_v50 = vld [vmem:[#allocation3 + $0xa0] sm:$0xff] }
 0x54b   :  { %v3977_v22 = vpack.c.bf16 %v3956_v47, %v3953_v61  ;;  %v3959_v55 = vld [vmem:[#allocation3 + $0x70] sm:$0xff]  ;;  %7670 = vmatprep.subr.bf16.mxu1 %v8108_v59  ;;  %v3632_v34 = vld [vmem:[#allocation2 + $0x1d] sm:$0xff]  ;;  %v3983_v43 = vpack.c.bf16 %v3968_v39, %v3965_v50  ;;  %v3200_v40 = vld [vmem:[#allocation2 + $0x13] sm:$0xff] }
 0x54c   :  { %7865 = vmatmul.mubr.msk.bf16.vlgmr.msra.gmra.mxu0 %vm54_vm0, %v3974_v13  ;;  %v3980_v0 = vpack.c.bf16 %v3962_v9, %v3959_v55  ;;  %v8113_v3 = vld [vmem:[%s11799_s10 + $0x8] sm:$0xff]   ;;  %v8114_v60 = vld [vmem:[%s11799_s10 + $0x40] sm:$0xff]   ;;  %v3695_v11 = vmul.f32 %v11942_v10, %v3632_v34  ;;  %v11945_v33 = vld [vmem:[#allocation7_spill] sm:$0xff] }
 0x54d   :  { %7868 = vmatprep.mubr.msk.bf16.mxu0 %vm8488_vm2, %v11872_v58  ;;  %7671 = vmatpush3.bf16.msra.mxu1 %v8109_v38  ;;  %v11941_v35 = vld [vmem:[#allocation25_spill] sm:$0xff]  ;;  %v11943_v31 = vld [vmem:[#allocation16_spill] sm:$0xff]  ;;  %v3581_v12 = vmul.f32 %v11945_v33, %v10523_v32  ;;  %v3634_v54 = vld [vmem:[#allocation2 + $0x2d] sm:$0xff] }
 0x54e   :  { %3830 = vrot.lane.b32.xlu1 %v3811_v62, %s8485_s1  ;;  %3828 = vrot.lane.b32.xlu0 %v3810_v14, %s8485_s1  ;;  %v3264_v56 = vmul.f32 %v11941_v35, %v3201_v5  ;;  %v3750_v1 = vld [vmem:[#allocation2 + $0x26] sm:$0xff]  ;;  %v11944_v13 = vld [vmem:[#allocation40_spill] sm:$0xff]  ;;  %v11947_v62 = vld [vmem:[#allocation15_spill] sm:$0xff] }
 0x54f   :  { %7672 = vmatprep.subr.bf16.mxu1 %v8110_v44  ;;  %v8115_v17 = vld [vmem:[%s11799_s10] sm:$0xff]   ;;  %v3813_v37 = vmul.f32 %v11943_v31, %v3750_v1  ;;  %v3263_v7 = vmul.f32 %v11944_v13, %v3200_v40  ;;  %v3697_v14 = vmul.f32 %v11947_v62, %v3634_v54  ;;  %v11948_v47 = vld [vmem:[#allocation11_spill] sm:$0xff]  ;;  %v11950_v45 = vld [vmem:[#allocation6_spill] sm:$0xff] }
 0x550   :  { %v3749_v24 = vld [vmem:[#allocation2 + $0x1e] sm:$0xff]  ;;  %v3380_v16 = vmul.f32 %v10493_v42, %v11948_v47  ;;  %v11953_v42 = vld [vmem:[#allocation14_spill] sm:$0xff]  ;;  %v3204_v53 = vld [vmem:[#allocation2 + $0x33] sm:$0xff] }
 0x551   :  { %7673 = vmatpush3.bf16.msra.mxu1 %v8111_v2  ;;  %v11946_v29 = vld [vmem:[#allocation5_spill] sm:$0xff]  ;;  %v11951_v59 = vld [vmem:[#allocation20_spill] sm:$0xff]  ;;  %v11957_v15 = vld [vmem:[#allocation18_spill] sm:$0xff] }
 0x552   :  { %3396 = vrot.lane.b32.xlu1 %v3378_v49, %s8485_s1  ;;  %3398 = vrot.lane.b32.xlu0 %v3379_v57, %s8485_s1  ;;  %v3812_v46 = vmul.f32 %v11946_v29, %v3749_v24  ;;  %v3202_v61 = vld [vmem:[#allocation2 + $0x23] sm:$0xff]  ;;  %v3751_v49 = vld [vmem:[#allocation2 + $0x2e] sm:$0xff]  ;;  %v3381_v57 = vmul.f32 %v10510_v21, %v11950_v45  ;;  %v3752_v34 = vld [vmem:[#allocation2 + $0x36] sm:$0xff] }
 0x553   :  { %7674 = vmatprep.subr.bf16.mxu1 %v8112_v26  ;;  %v3814_v28 = vmul.f32 %v11951_v59, %v3751_v49  ;;  %v3085_v55 = vld [vmem:[#allocation2 + $0x22] sm:$0xff]  ;;  %v11955_v21 = vld [vmem:[#allocation35_spill] sm:$0xff]  ;;  %v11958_v26 = vld [vmem:[#allocation30_spill] sm:$0xff] }
 0x554   :  { %7869 = vmatmul.mubr.msk.bf16.gmra.mxu0 %vm54_vm0, %v3977_v22  ;;  %v11949_v22 = vld [vmem:[#allocation42_spill] sm:$0xff]  ;;  %v11954_v9 = vld [vmem:[#allocation17_spill] sm:$0xff]  ;;  %v3582_v4 = vmul.f32 %v11955_v21, %v10471_v51  ;;  %v11959_v36 = vld [vmem:[#allocation43_spill] sm:$0xff] }
 0x555   :  { %7872 = vmatprep.mubr.msk.bf16.mxu0 %vm8488_vm2, %v11872_v58  ;;  %7675 = vmatpush3.bf16.msra.mxu1 %v8113_v3  ;;  %v3265_v32 = vmul.f32 %v11949_v22, %v3202_v61  ;;  %v3148_v44 = vmul.f32 %v11954_v9, %v3085_v55  ;;  %v3267_v51 = vmul.f32 %v11959_v36, %v3204_v53  ;;  %v3753_v50 = vld [vmem:[#allocation2 + $0x3e] sm:$0xff]  ;;  %v3087_v24 = vld [vmem:[#allocation2 + $0x32] sm:$0xff]  ;;  %v11971_v22 = vld [vmem:[#allocation26_spill] sm:$0xff] }
 0x556   :  { %3598 = vrot.lane.b32.xlu1 %v3578_v18, %s8483_s29  ;;  %3168 = vrot.lane.b32.xlu0 %v3147_v8, %s8483_s29  ;;  %v11952_v18 = vld [vmem:[#allocation33_spill] sm:$0xff]  ;;  %v3383_v8 = vmul.f32 %v10539_v6, %v11953_v42  ;;  %v11965_v31 = vld [vmem:[#allocation36_spill] sm:$0xff]  ;;  %v11968_v54 = vld [vmem:[#allocation31_spill] sm:$0xff] }
 0x557   :  { %7676 = vmatprep.subr.bf16.mxu1 %v8114_v60  ;;  %v3580_v38 = vmul.f32 %v11952_v18, %v10467_v48  ;;  %v11956_v48 = vld [vmem:[#allocation22_spill] sm:$0xff]  ;;  %v11960_v3 = vld [vmem:[#allocation9_spill] sm:$0xff]  ;;  %v11962_v60 = vld [vmem:[#allocation19_spill] sm:$0xff]  ;;  %v3150_v29 = vmul.f32 %v11968_v54, %v3087_v24 }
 0x558   :  { %v3815_v1 = vmul.f32 %v11962_v60, %v3752_v34  ;;  %v3206_v13 = vld [vmem:[#allocation2 + $0x43] sm:$0xff]  ;;  %v11969_v62 = vld [vmem:[#allocation24_spill] sm:$0xff]  ;;  %v11972_v45 = vld [vmem:[#allocation27_spill] sm:$0xff] }
 0x559   :  { %7677 = vmatpush3.bf16.msra.mxu1 %v8115_v17  ;;  %v11964_v17 = vld [vmem:[#allocation12_spill] sm:$0xff]  ;;  %v11970_v61 = vld [vmem:[#allocation21_spill] sm:$0xff]  ;;  %v11975_v55 = vld [vmem:[#allocation38_spill] sm:$0xff] }
 0x55a   :  { %3600 = vrot.lane.b32.xlu1 %v3579_v20, %s8483_s29  ;;  %3717 = vrot.lane.b32.xlu0 %v3696_v41, %s8484_s30  ;;  %v3636_v20 = vld [vmem:[#allocation2 + $0x3d] sm:$0xff]  ;;  %v3635_v41 = vld [vmem:[#allocation2 + $0x35] sm:$0xff]  ;;  %v3382_v40 = vmul.f32 %v10537_v27, %v11964_v17  ;;  %v3754_v49 = vld [vmem:[#allocation2 + $0x46] sm:$0xff] }
 0x55b   :  { %v3699_v6 = vmul.f32 %v11957_v15, %v3636_v20  ;;  %v3698_v5 = vmul.f32 %v11958_v26, %v3635_v41  ;;  %v3088_v27 = vld [vmem:[#allocation2 + $0x3a] sm:$0xff]  ;;  %v11973_v59 = vld [vmem:[#allocation29_spill] sm:$0xff]  ;;  %v3755_v21 = vld [vmem:[#allocation2 + $0x4e] sm:$0xff] }
 0x55c   :  { %7873 = vmatmul.mubr.msk.bf16.gmra.mxu0 %vm54_vm0, %v3980_v0  ;;  %v3086_v0 = vld [vmem:[#allocation2 + $0x2a] sm:$0xff] }
 0x55d   :  { %7876 = vmatprep.mubr.msk.bf16.mxu0 %vm8488_vm2, %v11872_v58  ;;  %v3149_v2 = vmul.f32 %v11956_v48, %v3086_v0  ;;  %v3521_v18 = vld [vmem:[#allocation2 + $0x49] sm:$0xff] }
 0x55e   :  { %3166 = vrot.lane.b32.xlu1 %v3146_v23, %s8483_s29  ;;  %3285 = vrot.lane.b32.xlu0 %v3264_v56, %s8484_s30  ;;  %v3203_v23 = vld [vmem:[#allocation2 + $0x2b] sm:$0xff]  ;;  %v11961_v56 = vld [vmem:[#allocation28_spill] sm:$0xff] }
 0x55f   :  { %v3266_v35 = vmul.f32 %v11960_v3, %v3203_v23  ;;  %v3816_v39 = vmul.f32 %v11961_v56, %v3753_v50 }
 0x562   :  { %3715 = vrot.lane.b32.xlu1 %v3695_v11, %s8484_s30  ;;  %3834 = vrot.lane.b32.xlu0 %v3813_v37, %s8485_s1  ;;  %v3089_v11 = vld [vmem:[#allocation2 + $0x42] sm:$0xff] }
 0x563   :  { %v3152_v37 = vmul.f32 %v11965_v31, %v3089_v11 }
 0x564   :  { %7877 = vmatmul.mubr.msk.bf16.gmra.mxu0 %vm54_vm0, %v3983_v43  ;;  %v11963_v43 = vld [vmem:[#allocation34_spill] sm:$0xff] }
 0x565   :  { %7880 = vmatprep.mubr.msk.bf16.mxu0 %vm8488_vm2, %v11872_v58  ;;  %v3385_v10 = vmul.f32 %v11963_v43, %v10474_v30 }
 0x566   :  { %3283 = vrot.lane.b32.xlu1 %v3263_v7, %s8484_s30  ;;  %3604 = vrot.lane.b32.xlu0 %v3581_v12, %s8483_s29  ;;  %v11966_v7 = vld [vmem:[#allocation13_spill] sm:$0xff]  ;;  %v11967_v12 = vld [vmem:[#allocation44_spill] sm:$0xff] }
 0x567   :  { %v3583_v33 = vmul.f32 %v11966_v7, %v10521_v63  ;;  %v3269_v30 = vmul.f32 %v11967_v12, %v3206_v13  ;;  %v3637_v63 = vld [vmem:[#allocation2 + $0x45] sm:$0xff] }
 0x568   :  { %v3700_v47 = vmul.f32 %v11970_v61, %v3637_v63 }
 0x56a   :  { %3832 = vrot.lane.b32.xlu1 %v3812_v46, %s8485_s1  ;;  %3719 = vrot.lane.b32.xlu0 %v3697_v14, %s8484_s30  ;;  %v8474_v46 = vld [vmem:[%s11834_s23 + $0x40] sm:$0xff]  ;;  %v3151_v14 = vmul.f32 %v11969_v62, %v3088_v27 }
 0x56e   :  { %3400 = vrot.lane.b32.xlu1 %v3380_v16, %s8485_s1  ;;  %3287 = vrot.lane.b32.xlu0 %v3265_v32, %s8484_s30  ;;  %v3205_v16 = vld [vmem:[#allocation2 + $0x3b] sm:$0xff] }
 0x56f   :  { %v3268_v32 = vmul.f32 %v11971_v22, %v3205_v16 }
 0x572   :  { %3402 = vrot.lane.b32.xlu1 %v3381_v57, %s8485_s1  ;;  %3836 = vrot.lane.b32.xlu0 %v3814_v28, %s8485_s1  ;;  %v3817_v57 = vmul.f32 %v11972_v45, %v3754_v49  ;;  %v3384_v28 = vmul.f32 %v11973_v59, %v10465_v25  ;;  %v11976_v25 = vld [vmem:[#allocation39_spill] sm:$0xff] }
 0x573   :  { %v3818_v0 = vmul.f32 %v11976_v25, %v3755_v21 }
 0x576   :  { %3602 = vrot.lane.b32.xlu1 %v3580_v38, %s8483_s29  ;;  %3406 = vrot.lane.b32.xlu0 %v3383_v8, %s8485_s1  ;;  %v11974_v38 = vld [vmem:[#allocation37_spill] sm:$0xff]  ;;  %v3638_v8 = vld [vmem:[#allocation2 + $0x4d] sm:$0xff] }
 0x577   :  { %v3584_v42 = vmul.f32 %v11974_v38, %v3521_v18  ;;  %v3701_v9 = vmul.f32 %v11975_v55, %v3638_v8 }
 0x57a   :  { %3170 = vrot.lane.b32.xlu1 %v3148_v44, %s8483_s29  ;;  %3606 = vrot.lane.b32.xlu0 %v3582_v4, %s8483_s29 }
 0x57e   :  { %3172 = vrot.lane.b32.xlu1 %v3149_v2, %s8483_s29  ;;  %3723 = vrot.lane.b32.xlu0 %v3699_v6, %s8484_s30  ;;  %v11977_v2 = vld [vmem:[#allocation41_spill] sm:$0xff] }
 0x57f   :  { %v3386_v15 = vmul.f32 %v11977_v2, %v10479_v19 }
 0x582   :  { %3721 = vrot.lane.b32.xlu1 %v3698_v5, %s8484_s30  ;;  %3291 = vrot.lane.b32.xlu0 %v3267_v51, %s8484_s30 }
 0x586   :  { %3289 = vrot.lane.b32.xlu1 %v3266_v35, %s8484_s30  ;;  %3840 = vrot.lane.b32.xlu0 %v3816_v39, %s8485_s1 }
 0x58a   :  { %3838 = vrot.lane.b32.xlu1 %v3815_v1, %s8485_s1  ;;  %3410 = vrot.lane.b32.xlu0 %v3385_v10, %s8485_s1 }
 0x58e   :  { %3404 = vrot.lane.b32.xlu1 %v3382_v40, %s8485_s1  ;;  %3178 = vrot.lane.b32.xlu0 %v3152_v37, %s8483_s29 }
 0x592   :  { %3608 = vrot.lane.b32.xlu1 %v3583_v33, %s8483_s29  ;;  %3295 = vrot.lane.b32.xlu0 %v3269_v30, %s8484_s30 }
 0x596   :  { %3174 = vrot.lane.b32.xlu1 %v3150_v29, %s8483_s29  ;;  %3924 = vperm.xlu0 %8060, %v8474_v46  }
 0x59a   :  { %3176 = vrot.lane.b32.xlu1 %v3151_v14, %s8483_s29 }
 0x59e   :  { %3725 = vrot.lane.b32.xlu1 %v3700_v47, %s8484_s30 }
 0x5a2   :  { %3293 = vrot.lane.b32.xlu1 %v3268_v32, %s8484_s30 }
 0x5a6   :  { %3842 = vrot.lane.b32.xlu1 %v3817_v57, %s8485_s1 }
 0x5aa   :  { %3408 = vrot.lane.b32.xlu1 %v3384_v28, %s8485_s1 }
 0x5ac   :  { %v3597_v44 = vpop.permute.xlu1 %3596 }
 0x5ad   :  { %3622 = vst.msk [vmem:[#allocation3 + $0x20] sm:$0xff] %vm274_vm3, %v3597_v44 }
 0x5ae   :  { %3610 = vrot.lane.b32.xlu1 %v3584_v42, %s8483_s29 }
 0x5af   :  { %v3595_v4 = vpop.permute.xlu0 %3594 }
 0x5b0   :  { %3621 = vst.msk [vmem:[#allocation3 + $0x8] sm:$0xff] %vm274_vm3, %v3595_v4 }
 0x5b2   :  { %3727 = vrot.lane.b32.xlu1 %v3701_v9, %s8484_s30 }
 0x5b4   :  { %v3165_v20 = vpop.permute.xlu1 %3164  ;;  %v3163_v48 = vpop.permute.xlu0 %3162 }
 0x5b5   :  { %3190 = vst.msk [vmem:[#allocation3 + $0x18] sm:$0xff] %vm274_vm3, %v3165_v20  ;;  %3189 = vst.msk [vmem:[#allocation3] sm:$0xff] %vm274_vm3, %v3163_v48 }
 0x5b6   :  { %3844 = vrot.lane.b32.xlu1 %v3818_v0, %s8485_s1 }
 0x5b8   :  { %v3714_v6 = vpop.permute.xlu1 %3713  ;;  %v3712_v41 = vpop.permute.xlu0 %3711 }
 0x5b9   :  { %3739 = vst.msk [vmem:[#allocation3 + $0x20] sm:$0xff] %vm392_vm4, %v3714_v6  ;;  %3738 = vst.msk [vmem:[#allocation3 + $0x8] sm:$0xff] %vm392_vm4, %v3712_v41 }
 0x5ba   :  { %3412 = vrot.lane.b32.xlu1 %v3386_v15, %s8485_s1 }
 0x5bc   :  { %v3282_v53 = vpop.permute.xlu1 %3281  ;;  %v3280_v26 = vpop.permute.xlu0 %3279 }
 0x5bd   :  { %3307 = vst.msk [vmem:[#allocation3 + $0x18] sm:$0xff] %vm392_vm4, %v3282_v53  ;;  %3306 = vst.msk [vmem:[#allocation3] sm:$0xff] %vm392_vm4, %v3280_v26 }
 0x5c0   :  { %v3831_v5 = vpop.permute.xlu1 %3830  ;;  %v3829_v36 = vpop.permute.xlu0 %3828 }
 0x5c1   :  { %3856 = vst.msk [vmem:[#allocation3 + $0x20] sm:$0xff] %vm510_vm5, %v3831_v5  ;;  %3855 = vst.msk [vmem:[#allocation3 + $0x8] sm:$0xff] %vm510_vm5, %v3829_v36  ;;  %v3872_v5 = vld [vmem:[#allocation2 + $0x4f] sm:$0xff] }
 0x5c4   :  { %v3397_v19 = vpop.permute.xlu1 %3396  ;;  %v3399_v51 = vpop.permute.xlu0 %3398 }
 0x5c5   :  { %3423 = vst.msk [vmem:[#allocation3] sm:$0xff] %vm510_vm5, %v3397_v19  ;;  %3424 = vst.msk [vmem:[#allocation3 + $0x18] sm:$0xff] %vm510_vm5, %v3399_v51 }
 0x5c8   :  { %v3599_v23 = vpop.permute.xlu1 %3598  ;;  %v3949_v50 = vld [vmem:[#allocation3 + $0x20] sm:$0xff]  ;;  %v3169_v3 = vpop.permute.xlu0 %3168  ;;  %v3946_v35 = vld [vmem:[#allocation3 + $0x8] sm:$0xff] }
 0x5c9   :  { %3623 = vst.msk [vmem:[#allocation3 + $0x38] sm:$0xff] %vm274_vm3, %v3599_v23  ;;  %3192 = vst.msk [vmem:[#allocation3 + $0x48] sm:$0xff] %vm274_vm3, %v3169_v3  ;;  %v3973_v56 = vpack.c.bf16 %v3949_v50, %v3946_v35 }
 0x5cb   :  { %4185 = vmatprep.mubr.bf16.mxu1 %v3973_v56 }
 0x5cc   :  { %v3601_v39 = vpop.permute.xlu1 %3600  ;;  %v3945_v34 = vld [vmem:[#allocation3] sm:$0xff]  ;;  %v3718_v60 = vpop.permute.xlu0 %3717  ;;  %v3948_v1 = vld [vmem:[#allocation3 + $0x18] sm:$0xff] }
 0x5cd   :  { %3624 = vst.msk [vmem:[#allocation3 + $0x50] sm:$0xff] %vm274_vm3, %v3601_v39  ;;  %v3972_v43 = vpack.c.bf16 %v3948_v1, %v3945_v34 }
 0x5ce   :  { %3741 = vst.msk [vmem:[#allocation3 + $0x50] sm:$0xff] %vm392_vm4, %v3718_v60 }
 0x5cf   :  { %4186 = vmatmul.mubr.bf16.vlgmr.msra.gmra.mxu1 %v3972_v43 }
 0x5d0   :  { %v3167_v10 = vpop.permute.xlu1 %3166  ;;  %v3286_v11 = vpop.permute.xlu0 %3285 }
 0x5d1   :  { %3191 = vst.msk [vmem:[#allocation3 + $0x30] sm:$0xff] %vm274_vm3, %v3167_v10 }
 0x5d2   :  { %3309 = vst.msk [vmem:[#allocation3 + $0x48] sm:$0xff] %vm392_vm4, %v3286_v11 }
 0x5d4   :  { %v3716_v17 = vpop.permute.xlu1 %3715  ;;  %v3835_v40 = vpop.permute.xlu0 %3834 }
 0x5d5   :  { %3740 = vst.msk [vmem:[#allocation3 + $0x38] sm:$0xff] %vm392_vm4, %v3716_v17 }
 0x5d6   :  { %3858 = vst.msk [vmem:[#allocation3 + $0x50] sm:$0xff] %vm510_vm5, %v3835_v40 }
 0x5d8   :  { %v3284_v31 = vpop.permute.xlu1 %3283  ;;  %v3605_v37 = vpop.permute.xlu0 %3604 }
 0x5d9   :  { %3308 = vst.msk [vmem:[#allocation3 + $0x30] sm:$0xff] %vm392_vm4, %v3284_v31 }
 0x5da   :  { %3626 = vst.msk [vmem:[#allocation3 + $0x80] sm:$0xff] %vm274_vm3, %v3605_v37 }
 0x5dc   :  { %v3833_v13 = vpop.permute.xlu1 %3832  ;;  %v3720_v7 = vpop.permute.xlu0 %3719 }
 0x5dd   :  { %3857 = vst.msk [vmem:[#allocation3 + $0x38] sm:$0xff] %vm510_vm5, %v3833_v13  ;;  %v3955_v54 = vld [vmem:[#allocation3 + $0x50] sm:$0xff] }
 0x5e0   :  { %v3401_v33 = vpop.permute.xlu1 %3400  ;;  %v3288_v12 = vpop.permute.xlu0 %3287 }
 0x5e1   :  { %3425 = vst.msk [vmem:[#allocation3 + $0x30] sm:$0xff] %vm510_vm5, %v3401_v33 }
 0x5e4   :  { %v3403_v30 = vpop.permute.xlu1 %3402  ;;  %v3952_v24 = vld [vmem:[#allocation3 + $0x38] sm:$0xff]  ;;  %v3837_v29 = vpop.permute.xlu0 %3836 }
 0x5e5   :  { %3426 = vst.msk [vmem:[#allocation3 + $0x48] sm:$0xff] %vm510_vm5, %v3403_v30  ;;  %v3976_v27 = vpack.c.bf16 %v3955_v54, %v3952_v24 }
 0x5e7   :  { %4193 = vmatprep.mubr.bf16.mxu1 %v3976_v27 }
 0x5e8   :  { %v3603_v46 = vpop.permute.xlu1 %3602  ;;  %v3407_v62 = vpop.permute.xlu0 %3406  ;;  %v3951_v63 = vld [vmem:[#allocation3 + $0x30] sm:$0xff] }
 0x5e9   :  { %3625 = vst.msk [vmem:[#allocation3 + $0x68] sm:$0xff] %vm274_vm3, %v3603_v46 }
 0x5ea   :  { %3742 = vst.msk [vmem:[#allocation3 + $0x68] sm:$0xff] %vm392_vm4, %v3720_v7 }
 0x5eb   :  { %3859 = vst.msk [vmem:[#allocation3 + $0x68] sm:$0xff] %vm510_vm5, %v3837_v29 }
 0x5ec   :  { %v3171_v14 = vpop.permute.xlu1 %3170  ;;  %v3954_v61 = vld [vmem:[#allocation3 + $0x48] sm:$0xff]  ;;  %v3607_v47 = vpop.permute.xlu0 %3606 }
 0x5ed   :  { %3193 = vst.msk [vmem:[#allocation3 + $0x60] sm:$0xff] %vm274_vm3, %v3171_v14  ;;  %v3975_v16 = vpack.c.bf16 %v3954_v61, %v3951_v63  ;;  %3627 = vst.msk [vmem:[#allocation3 + $0x98] sm:$0xff] %vm274_vm3, %v3607_v47 }
 0x5ee   :  { %3310 = vst.msk [vmem:[#allocation3 + $0x60] sm:$0xff] %vm392_vm4, %v3288_v12 }
 0x5ef   :  { %4194 = vmatmul.mubr.bf16.gmra.mxu1 %v3975_v16 }
 0x5f0   :  { %v3173_v22 = vpop.permute.xlu1 %3172  ;;  %v3724_v32 = vpop.permute.xlu0 %3723 }
 0x5f1   :  { %3194 = vst.msk [vmem:[#allocation3 + $0x78] sm:$0xff] %vm274_vm3, %v3173_v22 }
 0x5f2   :  { %3744 = vst.msk [vmem:[#allocation3 + $0x98] sm:$0xff] %vm392_vm4, %v3724_v32  ;;  %v3958_v55 = vld [vmem:[#allocation3 + $0x68] sm:$0xff] }
 0x5f4   :  { %v3722_v49 = vpop.permute.xlu1 %3721  ;;  %v3292_v45 = vpop.permute.xlu0 %3291 }
 0x5f5   :  { %3743 = vst.msk [vmem:[#allocation3 + $0x80] sm:$0xff] %vm392_vm4, %v3722_v49 }
 0x5f8   :  { %v3290_v57 = vpop.permute.xlu1 %3289  ;;  %v3841_v59 = vpop.permute.xlu0 %3840 }
 0x5f9   :  { %3311 = vst.msk [vmem:[#allocation3 + $0x78] sm:$0xff] %vm392_vm4, %v3290_v57 }
 0x5fa   :  { %3428 = vst.msk [vmem:[#allocation3 + $0x78] sm:$0xff] %vm510_vm5, %v3407_v62  ;;  %3861 = vst.msk [vmem:[#allocation3 + $0x98] sm:$0xff] %vm510_vm5, %v3841_v59 }
 0x5fc   :  { %v3839_v28 = vpop.permute.xlu1 %3838  ;;  %v3411_v18 = vpop.permute.xlu0 %3410 }
 0x5fd   :  { %3860 = vst.msk [vmem:[#allocation3 + $0x80] sm:$0xff] %vm510_vm5, %v3839_v28 }
 0x600   :  { %v3405_v38 = vpop.permute.xlu1 %3404  ;;  %v3179_v42 = vpop.permute.xlu0 %3178 }
 0x601   :  { %3427 = vst.msk [vmem:[#allocation3 + $0x60] sm:$0xff] %vm510_vm5, %v3405_v38  ;;  %v3960_v0 = vld [vmem:[#allocation3 + $0x78] sm:$0xff] }
 0x602   :  { %3197 = vst.msk [vmem:[#allocation3 + $0xc0] sm:$0xff] %vm274_vm3, %v3179_v42  ;;  %v3964_v17 = vld [vmem:[#allocation3 + $0x98] sm:$0xff] }
 0x604   :  { %v3609_v8 = vpop.permute.xlu1 %3608  ;;  %v3961_v9 = vld [vmem:[#allocation3 + $0x80] sm:$0xff]  ;;  %v3296_v44 = vpop.permute.xlu0 %3295 }
 0x605   :  { %3628 = vst.msk [vmem:[#allocation3 + $0xb0] sm:$0xff] %vm274_vm3, %v3609_v8  ;;  %v3979_v21 = vpack.c.bf16 %v3961_v9, %v3958_v55  ;;  %v10801_v8 = vld [vmem:[%s11802_s11] ss:$0 sm:$0xff] }
 0x606   :  { %3314 = vst.msk [vmem:[#allocation3 + $0xc0] sm:$0xff] %vm392_vm4, %v3296_v44 }
 0x607   :  { %4201 = vmatprep.mubr.bf16.mxu1 %v3979_v21 }
 0x608   :  { %v3175_v4 = vpop.permute.xlu1 %3174  ;;  %v3957_v25 = vld [vmem:[#allocation3 + $0x60] sm:$0xff] }
 0x609   :  { %3195 = vst.msk [vmem:[#allocation3 + $0x90] sm:$0xff] %vm274_vm3, %v3175_v4  ;;  %v3978_v20 = vpack.c.bf16 %v3960_v0, %v3957_v25 }
 0x60a   :  { %3312 = vst.msk [vmem:[#allocation3 + $0x90] sm:$0xff] %vm392_vm4, %v3292_v45 }
 0x60b   :  { %4202 = vmatmul.mubr.bf16.gmra.mxu1 %v3978_v20 }
 0x60c   :  { %v10769_v48 = vpop.f32.mrf.mxu0  ;;  %v3177_v15 = vpop.permute.xlu1 %3176 }
 0x60d   :  { %3196 = vst.msk [vmem:[#allocation3 + $0xa8] sm:$0xff] %vm274_vm3, %v3177_v15 }
 0x60e   :  { %v7866_v2 = vpop.f32.mrf.mxu0 }
 0x610   :  { %v10773_v6 = vpop.f32.mrf.mxu0  ;;  %v3726_v53 = vpop.permute.xlu1 %3725 }
 0x611   :  { %3745 = vst.msk [vmem:[#allocation3 + $0xb0] sm:$0xff] %vm392_vm4, %v3726_v53  ;;  %v3925_v36 = vpop.permute.xlu0 %3924 }
 0x612   :  { %v7867_v41 = vpop.f32.mrf.mxu0  ;;  %v3935_v19 = vmul.f32 %v3925_v36, %v3872_v5 }
 0x614   :  { %v10776_v26 = vpop.f32.mrf.mxu0  ;;  %v3294_v23 = vpop.permute.xlu1 %3293  ;;  %3944 = vst.msk [vmem:[#allocation3 + $0xd0] sm:$0xff] %vm54_vm0, %v3935_v19 }
 0x615   :  { %3313 = vst.msk [vmem:[#allocation3 + $0xa8] sm:$0xff] %vm392_vm4, %v3294_v23 }
 0x616   :  { %v7870_v51 = vpop.f32.mrf.mxu0  ;;  %3430 = vst.msk [vmem:[#allocation3 + $0xa8] sm:$0xff] %vm510_vm5, %v3411_v18 }
 0x618   :  { %v10780_v50 = vpop.f32.mrf.mxu0  ;;  %v3843_v35 = vpop.permute.xlu1 %3842 }
 0x619   :  { %3862 = vst.msk [vmem:[#allocation3 + $0xb0] sm:$0xff] %vm510_vm5, %v3843_v35 }
 0x61a   :  { %v7871_v3 = vpop.f32.mrf.mxu0 }
 0x61b   :  { %v3971_v60 = vld [vmem:[#allocation3 + $0xd0] sm:$0xff] }
 0x61c   :  { %v10784_v56 = vpop.f32.mrf.mxu0  ;;  %v3409_v34 = vpop.permute.xlu1 %3408  ;;  %v3986_v1 = vpack.c.bf16 %v3971_v60, %v3971_v60 }
 0x61d   :  { %3429 = vst.msk [vmem:[#allocation3 + $0x90] sm:$0xff] %vm510_vm5, %v3409_v34  ;;  %v3966_v12 = vld [vmem:[#allocation3 + $0xa8] sm:$0xff] }
 0x61e   :  { %v7874_v39 = vpop.f32.mrf.mxu0  ;;  %7881 = vmatmul.mubr.msk.bf16.gmra.mxu0 %vm54_vm0, %v3986_v1 }
 0x620   :  { %v10787_v43 = vpop.f32.mrf.mxu0  ;;  %v3611_v11 = vpop.permute.xlu1 %3610  ;;  %v3967_v40 = vld [vmem:[#allocation3 + $0xb0] sm:$0xff] }
 0x621   :  { %3629 = vst.msk [vmem:[#allocation3 + $0xc8] sm:$0xff] %vm274_vm3, %v3611_v11  ;;  %v3982_v31 = vpack.c.bf16 %v3967_v40, %v3964_v17 }
 0x622   :  { %v7875_v10 = vpop.f32.mrf.mxu0 }
 0x623   :  { %4209 = vmatprep.mubr.bf16.mxu1 %v3982_v31 }
 0x624   :  { %v10791_v37 = vpop.f32.mrf.mxu0  ;;  %v3728_v7 = vpop.permute.xlu1 %3727  ;;  %v3963_v33 = vld [vmem:[#allocation3 + $0x90] sm:$0xff] }
 0x625   :  { %3746 = vst.msk [vmem:[#allocation3 + $0xc8] sm:$0xff] %vm392_vm4, %v3728_v7  ;;  %v3981_v30 = vpack.c.bf16 %v3966_v12, %v3963_v33 }
 0x626   :  { %v7878_v13 = vpop.f32.mrf.mxu0 }
 0x627   :  { %4210 = vmatmul.mubr.bf16.gmra.mxu1 %v3981_v30 }
 0x628   :  { %v10794_v24 = vpop.f32.mrf.mxu0  ;;  %v3845_v29 = vpop.permute.xlu1 %3844 }
 0x629   :  { %3863 = vst.msk [vmem:[#allocation3 + $0xc8] sm:$0xff] %vm510_vm5, %v3845_v29 }
 0x62a   :  { %v7879_v54 = vpop.f32.mrf.mxu0 }
 0x62c   :  { %v3413_v27 = vpop.permute.xlu1 %3412 }
 0x62d   :  { %3431 = vst.msk [vmem:[#allocation3 + $0xc0] sm:$0xff] %vm510_vm5, %v3413_v27 }
 0x630   :  { %v3970_v46 = vld [vmem:[#allocation3 + $0xc8] sm:$0xff] }
 0x631   :  { %v3985_v62 = vpack.c.bf16 %v3970_v46, %v3970_v46 }
 0x633   :  { %4217 = vmatprep.mubr.bf16.mxu1 %v3985_v62 }
 0x634   :  { %v3969_v14 = vld [vmem:[#allocation3 + $0xc0] sm:$0xff] }
 0x635   :  { %v3984_v63 = vpack.c.bf16 %v3969_v14, %v3969_v14 }
 0x637   :  { %4218 = vmatmul.mubr.bf16.gmra.mxu1 %v3984_v63 }
 0x68f   :  { %v7678_v61 = vpop.f32.mrf.mxu1 }
 0x691   :  { %v7679_v47 = vpop.f32.mrf.mxu1 }
 0x692   :  { %v7680_v38 = vadd.f32 %v7679_v47, %v7678_v61 }
 0x693   :  { %v7681_v16 = vpop.f32.mrf.mxu1 }
 0x694   :  { %v4188_v21 = vadd.f32 %v7680_v38, %v10801_v8 }
 0x695   :  { %v7682_v22 = vpop.f32.mrf.mxu1 }
 0x696   :  { %v7683_v18 = vadd.f32 %v7682_v22, %v7681_v16  ;;  %v10811_v53 = vadd.f32 %v10769_v48, %v4188_v21 }
 0x698   :  { %v4191_v9 = vadd.f32 %v7683_v18, %v10801_v8  ;;  %v4306_v35 = vmin.f32 %v10811_v53, 0.0  ;;  %vm4297_vm4 = vcmp.gt.f32.partialorder %v10811_v53, 0.0 }
 0x69a   :  { %v10807_v2 = vadd.f32 %v10773_v6, %v4191_v9  ;;  %v4315_v11 = vmul.f32 1.442695, %v4306_v35 }
 0x69c   :  { %v4307_v23 = vmin.f32 %v10807_v2, 0.0  ;;  %vm4298_vm3 = vcmp.gt.f32.partialorder %v10807_v2, 0.0 }
 0x69e   :  { %v4317_v60 = vmul.f32 1.442695, %v4307_v23 }
 0x6a0   :  { %8445 = vpow2.f32 %v4317_v60 }
 0x6a1   :  { %8447 = vpow2.f32 %v4315_v11 }
 0x6af   :  { %v7684_v32 = vpop.f32.mrf.mxu1 }
 0x6b1   :  { %v7685_v49 = vpop.f32.mrf.mxu1 }
 0x6b2   :  { %v7686_v55 = vadd.f32 %v7685_v49, %v7684_v32 }
 0x6b3   :  { %v7687_v45 = vpop.f32.mrf.mxu1 }
 0x6b4   :  { %v4196_v25 = vadd.f32 %v7686_v55, %v10801_v8 }
 0x6b5   :  { %v7688_v57 = vpop.f32.mrf.mxu1 }
 0x6b6   :  { %v7689_v44 = vadd.f32 %v7688_v57, %v7687_v45  ;;  %v10814_v36 = vadd.f32 %v10776_v26, %v4196_v25 }
 0x6b8   :  { %v4199_v15 = vadd.f32 %v7689_v44, %v10801_v8  ;;  %v4308_v48 = vmin.f32 %v10814_v36, 0.0  ;;  %vm4299_vm5 = vcmp.gt.f32.partialorder %v10814_v36, 0.0 }
 0x6ba   :  { %v10819_v3 = vadd.f32 %v10780_v50, %v4199_v15  ;;  %v4319_v17 = vmul.f32 1.442695, %v4308_v48 }
 0x6bc   :  { %v4309_v1 = vmin.f32 %v10819_v3, 0.0  ;;  %8449 = vpow2.f32 %v4319_v17  ;;  %vm4300_vm13 = vcmp.gt.f32.partialorder %v10819_v3, 0.0 }
 0x6be   :  { %v4321_v7 = vmul.f32 1.442695, %v4309_v1 }
 0x6c0   :  { %8451 = vpow2.f32 %v4321_v7 }
 0x6cb   :  { %v7690_v59 = vpop.f32.mrf.mxu1 }
 0x6cd   :  { %v7691_v28 = vpop.f32.mrf.mxu1 }
 0x6ce   :  { %v7692_v0 = vadd.f32 %v7691_v28, %v7690_v59 }
 0x6cf   :  { %v7693_v42 = vpop.f32.mrf.mxu1 }
 0x6d0   :  { %v4204_v19 = vadd.f32 %v7692_v0, %v10801_v8 }
 0x6d1   :  { %v7694_v4 = vpop.f32.mrf.mxu1 }
 0x6d2   :  { %v7695_v41 = vadd.f32 %v7694_v4, %v7693_v42  ;;  %v10825_v34 = vadd.f32 %v10784_v56, %v4204_v19 }
 0x6d4   :  { %v4207_v6 = vadd.f32 %v7695_v41, %v10801_v8  ;;  %v4310_v40 = vmin.f32 %v10825_v34, 0.0  ;;  %vm4301_vm14 = vcmp.gt.f32.partialorder %v10825_v34, 0.0 }
 0x6d6   :  { %v10829_v10 = vadd.f32 %v10787_v43, %v4207_v6  ;;  %v4323_v30 = vmul.f32 1.442695, %v4310_v40 }
 0x6d8   :  { %v4311_v33 = vmin.f32 %v10829_v10, 0.0  ;;  %8453 = vpow2.f32 %v4323_v30  ;;  %vm4302_vm15 = vcmp.gt.f32.partialorder %v10829_v10, 0.0 }
 0x6da   :  { %v4325_v29 = vmul.f32 1.442695, %v4311_v33 }
 0x6dc   :  { %8455 = vpow2.f32 %v4325_v29 }
 0x6de   :  { %v4291_v20 = vpop.f32.mrf.mxu0 }
 0x6e0   :  { %v7882_v5 = vpop.f32.mrf.mxu0 }
 0x6e2   :  { %v4294_v51 = vpop.f32.mrf.mxu0 }
 0x6e4   :  { %v7883_v39 = vpop.f32.mrf.mxu0 }
 0x6e7   :  { %v7696_v26 = vpop.f32.mrf.mxu1 }
 0x6e9   :  { %v7697_v50 = vpop.f32.mrf.mxu1 }
 0x6ea   :  { %v7698_v31 = vadd.f32 %v7697_v50, %v7696_v26 }
 0x6eb   :  { %v7699_v13 = vpop.f32.mrf.mxu1 }
 0x6ec   :  { %v4212_v56 = vadd.f32 %v7698_v31, %v10801_v8 }
 0x6ed   :  { %v7700_v12 = vpop.f32.mrf.mxu1 }
 0x6ee   :  { %v10835_v43 = vadd.f32 %v10791_v37, %v4212_v56  ;;  %v7701_v54 = vadd.f32 %v7700_v12, %v7699_v13  ;;  %v8446_v37 = vpop.eup %8445 }
 0x6ef   :  { %v8448_v22 = vpop.eup %8447  ;;  %v7277_v57 = vadd.f32 -1.0, %v8446_v37 }
 0x6f0   :  { %v4312_v27 = vmin.f32 %v10835_v43, 0.0  ;;  %v4215_v46 = vadd.f32 %v7701_v54, %v10801_v8  ;;  %v8450_v49 = vpop.eup %8449  ;;  %v7276_v18 = vadd.f32 -1.0, %v8448_v22  ;;  %vm4303_vm1 = vcmp.gt.f32.partialorder %v10835_v43, 0.0 }
 0x6f1   :  { %v8452_v28 = vpop.eup %8451  ;;  %v7278_v38 = vadd.f32 -1.0, %v8450_v49  ;;  %v10849_v9 = vsel %vm4298_vm3, %v10807_v2, %v7277_v57  ;;  %vm7178_vm3 = vmor %vm7177_vm12, %vm7176_vm11 }
 0x6f2   :  { %v4327_v62 = vmul.f32 1.442695, %v4312_v27  ;;  %v10840_v14 = vadd.f32 %v10794_v24, %v4215_v46  ;;  %v8454_v55 = vpop.eup %8453  ;;  %v7279_v44 = vadd.f32 -1.0, %v8452_v28  ;;  %v4376_v41 = vmul.f32 %v10849_v9, %v10849_v9 }
 0x6f3   :  { %v8456_v4 = vpop.eup %8455  ;;  %v10857_v25 = vsel %vm4299_vm5, %v10814_v36, %v7278_v38  ;;  %v7280_v0 = vadd.f32 -1.0, %v8454_v55  ;;  %v4352_v36 = vsel %vm54_vm0, %v10849_v9, 0.0 }
 0x6f4   :  { %v4313_v63 = vmin.f32 %v10840_v14, 0.0  ;;  %8457 = vpow2.f32 %v4327_v62  ;;  %v10865_v5 = vsel %vm4300_vm13, %v10819_v3, %v7279_v44  ;;  %v4377_v51 = vmul.f32 %v10857_v25, %v10857_v25 }
 0x6f5   :  { %v10875_v6 = vsel %vm4301_vm14, %v10825_v34, %v7280_v0  ;;  %v4385_v3 = vsel %vm54_vm0, %v4376_v41, 0.0  ;;  %v4354_v39 = vsel %vm54_vm0, %v10857_v25, 0.0  ;;  %v4378_v48 = vmul.f32 %v10865_v5, %v10865_v5 }
 0x6f6   :  { %v4329_v61 = vmul.f32 1.442695, %v4313_v63  ;;  %v4387_v34 = vsel %vm54_vm0, %v4377_v51, 0.0  ;;  %v4356_v50 = vsel %vm54_vm0, %v10865_v5, 0.0  ;;  %v4379_v17 = vmul.f32 %v10875_v6, %v10875_v6 }
 0x6f7   :  { %v7702_v47 = vpop.f32.mrf.mxu1  ;;  %v4389_v7 = vsel %vm54_vm0, %v4378_v48, 0.0  ;;  %vm4304_vm6 = vcmp.gt.f32.partialorder %v10840_v14, 0.0 }
 0x6f8   :  { %8459 = vpow2.f32 %v4329_v61  ;;  %v4391_v54 = vsel %vm54_vm0, %v4379_v17, 0.0  ;;  %v8118_v17 = vld [vmem:[%s11804_s14 + $0xac] ss:$12 sps:$4 sm:$0xff]  }
 0x6f9   :  { %v7703_v16 = vpop.f32.mrf.mxu1  ;;  %6720 = vmatprep.subr.bf16.mxu1 %v8118_v17  ;;  %v8151_v17 = vld [vmem:[%s11804_s14 + $0x1b4] ss:$12 sps:$4 sm:$0xff]  }
 0x6fa   :  { %v7704_v32 = vadd.f32 %v7703_v16, %v7702_v47 }
 0x6fb   :  { %v7705_v45 = vpop.f32.mrf.mxu1 }
 0x6fc   :  { %v4220_v59 = vadd.f32 %v7704_v32, %v10801_v8  ;;  %v10853_v8 = vsel %vm4297_vm4, %v10811_v53, %v7276_v18  ;;  %v7281_v53 = vadd.f32 -1.0, %v8456_v4  ;;  %vm7179_vm4 = vcmask 259076  }
 0x6fd   :  { %v7706_v24 = vpop.f32.mrf.mxu1  ;;  %v4375_v2 = vmul.f32 %v10853_v8, %v10853_v8  ;;  %v4351_v23 = vsel %vm54_vm0, %v10853_v8, 0.0  ;;  %vm7180_vm5 = vmor %vm7179_vm4, %vm7178_vm3 }
 0x6fe   :  { %v10844_v42 = vadd.f32 %v4291_v20, %v4220_v59  ;;  %v4353_v60 = vadd.f32 %v4352_v36, %v4351_v23  ;;  %v10885_v1 = vsel %vm4302_vm15, %v10829_v10, %v7281_v53  ;;  %v4358_v10 = vsel %vm54_vm0, %v10875_v6, 0.0 }
 0x6ff   :  { %v4384_v26 = vsel %vm54_vm0, %v4375_v2, 0.0  ;;  %v4380_v33 = vmul.f32 %v10885_v1, %v10885_v1 }
 0x700   :  { %v4314_v21 = vmin.f32 %v10844_v42, 0.0  ;;  %v4386_v40 = vadd.f32 %v4385_v3, %v4384_v26  ;;  %v4355_v31 = vadd.f32 %v4354_v39, %v4353_v60  ;;  %vm4305_vm7 = vcmp.gt.f32.partialorder %v10844_v42, 0.0 }
 0x701   :  { %v8458_v15 = vpop.eup %8457  ;;  %v4393_v62 = vsel %vm54_vm0, %v4380_v33, 0.0  ;;  %v8122_v33 = vld [vmem:[%s11804_s14 + $0x90] ss:$12 sps:$4 sm:$0xff]  }
 0x702   :  { %v4331_v20 = vmul.f32 1.442695, %v4314_v21  ;;  %v7282_v35 = vadd.f32 -1.0, %v8458_v15  ;;  %v4388_v56 = vadd.f32 %v4387_v34, %v4386_v40  ;;  %v4357_v12 = vadd.f32 %v4356_v50, %v4355_v31  ;;  %v8116_v34 = vld [vmem:[%s11804_s14 + $0xa8] ss:$12 sps:$4 sm:$0xff]  }
 0x703   :  { %v8119_v31 = vld [vmem:[%s11804_s14 + $0x228] ss:$12 sps:$4 sm:$0xff]   ;;  %6721 = vmatpush1.bf16.msra.mxu1 %v8116_v34 }
 0x704   :  { %8461 = vpow2.f32 %v4331_v20  ;;  %v10894_v13 = vsel %vm4303_vm1, %v10835_v43, %v7282_v35  ;;  %v4360_v43 = vsel %vm54_vm0, %v10885_v1, 0.0  ;;  %v4390_v27 = vadd.f32 %v4389_v7, %v4388_v56  ;;  %v8121_v7 = vld [vmem:[%s11804_s14 + $0x22c] ss:$12 sps:$4 sm:$0xff]   ;;  %v8124_v56 = vld [vmem:[%s11804_s14 + $0x94] ss:$12 sps:$4 sm:$0xff]  }
 0x705   :  { %v8460_v19 = vpop.eup %8459  ;;  %v4381_v29 = vmul.f32 %v10894_v13, %v10894_v13  ;;  %v4359_v46 = vadd.f32 %v4358_v10, %v4357_v12  ;;  %v4362_v63 = vsel %vm54_vm0, %v10894_v13, 0.0  ;;  %v4429_v10 = vld [vmem:[%s11805_s13] sm:$0x1]  ;;  %6761 = vmatprep.subr.bf16.mxu0 %v8121_v7  ;;  %6722 = vmatprep.subr.bf16.mxu1 %v8124_v56  ;;  %v8154_v7 = vld [vmem:[%s11804_s14 + $0x1c] ss:$12 sps:$4 sm:$0xff]  }
 0x706   :  { %v7283_v11 = vadd.f32 -1.0, %v8460_v19  ;;  %6762 = vmatpush1.bf16.msra.mxu0 %v8119_v31  ;;  %v8157_v56 = vld [vmem:[%s11804_s14 + $0x19c] ss:$12 sps:$4 sm:$0xff]  }
 0x707   :  { %v4361_v47 = vadd.f32 %v4360_v43, %v4359_v46  ;;  %v4395_v16 = vsel %vm54_vm0, %v4381_v29, 0.0  ;;  %6723 = vmatpush1.bf16.msra.mxu1 %v8122_v33  ;;  %v8155_v33 = vld [vmem:[%s11804_s14 + $0x198] ss:$12 sps:$4 sm:$0xff]  }
 0x708   :  { %v10903_v30 = vsel %vm4304_vm6, %v10840_v14, %v7283_v11  ;;  %v4392_v14 = vadd.f32 %v4391_v54, %v4390_v27  ;;  %v4410_v11 = vld [vmem:[%s11803_s12] sm:$0x1] }
 0x709   :  { %v4382_v61 = vmul.f32 %v10903_v30, %v10903_v30  ;;  %v4364_v22 = vsel %vm54_vm0, %v10903_v30, 0.0  ;;  %v4363_v49 = vadd.f32 %v4362_v63, %v4361_v47  ;;  %v8127_v47 = vld [vmem:[%s11804_s14 + $0x214] ss:$12 sps:$4 sm:$0xff]  }
 0x70a   :  { %v4394_v32 = vadd.f32 %v4393_v62, %v4392_v14  ;;  %v8125_v14 = vld [vmem:[%s11804_s14 + $0x210] ss:$12 sps:$4 sm:$0xff]   ;;  %6763 = vmatprep.subr.bf16.mxu0 %v8127_v47  ;;  %v8167_v47 = vld [vmem:[%s11804_s14 + $0x2e8] ss:$12 sps:$4 sm:$0xff]  }
 0x70b   :  { %v4397_v57 = vsel %vm54_vm0, %v4382_v61, 0.0  ;;  %v4365_v28 = vadd.f32 %v4364_v22, %v4363_v49  ;;  %6764 = vmatpush1.bf16.msra.mxu0 %v8125_v14 }
 0x70c   :  { %v4396_v59 = vadd.f32 %v4395_v16, %v4394_v32 }
 0x70e   :  { %v4398_v55 = vadd.f32 %v4397_v57, %v4396_v59 }
 0x711   :  { %v8462_v37 = vpop.eup %8461 }
 0x712   :  { %v7284_v45 = vadd.f32 -1.0, %v8462_v37  ;;  %v8130_v37 = vld [vmem:[%s11804_s14 + $0x7c] ss:$12 sps:$4 sm:$0xff]  }
 0x713   :  { %6724 = vmatprep.subr.bf16.mxu1 %v8130_v37  ;;  %v8173_v37 = vld [vmem:[%s11804_s14 + $0x2d0] ss:$12 sps:$4 sm:$0xff]  }
 0x714   :  { %v4350_v18 = vsel %vm4305_vm7, %v10844_v42, %v7284_v45 }
 0x715   :  { %v4366_v24 = vsel %vm54_vm0, %v4350_v18, 0.0  ;;  %v4383_v38 = vmul.f32 %v4350_v18, %v4350_v18 }
 0x716   :  { %v4367_v44 = vadd.f32 %v4366_v24, %v4365_v28  ;;  %v8136_v24 = vld [vmem:[%s11804_s14 + $0x64] ss:$12 sps:$4 sm:$0xff]  }
 0x717   :  { %v4399_v21 = vsel %vm54_vm0, %v4383_v38, 0.0  ;;  %v8137_v38 = vld [vmem:[%s11804_s14 + $0x1e0] ss:$12 sps:$4 sm:$0xff]  }
 0x718   :  { %v4368_v4 = vrot.slane %v4367_v44, 4  ;;  %v4400_v0 = vadd.f32 %v4399_v21, %v4398_v55  ;;  %v8139_v55 = vld [vmem:[%s11804_s14 + $0x1e4] ss:$12 sps:$4 sm:$0xff]   ;;  %v8142_v21 = vld [vmem:[%s11804_s14 + $0x4c] ss:$12 sps:$4 sm:$0xff]  }
 0x71a   :  { %v4369_v20 = vadd.f32 %v4368_v4, %v4367_v44  ;;  %v4401_v15 = vrot.slane %v4400_v0, 4  ;;  %v8140_v44 = vld [vmem:[%s11804_s14 + $0x48] ss:$12 sps:$4 sm:$0xff]  }
 0x71c   :  { %v4370_v41 = vrot.slane %v4369_v20, 2  ;;  %v4402_v2 = vadd.f32 %v4401_v15, %v4400_v0 }
 0x71e   :  { %v4371_v53 = vadd.f32 %v4370_v41, %v4369_v20  ;;  %v4403_v19 = vrot.slane %v4402_v2, 2 }
 0x720   :  { %v4372_v36 = vrot.slane %v4371_v53, 1  ;;  %v4404_v51 = vadd.f32 %v4403_v19, %v4402_v2 }
 0x722   :  { %v4373_v23 = vadd.f32 %v4372_v36, %v4371_v53  ;;  %v4405_v35 = vrot.slane %v4404_v51, 1 }
 0x724   :  { %v4374_v42 = vmul.f32 0.013888889, %v4373_v23  ;;  %v4406_v3 = vadd.f32 %v4405_v35, %v4404_v51 }
 0x726   :  { %v4407_v39 = vmul.f32 0.013888889, %v4406_v3  ;;  %v4408_v48 = vmul.f32 %v4374_v42, %v4374_v42  ;;  %v8143_v3 = vld [vmem:[%s11804_s14 + $0x1c8] ss:$12 sps:$4 sm:$0xff]  }
 0x728   :  { %v4409_v26 = vsub.f32 %v4407_v39, %v4408_v48  ;;  %v8145_v48 = vld [vmem:[%s11804_s14 + $0x1cc] ss:$12 sps:$4 sm:$0xff]  }
 0x72a   :  { %v4411_v60 = vadd.f32 1e-05, %v4409_v26  ;;  %v8146_v26 = vld [vmem:[%s11804_s14 + $0x30] ss:$12 sps:$4 sm:$0xff]  }
 0x72c   :  { %8463 = vrsqrt.f32 %v4411_v60  ;;  %v8148_v60 = vld [vmem:[%s11804_s14 + $0x34] ss:$12 sps:$4 sm:$0xff]  }
 0x739   :  { %v8464_v50 = vpop.eup %8463 }
 0x73a   :  { %v4413_v40 = vmul.f32 %v8464_v50, %v4410_v11  ;;  %v8149_v50 = vld [vmem:[%s11804_s14 + $0x1b0] ss:$12 sps:$4 sm:$0xff]  }
 0x73c   :  { %v4430_v12 = vmul.f32 %v4413_v40, %v4374_v42  ;;  %v4418_v54 = vrot.slane %v4413_v40, %v9591_v52  ;;  %v8152_v40 = vld [vmem:[%s11804_s14 + $0x18] ss:$12 sps:$4 sm:$0xff]  }
 0x73e   :  { %v4431_v43 = vsub.f32 %v4429_v10, %v4430_v12  ;;  %v4420_v29 = vmul.f32 %v4418_v54, %v10853_v8  ;;  %v4421_v27 = vmul.f32 %v4418_v54, %v10849_v9  ;;  %v4422_v46 = vmul.f32 %v4418_v54, %v10857_v25  ;;  %v8128_v9 = vld [vmem:[%s11804_s14 + $0x78] ss:$12 sps:$4 sm:$0xff]   ;;  %v8158_v12 = vld [vmem:[%s11804_s14] ss:$12 sps:$4 sm:$0xff]  }
 0x73f   :  { %v4423_v62 = vmul.f32 %v4418_v54, %v10865_v5  ;;  %v4424_v63 = vmul.f32 %v4418_v54, %v10875_v6  ;;  %v4425_v8 = vmul.f32 %v4418_v54, %v10885_v1  ;;  %v4426_v25 = vmul.f32 %v4418_v54, %v10894_v13  ;;  %v8131_v13 = vld [vmem:[%s11804_s14 + $0x1f8] ss:$12 sps:$4 sm:$0xff]   ;;  %6725 = vmatpush1.bf16.msra.mxu1 %v8128_v9 }
 0x740   :  { %v4436_v61 = vrot.slane %v4431_v43, %v9591_v52  ;;  %v4427_v5 = vmul.f32 %v4418_v54, %v10903_v30  ;;  %v4428_v6 = vmul.f32 %v4418_v54, %v4350_v18  ;;  %v8133_v30 = vld [vmem:[%s11804_s14 + $0x1fc] ss:$12 sps:$4 sm:$0xff]   ;;  %v8134_v18 = vld [vmem:[%s11804_s14 + $0x60] ss:$12 sps:$4 sm:$0xff]   ;;  %6726 = vmatprep.subr.bf16.mxu1 %v8136_v24  ;;  %v8160_v43 = vld [vmem:[%s11804_s14 + $0x4] ss:$12 sps:$4 sm:$0xff]  }
 0x741   :  { %6765 = vmatprep.subr.bf16.mxu0 %v8133_v30  ;;  %v8169_v9 = vld [vmem:[%s11804_s14 + $0x2ec] ss:$12 sps:$4 sm:$0xff]   ;;  %v8184_v30 = vld [vmem:[%s11804_s14 + $0x124] ss:$12 sps:$4 sm:$0xff]  }
 0x742   :  { %v4438_v16 = vadd.f32 %v4436_v61, %v4420_v29  ;;  %v4439_v22 = vadd.f32 %v4436_v61, %v4421_v27  ;;  %v4440_v32 = vadd.f32 %v4436_v61, %v4422_v46  ;;  %v4441_v49 = vadd.f32 %v4436_v61, %v4423_v62  ;;  %6766 = vmatpush1.bf16.msra.mxu0 %v8131_v13  ;;  %v8161_v27 = vld [vmem:[%s11804_s14 + $0x180] ss:$12 sps:$4 sm:$0xff]   ;;  %v8163_v46 = vld [vmem:[%s11804_s14 + $0x184] ss:$12 sps:$4 sm:$0xff]   ;;  %v8164_v62 = vld [vmem:[%s11804_s14 + $0x168] ss:$12 sps:$4 sm:$0xff]  }
 0x743   :  { %v4442_v45 = vadd.f32 %v4436_v61, %v4424_v63  ;;  %v4443_v57 = vadd.f32 %v4436_v61, %v4425_v8  ;;  %v4444_v59 = vadd.f32 %v4436_v61, %v4426_v25  ;;  %v4445_v28 = vadd.f32 %v4436_v61, %v4427_v5  ;;  %6727 = vmatpush1.bf16.msra.mxu1 %v8134_v18  ;;  %v8170_v8 = vld [vmem:[%s11804_s14 + $0x150] ss:$12 sps:$4 sm:$0xff]   ;;  %v8172_v5 = vld [vmem:[%s11804_s14 + $0x154] ss:$12 sps:$4 sm:$0xff]  }
 0x744   :  { %v4446_v1 = vadd.f32 %v4436_v61, %v4428_v6  ;;  %4447 = vst.msk [vmem:[#allocation2 + $0x8] sm:$0xff] %vm54_vm0, %v4438_v16  ;;  %4448 = vst.msk [vmem:[#allocation2 + $0x10] sm:$0xff] %vm54_vm0, %v4439_v22  ;;  %6767 = vmatprep.subr.bf16.mxu0 %v8139_v55  ;;  %6728 = vmatprep.subr.bf16.mxu1 %v8142_v21  ;;  %v8166_v61 = vld [vmem:[%s11804_s14 + $0x16c] ss:$12 sps:$4 sm:$0xff]   ;;  %v8175_v16 = vld [vmem:[%s11804_s14 + $0x2d4] ss:$12 sps:$4 sm:$0xff]  }
 0x745   :  { %4449 = vst.msk [vmem:[#allocation2 + $0x18] sm:$0xff] %vm54_vm0, %v4440_v32  ;;  %4450 = vst.msk [vmem:[#allocation2 + $0x20] sm:$0xff] %vm54_vm0, %v4441_v49  ;;  %v8176_v32 = vld [vmem:[%s11804_s14 + $0x138] ss:$12 sps:$4 sm:$0xff]   ;;  %v8185_v18 = vld [vmem:[%s11804_s14 + $0x2a0] ss:$12 sps:$4 sm:$0xff]  }
 0x746   :  { %4451 = vst.msk [vmem:[#allocation2 + $0x28] sm:$0xff] %vm54_vm0, %v4442_v45  ;;  %4452 = vst.msk [vmem:[#allocation2 + $0x30] sm:$0xff] %vm54_vm0, %v4443_v57  ;;  %6768 = vmatpush1.bf16.msra.mxu0 %v8137_v38  ;;  %v8178_v45 = vld [vmem:[%s11804_s14 + $0x13c] ss:$12 sps:$4 sm:$0xff]   ;;  %v8179_v57 = vld [vmem:[%s11804_s14 + $0x2b8] ss:$12 sps:$4 sm:$0xff]  }
 0x747   :  { %4453 = vst.msk [vmem:[#allocation2 + $0x38] sm:$0xff] %vm54_vm0, %v4444_v59  ;;  %4454 = vst.msk [vmem:[#allocation2 + $0x40] sm:$0xff] %vm54_vm0, %v4445_v28  ;;  %6729 = vmatpush1.bf16.msra.mxu1 %v8140_v44  ;;  %6769 = vmatprep.subr.bf16.mxu0 %v8145_v48  ;;  %v8181_v59 = vld [vmem:[%s11804_s14 + $0x2bc] ss:$12 sps:$4 sm:$0xff]   ;;  %v8187_v38 = vld [vmem:[%s11804_s14 + $0x2a4] ss:$12 sps:$4 sm:$0xff]  }
 0x748   :  { %4455 = vst.msk [vmem:[#allocation2 + $0x48] sm:$0xff] %vm54_vm0, %v4446_v1  ;;  %6730 = vmatprep.subr.bf16.mxu1 %v8148_v60  ;;  %v8182_v1 = vld [vmem:[%s11804_s14 + $0x120] ss:$12 sps:$4 sm:$0xff]   ;;  %v8188_v44 = vld [vmem:[%s11804_s14 + $0x108] ss:$12 sps:$4 sm:$0xff]   ;;  %vm4471_vm0 = vcmask 516352  }
 0x749   :  { %v8190_v21 = vld [vmem:[%s11804_s14 + $0x10c] ss:$12 sps:$4 sm:$0xff]   ;;  %v8202_v60 = vld [vmem:[%s11804_s14 + $0xdc] ss:$12 sps:$4 sm:$0xff]  }
 0x74a   :  { %6770 = vmatpush1.bf16.msra.mxu0 %v8143_v3  ;;  %v8200_v48 = vld [vmem:[%s11804_s14 + $0xd8] ss:$12 sps:$4 sm:$0xff]  }
 0x74b   :  { %v7288_v4 = vld.sshfl [vmem:[#allocation2 + $0xd] sm:$0x1 pattern:$0x76325410]  ;;  %v4501_v0 = vld [vmem:[#allocation2 + $0xc] sm:$0x1]  ;;  %6731 = vmatpush1.bf16.msra.mxu1 %v8146_v26  ;;  %6771 = vmatprep.subr.bf16.mxu0 %v8151_v17 }
 0x74c   :  { %4512 = vrot.lane.b32.xlu1 %v7288_v4, %s8483_s29  ;;  %v7285_v20 = vld.sshfl [vmem:[#allocation2 + $0x9] sm:$0x1 pattern:$0x76325410]  ;;  %4502 = vst.msk [vmem:[#allocation4 + $0x2] sm:$0x1] %vm4457_vm8, %v4501_v0  ;;  %6732 = vmatprep.subr.bf16.mxu1 %v8154_v7 }
 0x74d   :  { %v4456_v15 = vld [vmem:[#allocation2 + $0x8] sm:$0x1]  ;;  %4468 = vrot.lane.b32.xlu0 %v7285_v20, %s8483_s29  ;;  %v4583_v41 = vld [vmem:[#allocation2 + $0x14] sm:$0x1]  ;;  %v4542_v2 = vld [vmem:[#allocation2 + $0x10] sm:$0x1] }
 0x74e   :  { %4458 = vst.msk [vmem:[#allocation4] sm:$0x1] %vm4457_vm8, %v4456_v15  ;;  %4584 = vst.msk [vmem:[#allocation4 + $0x6] sm:$0x1] %vm4457_vm8, %v4583_v41  ;;  %v4870_v19 = vld [vmem:[#allocation2 + $0x30] sm:$0x1]  ;;  %6772 = vmatpush1.bf16.msra.mxu0 %v8149_v50 }
 0x74f   :  { %v7294_v53 = vld.sshfl [vmem:[#allocation2 + $0x15] sm:$0x1 pattern:$0x76325410]  ;;  %4543 = vst.msk [vmem:[#allocation4 + $0x4] sm:$0x1] %vm4457_vm8, %v4542_v2  ;;  %6733 = vmatpush1.bf16.msra.mxu1 %v8152_v40  ;;  %6773 = vmatprep.subr.bf16.mxu0 %v8157_v56 }
 0x750   :  { %4594 = vrot.lane.b32.xlu1 %v7294_v53, %s8483_s29  ;;  %v7291_v36 = vld.sshfl [vmem:[#allocation2 + $0x11] sm:$0x1 pattern:$0x76325410]  ;;  %4871 = vst.msk [vmem:[#allocation4 + $0x3] sm:$0x1] %vm4457_vm8, %v4870_v19  ;;  %6734 = vmatprep.subr.bf16.mxu1 %v8160_v43 }
 0x751   :  { %v4829_v51 = vld [vmem:[#allocation2 + $0x2c] sm:$0x1]  ;;  %4553 = vrot.lane.b32.xlu0 %v7291_v36, %s8483_s29  ;;  %v4952_v23 = vld [vmem:[#allocation2 + $0x38] sm:$0x1]  ;;  %v4911_v35 = vld [vmem:[#allocation2 + $0x34] sm:$0x1] }
 0x752   :  { %4830 = vst.msk [vmem:[#allocation4 + $0x1] sm:$0x1] %vm4457_vm8, %v4829_v51  ;;  %4953 = vst.msk [vmem:[#allocation4 + $0x7] sm:$0x1] %vm4457_vm8, %v4952_v23  ;;  %6774 = vmatpush1.bf16.msra.mxu0 %v8155_v33  ;;  %v8191_v20 = vld [vmem:[%s11804_s14 + $0x288] ss:$12 sps:$4 sm:$0xff]  }
 0x753   :  { %v7315_v42 = vld.sshfl [vmem:[#allocation2 + $0x31] sm:$0x1 pattern:$0x76325410]  ;;  %4912 = vst.msk [vmem:[#allocation4 + $0x5] sm:$0x1] %vm4457_vm8, %v4911_v35  ;;  %6735 = vmatpush1.bf16.msra.mxu1 %v8158_v12  ;;  %6775 = vmatprep.subr.bf16.mxu0 %v8163_v46 }
 0x754   :  { %4881 = vrot.lane.b32.xlu1 %v7315_v42, %s8483_s29  ;;  %v7312_v39 = vld.sshfl [vmem:[#allocation2 + $0x2d] sm:$0x1 pattern:$0x76325410]  ;;  %6736 = vmatprep.subr.bf16.mxu1 %v8166_v61  ;;  %v8194_v2 = vld [vmem:[%s11804_s14 + $0xf0] ss:$12 sps:$4 sm:$0xff]  }
 0x755   :  { %4840 = vrot.lane.b32.xlu0 %v7312_v39, %s8483_s29  ;;  %v7321_v11 = vld.sshfl [vmem:[#allocation2 + $0x39] sm:$0x1 pattern:$0x76325410]  ;;  %v8196_v19 = vld [vmem:[%s11804_s14 + $0xf4] ss:$12 sps:$4 sm:$0xff]  }
 0x756   :  { %v7318_v34 = vld.sshfl [vmem:[#allocation2 + $0x35] sm:$0x1 pattern:$0x76325410]  ;;  %6776 = vmatpush1.bf16.msra.mxu0 %v8161_v27  ;;  %v8193_v15 = vld [vmem:[%s11804_s14 + $0x28c] ss:$12 sps:$4 sm:$0xff]  }
 0x757   :  { %v7289_v31 = vld.sshfl [vmem:[#allocation2 + $0xe] sm:$0x1 pattern:$0x76325410]  ;;  %6737 = vmatpush2.bf16.msra.mxu1 %v8164_v62  ;;  %6777 = vmatprep.subr.bf16.mxu0 %v8169_v9  ;;  %v4665_v36 = vld [vmem:[#allocation2 + $0x1c] sm:$0x1] }
 0x758   :  { %4963 = vrot.lane.b32.xlu1 %v7321_v11, %s8483_s29  ;;  %v7286_v10 = vld.sshfl [vmem:[#allocation2 + $0xa] sm:$0x1 pattern:$0x76325410]  ;;  %6738 = vmatprep.subr.bf16.mxu1 %v8172_v5  ;;  %4666 = vst.msk [vmem:[#allocation4 + $0xa] sm:$0x1] %vm4457_vm8, %v4665_v36 }
 0x759   :  { %4922 = vrot.lane.b32.xlu0 %v7318_v34, %s8483_s29  ;;  %v7295_v54 = vld.sshfl [vmem:[#allocation2 + $0x16] sm:$0x1 pattern:$0x76325410]  ;;  %v4624_v51 = vld [vmem:[#allocation2 + $0x18] sm:$0x1] }
 0x75a   :  { %v7292_v29 = vld.sshfl [vmem:[#allocation2 + $0x12] sm:$0x1 pattern:$0x76325410]  ;;  %6778 = vmatpush2.bf16.msra.mxu0 %v8167_v47  ;;  %4625 = vst.msk [vmem:[#allocation4 + $0x8] sm:$0x1] %vm4457_vm8, %v4624_v51 }
 0x75b   :  { %v7316_v63 = vld.sshfl [vmem:[#allocation2 + $0x32] sm:$0x1 pattern:$0x76325410]  ;;  %6739 = vmatpush2.bf16.msra.mxu1 %v8170_v8  ;;  %6779 = vmatprep.subr.bf16.mxu0 %v8175_v16  ;;  %v8199_v39 = vld [vmem:[%s11804_s14 + $0x274] ss:$12 sps:$4 sm:$0xff]  }
 0x75c   :  { %4525 = vrot.lane.b32.xlu1 %v7289_v31, %s8484_s30  ;;  %v7313_v14 = vld.sshfl [vmem:[#allocation2 + $0x2e] sm:$0x1 pattern:$0x76325410]  ;;  %6740 = vmatprep.subr.bf16.mxu1 %v8178_v45  ;;  %v8197_v42 = vld [vmem:[%s11804_s14 + $0x270] ss:$12 sps:$4 sm:$0xff]  }
 0x75d   :  { %4482 = vrot.lane.b32.xlu0 %v7286_v10, %s8484_s30  ;;  %v7322_v25 = vld.sshfl [vmem:[#allocation2 + $0x3a] sm:$0x1 pattern:$0x76325410]  ;;  %v4747_v11 = vld [vmem:[#allocation2 + $0x24] sm:$0x1] }
 0x75e   :  { %v7319_v6 = vld.sshfl [vmem:[#allocation2 + $0x36] sm:$0x1 pattern:$0x76325410]  ;;  %6780 = vmatpush2.bf16.msra.mxu0 %v8173_v37  ;;  %v4706_v34 = vld [vmem:[#allocation2 + $0x20] sm:$0x1] }
 0x75f   :  { %v7290_v22 = vld.sshfl [vmem:[#allocation2 + $0xf] sm:$0x1 pattern:$0x76325410]  ;;  %6741 = vmatpush2.bf16.msra.mxu1 %v8176_v32  ;;  %6781 = vmatprep.subr.bf16.mxu0 %v8181_v59  ;;  %4748 = vst.msk [vmem:[#allocation4 + $0xe] sm:$0x1] %vm4457_vm8, %v4747_v11 }
 0x760   :  { %4607 = vrot.lane.b32.xlu1 %v7295_v54, %s8484_s30  ;;  %v7287_v49 = vld.sshfl [vmem:[#allocation2 + $0xb] sm:$0x1 pattern:$0x76325410]  ;;  %6742 = vmatprep.subr.bf16.mxu1 %v8184_v30  ;;  %4707 = vst.msk [vmem:[#allocation4 + $0xc] sm:$0x1] %vm4457_vm8, %v4706_v34 }
 0x761   :  { %4566 = vrot.lane.b32.xlu0 %v7292_v29, %s8484_s30  ;;  %v7296_v28 = vld.sshfl [vmem:[#allocation2 + $0x17] sm:$0x1 pattern:$0x76325410]  ;;  %v8203_v50 = vld [vmem:[%s11804_s14 + $0x258] ss:$12 sps:$4 sm:$0xff]  }
 0x762   :  { %v7293_v13 = vld.sshfl [vmem:[#allocation2 + $0x13] sm:$0x1 pattern:$0x76325410]  ;;  %6782 = vmatpush2.bf16.msra.mxu0 %v8179_v57  ;;  %v8205_v17 = vld [vmem:[%s11804_s14 + $0x25c] ss:$12 sps:$4 sm:$0xff]  }
 0x763   :  { %v7317_v24 = vld.sshfl [vmem:[#allocation2 + $0x33] sm:$0x1 pattern:$0x76325410]  ;;  %6743 = vmatpush2.bf16.msra.mxu1 %v8182_v1  ;;  %6783 = vmatprep.subr.bf16.mxu0 %v8187_v38  ;;  %v8206_v31 = vld [vmem:[%s11804_s14 + $0xc0] ss:$12 sps:$4 sm:$0xff]  }
 0x764   :  { %4894 = vrot.lane.b32.xlu1 %v7316_v63, %s8484_s30  ;;  %v7314_v55 = vld.sshfl [vmem:[#allocation2 + $0x2f] sm:$0x1 pattern:$0x76325410]  ;;  %6744 = vmatprep.subr.bf16.mxu1 %v8190_v21  ;;  %v8208_v7 = vld [vmem:[%s11804_s14 + $0xc4] ss:$12 sps:$4 sm:$0xff]  }
 0x765   :  { %4853 = vrot.lane.b32.xlu0 %v7313_v14, %s8484_s30  ;;  %v7323_v4 = vld.sshfl [vmem:[#allocation2 + $0x3b] sm:$0x1 pattern:$0x76325410]  ;;  %v5034_v10 = vld [vmem:[#allocation2 + $0x40] sm:$0x1] }
 0x766   :  { %6784 = vmatpush2.bf16.msra.mxu0 %v8185_v18  ;;  %v7320_v0 = vld.sshfl [vmem:[#allocation2 + $0x37] sm:$0x1 pattern:$0x76325410]  ;;  %5035 = vst.msk [vmem:[#allocation4 + $0xb] sm:$0x1] %vm4457_vm8, %v5034_v10 }
 0x767   :  { %6745 = vmatpush2.bf16.msra.mxu1 %v8188_v44  ;;  %v7300_v41 = vld.sshfl [vmem:[#allocation2 + $0x1d] sm:$0x1 pattern:$0x76325410]  ;;  %6785 = vmatprep.subr.bf16.mxu0 %v8193_v15  ;;  %v4993_v56 = vld [vmem:[#allocation2 + $0x3c] sm:$0x1] }
 0x768   :  { %4976 = vrot.lane.b32.xlu1 %v7322_v25, %s8484_s30  ;;  %v7297_v53 = vld.sshfl [vmem:[#allocation2 + $0x19] sm:$0x1 pattern:$0x76325410]  ;;  %6746 = vmatprep.subr.bf16.mxu1 %v8196_v19  ;;  %4994 = vst.msk [vmem:[#allocation4 + $0x9] sm:$0x1] %vm4457_vm8, %v4993_v56 }
 0x769   :  { %4935 = vrot.lane.b32.xlu0 %v7319_v6, %s8484_s30  ;;  %v7306_v23 = vld.sshfl [vmem:[#allocation2 + $0x25] sm:$0x1 pattern:$0x76325410]  ;;  %v8209_v54 = vld [vmem:[%s11804_s14 + $0x240] ss:$12 sps:$4 sm:$0xff]  }
 0x76a   :  { %6786 = vmatpush2.bf16.msra.mxu0 %v8191_v20  ;;  %v7303_v35 = vld.sshfl [vmem:[#allocation2 + $0x21] sm:$0x1 pattern:$0x76325410]  ;;  %v8211_v12 = vld [vmem:[%s11804_s14 + $0x244] ss:$12 sps:$4 sm:$0xff]  }
 0x76b   :  { %6747 = vmatpush2.bf16.msra.mxu1 %v8194_v2  ;;  %v7327_v3 = vld.sshfl [vmem:[#allocation2 + $0x41] sm:$0x1 pattern:$0x76325410]  ;;  %6787 = vmatprep.subr.bf16.mxu0 %v8199_v39  ;;  %v8214_v43 = vld [vmem:[%s11804_s14 + $0x3ac] ss:$12 sps:$4 sm:$0xff]  }
 0x76c   :  { %4538 = vrot.lane.b32.xlu1 %v7290_v22, %s8485_s1  ;;  %v7324_v26 = vld.sshfl [vmem:[#allocation2 + $0x3d] sm:$0x1 pattern:$0x76325410]  ;;  %6748 = vmatprep.subr.bf16.mxu1 %v8202_v60  ;;  %v5116_v29 = vld [vmem:[#allocation2 + $0x48] sm:$0x1] }
 0x76d   :  { %4496 = vrot.lane.b32.xlu0 %v7287_v49, %s8485_s1  ;;  %v7333_v40 = vld.sshfl [vmem:[#allocation2 + $0x49] sm:$0x1 pattern:$0x76325410]  ;;  %v5075_v27 = vld [vmem:[#allocation2 + $0x44] sm:$0x1] }
 0x76e   :  { %6788 = vmatpush2.bf16.msra.mxu0 %v8197_v42  ;;  %v7330_v33 = vld.sshfl [vmem:[#allocation2 + $0x45] sm:$0x1 pattern:$0x76325410]  ;;  %5117 = vst.msk [vmem:[#allocation4 + $0xf] sm:$0x1] %vm4457_vm8, %v5116_v29 }
 0x76f   :  { %6749 = vmatpush2.bf16.msra.mxu1 %v8200_v48  ;;  %6789 = vmatprep.subr.bf16.mxu0 %v8205_v17  ;;  %5076 = vst.msk [vmem:[#allocation4 + $0xd] sm:$0x1] %vm4457_vm8, %v5075_v27  ;;  %v8217_v46 = vld [vmem:[%s11804_s14 + $0x52c] ss:$12 sps:$4 sm:$0xff]   ;;  %v4788_v32 = vld [vmem:[#allocation2 + $0x28] sm:$0x1] }
 0x770   :  { %4620 = vrot.lane.b32.xlu1 %v7296_v28, %s8485_s1  ;;  %6750 = vmatprep.subr.bf16.mxu1 %v8208_v7  ;;  %v7301_v62 = vld.sshfl [vmem:[#allocation2 + $0x1e] sm:$0x1 pattern:$0x76325410]  ;;  %v5157_v22 = vld [vmem:[#allocation2 + $0x4c] sm:$0x1] }
 0x771   :  { %4579 = vrot.lane.b32.xlu0 %v7293_v13, %s8485_s1  ;;  %v7298_v63 = vld.sshfl [vmem:[#allocation2 + $0x1a] sm:$0x1 pattern:$0x76325410]  ;;  %5158 = vst.msk [vmem:[#allocation4 + $0x11] sm:$0x1] %vm4457_vm8, %v5157_v22 }
 0x772   :  { %6790 = vmatpush2.bf16.msra.mxu0 %v8203_v50  ;;  %v7307_v61 = vld.sshfl [vmem:[#allocation2 + $0x26] sm:$0x1 pattern:$0x76325410]  ;;  %4789 = vst.msk [vmem:[#allocation4 + $0x10] sm:$0x1] %vm4457_vm8, %v4788_v32 }
 0x773   :  { %6791 = vmatprep.subr.bf16.mxu0 %v8211_v12  ;;  %6751 = vmatpush2.bf16.msra.mxu1 %v8206_v31  ;;  %v7304_v14 = vld.sshfl [vmem:[#allocation2 + $0x22] sm:$0x1 pattern:$0x76325410]  ;;  %v8489_v11 = vmov 1983009808  }
 0x774   :  { %4907 = vrot.lane.b32.xlu1 %v7317_v24, %s8485_s1  ;;  %6802 = vmatprep.subr.bf16.mxu1 %v8214_v43  ;;  %v7328_v47 = vld.sshfl [vmem:[#allocation2 + $0x42] sm:$0x1 pattern:$0x76325410]  ;;  %v5206_v34 = vunpack.c.l.s4 %v8489_v11  ;;  %v11978_v10 = vld [vmem:[#allocation32_spill] sm:$0xff] }
 0x775   :  { %4866 = vrot.lane.b32.xlu0 %v7314_v55, %s8485_s1  ;;  %v7325_v9 = vld.sshfl [vmem:[#allocation2 + $0x3e] sm:$0x1 pattern:$0x76325410]  ;;  %v8223_v32 = vld [vmem:[%s11804_s14 + $0x514] ss:$12 sps:$4 sm:$0xff]  }
 0x776   :  { %6792 = vmatpush2.bf16.msra.mxu0 %v8209_v54  ;;  %v7334_v8 = vld.sshfl [vmem:[#allocation2 + $0x4a] sm:$0x1 pattern:$0x76325410]  ;;  %v8218_v22 = vld [vmem:[%s11804_s14 + $0x390] ss:$12 sps:$4 sm:$0xff]  }
 0x777   :  { %6843 = vmatprep.subr.bf16.mxu0 %v8217_v46  ;;  %v7331_v25 = vld.sshfl [vmem:[#allocation2 + $0x46] sm:$0x1 pattern:$0x76325410] }
 0x778   :  { %4989 = vrot.lane.b32.xlu1 %v7323_v4, %s8485_s1  ;;  %v7302_v5 = vld.sshfl [vmem:[#allocation2 + $0x1f] sm:$0x1 pattern:$0x76325410]  ;;  %v8251_v11 = vld [vmem:[%s11804_s14 + $0x498] ss:$12 sps:$4 sm:$0xff]  }
 0x779   :  { %4948 = vrot.lane.b32.xlu0 %v7320_v0, %s8485_s1  ;;  %v7299_v6 = vld.sshfl [vmem:[#allocation2 + $0x1b] sm:$0x1 pattern:$0x76325410] }
 0x77a   :  { %v7308_v37 = vld.sshfl [vmem:[#allocation2 + $0x27] sm:$0x1 pattern:$0x76325410] }
 0x77b   :  { %v7305_v16 = vld.sshfl [vmem:[#allocation2 + $0x23] sm:$0x1 pattern:$0x76325410] }
 0x77c   :  { %4676 = vrot.lane.b32.xlu1 %v7300_v41, %s8483_s29  ;;  %v7329_v49 = vld.sshfl [vmem:[#allocation2 + $0x43] sm:$0x1 pattern:$0x76325410] }
 0x77d   :  { %4635 = vrot.lane.b32.xlu0 %v7297_v53, %s8483_s29  ;;  %v7326_v45 = vld.sshfl [vmem:[#allocation2 + $0x3f] sm:$0x1 pattern:$0x76325410] }
 0x77e   :  { %v7335_v57 = vld.sshfl [vmem:[#allocation2 + $0x4b] sm:$0x1 pattern:$0x76325410] }
 0x77f   :  { %v7332_v59 = vld.sshfl [vmem:[#allocation2 + $0x47] sm:$0x1 pattern:$0x76325410] }
 0x780   :  { %4758 = vrot.lane.b32.xlu1 %v7306_v23, %s8483_s29  ;;  %v7336_v28 = vld.sshfl [vmem:[#allocation2 + $0x4d] sm:$0x1 pattern:$0x76325410] }
 0x781   :  { %4717 = vrot.lane.b32.xlu0 %v7303_v35, %s8483_s29  ;;  %v7309_v1 = vld.sshfl [vmem:[#allocation2 + $0x29] sm:$0x1 pattern:$0x76325410] }
 0x782   :  { %v7337_v13 = vld.sshfl [vmem:[#allocation2 + $0x4e] sm:$0x1 pattern:$0x76325410] }
 0x783   :  { %v7310_v30 = vld.sshfl [vmem:[#allocation2 + $0x2a] sm:$0x1 pattern:$0x76325410] }
 0x784   :  { %5045 = vrot.lane.b32.xlu1 %v7327_v3, %s8483_s29  ;;  %v7338_v18 = vld.sshfl [vmem:[#allocation2 + $0x4f] sm:$0x1 pattern:$0x76325410] }
 0x785   :  { %5004 = vrot.lane.b32.xlu0 %v7324_v26, %s8483_s29  ;;  %v7311_v24 = vld.sshfl [vmem:[#allocation2 + $0x2b] sm:$0x1 pattern:$0x76325410] }
 0x788   :  { %5127 = vrot.lane.b32.xlu1 %v7333_v40, %s8483_s29  ;;  %v5207_v40 = vunpack.c.0.s8 %v5206_v34 }
 0x789   :  { %5086 = vrot.lane.b32.xlu0 %v7330_v33, %s8483_s29 }
 0x78a   :  { %v11245_v33 = vsub.s32 %v5207_v40, %v11978_v10  ;;  %v8262_v40 = vld [vmem:[%s11804_s14 + $0x46c] ss:$12 sps:$4 sm:$0xff]  }
 0x78c   :  { %4689 = vrot.lane.b32.xlu1 %v7301_v62, %s8484_s30  ;;  %v8212_v62 = vld [vmem:[%s11804_s14 + $0x3a8] ss:$12 sps:$4 sm:$0xff]  }
 0x78d   :  { %4648 = vrot.lane.b32.xlu0 %v7298_v63, %s8484_s30 }
 0x790   :  { %4771 = vrot.lane.b32.xlu1 %v7307_v61, %s8484_s30 }
 0x791   :  { %4730 = vrot.lane.b32.xlu0 %v7304_v14, %s8484_s30 }
 0x794   :  { %5058 = vrot.lane.b32.xlu1 %v7328_v47, %s8484_s30 }
 0x795   :  { %5017 = vrot.lane.b32.xlu0 %v7325_v9, %s8484_s30  ;;  %v8215_v9 = vld [vmem:[%s11804_s14 + $0x528] ss:$12 sps:$4 sm:$0xff]  }
 0x798   :  { %5140 = vrot.lane.b32.xlu1 %v7334_v8, %s8484_s30  ;;  %v8220_v8 = vld [vmem:[%s11804_s14 + $0x394] ss:$12 sps:$4 sm:$0xff]  }
 0x799   :  { %5099 = vrot.lane.b32.xlu0 %v7331_v25, %s8484_s30 }
 0x79c   :  { %4702 = vrot.lane.b32.xlu1 %v7302_v5, %s8485_s1 }
 0x79d   :  { %4661 = vrot.lane.b32.xlu0 %v7299_v6, %s8485_s1 }
 0x7a0   :  { %4784 = vrot.lane.b32.xlu1 %v7308_v37, %s8485_s1 }
 0x7a1   :  { %4743 = vrot.lane.b32.xlu0 %v7305_v16, %s8485_s1 }
 0x7a4   :  { %5071 = vrot.lane.b32.xlu1 %v7329_v49, %s8485_s1  ;;  %v8226_v49 = vld [vmem:[%s11804_s14 + $0x37c] ss:$12 sps:$4 sm:$0xff]  }
 0x7a5   :  { %5030 = vrot.lane.b32.xlu0 %v7326_v45, %s8485_s1 }
 0x7a8   :  { %5153 = vrot.lane.b32.xlu1 %v7335_v57, %s8485_s1  ;;  %v8221_v57 = vld [vmem:[%s11804_s14 + $0x510] ss:$12 sps:$4 sm:$0xff]  }
 0x7a9   :  { %5112 = vrot.lane.b32.xlu0 %v7332_v59, %s8485_s1  ;;  %v8229_v59 = vld [vmem:[%s11804_s14 + $0x4fc] ss:$12 sps:$4 sm:$0xff]  }
 0x7ac   :  { %5168 = vrot.lane.b32.xlu1 %v7336_v28, %s8483_s29 }
 0x7ad   :  { %4799 = vrot.lane.b32.xlu0 %v7309_v1, %s8483_s29  ;;  %v8224_v1 = vld [vmem:[%s11804_s14 + $0x378] ss:$12 sps:$4 sm:$0xff]  }
 0x7b0   :  { %5181 = vrot.lane.b32.xlu1 %v7337_v13, %s8484_s30  ;;  %v8232_v13 = vld [vmem:[%s11804_s14 + $0x364] ss:$12 sps:$4 sm:$0xff]  }
 0x7b1   :  { %4812 = vrot.lane.b32.xlu0 %v7310_v30, %s8484_s30 }
 0x7b4   :  { %5194 = vrot.lane.b32.xlu1 %v7338_v18, %s8485_s1  ;;  %v8227_v18 = vld [vmem:[%s11804_s14 + $0x4f8] ss:$12 sps:$4 sm:$0xff]  }
 0x7b5   :  { %4825 = vrot.lane.b32.xlu0 %v7311_v24, %s8485_s1 }
 0x7be   :  { %v4513_v38 = vpop.permute.xlu1 %4512 }
 0x7bf   :  { %4515 = vst.msk [vmem:[#allocation4 + $0x2] sm:$0x1] %vm4471_vm0, %v4513_v38  ;;  %v4469_v55 = vpop.permute.xlu0 %4468  ;;  %v8235_v38 = vld [vmem:[%s11804_s14 + $0x4e4] ss:$12 sps:$4 sm:$0xff]  }
 0x7c0   :  { %4472 = vst.msk [vmem:[#allocation4] sm:$0x1] %vm4471_vm0, %v4469_v55  ;;  %v8230_v55 = vld [vmem:[%s11804_s14 + $0x360] ss:$12 sps:$4 sm:$0xff]  }
 0x7c2   :  { %v4595_v44 = vpop.permute.xlu1 %4594 }
 0x7c3   :  { %4597 = vst.msk [vmem:[#allocation4 + $0x6] sm:$0x1] %vm4471_vm0, %v4595_v44  ;;  %v4554_v21 = vpop.permute.xlu0 %4553  ;;  %v8238_v44 = vld [vmem:[%s11804_s14 + $0x34c] ss:$12 sps:$4 sm:$0xff]  }
 0x7c4   :  { %4556 = vst.msk [vmem:[#allocation4 + $0x4] sm:$0x1] %vm4471_vm0, %v4554_v21 }
 0x7c6   :  { %v4882_v4 = vpop.permute.xlu1 %4881 }
 0x7c7   :  { %4884 = vst.msk [vmem:[#allocation4 + $0x3] sm:$0x1] %vm4471_vm0, %v4882_v4  ;;  %v4841_v0 = vpop.permute.xlu0 %4840  ;;  %v8233_v4 = vld [vmem:[%s11804_s14 + $0x4e0] ss:$12 sps:$4 sm:$0xff]  }
 0x7c8   :  { %4843 = vst.msk [vmem:[#allocation4 + $0x1] sm:$0x1] %vm4471_vm0, %v4841_v0 }
 0x7ca   :  { %v4964_v20 = vpop.permute.xlu1 %4963 }
 0x7cb   :  { %4966 = vst.msk [vmem:[#allocation4 + $0x7] sm:$0x1] %vm4471_vm0, %v4964_v20  ;;  %v4923_v15 = vpop.permute.xlu0 %4922  ;;  %v8241_v20 = vld [vmem:[%s11804_s14 + $0x4cc] ss:$12 sps:$4 sm:$0xff]  }
 0x7cc   :  { %4925 = vst.msk [vmem:[#allocation4 + $0x5] sm:$0x1] %vm4471_vm0, %v4923_v15  ;;  %v8236_v15 = vld [vmem:[%s11804_s14 + $0x348] ss:$12 sps:$4 sm:$0xff]  }
 0x7ce   :  { %v4526_v41 = vpop.permute.xlu1 %4525 }
 0x7cf   :  { %4528 = vst.msk [vmem:[#allocation4 + $0x2] sm:$0x1] %vm4485_vm9, %v4526_v41  ;;  %v4483_v2 = vpop.permute.xlu0 %4482  ;;  %v8244_v41 = vld [vmem:[%s11804_s14 + $0x334] ss:$12 sps:$4 sm:$0xff]  }
 0x7d0   :  { %4486 = vst.msk [vmem:[#allocation4] sm:$0x1] %vm4485_vm9, %v4483_v2 }
 0x7d2   :  { %v4608_v53 = vpop.permute.xlu1 %4607 }
 0x7d3   :  { %4610 = vst.msk [vmem:[#allocation4 + $0x6] sm:$0x1] %vm4485_vm9, %v4608_v53  ;;  %v4567_v19 = vpop.permute.xlu0 %4566  ;;  %v8239_v53 = vld [vmem:[%s11804_s14 + $0x4c8] ss:$12 sps:$4 sm:$0xff]  }
 0x7d4   :  { %4569 = vst.msk [vmem:[#allocation4 + $0x4] sm:$0x1] %vm4485_vm9, %v4567_v19 }
 0x7d6   :  { %v4895_v36 = vpop.permute.xlu1 %4894 }
 0x7d7   :  { %4897 = vst.msk [vmem:[#allocation4 + $0x3] sm:$0x1] %vm4485_vm9, %v4895_v36  ;;  %v4854_v51 = vpop.permute.xlu0 %4853  ;;  %v8247_v36 = vld [vmem:[%s11804_s14 + $0x4b4] ss:$12 sps:$4 sm:$0xff]  }
 0x7d8   :  { %4856 = vst.msk [vmem:[#allocation4 + $0x1] sm:$0x1] %vm4485_vm9, %v4854_v51  ;;  %v8242_v51 = vld [vmem:[%s11804_s14 + $0x330] ss:$12 sps:$4 sm:$0xff]  }
 0x7da   :  { %v4977_v23 = vpop.permute.xlu1 %4976 }
 0x7db   :  { %4979 = vst.msk [vmem:[#allocation4 + $0x7] sm:$0x1] %vm4485_vm9, %v4977_v23  ;;  %v4936_v35 = vpop.permute.xlu0 %4935  ;;  %v8250_v23 = vld [vmem:[%s11804_s14 + $0x31c] ss:$12 sps:$4 sm:$0xff]  }
 0x7dc   :  { %4938 = vst.msk [vmem:[#allocation4 + $0x5] sm:$0x1] %vm4485_vm9, %v4936_v35 }
 0x7de   :  { %v4539_v42 = vpop.permute.xlu1 %4538 }
 0x7df   :  { %4541 = vst.msk [vmem:[#allocation4 + $0x2] sm:$0x1] %vm4499_vm10, %v4539_v42  ;;  %v4497_v3 = vpop.permute.xlu0 %4496  ;;  %v8245_v42 = vld [vmem:[%s11804_s14 + $0x4b0] ss:$12 sps:$4 sm:$0xff]  }
 0x7e0   :  { %4500 = vst.msk [vmem:[#allocation4] sm:$0x1] %vm4499_vm10, %v4497_v3 }
 0x7e2   :  { %v4621_v39 = vpop.permute.xlu1 %4620 }
 0x7e3   :  { %4623 = vst.msk [vmem:[#allocation4 + $0x6] sm:$0x1] %vm4499_vm10, %v4621_v39  ;;  %v4580_v48 = vpop.permute.xlu0 %4579  ;;  %v8253_v39 = vld [vmem:[%s11804_s14 + $0x49c] ss:$12 sps:$4 sm:$0xff]  }
 0x7e4   :  { %4582 = vst.msk [vmem:[#allocation4 + $0x4] sm:$0x1] %vm4499_vm10, %v4580_v48  ;;  %v8248_v48 = vld [vmem:[%s11804_s14 + $0x318] ss:$12 sps:$4 sm:$0xff]  }
 0x7e6   :  { %v4908_v26 = vpop.permute.xlu1 %4907 }
 0x7e7   :  { %4910 = vst.msk [vmem:[#allocation4 + $0x3] sm:$0x1] %vm4499_vm10, %v4908_v26  ;;  %v4867_v60 = vpop.permute.xlu0 %4866  ;;  %v8256_v26 = vld [vmem:[%s11804_s14 + $0x304] ss:$12 sps:$4 sm:$0xff]  }
 0x7e8   :  { %4869 = vst.msk [vmem:[#allocation4 + $0x1] sm:$0x1] %vm4499_vm10, %v4867_v60 }
 0x7ea   :  { %v4990_v50 = vpop.permute.xlu1 %4989 }
 0x7eb   :  { %4992 = vst.msk [vmem:[#allocation4 + $0x7] sm:$0x1] %vm4499_vm10, %v4990_v50  ;;  %v4949_v17 = vpop.permute.xlu0 %4948  ;;  %v8259_v50 = vld [vmem:[%s11804_s14 + $0x484] ss:$12 sps:$4 sm:$0xff]  }
 0x7ec   :  { %4951 = vst.msk [vmem:[#allocation4 + $0x5] sm:$0x1] %vm4499_vm10, %v4949_v17  ;;  %v8254_v17 = vld [vmem:[%s11804_s14 + $0x300] ss:$12 sps:$4 sm:$0xff]  }
 0x7ee   :  { %v4677_v31 = vpop.permute.xlu1 %4676 }
 0x7ef   :  { %4679 = vst.msk [vmem:[#allocation4 + $0xa] sm:$0x1] %vm4471_vm0, %v4677_v31  ;;  %v4636_v7 = vpop.permute.xlu0 %4635 }
 0x7f0   :  { %4638 = vst.msk [vmem:[#allocation4 + $0x8] sm:$0x1] %vm4471_vm0, %v4636_v7  ;;  %v8257_v7 = vld [vmem:[%s11804_s14 + $0x480] ss:$12 sps:$4 sm:$0xff]  }
 0x7f2   :  { %v4759_v56 = vpop.permute.xlu1 %4758 }
 0x7f3   :  { %4761 = vst.msk [vmem:[#allocation4 + $0xe] sm:$0x1] %vm4471_vm0, %v4759_v56  ;;  %v4718_v12 = vpop.permute.xlu0 %4717  ;;  %v5198_v54 = vld [vmem:[#allocation4] sm:$0xff] }
 0x7f4   :  { %4720 = vst.msk [vmem:[#allocation4 + $0xc] sm:$0x1] %vm4471_vm0, %v4718_v12  ;;  %v5211_v43 = vrot.slane %v5198_v54, %v11245_v33  ;;  %v5204_v29 = vcombine.high %v5198_v54, %v5198_v54  ;;  %v8265_v12 = vld [vmem:[%s11804_s14 + $0x5ec] ss:$12 sps:$4 sm:$0xff]   ;;  %v8260_v54 = vld [vmem:[%s11804_s14 + $0x468] ss:$12 sps:$4 sm:$0xff]  }
 0x7f6   :  { %v5046_v27 = vpop.permute.xlu1 %5045  ;;  %v5219_v46 = vcombine.high %v5211_v43, %v5211_v43  ;;  %v5218_v63 = vrot.slane %v5204_v29, %v11245_v33  ;;  %v11264_v25 = vpack.c.bf16 %v5211_v43, %v5211_v43  ;;  %v8268_v43 = vld [vmem:[%s11804_s14 + $0x454] ss:$12 sps:$4 sm:$0xff]  }
 0x7f7   :  { %5048 = vst.msk [vmem:[#allocation4 + $0xb] sm:$0x1] %vm4471_vm0, %v5046_v27  ;;  %v5005_v61 = vpop.permute.xlu0 %5004  ;;  %v8263_v27 = vld [vmem:[%s11804_s14 + $0x5e8] ss:$12 sps:$4 sm:$0xff]  }
 0x7f8   :  { %5007 = vst.msk [vmem:[#allocation4 + $0x9] sm:$0x1] %vm4471_vm0, %v5005_v61  ;;  %v11256_v14 = vpack.c.bf16 %v5219_v46, %v5219_v46  ;;  %v5220_v47 = vcombine.high %v5218_v63, %v5218_v63  ;;  %v11271_v16 = vpack.c.bf16 %v5218_v63, %v5218_v63  ;;  %v8266_v63 = vld [vmem:[%s11804_s14 + $0x450] ss:$12 sps:$4 sm:$0xff]  }
 0x7f9   :  { %v8274_v61 = vld [vmem:[%s11804_s14 + $0x43c] ss:$12 sps:$4 sm:$0xff]  }
 0x7fa   :  { %6752 = vmatprep.mubr.bf16.mxu1 %v11256_v14  ;;  %v5128_v5 = vpop.permute.xlu1 %5127  ;;  %v11267_v6 = vpack.c.bf16 %v5220_v47, %v5220_v47 }
 0x7fb   :  { %5130 = vst.msk [vmem:[#allocation4 + $0xf] sm:$0x1] %vm4471_vm0, %v5128_v5  ;;  %v5087_v37 = vpop.permute.xlu0 %5086  ;;  %6753 = vmatmul.mubr.bf16.vlgmr.msra.gmra.mxu1 %v11264_v25  ;;  %v8277_v5 = vld [vmem:[%s11804_s14 + $0x5bc] ss:$12 sps:$4 sm:$0xff]  }
 0x7fc   :  { %5089 = vst.msk [vmem:[#allocation4 + $0xd] sm:$0x1] %vm4471_vm0, %v5087_v37  ;;  %6803 = vmatpush1.bf16.msra.mxu1 %v8212_v62  ;;  %6793 = vmatprep.mubr.bf16.mxu0 %v11267_v6  ;;  %v8271_v62 = vld [vmem:[%s11804_s14 + $0x5d4] ss:$12 sps:$4 sm:$0xff]   ;;  %v8272_v37 = vld [vmem:[%s11804_s14 + $0x438] ss:$12 sps:$4 sm:$0xff]  }
 0x7fd   :  { %6794 = vmatmul.mubr.bf16.vlgmr.msra.gmra.mxu0 %v11271_v16  ;;  %6804 = vmatprep.subr.bf16.mxu1 %v8220_v8 }
 0x7fe   :  { %6844 = vmatpush1.bf16.msra.mxu0 %v8215_v9  ;;  %v4690_v45 = vpop.permute.xlu1 %4689  ;;  %v8269_v9 = vld [vmem:[%s11804_s14 + $0x5d0] ss:$12 sps:$4 sm:$0xff]  }
 0x7ff   :  { %4692 = vst.msk [vmem:[#allocation4 + $0xa] sm:$0x1] %vm4485_vm9, %v4690_v45  ;;  %v4649_v28 = vpop.permute.xlu0 %4648  ;;  %6845 = vmatprep.subr.bf16.mxu0 %v8223_v32 }
 0x800   :  { %4651 = vst.msk [vmem:[#allocation4 + $0x8] sm:$0x1] %vm4485_vm9, %v4649_v28  ;;  %6805 = vmatpush1.bf16.msra.mxu1 %v8218_v22  ;;  %v8280_v22 = vld [vmem:[%s11804_s14 + $0x424] ss:$12 sps:$4 sm:$0xff]   ;;  %v8278_v28 = vld [vmem:[%s11804_s14 + $0x420] ss:$12 sps:$4 sm:$0xff]  }
 0x801   :  { %6806 = vmatprep.subr.bf16.mxu1 %v8226_v49  ;;  %v8275_v49 = vld [vmem:[%s11804_s14 + $0x5b8] ss:$12 sps:$4 sm:$0xff]  }
 0x802   :  { %6846 = vmatpush1.bf16.msra.mxu0 %v8221_v57  ;;  %v4772_v30 = vpop.permute.xlu1 %4771  ;;  %v8283_v57 = vld [vmem:[%s11804_s14 + $0x5a4] ss:$12 sps:$4 sm:$0xff]  }
 0x803   :  { %4774 = vst.msk [vmem:[#allocation4 + $0xe] sm:$0x1] %vm4485_vm9, %v4772_v30  ;;  %v4731_v24 = vpop.permute.xlu0 %4730  ;;  %6847 = vmatprep.subr.bf16.mxu0 %v8229_v59  ;;  %v8286_v30 = vld [vmem:[%s11804_s14 + $0x40c] ss:$12 sps:$4 sm:$0xff]  }
 0x804   :  { %4733 = vst.msk [vmem:[#allocation4 + $0xc] sm:$0x1] %vm4485_vm9, %v4731_v24  ;;  %6807 = vmatpush1.bf16.msra.mxu1 %v8224_v1  ;;  %v8281_v24 = vld [vmem:[%s11804_s14 + $0x5a0] ss:$12 sps:$4 sm:$0xff]  }
 0x805   :  { %6808 = vmatprep.subr.bf16.mxu1 %v8232_v13 }
 0x806   :  { %6848 = vmatpush1.bf16.msra.mxu0 %v8227_v18  ;;  %v5059_v21 = vpop.permute.xlu1 %5058 }
 0x807   :  { %5061 = vst.msk [vmem:[#allocation4 + $0xb] sm:$0x1] %vm4485_vm9, %v5059_v21  ;;  %v5018_v0 = vpop.permute.xlu0 %5017  ;;  %6849 = vmatprep.subr.bf16.mxu0 %v8235_v38  ;;  %v8289_v21 = vld [vmem:[%s11804_s14 + $0x58c] ss:$12 sps:$4 sm:$0xff]  }
 0x808   :  { %5020 = vst.msk [vmem:[#allocation4 + $0x9] sm:$0x1] %vm4485_vm9, %v5018_v0  ;;  %6809 = vmatpush1.bf16.msra.mxu1 %v8230_v55 }
 0x809   :  { %6810 = vmatprep.subr.bf16.mxu1 %v8238_v44 }
 0x80a   :  { %6850 = vmatpush1.bf16.msra.mxu0 %v8233_v4  ;;  %v5141_v2 = vpop.permute.xlu1 %5140  ;;  %v8284_v4 = vld [vmem:[%s11804_s14 + $0x408] ss:$12 sps:$4 sm:$0xff]  }
 0x80b   :  { %5143 = vst.msk [vmem:[#allocation4 + $0xf] sm:$0x1] %vm4485_vm9, %v5141_v2  ;;  %v5100_v19 = vpop.permute.xlu0 %5099  ;;  %6851 = vmatprep.subr.bf16.mxu0 %v8241_v20 }
 0x80c   :  { %5102 = vst.msk [vmem:[#allocation4 + $0xd] sm:$0x1] %vm4485_vm9, %v5100_v19  ;;  %6811 = vmatpush1.bf16.msra.mxu1 %v8236_v15  ;;  %v8293_v15 = vld [vmem:[%s11804_s14 + $0x3f4] ss:$12 sps:$4 sm:$0xff]   ;;  %v8291_v19 = vld [vmem:[%s11804_s14 + $0x3f0] ss:$12 sps:$4 sm:$0xff]  }
 0x80d   :  { %6812 = vmatprep.subr.bf16.mxu1 %v8244_v41  ;;  %v8287_v41 = vld [vmem:[%s11804_s14 + $0x588] ss:$12 sps:$4 sm:$0xff]  }
 0x80e   :  { %6852 = vmatpush1.bf16.msra.mxu0 %v8239_v53  ;;  %v4703_v35 = vpop.permute.xlu1 %4702  ;;  %v8296_v53 = vld [vmem:[%s11804_s14 + $0x574] ss:$12 sps:$4 sm:$0xff]  }
 0x80f   :  { %4705 = vst.msk [vmem:[#allocation4 + $0xa] sm:$0x1] %vm4499_vm10, %v4703_v35  ;;  %v4662_v3 = vpop.permute.xlu0 %4661  ;;  %6853 = vmatprep.subr.bf16.mxu0 %v8247_v36  ;;  %v8299_v36 = vld [vmem:[%s11804_s14 + $0x3dc] ss:$12 sps:$4 sm:$0xff]   ;;  %v8297_v35 = vld [vmem:[%s11804_s14 + $0x3d8] ss:$12 sps:$4 sm:$0xff]  }
 0x810   :  { %4664 = vst.msk [vmem:[#allocation4 + $0x8] sm:$0x1] %vm4499_vm10, %v4662_v3  ;;  %6813 = vmatpush1.bf16.msra.mxu1 %v8242_v51  ;;  %v8294_v51 = vld [vmem:[%s11804_s14 + $0x570] ss:$12 sps:$4 sm:$0xff]   ;;  %v8300_v3 = vld [vmem:[%s11804_s14 + $0x558] ss:$12 sps:$4 sm:$0xff]  }
 0x811   :  { %6814 = vmatprep.subr.bf16.mxu1 %v8250_v23  ;;  %v8302_v23 = vld [vmem:[%s11804_s14 + $0x55c] ss:$12 sps:$4 sm:$0xff]  }
 0x812   :  { %6854 = vmatpush1.bf16.msra.mxu0 %v8245_v42  ;;  %v4785_v60 = vpop.permute.xlu1 %4784  ;;  %v8305_v42 = vld [vmem:[%s11804_s14 + $0x3c4] ss:$12 sps:$4 sm:$0xff]  }
 0x813   :  { %4787 = vst.msk [vmem:[#allocation4 + $0xe] sm:$0x1] %vm4499_vm10, %v4785_v60  ;;  %v4744_v34 = vpop.permute.xlu0 %4743  ;;  %6855 = vmatprep.subr.bf16.mxu0 %v8253_v39  ;;  %v8308_v39 = vld [vmem:[%s11804_s14 + $0x544] ss:$12 sps:$4 sm:$0xff]   ;;  %v8306_v60 = vld [vmem:[%s11804_s14 + $0x540] ss:$12 sps:$4 sm:$0xff]  }
 0x814   :  { %4746 = vst.msk [vmem:[#allocation4 + $0xc] sm:$0x1] %vm4499_vm10, %v4744_v34  ;;  %6815 = vmatpush1.bf16.msra.mxu1 %v8248_v48  ;;  %v8303_v48 = vld [vmem:[%s11804_s14 + $0x3c0] ss:$12 sps:$4 sm:$0xff]   ;;  %v8309_v34 = vld [vmem:[%s11804_s14 + $0x6a8] ss:$12 sps:$4 sm:$0xff]  }
 0x815   :  { %6816 = vmatprep.subr.bf16.mxu1 %v8256_v26  ;;  %v8311_v26 = vld [vmem:[%s11804_s14 + $0x6ac] ss:$12 sps:$4 sm:$0xff]  }
 0x816   :  { %6856 = vmatpush1.bf16.msra.mxu0 %v8251_v11  ;;  %v5072_v31 = vpop.permute.xlu1 %5071  ;;  %v8312_v11 = vld [vmem:[%s11804_s14 + $0x170] ss:$12 sps:$4 sm:$0xff]  }
 0x817   :  { %5074 = vst.msk [vmem:[#allocation4 + $0xb] sm:$0x1] %vm4499_vm10, %v5072_v31  ;;  %v5031_v56 = vpop.permute.xlu0 %5030  ;;  %6857 = vmatprep.subr.bf16.mxu0 %v8259_v50 }
 0x818   :  { %5033 = vst.msk [vmem:[#allocation4 + $0x9] sm:$0x1] %vm4499_vm10, %v5031_v56  ;;  %6817 = vmatpush1.bf16.msra.mxu1 %v8254_v17  ;;  %v8316_v17 = vld [vmem:[%s11804_s14 + $0x694] ss:$12 sps:$4 sm:$0xff]   ;;  %v8314_v56 = vld [vmem:[%s11804_s14 + $0x690] ss:$12 sps:$4 sm:$0xff]  }
 0x819   :  { %6818 = vmatprep.subr.bf16.mxu1 %v8262_v40  ;;  %v8313_v40 = vld [vmem:[%s11804_s14 + $0xb0] ss:$12 sps:$4 sm:$0xff]  }
 0x81a   :  { %6858 = vmatpush1.bf16.msra.mxu0 %v8257_v7  ;;  %v5154_v29 = vpop.permute.xlu1 %5153  ;;  %v8317_v7 = vld [vmem:[%s11804_s14 + $0x158] ss:$12 sps:$4 sm:$0xff]  }
 0x81b   :  { %5156 = vst.msk [vmem:[#allocation4 + $0xf] sm:$0x1] %vm4499_vm10, %v5154_v29  ;;  %v5113_v46 = vpop.permute.xlu0 %5112  ;;  %6859 = vmatprep.subr.bf16.mxu0 %v8265_v12  ;;  %v11979_v12 = vmov 0   ;;  %v8322_v29 = vld [vmem:[%s11804_s14 + $0x140] ss:$12 sps:$4 sm:$0xff]  }
 0x81c   :  { %5115 = vst.msk [vmem:[#allocation4 + $0xd] sm:$0x1] %vm4499_vm10, %v5113_v46  ;;  %6819 = vmatpush2.bf16.msra.mxu1 %v8260_v54  ;;  %v8321_v54 = vld [vmem:[%s11804_s14 + $0x67c] ss:$12 sps:$4 sm:$0xff]   ;;  %v8326_v46 = vld [vmem:[%s11804_s14 + $0x664] ss:$12 sps:$4 sm:$0xff]  }
 0x81d   :  { %6820 = vmatprep.subr.bf16.mxu1 %v8268_v43  ;;  %v8318_v43 = vld [vmem:[%s11804_s14 + $0x98] ss:$12 sps:$4 sm:$0xff]  }
 0x81e   :  { %6860 = vmatpush2.bf16.msra.mxu0 %v8263_v27  ;;  %v5169_v47 = vpop.permute.xlu1 %5168  ;;  %v8319_v27 = vld [vmem:[%s11804_s14 + $0x678] ss:$12 sps:$4 sm:$0xff]  }
 0x81f   :  { %5171 = vst.msk [vmem:[#allocation4 + $0x11] sm:$0x1] %vm4471_vm0, %v5169_v47  ;;  %v4800_v8 = vpop.permute.xlu0 %4799  ;;  %6861 = vmatprep.subr.bf16.mxu0 %v8271_v62  ;;  %v8327_v62 = vld [vmem:[%s11804_s14 + $0x128] ss:$12 sps:$4 sm:$0xff]  }
 0x820   :  { %4802 = vst.msk [vmem:[#allocation4 + $0x10] sm:$0x1] %vm4471_vm0, %v4800_v8  ;;  %6821 = vmatpush2.bf16.msra.mxu1 %v8266_v63  ;;  %v8324_v63 = vld [vmem:[%s11804_s14 + $0x660] ss:$12 sps:$4 sm:$0xff]   ;;  %v8328_v47 = vld [vmem:[%s11804_s14 + $0x68] ss:$12 sps:$4 sm:$0xff]  }
 0x821   :  { %6822 = vmatprep.subr.bf16.mxu1 %v8274_v61  ;;  %v8331_v61 = vld [vmem:[%s11804_s14 + $0x64c] ss:$12 sps:$4 sm:$0xff]   ;;  %v8329_v8 = vld [vmem:[%s11804_s14 + $0x648] ss:$12 sps:$4 sm:$0xff]  }
 0x822   :  { %6862 = vmatpush2.bf16.msra.mxu0 %v8269_v9  ;;  %v5182_v32 = vpop.permute.xlu1 %5181  ;;  %v8332_v9 = vld [vmem:[%s11804_s14 + $0x110] ss:$12 sps:$4 sm:$0xff]  }
 0x823   :  { %5184 = vst.msk [vmem:[#allocation4 + $0x11] sm:$0x1] %vm4485_vm9, %v5182_v32  ;;  %v4813_v45 = vpop.permute.xlu0 %4812  ;;  %6863 = vmatprep.subr.bf16.mxu0 %v8277_v5  ;;  %v5199_v59 = vld [vmem:[#allocation4 + $0x8] sm:$0xff]  ;;  %v8336_v5 = vld [vmem:[%s11804_s14 + $0x634] ss:$12 sps:$4 sm:$0xff]  }
 0x824   :  { %4815 = vst.msk [vmem:[#allocation4 + $0x10] sm:$0x1] %vm4485_vm9, %v4813_v45  ;;  %6823 = vmatpush2.bf16.msra.mxu1 %v8272_v37  ;;  %v5228_v1 = vrot.slane %v5199_v59, %v11245_v33  ;;  %v5221_v13 = vcombine.high %v5199_v59, %v5199_v59  ;;  %v8333_v37 = vld [vmem:[%s11804_s14 + $0x50] ss:$12 sps:$4 sm:$0xff]   ;;  %v8338_v45 = vld [vmem:[%s11804_s14 + $0x38] ss:$12 sps:$4 sm:$0xff]  }
 0x825   :  { %6824 = vmatprep.subr.bf16.mxu1 %v8280_v22  ;;  %v8337_v22 = vld [vmem:[%s11804_s14 + $0xf8] ss:$12 sps:$4 sm:$0xff]   ;;  %v8334_v32 = vld [vmem:[%s11804_s14 + $0x630] ss:$12 sps:$4 sm:$0xff]  }
 0x826   :  { %6864 = vmatpush2.bf16.msra.mxu0 %v8275_v49  ;;  %v5195_v18 = vpop.permute.xlu1 %5194  ;;  %v5236_v38 = vcombine.high %v5228_v1, %v5228_v1  ;;  %v5235_v55 = vrot.slane %v5221_v13, %v11245_v33  ;;  %v11492_v50 = vpack.c.bf16 %v5228_v1, %v5228_v1  ;;  %v8341_v49 = vld [vmem:[%s11804_s14 + $0x61c] ss:$12 sps:$4 sm:$0xff]   ;;  %v8339_v59 = vld [vmem:[%s11804_s14 + $0x618] ss:$12 sps:$4 sm:$0xff]   ;;  %v8343_v1 = vld [vmem:[%s11804_s14 + $0x20] ss:$12 sps:$4 sm:$0xff]  }
 0x827   :  { %5197 = vst.msk [vmem:[#allocation4 + $0x11] sm:$0x1] %vm4499_vm10, %v5195_v18  ;;  %v4826_v44 = vpop.permute.xlu0 %4825  ;;  %6865 = vmatprep.subr.bf16.mxu0 %v8283_v57  ;;  %v8342_v57 = vld [vmem:[%s11804_s14 + $0xe0] ss:$12 sps:$4 sm:$0xff]   ;;  %v8347_v13 = vld [vmem:[%s11804_s14 + $0xc8] ss:$12 sps:$4 sm:$0xff]  }
 0x828   :  { %4828 = vst.msk [vmem:[#allocation4 + $0x10] sm:$0x1] %vm4499_vm10, %v4826_v44  ;;  %6825 = vmatpush2.bf16.msra.mxu1 %v8278_v28  ;;  %v11438_v0 = vpack.c.bf16 %v5236_v38, %v5236_v38  ;;  %v5237_v20 = vcombine.high %v5235_v55, %v5235_v55  ;;  %v11501_v31 = vpack.c.bf16 %v5235_v55, %v5235_v55  ;;  %v8346_v28 = vld [vmem:[%s11804_s14 + $0x604] ss:$12 sps:$4 sm:$0xff]  }
 0x829   :  { %6826 = vmatprep.subr.bf16.mxu1 %v8286_v30  ;;  %v8344_v30 = vld [vmem:[%s11804_s14 + $0x600] ss:$12 sps:$4 sm:$0xff]   ;;  %v8349_v18 = vld [vmem:[%s11804_s14 + $0x2f0] ss:$12 sps:$4 sm:$0xff]  }
 0x82a   :  { %6866 = vmatpush2.bf16.msra.mxu0 %v8281_v24  ;;  %6834 = vmatprep.mubr.bf16.mxu1 %v11438_v0  ;;  %v11447_v2 = vpack.c.bf16 %v5237_v20, %v5237_v20  ;;  %v8348_v24 = vld [vmem:[%s11804_s14 + $0x8] ss:$12 sps:$4 sm:$0xff]   ;;  %v8351_v55 = vld [vmem:[%s11804_s14 + $0x470] ss:$12 sps:$4 sm:$0xff]  }
 0x82b   :  { %6867 = vmatprep.subr.bf16.mxu0 %v8289_v21  ;;  %v8350_v44 = vld [vmem:[%s11804_s14 + $0x230] ss:$12 sps:$4 sm:$0xff]  }
 0x82c   :  { %6827 = vmatpush2.bf16.msra.mxu1 %v8284_v4  ;;  %6875 = vmatprep.mubr.bf16.mxu0 %v11447_v2  ;;  %v8353_v4 = vld [vmem:[%s11804_s14 + $0x2d8] ss:$12 sps:$4 sm:$0xff]   ;;  %v8352_v20 = vld [vmem:[%s11804_s14 + $0x3b0] ss:$12 sps:$4 sm:$0xff]  }
 0x82d   :  { %6828 = vmatprep.subr.bf16.mxu1 %v8293_v15  ;;  %v8355_v15 = vld [vmem:[%s11804_s14 + $0x458] ss:$12 sps:$4 sm:$0xff]  }
 0x82e   :  { %6868 = vmatpush2.bf16.msra.mxu0 %v8287_v41  ;;  %v8354_v41 = vld [vmem:[%s11804_s14 + $0x218] ss:$12 sps:$4 sm:$0xff]  }
 0x82f   :  { %6869 = vmatprep.subr.bf16.mxu0 %v8296_v53  ;;  %v7339_v38 = vld.sshfl [vmem:[#allocation4 + $0x10] sm:$0x3 pattern:$0x76325410] }
 0x830   :  { %6829 = vmatpush2.bf16.msra.mxu1 %v8291_v19  ;;  %v11596_v21 = vpack.c.bf16 %v7339_v38, %v7339_v38  ;;  %v8357_v53 = vld [vmem:[%s11804_s14 + $0x2c0] ss:$12 sps:$4 sm:$0xff]   ;;  %v8356_v19 = vld [vmem:[%s11804_s14 + $0x398] ss:$12 sps:$4 sm:$0xff]  }
 0x831   :  { %6830 = vmatprep.subr.bf16.mxu1 %v8299_v36  ;;  %v8361_v36 = vld [vmem:[%s11804_s14 + $0x2a8] ss:$12 sps:$4 sm:$0xff]  }
 0x832   :  { %6870 = vmatpush2.bf16.msra.mxu0 %v8294_v51  ;;  %v8363_v51 = vld [vmem:[%s11804_s14 + $0x428] ss:$12 sps:$4 sm:$0xff]  }
 0x833   :  { %6871 = vmatprep.subr.bf16.mxu0 %v8302_v23  ;;  %v8362_v23 = vld [vmem:[%s11804_s14 + $0x1e8] ss:$12 sps:$4 sm:$0xff]  }
 0x834   :  { %6831 = vmatpush2.bf16.msra.mxu1 %v8297_v35  ;;  %v8365_v35 = vld [vmem:[%s11804_s14 + $0x290] ss:$12 sps:$4 sm:$0xff]  }
 0x835   :  { %6832 = vmatprep.subr.bf16.mxu1 %v8305_v42  ;;  %v8364_v42 = vld [vmem:[%s11804_s14 + $0x368] ss:$12 sps:$4 sm:$0xff]  }
 0x836   :  { %6872 = vmatpush2.bf16.msra.mxu0 %v8300_v3  ;;  %v8367_v3 = vld [vmem:[%s11804_s14 + $0x410] ss:$12 sps:$4 sm:$0xff]  }
 0x837   :  { %6873 = vmatprep.subr.bf16.mxu0 %v8308_v39  ;;  %v8366_v39 = vld [vmem:[%s11804_s14 + $0x1d0] ss:$12 sps:$4 sm:$0xff]  }
 0x838   :  { %6833 = vmatpush2.bf16.msra.mxu1 %v8303_v48  ;;  %v8369_v48 = vld [vmem:[%s11804_s14 + $0x278] ss:$12 sps:$4 sm:$0xff]  }
 0x839   :  { %6884 = vmatprep.subr.bf16.mxu1 %v8311_v26  ;;  %v8368_v26 = vld [vmem:[%s11804_s14 + $0x350] ss:$12 sps:$4 sm:$0xff]  }
 0x83a   :  { %6874 = vmatpush2.bf16.msra.mxu0 %v8306_v60  ;;  %v8371_v60 = vld [vmem:[%s11804_s14 + $0x3f8] ss:$12 sps:$4 sm:$0xff]  }
 0x83b   :  { %6835 = vmatmul.mubr.bf16.vlgmr.msra.gmra.mxu1 %v11492_v50  ;;  %7715 = vmatprep.subr.bf16.mxu0 %v8312_v11  ;;  %v8370_v11 = vld [vmem:[%s11804_s14 + $0x1b8] ss:$12 sps:$4 sm:$0xff]  }
 0x83c   :  { %6885 = vmatpush1.bf16.msra.mxu1 %v8309_v34  ;;  %6916 = vmatprep.mubr.bf16.mxu1 %v11979_v12  ;;  %v8373_v34 = vld [vmem:[%s11804_s14 + $0x260] ss:$12 sps:$4 sm:$0xff]  }
 0x83d   :  { %6876 = vmatmul.mubr.bf16.vlgmr.msra.gmra.mxu0 %v11501_v31  ;;  %6886 = vmatprep.subr.bf16.mxu1 %v8316_v17  ;;  %v8372_v17 = vld [vmem:[%s11804_s14 + $0x338] ss:$12 sps:$4 sm:$0xff]   ;;  %v8376_v12 = vld [vmem:[%s11804_s14 + $0x320] ss:$12 sps:$4 sm:$0xff]  }
 0x83e   :  { %7716 = vmatpush3.bf16.msra.mxu0 %v8313_v40  ;;  %6957 = vmatprep.mubr.bf16.mxu0 %v11256_v14  ;;  %v8323_v14 = vld [vmem:[%s11804_s14 + $0x80] ss:$12 sps:$4 sm:$0xff]  }
 0x83f   :  { %7717 = vmatprep.subr.bf16.mxu0 %v8317_v7  ;;  %v8375_v40 = vld [vmem:[%s11804_s14 + $0x3e0] ss:$12 sps:$4 sm:$0xff]  }
 0x840   :  { %6887 = vmatpush1.bf16.msra.mxu1 %v8314_v56  ;;  %v8374_v7 = vld [vmem:[%s11804_s14 + $0x1a0] ss:$12 sps:$4 sm:$0xff]   ;;  %v8377_v56 = vld [vmem:[%s11804_s14 + $0x248] ss:$12 sps:$4 sm:$0xff]  }
 0x841   :  { %6888 = vmatprep.subr.bf16.mxu1 %v8321_v54  ;;  %v8379_v54 = vld [vmem:[%s11804_s14 + $0x3c8] ss:$12 sps:$4 sm:$0xff]  }
 0x842   :  { %7718 = vmatpush3.bf16.msra.mxu0 %v8318_v43  ;;  %v8378_v43 = vld [vmem:[%s11804_s14 + $0x188] ss:$12 sps:$4 sm:$0xff]  }
 0x843   :  { %7719 = vmatprep.subr.bf16.mxu0 %v8322_v29  ;;  %v8381_v29 = vld [vmem:[%s11804_s14 + $0x5f0] ss:$12 sps:$4 sm:$0xff]  }
 0x844   :  { %6889 = vmatpush1.bf16.msra.mxu1 %v8319_v27  ;;  %v8380_v27 = vld [vmem:[%s11804_s14 + $0x308] ss:$12 sps:$4 sm:$0xff]  }
 0x845   :  { %6890 = vmatprep.subr.bf16.mxu1 %v8326_v46  ;;  %v8382_v46 = vld [vmem:[%s11804_s14 + $0x530] ss:$12 sps:$4 sm:$0xff]  }
 0x846   :  { %7720 = vmatpush3.bf16.msra.mxu0 %v8323_v14  ;;  %v8384_v14 = vld [vmem:[%s11804_s14 + $0x5d8] ss:$12 sps:$4 sm:$0xff]  }
 0x847   :  { %7721 = vmatprep.subr.bf16.mxu0 %v8327_v62  ;;  %v8383_v62 = vld [vmem:[%s11804_s14 + $0x6b0] ss:$12 sps:$4 sm:$0xff]  }
 0x848   :  { %6891 = vmatpush1.bf16.msra.mxu1 %v8324_v63  ;;  %v8385_v63 = vld [vmem:[%s11804_s14 + $0x518] ss:$12 sps:$4 sm:$0xff]  }
 0x849   :  { %6892 = vmatprep.subr.bf16.mxu1 %v8331_v61  ;;  %v8387_v61 = vld [vmem:[%s11804_s14 + $0x5c0] ss:$12 sps:$4 sm:$0xff]  }
 0x84a   :  { %7722 = vmatpush3.bf16.msra.mxu0 %v8328_v47  ;;  %v8389_v47 = vld [vmem:[%s11804_s14 + $0x680] ss:$12 sps:$4 sm:$0xff]  }
 0x84b   :  { %7723 = vmatprep.subr.bf16.mxu0 %v8332_v9  ;;  %v8391_v9 = vld [vmem:[%s11804_s14 + $0x4e8] ss:$12 sps:$4 sm:$0xff]  }
 0x84c   :  { %6893 = vmatpush1.bf16.msra.mxu1 %v8329_v8  ;;  %v8393_v8 = vld [vmem:[%s11804_s14 + $0x590] ss:$12 sps:$4 sm:$0xff]  }
 0x84d   :  { %6894 = vmatprep.subr.bf16.mxu1 %v8336_v5  ;;  %v8392_v5 = vld [vmem:[%s11804_s14 + $0x668] ss:$12 sps:$4 sm:$0xff]  }
 0x84e   :  { %7724 = vmatpush3.bf16.msra.mxu0 %v8333_v37  ;;  %v8394_v37 = vld [vmem:[%s11804_s14 + $0x4d0] ss:$12 sps:$4 sm:$0xff]  }
 0x84f   :  { %7725 = vmatprep.subr.bf16.mxu0 %v8337_v22  ;;  %v8396_v22 = vld [vmem:[%s11804_s14 + $0x578] ss:$12 sps:$4 sm:$0xff]  }
 0x850   :  { %6895 = vmatpush1.bf16.msra.mxu1 %v8334_v32  ;;  %v8395_v32 = vld [vmem:[%s11804_s14 + $0x650] ss:$12 sps:$4 sm:$0xff]  }
 0x851   :  { %6896 = vmatprep.subr.bf16.mxu1 %v8341_v49  ;;  %v8397_v49 = vld [vmem:[%s11804_s14 + $0x4b8] ss:$12 sps:$4 sm:$0xff]  }
 0x852   :  { %7726 = vmatpush3.bf16.msra.mxu0 %v8338_v45  ;;  %v8399_v45 = vld [vmem:[%s11804_s14 + $0x560] ss:$12 sps:$4 sm:$0xff]  }
 0x853   :  { %7727 = vmatprep.subr.bf16.mxu0 %v8342_v57  ;;  %v8398_v57 = vld [vmem:[%s11804_s14 + $0x638] ss:$12 sps:$4 sm:$0xff]  }
 0x854   :  { %6897 = vmatpush1.bf16.msra.mxu1 %v8339_v59  ;;  %v8400_v59 = vld [vmem:[%s11804_s14 + $0x4a0] ss:$12 sps:$4 sm:$0xff]  }
 0x855   :  { %6898 = vmatprep.subr.bf16.mxu1 %v8346_v28  ;;  %v8402_v28 = vld [vmem:[%s11804_s14 + $0x548] ss:$12 sps:$4 sm:$0xff]  }
 0x856   :  { %7728 = vmatpush3.bf16.msra.mxu0 %v8343_v1  ;;  %v8401_v1 = vld [vmem:[%s11804_s14 + $0x620] ss:$12 sps:$4 sm:$0xff]  }
 0x857   :  { %7729 = vmatprep.subr.bf16.mxu0 %v8347_v13  ;;  %v8403_v13 = vld [vmem:[%s11804_s14 + $0x488] ss:$12 sps:$4 sm:$0xff]  }
 0x858   :  { %6899 = vmatpush1.bf16.msra.mxu1 %v8344_v30  ;;  %v8404_v30 = vld [vmem:[%s11804_s14 + $0x608] ss:$12 sps:$4 sm:$0xff]  }
 0x859   :  { %7737 = vmatprep.subr.bf16.mxu1 %v8349_v18  ;;  %v5551_v18 = vld [vmem:[%s11806_s15] sm:$0x7] }
 0x85a   :  { %7730 = vmatpush3.bf16.msra.mxu0 %v8348_v24  ;;  %v5559_v24 = vsub.s32 1, %v11978_v10  ;;  %v5556_v38 = vrot.slane %v5551_v18, %v9591_v52 }
 0x85b   :  { %6917 = vmatmul.mubr.bf16.vlgmr.msra.gmra.mxu1 %v11596_v21  ;;  %7759 = vmatprep.subr.bf16.mxu0 %v8351_v55 }
 0x85c   :  { %7738 = vmatpush3.bf16.msra.mxu1 %v8350_v44  ;;  %6997 = vmatprep.mubr.bf16.mxu1 %v11267_v6  ;;  %v8359_v6 = vld [vmem:[%s11804_s14 + $0x440] ss:$12 sps:$4 sm:$0xff]   ;;  %v5560_v55 = vrot.slane %v5551_v18, %v5559_v24 }
 0x85d   :  { %6958 = vmatmul.mubr.bf16.vlgmr.msra.gmra.mxu0 %v11264_v25  ;;  %7739 = vmatprep.subr.bf16.mxu1 %v8353_v4  ;;  %v8358_v25 = vld [vmem:[%s11804_s14 + $0x200] ss:$12 sps:$4 sm:$0xff]  }
 0x85e   :  { %7760 = vmatpush3.bf16.msra.mxu0 %v8352_v20  ;;  %7037 = vmatprep.mubr.bf16.mxu0 %v11438_v0  ;;  %v8360_v0 = vld [vmem:[%s11804_s14 + $0x380] ss:$12 sps:$4 sm:$0xff]  }
 0x85f   :  { %7761 = vmatprep.subr.bf16.mxu0 %v8355_v15 }
 0x860   :  { %7740 = vmatpush3.bf16.msra.mxu1 %v8354_v41 }
 0x861   :  { %7741 = vmatprep.subr.bf16.mxu1 %v8357_v53 }
 0x862   :  { %7762 = vmatpush3.bf16.msra.mxu0 %v8356_v19 }
 0x863   :  { %7763 = vmatprep.subr.bf16.mxu0 %v8359_v6 }
 0x864   :  { %7742 = vmatpush3.bf16.msra.mxu1 %v8358_v25 }
 0x865   :  { %7743 = vmatprep.subr.bf16.mxu1 %v8361_v36 }
 0x866   :  { %7764 = vmatpush3.bf16.msra.mxu0 %v8360_v0 }
 0x867   :  { %7765 = vmatprep.subr.bf16.mxu0 %v8363_v51 }
 0x868   :  { %7744 = vmatpush3.bf16.msra.mxu1 %v8362_v23 }
 0x869   :  { %7745 = vmatprep.subr.bf16.mxu1 %v8365_v35 }
 0x86a   :  { %7766 = vmatpush3.bf16.msra.mxu0 %v8364_v42 }
 0x86b   :  { %7767 = vmatprep.subr.bf16.mxu0 %v8367_v3 }
 0x86c   :  { %7746 = vmatpush3.bf16.msra.mxu1 %v8366_v39 }
 0x86d   :  { %7747 = vmatprep.subr.bf16.mxu1 %v8369_v48 }
 0x86e   :  { %7768 = vmatpush3.bf16.msra.mxu0 %v8368_v26 }
 0x86f   :  { %7769 = vmatprep.subr.bf16.mxu0 %v8371_v60 }
 0x870   :  { %7748 = vmatpush3.bf16.msra.mxu1 %v8370_v11 }
 0x871   :  { %7749 = vmatprep.subr.bf16.mxu1 %v8373_v34 }
 0x872   :  { %7770 = vmatpush3.bf16.msra.mxu0 %v8372_v17 }
 0x873   :  { %7771 = vmatprep.subr.bf16.mxu0 %v8375_v40 }
 0x874   :  { %7750 = vmatpush3.bf16.msra.mxu1 %v8374_v7 }
 0x875   :  { %7751 = vmatprep.subr.bf16.mxu1 %v8377_v56 }
 0x876   :  { %7772 = vmatpush3.bf16.msra.mxu0 %v8376_v12 }
 0x877   :  { %7773 = vmatprep.subr.bf16.mxu0 %v8379_v54 }
 0x878   :  { %7752 = vmatpush3.bf16.msra.mxu1 %v8378_v43 }
 0x879   :  { %7781 = vmatprep.subr.bf16.mxu1 %v8381_v29 }
 0x87a   :  { %7774 = vmatpush3.bf16.msra.mxu0 %v8380_v27 }
 0x87b   :  { %6998 = vmatmul.mubr.bf16.vlgmr.msra.gmra.mxu1 %v11271_v16  ;;  %7884 = vmatprep.subr.bf16.mxu0 %v11872_v58  ;;  %v8386_v16 = vld [vmem:[%s11804_s14 + $0x698] ss:$12 sps:$4 sm:$0xff]  }
 0x87c   :  { %7782 = vmatpush3.bf16.msra.mxu1 %v8382_v46  ;;  %7077 = vmatprep.mubr.bf16.mxu1 %v11447_v2  ;;  %v8388_v2 = vld [vmem:[%s11804_s14 + $0x500] ss:$12 sps:$4 sm:$0xff]  }
 0x87d   :  { %7038 = vmatmul.mubr.bf16.vlgmr.msra.gmra.mxu0 %v11492_v50  ;;  %7783 = vmatprep.subr.bf16.mxu1 %v8384_v14  ;;  %v8390_v50 = vld [vmem:[%s11804_s14 + $0x5a8] ss:$12 sps:$4 sm:$0xff]  }
 0x87e   :  { %7885 = vmatpush3.bf16.msra.mxu0 %v8383_v62  ;;  %7900 = vmatprep.mubr.msk.bf16.mxu0 %vm8488_vm2, %v11872_v58 }
 0x87f   :  { %7886 = vmatprep.subr.bf16.mxu0 %v11872_v58 }
 0x880   :  { %7784 = vmatpush3.bf16.msra.mxu1 %v8385_v63  ;;  %v11980_v63 = vlaneseq }
 0x881   :  { %7785 = vmatprep.subr.bf16.mxu1 %v8387_v61 }
 0x882   :  { %7887 = vmatpush3.bf16.msra.mxu0 %v8386_v16  ;;  %v7126_v61 = vand.u32 127, %v11980_v63 }
 0x883   :  { %7888 = vmatprep.subr.bf16.mxu0 %v11872_v58 }
 0x884   :  { %7786 = vmatpush3.bf16.msra.mxu1 %v8388_v2 }
 0x885   :  { %7787 = vmatprep.subr.bf16.mxu1 %v8390_v50 }
 0x886   :  { %7889 = vmatpush3.bf16.msra.mxu0 %v8389_v47  ;;  %v7127_v47 = vadd.s32 128, %v7126_v61 }
 0x887   :  { %7890 = vmatprep.subr.bf16.mxu0 %v11872_v58 }
 0x888   :  { %7788 = vmatpush3.bf16.msra.mxu1 %v8391_v9  ;;  %vm7151_vm2 = vcmp.lt.s32.totalorder %v7127_v47, 144 }
 0x889   :  { %7789 = vmatprep.subr.bf16.mxu1 %v8393_v8 }
 0x88a   :  { %7891 = vmatpush3.bf16.msra.mxu0 %v8392_v5 }
 0x88b   :  { %7892 = vmatprep.subr.bf16.mxu0 %v11872_v58 }
 0x88c   :  { %7790 = vmatpush3.bf16.msra.mxu1 %v8394_v37 }
 0x88d   :  { %7791 = vmatprep.subr.bf16.mxu1 %v8396_v22 }
 0x88e   :  { %7893 = vmatpush3.bf16.msra.mxu0 %v8395_v32 }
 0x88f   :  { %7894 = vmatprep.subr.bf16.mxu0 %v11872_v58 }
 0x890   :  { %7792 = vmatpush3.bf16.msra.mxu1 %v8397_v49 }
 0x891   :  { %7793 = vmatprep.subr.bf16.mxu1 %v8399_v45 }
 0x892   :  { %7895 = vmatpush3.bf16.msra.mxu0 %v8398_v57 }
 0x893   :  { %7896 = vmatprep.subr.bf16.mxu0 %v11872_v58 }
 0x894   :  { %7794 = vmatpush3.bf16.msra.mxu1 %v8400_v59 }
 0x895   :  { %7795 = vmatprep.subr.bf16.mxu1 %v8402_v28  ;;  %v5563_v28 = vsub.s32 2, %v11978_v10 }
 0x896   :  { %7897 = vmatpush3.bf16.msra.mxu0 %v8401_v1 }
 0x897   :  { %7898 = vmatprep.subr.bf16.mxu0 %v11872_v58  ;;  %v5564_v1 = vrot.slane %v5551_v18, %v5563_v28 }
 0x898   :  { %7796 = vmatpush3.bf16.msra.mxu1 %v8403_v13 }
 0x89a   :  { %7899 = vmatpush3.bf16.msra.mxu0 %v8404_v30 }
 0x89b   :  { %7078 = vmatmul.mubr.bf16.vlgmr.msra.gmra.mxu1 %v11501_v31 }
 0x89d   :  { %7901 = vmatmul.mubr.bf16.vlgmr.msra.gmra.mxu0 %v11596_v21 }
 0x8bb   :  { %v6754_v44 = vpop.f32.mrf.mxu1 }
 0x8bc   :  { %v6755_v4 = vadd.f32 %v6754_v44, %v5556_v38 }
 0x8bd   :  { %v6756_v20 = vpop.f32.mrf.mxu1  ;;  %v6795_v15 = vpop.f32.mrf.mxu0 }
 0x8be   :  { %v6757_v58 = vadd.f32 %v6756_v20, %v5560_v55  ;;  %v6796_v41 = vadd.f32 %v6795_v15, %v6755_v4 }
 0x8bf   :  { %v6758_v53 = vpop.f32.mrf.mxu1  ;;  %v6797_v19 = vpop.f32.mrf.mxu0 }
 0x8c0   :  { %v6798_v31 = vadd.f32 %v6797_v19, %v6757_v58 }
 0x8c1   :  { %v6759_v6 = vpop.f32.mrf.mxu1  ;;  %v6799_v21 = vpop.f32.mrf.mxu0 }
 0x8c3   :  { %v6800_v25 = vpop.f32.mrf.mxu0 }
 0x8fb   :  { %v6836_v36 = vpop.f32.mrf.mxu1 }
 0x8fc   :  { %v6837_v0 = vadd.f32 %v6836_v36, %v6796_v41 }
 0x8fd   :  { %v6838_v51 = vpop.f32.mrf.mxu1  ;;  %v6877_v23 = vpop.f32.mrf.mxu0 }
 0x8fe   :  { %v6839_v35 = vadd.f32 %v6838_v51, %v6798_v31  ;;  %v6878_v42 = vadd.f32 %v6877_v23, %v6837_v0 }
 0x8ff   :  { %v6840_v52 = vpop.f32.mrf.mxu1  ;;  %v6879_v3 = vpop.f32.mrf.mxu0 }
 0x900   :  { %v6880_v39 = vadd.f32 %v6879_v3, %v6839_v35 }
 0x901   :  { %v6841_v48 = vpop.f32.mrf.mxu1  ;;  %v6881_v26 = vpop.f32.mrf.mxu0 }
 0x903   :  { %v6882_v60 = vpop.f32.mrf.mxu0 }
 0x91b   :  { %v6918_v11 = vpop.f32.mrf.mxu1 }
 0x91c   :  { %v11781_v34 = vadd.f32 %v6918_v11, %v6878_v42 }
 0x91d   :  { %v6920_v17 = vpop.f32.mrf.mxu1  ;;  %v7731_v40 = vpop.f32.mrf.mxu0 }
 0x91e   :  { %v6921_v7 = vadd.f32 %v6920_v17, %v6880_v39 }
 0x91f   :  { %v6922_v56 = vpop.f32.mrf.mxu1  ;;  %v7732_v12 = vpop.f32.mrf.mxu0 }
 0x920   :  { %v7130_v54 = vsub.f32 0.0, %v6921_v7  ;;  %v7733_v13 = vadd.f32 %v7732_v12, %v7731_v40 }
 0x921   :  { %v6923_v43 = vpop.f32.mrf.mxu1  ;;  %v7734_v29 = vpop.f32.mrf.mxu0 }
 0x922   :  { %v7134_v27 = vmul.f32 1.442695, %v7130_v54  ;;  %v6960_v24 = vadd.f32 %v7733_v13, %v5564_v1 }
 0x923   :  { %v7735_v46 = vpop.f32.mrf.mxu0 }
 0x924   :  { %8465 = vpow2.f32 %v7134_v27 }
 0x931   :  { %v8466_v14 = vpop.eup %8465 }
 0x932   :  { %v7139_v62 = vadd.f32 1.0, %v8466_v14 }
 0x934   :  { %8467 = vrcp.f32 %v7139_v62 }
 0x93b   :  { %v7753_v16 = vpop.f32.mrf.mxu1 }
 0x93d   :  { %v7754_v2 = vpop.f32.mrf.mxu1  ;;  %v7775_v50 = vpop.f32.mrf.mxu0 }
 0x93e   :  { %v7755_v30 = vadd.f32 %v7754_v2, %v7753_v16 }
 0x93f   :  { %v7756_v9 = vpop.f32.mrf.mxu1  ;;  %v7776_v8 = vpop.f32.mrf.mxu0 }
 0x940   :  { %v7000_v38 = vadd.f32 %v7755_v30, %v6960_v24  ;;  %v7777_v55 = vadd.f32 %v7776_v8, %v7775_v50 }
 0x941   :  { %v8468_v5 = vpop.eup %8467  ;;  %v7757_v37 = vpop.f32.mrf.mxu1 }
 0x942   :  { %v7778_v22 = vpop.f32.mrf.mxu0  ;;  %v7145_v32 = vmul.f32 0.9, %v8468_v5  ;;  %v7040_v15 = vadd.f32 %v7777_v55, %v7000_v38 }
 0x944   :  { %v7779_v49 = vpop.f32.mrf.mxu0  ;;  %v7148_v45 = vadd.f32 0.1, %v7145_v32 }
 0x946   :  { %v7154_v57 = vsel %vm7151_vm2, %v6921_v7, %v7148_v45 }
 0x947   :  { %v7159_v59 = vcombine.low %v11781_v34, %v7154_v57 }
 0x949   :  { %v7166_v42 = vrot.slane %v7159_v59, %v11245_v33 }
 0x95b   :  { %v7797_v44 = vpop.f32.mrf.mxu1 }
 0x95d   :  { %v7798_v4 = vpop.f32.mrf.mxu1  ;;  %v7119_v20 = vpop.f32.mrf.mxu0 }
 0x95e   :  { %v7799_v58 = vadd.f32 %v7798_v4, %v7797_v44 }
 0x95f   :  { %v7800_v41 = vpop.f32.mrf.mxu1  ;;  %v7902_v53 = vpop.f32.mrf.mxu0 }
 0x960   :  { %v7080_v19 = vadd.f32 %v7799_v58, %v7040_v15 }
 0x961   :  { %v7801_v31 = vpop.f32.mrf.mxu1  ;;  %v7122_v6 = vpop.f32.mrf.mxu0 }
 0x962   :  { %v7120_v21 = vadd.f32 %v7119_v20, %v7080_v19 }
 0x963   :  { %v7903_v25 = vpop.f32.mrf.mxu0 }
 0x964   :  { %v7131_v36 = vsub.f32 0.0, %v7120_v21 }
 0x966   :  { %v7136_v10 = vmul.f32 1.442695, %v7131_v36 }
 0x968   :  { %8469 = vpow2.f32 %v7136_v10 }
 0x975   :  { %v8470_v18 = vpop.eup %8469 }
 0x976   :  { %v7140_v0 = vadd.f32 1.0, %v8470_v18 }
 0x978   :  { %8471 = vrcp.f32 %v7140_v0 }
 0x985   :  { %v8472_v51 = vpop.eup %8471 }
 0x986   :  { %v7146_v23 = vmul.f32 0.9, %v8472_v51 }
 0x988   :  { %v7149_v35 = vadd.f32 0.1, %v7146_v23 }
 0x98a   :  { %v7173_v52 = vrot.slane %v7149_v35, %v11245_v33 }
 0x98c   :  { %v7174_v3 = vcombine.low %v7166_v42, %v7173_v52 }
 0x98e   :  { %7181 = vst.msk [vmem:[%s11807_s16] sm:$0x3f] %vm7180_vm5, %v7174_v3 }

</bundles_post_ra>
